<compile_context>
chip_gen: v6e
topology: v6e:2x2x1
jax: 0.10.0
libtpu: 0.0.40
codegen_flags: <defaults>
</compile_context>

<pallas_src>
import math

import jax
import jax.numpy as jnp
from jax.experimental import pallas as pl
from jax.experimental.pallas import tpu as pltpu

# Below this many elements the Pallas custom-call launch dominates; XLA fuses a
# scalar affine for free.
_PALLAS_MIN_ELEMENTS = 256 * 1024

# Lane-dense column width (multiple of 128) the flattened array is reshaped to.
_LANE_COLS = 2048


def _affine_kernel(w_ref, b_ref, x_ref, o_ref):
    # w_ref / b_ref: SMEM f32 scalars (shape (1,)); x_ref / o_ref: VMEM tiles.
    w = w_ref[0]
    b = b_ref[0]
    x = x_ref[...]
    # Compute in f32 (matches the f32 Linear parameters), cast back on store so
    # HBM traffic stays in the input dtype.
    o_ref[...] = (x.astype(jnp.float32) * w + b).astype(o_ref.dtype)


def _pick_row_tile(rows: int, cols: int, itemsize: int):
    """Generation-aware row-tile size and scoped-VMEM limit."""
    try:
        vmem_bytes = pltpu.get_tpu_info().vmem_capacity_bytes
    except Exception:  # interpret mode / unknown chip: be conservative (v7x-safe)
        vmem_bytes = 64 * 1024 * 1024

    if vmem_bytes >= 100 * 1024 * 1024:
        # v5e / v6e: 128 MiB physical VMEM -> ~8 MiB tiles, 64 MiB scoped limit.
        target_tile_bytes = 8 * 1024 * 1024
        vmem_limit = 64 * 1024 * 1024
    else:
        # v7x: 64 MiB physical VMEM -> ~4 MiB tiles, 32 MiB scoped limit
        # (in + out, each double-buffered -> 4x tile footprint).
        target_tile_bytes = 4 * 1024 * 1024
        vmem_limit = 32 * 1024 * 1024

    tm = max(8, target_tile_bytes // (cols * itemsize))
    tm = min(tm, rows)
    tm = max(8, (tm // 8) * 8)  # keep sublane-aligned (8, 128) blocks
    return tm, vmem_limit


def linear1_forward(x: jax.Array, w: jax.Array, b: jax.Array,
                    *, donate_x: bool = False) -> jax.Array:
    """Equivalent of nn.Linear(1, 1)(x.unsqueeze(-1)).squeeze(-1).

    x: any-shape array. w, b: scalar (f32) Linear parameters.
    donate_x: alias x's HBM buffer to the output (only if caller no longer
              needs x and the input needs no padding/reshape copy).
    """
    orig_shape = x.shape
    total = math.prod(orig_shape) if orig_shape else 1

    w_f = jnp.asarray(w, jnp.float32).reshape(())
    b_f = jnp.asarray(b, jnp.float32).reshape(())

    # Tiny-input fast path: plain fused XLA affine.
    if total < _PALLAS_MIN_ELEMENTS:
        return (x.astype(jnp.float32) * w_f + b_f).astype(x.dtype)

    # Lane-dense flattening: (rows, _LANE_COLS) with rows a multiple of 8.
    cols = _LANE_COLS
    chunk = 8 * cols
    padded_total = ((total + chunk - 1) // chunk) * chunk
    flat = x.reshape(total)
    if padded_total != total:
        flat = jnp.pad(flat, (0, padded_total - total))
    rows = padded_total // cols
    x2 = flat.reshape(rows, cols)

    itemsize = jnp.dtype(x.dtype).itemsize
    tm, vmem_limit = _pick_row_tile(rows, cols, itemsize)

    w_s = w_f.reshape(1)
    b_s = b_f.reshape(1)

    extra_kwargs = {}
    if donate_x:
        extra_kwargs["input_output_aliases"] = {2: 0}

    out2 = pl.pallas_call(
        _affine_kernel,
        out_shape=jax.ShapeDtypeStruct((rows, cols), x.dtype),
        grid=(pl.cdiv(rows, tm),),
        in_specs=[
            pl.BlockSpec(memory_space=pltpu.SMEM),       # w (f32 scalar)
            pl.BlockSpec(memory_space=pltpu.SMEM),       # b (f32 scalar)
            pl.BlockSpec((tm, cols), lambda i: (i, 0)),  # x row-tile
        ],
        out_specs=pl.BlockSpec((tm, cols), lambda i: (i, 0)),
        compiler_params=pltpu.CompilerParams(
            dimension_semantics=("parallel",),
            vmem_limit_bytes=vmem_limit,
        ),
        **extra_kwargs,
    )(w_s, b_s, x2)

    out = out2.reshape(padded_total)
    if padded_total != total:
        out = out[:total]
    return out.reshape(orig_shape)


def _ref(x, w, b):
    return (x.astype(jnp.float32) * jnp.asarray(w, jnp.float32)
            + jnp.asarray(b, jnp.float32)).astype(x.dtype)


if __name__ == "__main__":
    key = jax.random.PRNGKey(0)
    k1, k2, k3, k4, k_w, k_b = jax.random.split(key, 6)

    # Deterministic parameters matching nn.Linear(1, 1) init: U(-1, 1).
    w = jax.random.uniform(k_w, (), jnp.float32, minval=-1.0, maxval=1.0)
    b = jax.random.uniform(k_b, (), jnp.float32, minval=-1.0, maxval=1.0)

    # 1) Small input (exercises the tiny-input JAX fast path).
    x_small = jax.random.normal(k1, (2, 4, 16, 16), jnp.float32)
    out_small = jax.block_until_ready(linear1_forward(x_small, w, b))
    assert out_small.shape == x_small.shape and out_small.dtype == x_small.dtype
    assert jnp.allclose(out_small, _ref(x_small, w, b), atol=1e-6, rtol=1e-6)

    # 2) Large f32 input (exercises the tiled Pallas pipeline).
    x_large = jax.random.normal(k2, (2048, 2048), jnp.float32)
    out_large = jax.block_until_ready(linear1_forward(x_large, w, b))
    assert out_large.shape == x_large.shape and out_large.dtype == x_large.dtype
    assert jnp.allclose(out_large, _ref(x_large, w, b), atol=1e-5, rtol=1e-5)

    # 3) Ragged shape (exercises lane-dense flattening with padding).
    x_ragged = jax.random.normal(k3, (300, 1001), jnp.float32)
    out_ragged = jax.block_until_ready(linear1_forward(x_ragged, w, b))
    assert out_ragged.shape == x_ragged.shape
    assert jnp.allclose(out_ragged, _ref(x_ragged, w, b), atol=1e-5, rtol=1e-5)

    # 4) bf16 input (exercises dtype-preserving store).
    x_bf16 = jax.random.normal(k4, (1024, 2048), jnp.bfloat16)
    out_bf16 = jax.block_until_ready(linear1_forward(x_bf16, w, b))
    assert out_bf16.shape == x_bf16.shape and out_bf16.dtype == jnp.bfloat16
    assert jnp.allclose(out_bf16.astype(jnp.float32),
                        _ref(x_bf16, w, b).astype(jnp.float32),
                        atol=2e-2, rtol=2e-2)

    print("KERNEL_OK")
</pallas_src>

<mosaic_0001>
module attributes {stable_mosaic.version = 11 : i64} {
  func.func @_affine_kernel(%arg0: i32, %arg1: memref<1xf32, #tpu.memory_space<smem>>, %arg2: memref<1xf32, #tpu.memory_space<smem>>, %arg3: memref<512x2048xf32, #tpu.memory_space<vmem>>, %arg4: memref<512x2048xf32, #tpu.memory_space<vmem>>) attributes {dimension_semantics = [#tpu.dimension_semantics<parallel>], iteration_bounds = array<i64: 4>, scalar_prefetch = 0 : i64, scratch_operands = 0 : i64, tpu.core_type = #tpu.core_type<tc>, window_params = [{transform_indices = @transform_0, window_bounds = array<i64: 1>}, {transform_indices = @transform_1, window_bounds = array<i64: 1>}, {transform_indices = @transform_2, window_bounds = array<i64: 512, 2048>}, {transform_indices = @transform_3, window_bounds = array<i64: 512, 2048>}]} {
    %c0 = arith.constant 0 : index
    %0 = memref.load %arg1[%c0] : memref<1xf32, #tpu.memory_space<smem>>
    %c0_0 = arith.constant 0 : index
    %1 = memref.load %arg2[%c0_0] : memref<1xf32, #tpu.memory_space<smem>>
    %c0_1 = arith.constant 0 : index
    %c0_2 = arith.constant 0 : index
    %2 = vector.load %arg3[%c0_1, %c0_2] : memref<512x2048xf32, #tpu.memory_space<vmem>>, vector<512x2048xf32>
    %3 = vector.broadcast %0 : f32 to vector<512x2048xf32>
    %4 = arith.mulf %2, %3 : vector<512x2048xf32>
    %5 = vector.broadcast %1 : f32 to vector<512x2048xf32>
    %6 = arith.addf %4, %5 : vector<512x2048xf32>
    %c0_3 = arith.constant 0 : index
    %c0_4 = arith.constant 0 : index
    %7 = vector.load %arg4[%c0_3, %c0_4] : memref<512x2048xf32, #tpu.memory_space<vmem>>, vector<512x2048xf32>
    tpu.vector_store %arg4[%c0_3, %c0_4], %6 {strides = array<i32>} : memref<512x2048xf32, #tpu.memory_space<vmem>>, vector<512x2048xf32>,
    return
  }
  func.func @transform_0(%arg0: i32) -> i32 {
    %c0_i32 = arith.constant 0 : i32
    %c0_i32_0 = arith.constant 0 : i32
    return %c0_i32 : i32
  }
  func.func @transform_1(%arg0: i32) -> i32 {
    %c0_i32 = arith.constant 0 : i32
    %c0_i32_0 = arith.constant 0 : i32
    return %c0_i32 : i32
  }
  func.func @transform_2(%arg0: i32) -> (i32, i32) {
    %c0_i32 = arith.constant 0 : i32
    %c0_i32_0 = arith.constant 0 : i32
    return %arg0, %c0_i32 : i32, i32
  }
  func.func @transform_3(%arg0: i32) -> (i32, i32) {
    %c0_i32 = arith.constant 0 : i32
    %c0_i32_0 = arith.constant 0 : i32
    return %arg0, %c0_i32 : i32, i32
  }
}

</mosaic_0001>

<bundles_post_ra>
// kernel: tpu_custom_call.1
= control target key start
LH: loop header
LB: loop body
LE: loop exit
PB: predicated region body
PF: predicated region fallthrough
CT: control target
= control target key end

     0   :  { %s8839_s0 = inlined_call_operand.<no memory space> [shape: f32[1], index: 0, kind: input, shape index: {}]   ;;  %s8840_s1 = inlined_call_operand.<no memory space> [shape: f32[1], index: 1, kind: input, shape index: {}]   ;;  %s8841_s2 = inlined_call_operand.hbm [shape: f32[2048,2048], index: 2, kind: input, shape index: {}]   ;;  %s8842_s3 = inlined_call_operand.hbm [shape: f32[2048,2048], index: 3, kind: output, shape index: {}]  }
   0x1   :  { %8 = sst [smem:[#allocation2]] %s8839_s0 }
   0x2   :  { %9 = sst [smem:[#allocation3]] %s8840_s1 }
   0x3   :  { %10 = vsyncpa [#allocation5], 0 }
   0x4   :  { %12 = vsyncpa [#allocation5 + $0x1], 0 }
   0x5   :  { %13 = vsyncpa [#allocation6], 0 }
   0x6   :  { %15 = vsyncpa [#allocation6 + $0x1], 0  ;;  %s4578_s16 = smov 0   ;;  %s4580_s17 = smov 0  }
   0x7   :  { %s4582_s18 = smov 0   ;;  %s4584_s19 = smov 0  }
   0x8 LB: > { %s4599_s0 = sadd.s32 4294967295, %s4544_s19   ;;  %s4382_s1 = sadd.s32 4294967294, %s4544_s19   ;;  %s4544_s19 = sphi %s4584_s19, %s8856_s19   ;;  %s4540_s18 = sphi %s4582_s18, %s8855_s18   ;;  %s4536_s17 = sphi %s4580_s17, %s8854_s17   ;;  %s4532_s16 = sphi %s4578_s16, %s8853_s16  }
   0x9   : > { %s4603_s20 = sadd.s32 1, %s4544_s19   ;;  %s70_s21 = sadd.s32 1, %s4540_s18 }
   0xa   : > { %s67_s22 = ssub.s32 %s4544_s19, %s4603_s20  ;;  %p77_p0 = scmp.ne.s32.totalorder %s4540_s18, %s4536_s17 }
   0xb   : > { %p68_p1 = scmp.eq.s32.totalorder %s67_s22, 0  ;;  %p78_p2 = scmp.eq.s32.totalorder %s4544_s19, 0 }
   0xc   : > { %p83_p3 = scmp.ne.s32.totalorder %s4536_s17, %s4532_s16  ;;  %p84_p4 = scmp.eq.s32.totalorder %s4599_s0, 0 }
   0xd   : > { %s4615_s23 = scalar_select %p68_p1, %s4540_s18, %s70_s21  }
   0xe   : > { %p4617_p5 = por %p78_p2, %p77_p0  ;;  %p4621_p6 = por %p84_p4, %p83_p3 }
   0xf   : > { %p107_p7 = scmp.eq.s32.totalorder %s4599_s0, 3  ;;  %p113_p8 = scmp.eq.s32.totalorder %s4382_s1, 3 }
  0x10   : > { %s8846_s25 = scalar_select %p4621_p6, 1, 0 }
  0x11   : > { %p4414_p9 = scmp.lt.s32.totalorder %s4544_s19, 4  ;;  %p4627_p10 = por %p107_p7, %p77_p0 }
  0x12   : > { %p4631_p11 = por %p113_p8, %p83_p3  ;;  %s139_s28 = sand.u32 1, %s4540_s18  }
  0x13   : > { %s8847_s26 = scalar_select %p4627_p10, 1, 0 }
  0x14   : > { %s8848_s27 = scalar_select %p4631_p11, 1, 0 }
  0x15   : > { %s4399_s29 = sshll.u32 %s4544_s19, 17  ;;  %s4385_s30 = sshll.u32 %s139_s28, 13 }
  0x16   : > { %s4640_s6 = scalar_lea.hbm %s8841_s2, %s4399_s29  ;;  %s143_s7 = scalar_lea.vmem [#allocation4], %s4385_s30 }
  0x17   : > { %s151_s8 = sshll.u32 %s143_s7, 4  ;;  %p4644_p12 = pnand %p4414_p9, %p4617_p5  ;;  %s4648_s8 = int_to_ptr.vmem [resolvable:$true] %s151_s8 }
  0x18   : > { %s4650_s10 = scalar_lea.sflag [#allocation5], %s139_s28  ;;  %s4452_s11 = scalar_lea.hbm %s4640_s6, 131072 }
  0x19   : > { %p4453_p13 = scmp.ne.s32.totalorder %s4640_s6, %s4452_s11  ;;  %p4454_p0 = pneg %p4644_p12 }
  0x1a   : > { %s4457_s14 = scalar_lea.hbm %s8841_s2, 524288  ;;  %p4458_p3 = scmp.lt.s32.totalorder %s4640_s6, %s8841_s2 }
  0x1b   : > { %p4455_p1 = pnand %p4454_p0, %p4453_p13  ;;  %p4459_p4 = scmp.lt.s32.totalorder %s4457_s14, %s4452_s11 }
  0x1d   : > { %p4456_p2 = pneg %p4455_p1  ;;  %p4460_p5 = por %p4459_p4, %p4458_p3 }
  0x1f   : > { %p4461_p7 = pnand %p4460_p5, %p4456_p2 }
  0x21   : > { %4464 = shalt.err (!%p4461_p7)
}
  0x22   : > { %s4465_s21 = scalar_lea.vmem %s4648_s8, 131072  ;;  %s4546_s22 = smov [#allocation4]  }
  0x23   : > { %p4466_p8 = scmp.ne.s32.totalorder %s4648_s8, %s4465_s21  ;;  %s4470_s24 = sshll.u32 %s4546_s22, 4  ;;  %s4471_s24 = int_to_ptr.vmem [resolvable:$false] %s4470_s24 }
  0x24   : > { %s4472_s28 = scalar_lea.vmem %s4471_s24, 262144  ;;  %p4473_p1 = scmp.lt.s32.totalorder %s4648_s8, %s4471_s24 }
  0x25   : > { %p4468_p9 = pnand %p4466_p8, %p4454_p0  ;;  %p4474_p11 = scmp.lt.s32.totalorder %s4472_s28, %s4465_s21 }
  0x27   : > { %p4469_p13 = pneg %p4468_p9  ;;  %p4475_p10 = por %p4474_p11, %p4473_p1 }
  0x29   : > { %p4476_p6 = pnand %p4475_p10, %p4469_p13 }
  0x2b   : > { %4479 = shalt.err (!%p4476_p6)
}
  0x2c   : > { %s4547_s29 = smov 2048   ;;  %s4548_s30 = smov 128  }
  0x2d   : > { %4409 = dma.hbm_to_vmem [thread:$0]  (!%p4644_p12), %s4640_s6, 131072, %s4648_s8, %s4650_s10, %s4547_s29, %s4547_s29, %s4548_s30  }
  0x2e   : > { %p4389_p0 = scmp.ge.s32.totalorder %s4544_s19, 1  ;;  %p159_p2 = scmp.lt.s32.totalorder %s4544_s19, 5 }
  0x30   : > { %p160_p3 = pnand %p4389_p0, %p159_p2 }
  0x31   : > { %s4674_s4 = sand.u32 (!%p160_p3), 1, %s4536_s17   ;;  %p8850_p6 = scmp.ne.s32.totalorder (!%p160_p3), %s8846_s25, 0 }
  0x32   : > { %163 = sbr.rel (%p160_p3) target bundleno = 694 (0x2b6), region = 32  ;;  %s4390_s5 = sshll.u32 (!%p160_p3), %s4674_s4, 13 }
  0x33   : > { %s166_s7 = scalar_lea.sflag (!%p160_p3), [#allocation5], %s4674_s4  ;;  %s4680_s11 = scalar_lea.vmem (!%p160_p3), [#allocation4], %s4390_s5 }
  0x37   : > { %4523 = dma.done.wait (%p8850_p6), %s166_s7, 131072  }
  0x38   : > { %4525 = vsyncadd (%p8850_p6), %s166_s7, 4294836224  ;;  %s194_s6 = sld [smem:[#allocation2]]  ;;  %v196_v0 = vld [vmem:[%s4680_s11] sm:$0xff]  ;;  %v197_v2 = vld [vmem:[%s4680_s11 + $0x8] sm:$0xff]  ;;  %s4721_s25 = scalar_lea.vmem [#allocation7], %s4390_s5 }
  0x39   : > { %s195_s8 = sld [smem:[#allocation3]]  ;;  %v198_v3 = vld [vmem:[%s4680_s11 + $0x10] sm:$0xff]  ;;  %v199_v8 = vld [vmem:[%s4680_s11 + $0x18] sm:$0xff]  ;;  %v200_v9 = vld [vmem:[%s4680_s11 + $0x20] sm:$0xff]  ;;  %s4401_s9 = sshll.u32 %s4599_s0, 17 }
  0x3a   : > { %v201_v10 = vld [vmem:[%s4680_s11 + $0x28] sm:$0xff]  ;;  %v202_v14 = vld [vmem:[%s4680_s11 + $0x30] sm:$0xff]  ;;  %v203_v15 = vld [vmem:[%s4680_s11 + $0x38] sm:$0xff]  ;;  %s4309_s10 = sshll.u32 %s4721_s25, 4  ;;  %s8789_s13 = scalar_lea.hbm %s8842_s3, %s4401_s9  ;;  %s8791_s10 = int_to_ptr.vmem [resolvable:$true] %s4309_s10 }
  0x3b   : > { %v204_v16 = vld [vmem:[%s4680_s11 + $0x40] sm:$0xff]  ;;  %v205_v21 = vld [vmem:[%s4680_s11 + $0x48] sm:$0xff]  ;;  %v206_v22 = vld [vmem:[%s4680_s11 + $0x50] sm:$0xff]  ;;  %s4295_s14 = scalar_lea.sflag [#allocation6], %s4674_s4  ;;  %s4480_s15 = scalar_lea.vmem %s8791_s10, 131072 }
  0x3c   : > { %v207_v23 = vld [vmem:[%s4680_s11 + $0x58] sm:$0xff]  ;;  %v208_v28 = vld [vmem:[%s4680_s11 + $0x60] sm:$0xff]  ;;  %v209_v29 = vld [vmem:[%s4680_s11 + $0x68] sm:$0xff]  ;;  %p4481_p10 = scmp.ne.s32.totalorder %s8791_s10, %s4480_s15  ;;  %p8851_p11 = scmp.ne.s32.totalorder %s8847_s26, 0 }
  0x3d   : > { %v210_v30 = vld [vmem:[%s4680_s11 + $0x70] sm:$0xff]  ;;  %v211_v35 = vld [vmem:[%s4680_s11 + $0x78] sm:$0xff]  ;;  %v212_v40 = vld [vmem:[%s4680_s11 + $0x80] sm:$0xff]  ;;  %s4549_s1 = smov [#allocation7]  }
  0x3e   : > { %v4687_v1 = vstv %s194_s6  ;;  %v213_v41 = vld [vmem:[%s4680_s11 + $0x88] sm:$0xff]  ;;  %v214_v42 = vld [vmem:[%s4680_s11 + $0x90] sm:$0xff]  ;;  %v215_v47 = vld [vmem:[%s4680_s11 + $0x98] sm:$0xff]  ;;  %p4482_p12 = pnand %p4481_p10, %p8851_p11  ;;  %s4484_s21 = sshll.u32 %s4549_s1, 4  ;;  %s4485_s21 = int_to_ptr.vmem [resolvable:$false] %s4484_s21 }
  0x3f   : > { %v1221_v4 = vmul.f32 %v4687_v1, %v196_v0  ;;  %v4692_v5 = vstv %s195_s8  ;;  %v1222_v6 = vmul.f32 %v4687_v1, %v197_v2  ;;  %v1223_v7 = vmul.f32 %v4687_v1, %v198_v3  ;;  %v216_v48 = vld [vmem:[%s4680_s11 + $0xa0] sm:$0xff]  ;;  %v217_v49 = vld [vmem:[%s4680_s11 + $0xa8] sm:$0xff]  ;;  %v218_v54 = vld [vmem:[%s4680_s11 + $0xb0] sm:$0xff]  ;;  %s4486_s22 = scalar_lea.vmem %s4485_s21, 262144  ;;  %p4487_p5 = scmp.lt.s32.totalorder %s8791_s10, %s4485_s21 }
  0x40   : > { %v1224_v11 = vmul.f32 %v4687_v1, %v199_v8  ;;  %v1225_v12 = vmul.f32 %v4687_v1, %v200_v9  ;;  %v1226_v13 = vmul.f32 %v4687_v1, %v201_v10  ;;  %v1227_v20 = vmul.f32 %v4687_v1, %v202_v14  ;;  %v219_v59 = vld [vmem:[%s4680_s11 + $0xb8] sm:$0xff]  ;;  %v220_v0 = vld [vmem:[%s4680_s11 + $0xc0] sm:$0xff]  ;;  %v221_v2 = vld [vmem:[%s4680_s11 + $0xc8] sm:$0xff]  ;;  %p4483_p4 = pneg %p4482_p12  ;;  %p4488_p7 = scmp.lt.s32.totalorder %s4486_s22, %s4480_s15 }
  0x41   : > { %v2246_v17 = vadd.f32 %v4692_v5, %v1221_v4  ;;  %v2247_v18 = vadd.f32 %v4692_v5, %v1222_v6  ;;  %v2248_v19 = vadd.f32 %v4692_v5, %v1223_v7  ;;  %v1228_v27 = vmul.f32 %v4687_v1, %v203_v15  ;;  %v222_v3 = vld [vmem:[%s4680_s11 + $0xd0] sm:$0xff]  ;;  %v223_v9 = vld [vmem:[%s4680_s11 + $0xd8] sm:$0xff]  ;;  %v224_v10 = vld [vmem:[%s4680_s11 + $0xe0] sm:$0xff] }
  0x42   : > { %v2249_v24 = vadd.f32 %v4692_v5, %v1224_v11  ;;  %v2250_v25 = vadd.f32 %v4692_v5, %v1225_v12  ;;  %v2251_v26 = vadd.f32 %v4692_v5, %v1226_v13  ;;  %v2252_v31 = vadd.f32 %v4692_v5, %v1227_v20  ;;  %v225_v11 = vld [vmem:[%s4680_s11 + $0xe8] sm:$0xff]  ;;  %p4489_p8 = por %p4488_p7, %p4487_p5 }
  0x43   : > { %3270 = vst [vmem:[%s4721_s25] sm:$0xff] %v2246_v17  ;;  %3271 = vst [vmem:[%s4721_s25 + $0x8] sm:$0xff] %v2247_v18  ;;  %v1229_v32 = vmul.f32 %v4687_v1, %v204_v16  ;;  %v1230_v33 = vmul.f32 %v4687_v1, %v205_v21  ;;  %v1231_v34 = vmul.f32 %v4687_v1, %v206_v22  ;;  %v226_v16 = vld [vmem:[%s4680_s11 + $0xf0] sm:$0xff]  ;;  %v227_v21 = vld [vmem:[%s4680_s11 + $0xf8] sm:$0xff] }
  0x44   : > { %3272 = vst [vmem:[%s4721_s25 + $0x10] sm:$0xff] %v2248_v19  ;;  %3273 = vst [vmem:[%s4721_s25 + $0x18] sm:$0xff] %v2249_v24  ;;  %v2253_v36 = vadd.f32 %v4692_v5, %v1228_v27  ;;  %v1232_v37 = vmul.f32 %v4687_v1, %v207_v23  ;;  %v1233_v38 = vmul.f32 %v4687_v1, %v208_v28  ;;  %v229_v27 = vld [vmem:[%s4680_s11 + $0x108] sm:$0xff]  ;;  %v230_v28 = vld [vmem:[%s4680_s11 + $0x110] sm:$0xff]  ;;  %p4490_p9 = pnand %p4489_p8, %p4483_p4 }
  0x45   : > { %3274 = vst [vmem:[%s4721_s25 + $0x20] sm:$0xff] %v2250_v25  ;;  %3275 = vst [vmem:[%s4721_s25 + $0x28] sm:$0xff] %v2251_v26  ;;  %v1234_v39 = vmul.f32 %v4687_v1, %v209_v29  ;;  %v2254_v43 = vadd.f32 %v4692_v5, %v1229_v32  ;;  %v2255_v44 = vadd.f32 %v4692_v5, %v1230_v33  ;;  %v228_v26 = vld [vmem:[%s4680_s11 + $0x100] sm:$0xff]  ;;  %v231_v33 = vld [vmem:[%s4680_s11 + $0x118] sm:$0xff] }
  0x46   : > { %3276 = vst [vmem:[%s4721_s25 + $0x30] sm:$0xff] %v2252_v31  ;;  %v2256_v45 = vadd.f32 %v4692_v5, %v1231_v34  ;;  %v1235_v46 = vmul.f32 %v4687_v1, %v210_v30  ;;  %3277 = vst [vmem:[%s4721_s25 + $0x38] sm:$0xff] %v2253_v36  ;;  %v2257_v50 = vadd.f32 %v4692_v5, %v1232_v37  ;;  %v232_v34 = vld [vmem:[%s4680_s11 + $0x120] sm:$0xff] }
  0x47   : > { %v2258_v51 = vadd.f32 %v4692_v5, %v1233_v38  ;;  %v2259_v52 = vadd.f32 %v4692_v5, %v1234_v39  ;;  %v1236_v53 = vmul.f32 %v4687_v1, %v211_v35  ;;  %3278 = vst [vmem:[%s4721_s25 + $0x40] sm:$0xff] %v2254_v43  ;;  %3279 = vst [vmem:[%s4721_s25 + $0x48] sm:$0xff] %v2255_v44  ;;  %v233_v35 = vld [vmem:[%s4680_s11 + $0x128] sm:$0xff] }
  0x48   : > { %3280 = vst [vmem:[%s4721_s25 + $0x50] sm:$0xff] %v2256_v45  ;;  %v2260_v55 = vadd.f32 %v4692_v5, %v1235_v46  ;;  %v1237_v56 = vmul.f32 %v4687_v1, %v212_v40  ;;  %v1238_v57 = vmul.f32 %v4687_v1, %v213_v41  ;;  %v1239_v58 = vmul.f32 %v4687_v1, %v214_v42  ;;  %v234_v40 = vld [vmem:[%s4680_s11 + $0x130] sm:$0xff]  ;;  %v235_v45 = vld [vmem:[%s4680_s11 + $0x138] sm:$0xff] }
  0x49   : > { %3281 = vst [vmem:[%s4721_s25 + $0x58] sm:$0xff] %v2257_v50  ;;  %3282 = vst [vmem:[%s4721_s25 + $0x60] sm:$0xff] %v2258_v51  ;;  %v2261_v60 = vadd.f32 %v4692_v5, %v1236_v53  ;;  %v1240_v61 = vmul.f32 %v4687_v1, %v215_v47  ;;  %v1241_v62 = vmul.f32 %v4687_v1, %v216_v48  ;;  %v236_v50 = vld [vmem:[%s4680_s11 + $0x140] sm:$0xff]  ;;  %v237_v51 = vld [vmem:[%s4680_s11 + $0x148] sm:$0xff] }
  0x4a   : > { %3283 = vst [vmem:[%s4721_s25 + $0x68] sm:$0xff] %v2259_v52  ;;  %v1242_v63 = vmul.f32 %v4687_v1, %v217_v49  ;;  %3284 = vst [vmem:[%s4721_s25 + $0x70] sm:$0xff] %v2260_v55  ;;  %v2262_v4 = vadd.f32 %v4692_v5, %v1237_v56  ;;  %v2263_v6 = vadd.f32 %v4692_v5, %v1238_v57  ;;  %v238_v52 = vld [vmem:[%s4680_s11 + $0x150] sm:$0xff]  ;;  %v239_v57 = vld [vmem:[%s4680_s11 + $0x158] sm:$0xff] }
  0x4b   : > { %v2264_v7 = vadd.f32 %v4692_v5, %v1239_v58  ;;  %v1243_v8 = vmul.f32 %v4687_v1, %v218_v54  ;;  %3285 = vst [vmem:[%s4721_s25 + $0x78] sm:$0xff] %v2261_v60  ;;  %v2265_v12 = vadd.f32 %v4692_v5, %v1240_v61  ;;  %v2266_v13 = vadd.f32 %v4692_v5, %v1241_v62  ;;  %v240_v58 = vld [vmem:[%s4680_s11 + $0x160] sm:$0xff] }
  0x4c   : > { %v2267_v14 = vadd.f32 %v4692_v5, %v1242_v63  ;;  %v1244_v15 = vmul.f32 %v4687_v1, %v219_v59  ;;  %3286 = vst [vmem:[%s4721_s25 + $0x80] sm:$0xff] %v2262_v4  ;;  %3287 = vst [vmem:[%s4721_s25 + $0x88] sm:$0xff] %v2263_v6  ;;  %v1245_v18 = vmul.f32 %v4687_v1, %v220_v0  ;;  %v241_v59 = vld [vmem:[%s4680_s11 + $0x168] sm:$0xff]  ;;  %v242_v0 = vld [vmem:[%s4680_s11 + $0x170] sm:$0xff] }
  0x4d   : > { %3288 = vst [vmem:[%s4721_s25 + $0x90] sm:$0xff] %v2264_v7  ;;  %v2268_v17 = vadd.f32 %v4692_v5, %v1243_v8  ;;  %v1246_v19 = vmul.f32 %v4687_v1, %v221_v2  ;;  %v1247_v20 = vmul.f32 %v4687_v1, %v222_v3  ;;  %3289 = vst [vmem:[%s4721_s25 + $0x98] sm:$0xff] %v2265_v12  ;;  %v243_v7 = vld [vmem:[%s4680_s11 + $0x178] sm:$0xff]  ;;  %v244_v12 = vld [vmem:[%s4680_s11 + $0x180] sm:$0xff] }
  0x4e   : > { %3290 = vst [vmem:[%s4721_s25 + $0xa0] sm:$0xff] %v2266_v13  ;;  %3291 = vst [vmem:[%s4721_s25 + $0xa8] sm:$0xff] %v2267_v14  ;;  %v2269_v22 = vadd.f32 %v4692_v5, %v1244_v15  ;;  %v1248_v23 = vmul.f32 %v4687_v1, %v223_v9  ;;  %v1249_v24 = vmul.f32 %v4687_v1, %v224_v10  ;;  %v245_v13 = vld [vmem:[%s4680_s11 + $0x188] sm:$0xff]  ;;  %v246_v14 = vld [vmem:[%s4680_s11 + $0x190] sm:$0xff] }
  0x4f   : > { %v1250_v25 = vmul.f32 %v4687_v1, %v225_v11  ;;  %3292 = vst [vmem:[%s4721_s25 + $0xb0] sm:$0xff] %v2268_v17  ;;  %v2270_v29 = vadd.f32 %v4692_v5, %v1245_v18  ;;  %v2271_v30 = vadd.f32 %v4692_v5, %v1246_v19  ;;  %v2272_v31 = vadd.f32 %v4692_v5, %v1247_v20  ;;  %v247_v19 = vld [vmem:[%s4680_s11 + $0x198] sm:$0xff]  ;;  %v248_v20 = vld [vmem:[%s4680_s11 + $0x1a0] sm:$0xff] }
  0x50   : > { %v1251_v32 = vmul.f32 %v4687_v1, %v226_v16  ;;  %3293 = vst [vmem:[%s4721_s25 + $0xb8] sm:$0xff] %v2269_v22  ;;  %v2273_v36 = vadd.f32 %v4692_v5, %v1248_v23  ;;  %v2274_v37 = vadd.f32 %v4692_v5, %v1249_v24  ;;  %v1252_v39 = vmul.f32 %v4687_v1, %v227_v21  ;;  %v249_v21 = vld [vmem:[%s4680_s11 + $0x1a8] sm:$0xff] }
  0x51   : > { %v2275_v38 = vadd.f32 %v4692_v5, %v1250_v25  ;;  %3294 = vst [vmem:[%s4721_s25 + $0xc0] sm:$0xff] %v2270_v29  ;;  %3295 = vst [vmem:[%s4721_s25 + $0xc8] sm:$0xff] %v2271_v30  ;;  %v1253_v42 = vmul.f32 %v4687_v1, %v228_v26  ;;  %v1254_v43 = vmul.f32 %v4687_v1, %v229_v27  ;;  %v250_v26 = vld [vmem:[%s4680_s11 + $0x1b0] sm:$0xff] }
  0x52   : > { %3296 = vst [vmem:[%s4721_s25 + $0xd0] sm:$0xff] %v2272_v31  ;;  %v2276_v41 = vadd.f32 %v4692_v5, %v1251_v32  ;;  %v1255_v44 = vmul.f32 %v4687_v1, %v230_v28  ;;  %3297 = vst [vmem:[%s4721_s25 + $0xd8] sm:$0xff] %v2273_v36  ;;  %v2277_v46 = vadd.f32 %v4692_v5, %v1252_v39  ;;  %v251_v31 = vld [vmem:[%s4680_s11 + $0x1b8] sm:$0xff]  ;;  %v252_v36 = vld [vmem:[%s4680_s11 + $0x1c0] sm:$0xff] }
  0x53   : > { %3298 = vst [vmem:[%s4721_s25 + $0xe0] sm:$0xff] %v2274_v37  ;;  %3299 = vst [vmem:[%s4721_s25 + $0xe8] sm:$0xff] %v2275_v38  ;;  %v1256_v47 = vmul.f32 %v4687_v1, %v231_v33  ;;  %v1257_v48 = vmul.f32 %v4687_v1, %v232_v34  ;;  %v1258_v49 = vmul.f32 %v4687_v1, %v233_v35  ;;  %v253_v37 = vld [vmem:[%s4680_s11 + $0x1c8] sm:$0xff]  ;;  %v254_v38 = vld [vmem:[%s4680_s11 + $0x1d0] sm:$0xff] }
  0x54   : > { %3300 = vst [vmem:[%s4721_s25 + $0xf0] sm:$0xff] %v2276_v41  ;;  %v2278_v53 = vadd.f32 %v4692_v5, %v1253_v42  ;;  %v2279_v54 = vadd.f32 %v4692_v5, %v1254_v43  ;;  %v2280_v55 = vadd.f32 %v4692_v5, %v1255_v44  ;;  %v1259_v56 = vmul.f32 %v4687_v1, %v234_v40  ;;  %v255_v43 = vld [vmem:[%s4680_s11 + $0x1d8] sm:$0xff]  ;;  %v256_v44 = vld [vmem:[%s4680_s11 + $0x1e0] sm:$0xff] }
  0x55   : > { %3301 = vst [vmem:[%s4721_s25 + $0xf8] sm:$0xff] %v2277_v46  ;;  %v2281_v60 = vadd.f32 %v4692_v5, %v1256_v47  ;;  %v2282_v61 = vadd.f32 %v4692_v5, %v1257_v48  ;;  %v2283_v62 = vadd.f32 %v4692_v5, %v1258_v49  ;;  %v1260_v63 = vmul.f32 %v4687_v1, %v235_v45  ;;  %v257_v45 = vld [vmem:[%s4680_s11 + $0x1e8] sm:$0xff] }
  0x56   : > { %3302 = vst [vmem:[%s4721_s25 + $0x100] sm:$0xff] %v2278_v53  ;;  %3303 = vst [vmem:[%s4721_s25 + $0x108] sm:$0xff] %v2279_v54  ;;  %v2284_v2 = vadd.f32 %v4692_v5, %v1259_v56  ;;  %v1261_v3 = vmul.f32 %v4687_v1, %v236_v50  ;;  %v1262_v4 = vmul.f32 %v4687_v1, %v237_v51  ;;  %v258_v50 = vld [vmem:[%s4680_s11 + $0x1f0] sm:$0xff] }
  0x57   : > { %3304 = vst [vmem:[%s4721_s25 + $0x110] sm:$0xff] %v2280_v55  ;;  %v1263_v6 = vmul.f32 %v4687_v1, %v238_v52  ;;  %3305 = vst [vmem:[%s4721_s25 + $0x118] sm:$0xff] %v2281_v60  ;;  %v2285_v8 = vadd.f32 %v4692_v5, %v1260_v63  ;;  %v1264_v9 = vmul.f32 %v4687_v1, %v239_v57  ;;  %v259_v55 = vld [vmem:[%s4680_s11 + $0x1f8] sm:$0xff]  ;;  %v260_v60 = vld [vmem:[%s4680_s11 + $0x200] sm:$0xff] }
  0x58   : > { %3306 = vst [vmem:[%s4721_s25 + $0x120] sm:$0xff] %v2282_v61  ;;  %3307 = vst [vmem:[%s4721_s25 + $0x128] sm:$0xff] %v2283_v62  ;;  %v1265_v10 = vmul.f32 %v4687_v1, %v240_v58  ;;  %v1266_v11 = vmul.f32 %v4687_v1, %v241_v59  ;;  %v2286_v15 = vadd.f32 %v4692_v5, %v1261_v3  ;;  %v261_v61 = vld [vmem:[%s4680_s11 + $0x208] sm:$0xff]  ;;  %v262_v62 = vld [vmem:[%s4680_s11 + $0x210] sm:$0xff] }
  0x59   : > { %3308 = vst [vmem:[%s4721_s25 + $0x130] sm:$0xff] %v2284_v2  ;;  %v2287_v16 = vadd.f32 %v4692_v5, %v1262_v4  ;;  %v2288_v17 = vadd.f32 %v4692_v5, %v1263_v6  ;;  %v1267_v18 = vmul.f32 %v4687_v1, %v242_v0  ;;  %3309 = vst [vmem:[%s4721_s25 + $0x138] sm:$0xff] %v2285_v8  ;;  %v263_v4 = vld [vmem:[%s4680_s11 + $0x218] sm:$0xff]  ;;  %v264_v6 = vld [vmem:[%s4680_s11 + $0x220] sm:$0xff] }
  0x5a   : > { %v2289_v22 = vadd.f32 %v4692_v5, %v1264_v9  ;;  %v2290_v23 = vadd.f32 %v4692_v5, %v1265_v10  ;;  %v2291_v24 = vadd.f32 %v4692_v5, %v1266_v11  ;;  %v1268_v25 = vmul.f32 %v4687_v1, %v243_v7  ;;  %3310 = vst [vmem:[%s4721_s25 + $0x140] sm:$0xff] %v2286_v15  ;;  %v265_v7 = vld [vmem:[%s4680_s11 + $0x228] sm:$0xff] }
  0x5b   : > { %3311 = vst [vmem:[%s4721_s25 + $0x148] sm:$0xff] %v2287_v16  ;;  %3312 = vst [vmem:[%s4721_s25 + $0x150] sm:$0xff] %v2288_v17  ;;  %v2292_v27 = vadd.f32 %v4692_v5, %v1267_v18  ;;  %v1269_v28 = vmul.f32 %v4687_v1, %v244_v12  ;;  %v1270_v29 = vmul.f32 %v4687_v1, %v245_v13  ;;  %v266_v12 = vld [vmem:[%s4680_s11 + $0x230] sm:$0xff]  ;;  %v267_v17 = vld [vmem:[%s4680_s11 + $0x238] sm:$0xff] }
  0x5c   : > { %v1271_v30 = vmul.f32 %v4687_v1, %v246_v14  ;;  %3313 = vst [vmem:[%s4721_s25 + $0x158] sm:$0xff] %v2289_v22  ;;  %3314 = vst [vmem:[%s4721_s25 + $0x160] sm:$0xff] %v2290_v23  ;;  %v2293_v32 = vadd.f32 %v4692_v5, %v1268_v25  ;;  %v1272_v33 = vmul.f32 %v4687_v1, %v247_v19  ;;  %v268_v22 = vld [vmem:[%s4680_s11 + $0x240] sm:$0xff]  ;;  %v269_v23 = vld [vmem:[%s4680_s11 + $0x248] sm:$0xff] }
  0x5d   : > { %3315 = vst [vmem:[%s4721_s25 + $0x168] sm:$0xff] %v2291_v24  ;;  %v1273_v34 = vmul.f32 %v4687_v1, %v248_v20  ;;  %v1274_v35 = vmul.f32 %v4687_v1, %v249_v21  ;;  %3316 = vst [vmem:[%s4721_s25 + $0x170] sm:$0xff] %v2292_v27  ;;  %v2294_v39 = vadd.f32 %v4692_v5, %v1269_v28  ;;  %v270_v24 = vld [vmem:[%s4680_s11 + $0x250] sm:$0xff] }
  0x5e   : > { %v2295_v40 = vadd.f32 %v4692_v5, %v1270_v29  ;;  %v2296_v41 = vadd.f32 %v4692_v5, %v1271_v30  ;;  %v1275_v42 = vmul.f32 %v4687_v1, %v250_v26  ;;  %3317 = vst [vmem:[%s4721_s25 + $0x178] sm:$0xff] %v2293_v32  ;;  %v2297_v46 = vadd.f32 %v4692_v5, %v1272_v33  ;;  %v271_v29 = vld [vmem:[%s4680_s11 + $0x258] sm:$0xff]  ;;  %v272_v30 = vld [vmem:[%s4680_s11 + $0x260] sm:$0xff] }
  0x5f   : > { %v2298_v47 = vadd.f32 %v4692_v5, %v1273_v34  ;;  %v2299_v48 = vadd.f32 %v4692_v5, %v1274_v35  ;;  %v1276_v49 = vmul.f32 %v4687_v1, %v251_v31  ;;  %3318 = vst [vmem:[%s4721_s25 + $0x180] sm:$0xff] %v2294_v39  ;;  %v1277_v52 = vmul.f32 %v4687_v1, %v252_v36  ;;  %v273_v31 = vld [vmem:[%s4680_s11 + $0x268] sm:$0xff]  ;;  %v274_v36 = vld [vmem:[%s4680_s11 + $0x270] sm:$0xff] }
  0x60   : > { %3319 = vst [vmem:[%s4721_s25 + $0x188] sm:$0xff] %v2295_v40  ;;  %3320 = vst [vmem:[%s4721_s25 + $0x190] sm:$0xff] %v2296_v41  ;;  %v2300_v51 = vadd.f32 %v4692_v5, %v1275_v42  ;;  %v1278_v53 = vmul.f32 %v4687_v1, %v253_v37  ;;  %v1279_v54 = vmul.f32 %v4687_v1, %v254_v38  ;;  %v275_v41 = vld [vmem:[%s4680_s11 + $0x278] sm:$0xff] }
  0x61   : > { %3321 = vst [vmem:[%s4721_s25 + $0x198] sm:$0xff] %v2297_v46  ;;  %3322 = vst [vmem:[%s4721_s25 + $0x1a0] sm:$0xff] %v2298_v47  ;;  %v2301_v56 = vadd.f32 %v4692_v5, %v1276_v49  ;;  %v1280_v57 = vmul.f32 %v4687_v1, %v255_v43  ;;  %v1281_v58 = vmul.f32 %v4687_v1, %v256_v44  ;;  %v276_v46 = vld [vmem:[%s4680_s11 + $0x280] sm:$0xff]  ;;  %v277_v47 = vld [vmem:[%s4680_s11 + $0x288] sm:$0xff] }
  0x62   : > { %3323 = vst [vmem:[%s4721_s25 + $0x1a8] sm:$0xff] %v2299_v48  ;;  %v1282_v59 = vmul.f32 %v4687_v1, %v257_v45  ;;  %3324 = vst [vmem:[%s4721_s25 + $0x1b0] sm:$0xff] %v2300_v51  ;;  %v2302_v63 = vadd.f32 %v4692_v5, %v1277_v52  ;;  %v2303_v0 = vadd.f32 %v4692_v5, %v1278_v53  ;;  %v278_v48 = vld [vmem:[%s4680_s11 + $0x290] sm:$0xff]  ;;  %v279_v53 = vld [vmem:[%s4680_s11 + $0x298] sm:$0xff] }
  0x63   : > { %v2304_v2 = vadd.f32 %v4692_v5, %v1279_v54  ;;  %v1283_v3 = vmul.f32 %v4687_v1, %v258_v50  ;;  %3325 = vst [vmem:[%s4721_s25 + $0x1b8] sm:$0xff] %v2301_v56  ;;  %v2305_v8 = vadd.f32 %v4692_v5, %v1280_v57  ;;  %v2306_v9 = vadd.f32 %v4692_v5, %v1281_v58  ;;  %v280_v54 = vld [vmem:[%s4680_s11 + $0x2a0] sm:$0xff] }
  0x64   : > { %v2307_v10 = vadd.f32 %v4692_v5, %v1282_v59  ;;  %v1284_v11 = vmul.f32 %v4687_v1, %v259_v55  ;;  %3326 = vst [vmem:[%s4721_s25 + $0x1c0] sm:$0xff] %v2302_v63  ;;  %3327 = vst [vmem:[%s4721_s25 + $0x1c8] sm:$0xff] %v2303_v0  ;;  %v1285_v14 = vmul.f32 %v4687_v1, %v260_v60  ;;  %v281_v55 = vld [vmem:[%s4680_s11 + $0x2a8] sm:$0xff]  ;;  %v282_v60 = vld [vmem:[%s4680_s11 + $0x2b0] sm:$0xff] }
  0x65   : > { %3328 = vst [vmem:[%s4721_s25 + $0x1d0] sm:$0xff] %v2304_v2  ;;  %v2308_v13 = vadd.f32 %v4692_v5, %v1283_v3  ;;  %v1286_v15 = vmul.f32 %v4687_v1, %v261_v61  ;;  %v1287_v16 = vmul.f32 %v4687_v1, %v262_v62  ;;  %3329 = vst [vmem:[%s4721_s25 + $0x1d8] sm:$0xff] %v2305_v8  ;;  %v283_v2 = vld [vmem:[%s4680_s11 + $0x2b8] sm:$0xff]  ;;  %v284_v8 = vld [vmem:[%s4680_s11 + $0x2c0] sm:$0xff] }
  0x66   : > { %3330 = vst [vmem:[%s4721_s25 + $0x1e0] sm:$0xff] %v2306_v9  ;;  %3331 = vst [vmem:[%s4721_s25 + $0x1e8] sm:$0xff] %v2307_v10  ;;  %v2309_v18 = vadd.f32 %v4692_v5, %v1284_v11  ;;  %v1288_v19 = vmul.f32 %v4687_v1, %v263_v4  ;;  %v1289_v20 = vmul.f32 %v4687_v1, %v264_v6  ;;  %v285_v9 = vld [vmem:[%s4680_s11 + $0x2c8] sm:$0xff]  ;;  %v286_v10 = vld [vmem:[%s4680_s11 + $0x2d0] sm:$0xff] }
  0x67   : > { %v1290_v21 = vmul.f32 %v4687_v1, %v265_v7  ;;  %3332 = vst [vmem:[%s4721_s25 + $0x1f0] sm:$0xff] %v2308_v13  ;;  %v2310_v25 = vadd.f32 %v4692_v5, %v1285_v14  ;;  %v2311_v26 = vadd.f32 %v4692_v5, %v1286_v15  ;;  %v2312_v27 = vadd.f32 %v4692_v5, %v1287_v16  ;;  %v287_v15 = vld [vmem:[%s4680_s11 + $0x2d8] sm:$0xff]  ;;  %v288_v16 = vld [vmem:[%s4680_s11 + $0x2e0] sm:$0xff] }
  0x68   : > { %v1291_v28 = vmul.f32 %v4687_v1, %v266_v12  ;;  %3333 = vst [vmem:[%s4721_s25 + $0x1f8] sm:$0xff] %v2309_v18  ;;  %v2313_v32 = vadd.f32 %v4692_v5, %v1288_v19  ;;  %v2314_v33 = vadd.f32 %v4692_v5, %v1289_v20  ;;  %v1292_v35 = vmul.f32 %v4687_v1, %v267_v17  ;;  %v289_v17 = vld [vmem:[%s4680_s11 + $0x2e8] sm:$0xff] }
  0x69   : > { %v2315_v34 = vadd.f32 %v4692_v5, %v1290_v21  ;;  %3334 = vst [vmem:[%s4721_s25 + $0x200] sm:$0xff] %v2310_v25  ;;  %3335 = vst [vmem:[%s4721_s25 + $0x208] sm:$0xff] %v2311_v26  ;;  %v1293_v38 = vmul.f32 %v4687_v1, %v268_v22  ;;  %v1294_v39 = vmul.f32 %v4687_v1, %v269_v23  ;;  %v290_v22 = vld [vmem:[%s4680_s11 + $0x2f0] sm:$0xff] }
  0x6a   : > { %3336 = vst [vmem:[%s4721_s25 + $0x210] sm:$0xff] %v2312_v27  ;;  %v2316_v37 = vadd.f32 %v4692_v5, %v1291_v28  ;;  %v1295_v40 = vmul.f32 %v4687_v1, %v270_v24  ;;  %3337 = vst [vmem:[%s4721_s25 + $0x218] sm:$0xff] %v2313_v32  ;;  %v2317_v42 = vadd.f32 %v4692_v5, %v1292_v35  ;;  %v291_v27 = vld [vmem:[%s4680_s11 + $0x2f8] sm:$0xff]  ;;  %v292_v32 = vld [vmem:[%s4680_s11 + $0x300] sm:$0xff] }
  0x6b   : > { %3338 = vst [vmem:[%s4721_s25 + $0x220] sm:$0xff] %v2314_v33  ;;  %3339 = vst [vmem:[%s4721_s25 + $0x228] sm:$0xff] %v2315_v34  ;;  %v1296_v43 = vmul.f32 %v4687_v1, %v271_v29  ;;  %v1297_v44 = vmul.f32 %v4687_v1, %v272_v30  ;;  %v1298_v45 = vmul.f32 %v4687_v1, %v273_v31  ;;  %v293_v33 = vld [vmem:[%s4680_s11 + $0x308] sm:$0xff]  ;;  %v294_v34 = vld [vmem:[%s4680_s11 + $0x310] sm:$0xff] }
  0x6c   : > { %3340 = vst [vmem:[%s4721_s25 + $0x230] sm:$0xff] %v2316_v37  ;;  %v2318_v49 = vadd.f32 %v4692_v5, %v1293_v38  ;;  %v2319_v50 = vadd.f32 %v4692_v5, %v1294_v39  ;;  %v2320_v51 = vadd.f32 %v4692_v5, %v1295_v40  ;;  %v1299_v52 = vmul.f32 %v4687_v1, %v274_v36  ;;  %v295_v39 = vld [vmem:[%s4680_s11 + $0x318] sm:$0xff]  ;;  %v296_v40 = vld [vmem:[%s4680_s11 + $0x320] sm:$0xff] }
  0x6d   : > { %3341 = vst [vmem:[%s4721_s25 + $0x238] sm:$0xff] %v2317_v42  ;;  %v2321_v56 = vadd.f32 %v4692_v5, %v1296_v43  ;;  %v2322_v57 = vadd.f32 %v4692_v5, %v1297_v44  ;;  %v2323_v58 = vadd.f32 %v4692_v5, %v1298_v45  ;;  %v1300_v59 = vmul.f32 %v4687_v1, %v275_v41  ;;  %v297_v41 = vld [vmem:[%s4680_s11 + $0x328] sm:$0xff] }
  0x6e   : > { %3342 = vst [vmem:[%s4721_s25 + $0x240] sm:$0xff] %v2318_v49  ;;  %3343 = vst [vmem:[%s4721_s25 + $0x248] sm:$0xff] %v2319_v50  ;;  %v2324_v61 = vadd.f32 %v4692_v5, %v1299_v52  ;;  %v1301_v62 = vmul.f32 %v4687_v1, %v276_v46  ;;  %v1302_v63 = vmul.f32 %v4687_v1, %v277_v47  ;;  %v298_v46 = vld [vmem:[%s4680_s11 + $0x330] sm:$0xff] }
  0x6f   : > { %3344 = vst [vmem:[%s4721_s25 + $0x250] sm:$0xff] %v2320_v51  ;;  %v1303_v0 = vmul.f32 %v4687_v1, %v278_v48  ;;  %3345 = vst [vmem:[%s4721_s25 + $0x258] sm:$0xff] %v2321_v56  ;;  %v2325_v3 = vadd.f32 %v4692_v5, %v1300_v59  ;;  %v1304_v4 = vmul.f32 %v4687_v1, %v279_v53  ;;  %v299_v51 = vld [vmem:[%s4680_s11 + $0x338] sm:$0xff]  ;;  %v300_v56 = vld [vmem:[%s4680_s11 + $0x340] sm:$0xff] }
  0x70   : > { %3346 = vst [vmem:[%s4721_s25 + $0x260] sm:$0xff] %v2322_v57  ;;  %3347 = vst [vmem:[%s4721_s25 + $0x268] sm:$0xff] %v2323_v58  ;;  %v1305_v6 = vmul.f32 %v4687_v1, %v280_v54  ;;  %v1306_v7 = vmul.f32 %v4687_v1, %v281_v55  ;;  %v2326_v11 = vadd.f32 %v4692_v5, %v1301_v62  ;;  %v301_v57 = vld [vmem:[%s4680_s11 + $0x348] sm:$0xff]  ;;  %v302_v58 = vld [vmem:[%s4680_s11 + $0x350] sm:$0xff] }
  0x71   : > { %3348 = vst [vmem:[%s4721_s25 + $0x270] sm:$0xff] %v2324_v61  ;;  %v2327_v12 = vadd.f32 %v4692_v5, %v1302_v63  ;;  %v2328_v13 = vadd.f32 %v4692_v5, %v1303_v0  ;;  %v1307_v14 = vmul.f32 %v4687_v1, %v282_v60  ;;  %3349 = vst [vmem:[%s4721_s25 + $0x278] sm:$0xff] %v2325_v3  ;;  %v303_v63 = vld [vmem:[%s4680_s11 + $0x358] sm:$0xff]  ;;  %v304_v0 = vld [vmem:[%s4680_s11 + $0x360] sm:$0xff] }
  0x72   : > { %v2329_v18 = vadd.f32 %v4692_v5, %v1304_v4  ;;  %v2330_v19 = vadd.f32 %v4692_v5, %v1305_v6  ;;  %v2331_v20 = vadd.f32 %v4692_v5, %v1306_v7  ;;  %v1308_v21 = vmul.f32 %v4687_v1, %v283_v2  ;;  %3350 = vst [vmem:[%s4721_s25 + $0x280] sm:$0xff] %v2326_v11  ;;  %v305_v2 = vld [vmem:[%s4680_s11 + $0x368] sm:$0xff] }
  0x73   : > { %3351 = vst [vmem:[%s4721_s25 + $0x288] sm:$0xff] %v2327_v12  ;;  %3352 = vst [vmem:[%s4721_s25 + $0x290] sm:$0xff] %v2328_v13  ;;  %v2332_v23 = vadd.f32 %v4692_v5, %v1307_v14  ;;  %v1309_v24 = vmul.f32 %v4687_v1, %v284_v8  ;;  %v1310_v25 = vmul.f32 %v4687_v1, %v285_v9  ;;  %v306_v8 = vld [vmem:[%s4680_s11 + $0x370] sm:$0xff]  ;;  %v307_v13 = vld [vmem:[%s4680_s11 + $0x378] sm:$0xff] }
  0x74   : > { %v1311_v26 = vmul.f32 %v4687_v1, %v286_v10  ;;  %3353 = vst [vmem:[%s4721_s25 + $0x298] sm:$0xff] %v2329_v18  ;;  %3354 = vst [vmem:[%s4721_s25 + $0x2a0] sm:$0xff] %v2330_v19  ;;  %v2333_v28 = vadd.f32 %v4692_v5, %v1308_v21  ;;  %v1312_v29 = vmul.f32 %v4687_v1, %v287_v15  ;;  %v308_v18 = vld [vmem:[%s4680_s11 + $0x380] sm:$0xff]  ;;  %v309_v19 = vld [vmem:[%s4680_s11 + $0x388] sm:$0xff] }
  0x75   : > { %3355 = vst [vmem:[%s4721_s25 + $0x2a8] sm:$0xff] %v2331_v20  ;;  %v1313_v30 = vmul.f32 %v4687_v1, %v288_v16  ;;  %v1314_v31 = vmul.f32 %v4687_v1, %v289_v17  ;;  %3356 = vst [vmem:[%s4721_s25 + $0x2b0] sm:$0xff] %v2332_v23  ;;  %v2334_v35 = vadd.f32 %v4692_v5, %v1309_v24  ;;  %v310_v20 = vld [vmem:[%s4680_s11 + $0x390] sm:$0xff] }
  0x76   : > { %v2335_v36 = vadd.f32 %v4692_v5, %v1310_v25  ;;  %v2336_v37 = vadd.f32 %v4692_v5, %v1311_v26  ;;  %v1315_v38 = vmul.f32 %v4687_v1, %v290_v22  ;;  %3357 = vst [vmem:[%s4721_s25 + $0x2b8] sm:$0xff] %v2333_v28  ;;  %v2337_v42 = vadd.f32 %v4692_v5, %v1312_v29  ;;  %v311_v25 = vld [vmem:[%s4680_s11 + $0x398] sm:$0xff]  ;;  %v312_v26 = vld [vmem:[%s4680_s11 + $0x3a0] sm:$0xff] }
  0x77   : > { %v2338_v43 = vadd.f32 %v4692_v5, %v1313_v30  ;;  %v2339_v44 = vadd.f32 %v4692_v5, %v1314_v31  ;;  %v1316_v45 = vmul.f32 %v4687_v1, %v291_v27  ;;  %3358 = vst [vmem:[%s4721_s25 + $0x2c0] sm:$0xff] %v2334_v35  ;;  %v1317_v48 = vmul.f32 %v4687_v1, %v292_v32  ;;  %v313_v27 = vld [vmem:[%s4680_s11 + $0x3a8] sm:$0xff]  ;;  %v314_v32 = vld [vmem:[%s4680_s11 + $0x3b0] sm:$0xff] }
  0x78   : > { %3359 = vst [vmem:[%s4721_s25 + $0x2c8] sm:$0xff] %v2335_v36  ;;  %3360 = vst [vmem:[%s4721_s25 + $0x2d0] sm:$0xff] %v2336_v37  ;;  %v2340_v47 = vadd.f32 %v4692_v5, %v1315_v38  ;;  %v1318_v49 = vmul.f32 %v4687_v1, %v293_v33  ;;  %v1319_v50 = vmul.f32 %v4687_v1, %v294_v34  ;;  %v315_v37 = vld [vmem:[%s4680_s11 + $0x3b8] sm:$0xff] }
  0x79   : > { %3361 = vst [vmem:[%s4721_s25 + $0x2d8] sm:$0xff] %v2337_v42  ;;  %3362 = vst [vmem:[%s4721_s25 + $0x2e0] sm:$0xff] %v2338_v43  ;;  %v2341_v52 = vadd.f32 %v4692_v5, %v1316_v45  ;;  %v1320_v53 = vmul.f32 %v4687_v1, %v295_v39  ;;  %v1321_v54 = vmul.f32 %v4687_v1, %v296_v40  ;;  %v316_v42 = vld [vmem:[%s4680_s11 + $0x3c0] sm:$0xff]  ;;  %v317_v43 = vld [vmem:[%s4680_s11 + $0x3c8] sm:$0xff] }
  0x7a   : > { %3363 = vst [vmem:[%s4721_s25 + $0x2e8] sm:$0xff] %v2339_v44  ;;  %v1322_v55 = vmul.f32 %v4687_v1, %v297_v41  ;;  %3364 = vst [vmem:[%s4721_s25 + $0x2f0] sm:$0xff] %v2340_v47  ;;  %v2342_v59 = vadd.f32 %v4692_v5, %v1317_v48  ;;  %v2343_v60 = vadd.f32 %v4692_v5, %v1318_v49  ;;  %v318_v44 = vld [vmem:[%s4680_s11 + $0x3d0] sm:$0xff]  ;;  %v319_v49 = vld [vmem:[%s4680_s11 + $0x3d8] sm:$0xff] }
  0x7b   : > { %v2344_v61 = vadd.f32 %v4692_v5, %v1319_v50  ;;  %v1323_v62 = vmul.f32 %v4687_v1, %v298_v46  ;;  %3365 = vst [vmem:[%s4721_s25 + $0x2f8] sm:$0xff] %v2341_v52  ;;  %v2345_v3 = vadd.f32 %v4692_v5, %v1320_v53  ;;  %v2346_v4 = vadd.f32 %v4692_v5, %v1321_v54  ;;  %v320_v50 = vld [vmem:[%s4680_s11 + $0x3e0] sm:$0xff] }
  0x7c   : > { %v2347_v6 = vadd.f32 %v4692_v5, %v1322_v55  ;;  %v1324_v7 = vmul.f32 %v4687_v1, %v299_v51  ;;  %3366 = vst [vmem:[%s4721_s25 + $0x300] sm:$0xff] %v2342_v59  ;;  %3367 = vst [vmem:[%s4721_s25 + $0x308] sm:$0xff] %v2343_v60  ;;  %v1325_v10 = vmul.f32 %v4687_v1, %v300_v56  ;;  %v321_v51 = vld [vmem:[%s4680_s11 + $0x3e8] sm:$0xff]  ;;  %v322_v56 = vld [vmem:[%s4680_s11 + $0x3f0] sm:$0xff] }
  0x7d   : > { %3368 = vst [vmem:[%s4721_s25 + $0x310] sm:$0xff] %v2344_v61  ;;  %v2348_v9 = vadd.f32 %v4692_v5, %v1323_v62  ;;  %v1326_v11 = vmul.f32 %v4687_v1, %v301_v57  ;;  %v1327_v12 = vmul.f32 %v4687_v1, %v302_v58  ;;  %3369 = vst [vmem:[%s4721_s25 + $0x318] sm:$0xff] %v2345_v3  ;;  %v323_v61 = vld [vmem:[%s4680_s11 + $0x3f8] sm:$0xff]  ;;  %v324_v3 = vld [vmem:[%s4680_s11 + $0x400] sm:$0xff] }
  0x7e   : > { %3370 = vst [vmem:[%s4721_s25 + $0x320] sm:$0xff] %v2346_v4  ;;  %3371 = vst [vmem:[%s4721_s25 + $0x328] sm:$0xff] %v2347_v6  ;;  %v2349_v14 = vadd.f32 %v4692_v5, %v1324_v7  ;;  %v1328_v15 = vmul.f32 %v4687_v1, %v303_v63  ;;  %v1329_v16 = vmul.f32 %v4687_v1, %v304_v0  ;;  %v325_v4 = vld [vmem:[%s4680_s11 + $0x408] sm:$0xff]  ;;  %v326_v6 = vld [vmem:[%s4680_s11 + $0x410] sm:$0xff] }
  0x7f   : > { %v1330_v17 = vmul.f32 %v4687_v1, %v305_v2  ;;  %3372 = vst [vmem:[%s4721_s25 + $0x330] sm:$0xff] %v2348_v9  ;;  %v2350_v21 = vadd.f32 %v4692_v5, %v1325_v10  ;;  %v2351_v22 = vadd.f32 %v4692_v5, %v1326_v11  ;;  %v2352_v23 = vadd.f32 %v4692_v5, %v1327_v12  ;;  %v327_v11 = vld [vmem:[%s4680_s11 + $0x418] sm:$0xff]  ;;  %v328_v12 = vld [vmem:[%s4680_s11 + $0x420] sm:$0xff] }
  0x80   : > { %v1331_v24 = vmul.f32 %v4687_v1, %v306_v8  ;;  %3373 = vst [vmem:[%s4721_s25 + $0x338] sm:$0xff] %v2349_v14  ;;  %v2353_v28 = vadd.f32 %v4692_v5, %v1328_v15  ;;  %v2354_v29 = vadd.f32 %v4692_v5, %v1329_v16  ;;  %v1332_v31 = vmul.f32 %v4687_v1, %v307_v13  ;;  %v329_v13 = vld [vmem:[%s4680_s11 + $0x428] sm:$0xff] }
  0x81   : > { %v2355_v30 = vadd.f32 %v4692_v5, %v1330_v17  ;;  %3374 = vst [vmem:[%s4721_s25 + $0x340] sm:$0xff] %v2350_v21  ;;  %3375 = vst [vmem:[%s4721_s25 + $0x348] sm:$0xff] %v2351_v22  ;;  %v1333_v34 = vmul.f32 %v4687_v1, %v308_v18  ;;  %v1334_v35 = vmul.f32 %v4687_v1, %v309_v19  ;;  %v330_v18 = vld [vmem:[%s4680_s11 + $0x430] sm:$0xff] }
  0x82   : > { %3376 = vst [vmem:[%s4721_s25 + $0x350] sm:$0xff] %v2352_v23  ;;  %v2356_v33 = vadd.f32 %v4692_v5, %v1331_v24  ;;  %v1335_v36 = vmul.f32 %v4687_v1, %v310_v20  ;;  %3377 = vst [vmem:[%s4721_s25 + $0x358] sm:$0xff] %v2353_v28  ;;  %v2357_v38 = vadd.f32 %v4692_v5, %v1332_v31  ;;  %v331_v23 = vld [vmem:[%s4680_s11 + $0x438] sm:$0xff]  ;;  %v332_v28 = vld [vmem:[%s4680_s11 + $0x440] sm:$0xff] }
  0x83   : > { %3378 = vst [vmem:[%s4721_s25 + $0x360] sm:$0xff] %v2354_v29  ;;  %3379 = vst [vmem:[%s4721_s25 + $0x368] sm:$0xff] %v2355_v30  ;;  %v1336_v39 = vmul.f32 %v4687_v1, %v311_v25  ;;  %v1337_v40 = vmul.f32 %v4687_v1, %v312_v26  ;;  %v1338_v41 = vmul.f32 %v4687_v1, %v313_v27  ;;  %v333_v29 = vld [vmem:[%s4680_s11 + $0x448] sm:$0xff]  ;;  %v334_v30 = vld [vmem:[%s4680_s11 + $0x450] sm:$0xff] }
  0x84   : > { %3380 = vst [vmem:[%s4721_s25 + $0x370] sm:$0xff] %v2356_v33  ;;  %v2358_v45 = vadd.f32 %v4692_v5, %v1333_v34  ;;  %v2359_v46 = vadd.f32 %v4692_v5, %v1334_v35  ;;  %v2360_v47 = vadd.f32 %v4692_v5, %v1335_v36  ;;  %v1339_v48 = vmul.f32 %v4687_v1, %v314_v32  ;;  %v335_v35 = vld [vmem:[%s4680_s11 + $0x458] sm:$0xff]  ;;  %v336_v36 = vld [vmem:[%s4680_s11 + $0x460] sm:$0xff] }
  0x85   : > { %3381 = vst [vmem:[%s4721_s25 + $0x378] sm:$0xff] %v2357_v38  ;;  %v2361_v52 = vadd.f32 %v4692_v5, %v1336_v39  ;;  %v2362_v53 = vadd.f32 %v4692_v5, %v1337_v40  ;;  %v2363_v54 = vadd.f32 %v4692_v5, %v1338_v41  ;;  %v1340_v55 = vmul.f32 %v4687_v1, %v315_v37  ;;  %v337_v37 = vld [vmem:[%s4680_s11 + $0x468] sm:$0xff] }
  0x86   : > { %3382 = vst [vmem:[%s4721_s25 + $0x380] sm:$0xff] %v2358_v45  ;;  %3383 = vst [vmem:[%s4721_s25 + $0x388] sm:$0xff] %v2359_v46  ;;  %v2364_v57 = vadd.f32 %v4692_v5, %v1339_v48  ;;  %v1341_v58 = vmul.f32 %v4687_v1, %v316_v42  ;;  %v1342_v59 = vmul.f32 %v4687_v1, %v317_v43  ;;  %v338_v42 = vld [vmem:[%s4680_s11 + $0x470] sm:$0xff] }
  0x87   : > { %3384 = vst [vmem:[%s4721_s25 + $0x390] sm:$0xff] %v2360_v47  ;;  %v1343_v60 = vmul.f32 %v4687_v1, %v318_v44  ;;  %3385 = vst [vmem:[%s4721_s25 + $0x398] sm:$0xff] %v2361_v52  ;;  %v2365_v62 = vadd.f32 %v4692_v5, %v1340_v55  ;;  %v1344_v63 = vmul.f32 %v4687_v1, %v319_v49  ;;  %v339_v47 = vld [vmem:[%s4680_s11 + $0x478] sm:$0xff]  ;;  %v340_v52 = vld [vmem:[%s4680_s11 + $0x480] sm:$0xff] }
  0x88   : > { %3386 = vst [vmem:[%s4721_s25 + $0x3a0] sm:$0xff] %v2362_v53  ;;  %3387 = vst [vmem:[%s4721_s25 + $0x3a8] sm:$0xff] %v2363_v54  ;;  %v1345_v0 = vmul.f32 %v4687_v1, %v320_v50  ;;  %v1346_v2 = vmul.f32 %v4687_v1, %v321_v51  ;;  %v2366_v7 = vadd.f32 %v4692_v5, %v1341_v58  ;;  %v341_v53 = vld [vmem:[%s4680_s11 + $0x488] sm:$0xff]  ;;  %v342_v54 = vld [vmem:[%s4680_s11 + $0x490] sm:$0xff] }
  0x89   : > { %3388 = vst [vmem:[%s4721_s25 + $0x3b0] sm:$0xff] %v2364_v57  ;;  %v2367_v8 = vadd.f32 %v4692_v5, %v1342_v59  ;;  %v2368_v9 = vadd.f32 %v4692_v5, %v1343_v60  ;;  %v1347_v10 = vmul.f32 %v4687_v1, %v322_v56  ;;  %3389 = vst [vmem:[%s4721_s25 + $0x3b8] sm:$0xff] %v2365_v62  ;;  %v343_v59 = vld [vmem:[%s4680_s11 + $0x498] sm:$0xff]  ;;  %v344_v60 = vld [vmem:[%s4680_s11 + $0x4a0] sm:$0xff] }
  0x8a   : > { %v2369_v14 = vadd.f32 %v4692_v5, %v1344_v63  ;;  %v2370_v15 = vadd.f32 %v4692_v5, %v1345_v0  ;;  %v2371_v16 = vadd.f32 %v4692_v5, %v1346_v2  ;;  %v1348_v17 = vmul.f32 %v4687_v1, %v323_v61  ;;  %3390 = vst [vmem:[%s4721_s25 + $0x3c0] sm:$0xff] %v2366_v7  ;;  %v345_v61 = vld [vmem:[%s4680_s11 + $0x4a8] sm:$0xff] }
  0x8b   : > { %3391 = vst [vmem:[%s4721_s25 + $0x3c8] sm:$0xff] %v2367_v8  ;;  %3392 = vst [vmem:[%s4721_s25 + $0x3d0] sm:$0xff] %v2368_v9  ;;  %v2372_v19 = vadd.f32 %v4692_v5, %v1347_v10  ;;  %v1349_v20 = vmul.f32 %v4687_v1, %v324_v3  ;;  %v1350_v21 = vmul.f32 %v4687_v1, %v325_v4  ;;  %v346_v3 = vld [vmem:[%s4680_s11 + $0x4b0] sm:$0xff]  ;;  %v347_v9 = vld [vmem:[%s4680_s11 + $0x4b8] sm:$0xff] }
  0x8c   : > { %v1351_v22 = vmul.f32 %v4687_v1, %v326_v6  ;;  %3393 = vst [vmem:[%s4721_s25 + $0x3d8] sm:$0xff] %v2369_v14  ;;  %3394 = vst [vmem:[%s4721_s25 + $0x3e0] sm:$0xff] %v2370_v15  ;;  %v2373_v24 = vadd.f32 %v4692_v5, %v1348_v17  ;;  %v1352_v25 = vmul.f32 %v4687_v1, %v327_v11  ;;  %v348_v14 = vld [vmem:[%s4680_s11 + $0x4c0] sm:$0xff]  ;;  %v349_v15 = vld [vmem:[%s4680_s11 + $0x4c8] sm:$0xff] }
  0x8d   : > { %3395 = vst [vmem:[%s4721_s25 + $0x3e8] sm:$0xff] %v2371_v16  ;;  %v1353_v26 = vmul.f32 %v4687_v1, %v328_v12  ;;  %v1354_v27 = vmul.f32 %v4687_v1, %v329_v13  ;;  %3396 = vst [vmem:[%s4721_s25 + $0x3f0] sm:$0xff] %v2372_v19  ;;  %v2374_v31 = vadd.f32 %v4692_v5, %v1349_v20  ;;  %v350_v16 = vld [vmem:[%s4680_s11 + $0x4d0] sm:$0xff] }
  0x8e   : > { %v2375_v32 = vadd.f32 %v4692_v5, %v1350_v21  ;;  %v2376_v33 = vadd.f32 %v4692_v5, %v1351_v22  ;;  %v1355_v34 = vmul.f32 %v4687_v1, %v330_v18  ;;  %3397 = vst [vmem:[%s4721_s25 + $0x3f8] sm:$0xff] %v2373_v24  ;;  %v2377_v38 = vadd.f32 %v4692_v5, %v1352_v25  ;;  %v351_v21 = vld [vmem:[%s4680_s11 + $0x4d8] sm:$0xff]  ;;  %v352_v22 = vld [vmem:[%s4680_s11 + $0x4e0] sm:$0xff] }
  0x8f   : > { %v2378_v39 = vadd.f32 %v4692_v5, %v1353_v26  ;;  %v2379_v40 = vadd.f32 %v4692_v5, %v1354_v27  ;;  %v1356_v41 = vmul.f32 %v4687_v1, %v331_v23  ;;  %3398 = vst [vmem:[%s4721_s25 + $0x400] sm:$0xff] %v2374_v31  ;;  %v1357_v44 = vmul.f32 %v4687_v1, %v332_v28  ;;  %v353_v23 = vld [vmem:[%s4680_s11 + $0x4e8] sm:$0xff]  ;;  %v354_v28 = vld [vmem:[%s4680_s11 + $0x4f0] sm:$0xff] }
  0x90   : > { %3399 = vst [vmem:[%s4721_s25 + $0x408] sm:$0xff] %v2375_v32  ;;  %3400 = vst [vmem:[%s4721_s25 + $0x410] sm:$0xff] %v2376_v33  ;;  %v2380_v43 = vadd.f32 %v4692_v5, %v1355_v34  ;;  %v1358_v45 = vmul.f32 %v4687_v1, %v333_v29  ;;  %v1359_v46 = vmul.f32 %v4687_v1, %v334_v30  ;;  %v355_v33 = vld [vmem:[%s4680_s11 + $0x4f8] sm:$0xff] }
  0x91   : > { %3401 = vst [vmem:[%s4721_s25 + $0x418] sm:$0xff] %v2377_v38  ;;  %3402 = vst [vmem:[%s4721_s25 + $0x420] sm:$0xff] %v2378_v39  ;;  %v2381_v48 = vadd.f32 %v4692_v5, %v1356_v41  ;;  %v1360_v49 = vmul.f32 %v4687_v1, %v335_v35  ;;  %v1361_v50 = vmul.f32 %v4687_v1, %v336_v36  ;;  %v356_v38 = vld [vmem:[%s4680_s11 + $0x500] sm:$0xff]  ;;  %v357_v39 = vld [vmem:[%s4680_s11 + $0x508] sm:$0xff] }
  0x92   : > { %3403 = vst [vmem:[%s4721_s25 + $0x428] sm:$0xff] %v2379_v40  ;;  %v1362_v51 = vmul.f32 %v4687_v1, %v337_v37  ;;  %3404 = vst [vmem:[%s4721_s25 + $0x430] sm:$0xff] %v2380_v43  ;;  %v2382_v55 = vadd.f32 %v4692_v5, %v1357_v44  ;;  %v2383_v56 = vadd.f32 %v4692_v5, %v1358_v45  ;;  %v358_v40 = vld [vmem:[%s4680_s11 + $0x510] sm:$0xff]  ;;  %v359_v45 = vld [vmem:[%s4680_s11 + $0x518] sm:$0xff] }
  0x93   : > { %v2384_v57 = vadd.f32 %v4692_v5, %v1359_v46  ;;  %v1363_v58 = vmul.f32 %v4687_v1, %v338_v42  ;;  %3405 = vst [vmem:[%s4721_s25 + $0x438] sm:$0xff] %v2381_v48  ;;  %v2385_v62 = vadd.f32 %v4692_v5, %v1360_v49  ;;  %v2386_v63 = vadd.f32 %v4692_v5, %v1361_v50  ;;  %v360_v46 = vld [vmem:[%s4680_s11 + $0x520] sm:$0xff] }
  0x94   : > { %v2387_v0 = vadd.f32 %v4692_v5, %v1362_v51  ;;  %v1364_v2 = vmul.f32 %v4687_v1, %v339_v47  ;;  %3406 = vst [vmem:[%s4721_s25 + $0x440] sm:$0xff] %v2382_v55  ;;  %3407 = vst [vmem:[%s4721_s25 + $0x448] sm:$0xff] %v2383_v56  ;;  %v1365_v6 = vmul.f32 %v4687_v1, %v340_v52  ;;  %v361_v47 = vld [vmem:[%s4680_s11 + $0x528] sm:$0xff]  ;;  %v362_v52 = vld [vmem:[%s4680_s11 + $0x530] sm:$0xff] }
  0x95   : > { %3408 = vst [vmem:[%s4721_s25 + $0x450] sm:$0xff] %v2384_v57  ;;  %v2388_v4 = vadd.f32 %v4692_v5, %v1363_v58  ;;  %v1366_v7 = vmul.f32 %v4687_v1, %v341_v53  ;;  %v1367_v8 = vmul.f32 %v4687_v1, %v342_v54  ;;  %3409 = vst [vmem:[%s4721_s25 + $0x458] sm:$0xff] %v2385_v62  ;;  %v363_v57 = vld [vmem:[%s4680_s11 + $0x538] sm:$0xff]  ;;  %v364_v62 = vld [vmem:[%s4680_s11 + $0x540] sm:$0xff] }
  0x96   : > { %3410 = vst [vmem:[%s4721_s25 + $0x460] sm:$0xff] %v2386_v63  ;;  %3411 = vst [vmem:[%s4721_s25 + $0x468] sm:$0xff] %v2387_v0  ;;  %v2389_v10 = vadd.f32 %v4692_v5, %v1364_v2  ;;  %v1368_v11 = vmul.f32 %v4687_v1, %v343_v59  ;;  %v1369_v12 = vmul.f32 %v4687_v1, %v344_v60  ;;  %v365_v63 = vld [vmem:[%s4680_s11 + $0x548] sm:$0xff]  ;;  %v366_v0 = vld [vmem:[%s4680_s11 + $0x550] sm:$0xff] }
  0x97   : > { %v1370_v13 = vmul.f32 %v4687_v1, %v345_v61  ;;  %3412 = vst [vmem:[%s4721_s25 + $0x470] sm:$0xff] %v2388_v4  ;;  %v2390_v17 = vadd.f32 %v4692_v5, %v1365_v6  ;;  %v2391_v18 = vadd.f32 %v4692_v5, %v1366_v7  ;;  %v2392_v19 = vadd.f32 %v4692_v5, %v1367_v8  ;;  %v367_v7 = vld [vmem:[%s4680_s11 + $0x558] sm:$0xff]  ;;  %v368_v8 = vld [vmem:[%s4680_s11 + $0x560] sm:$0xff] }
  0x98   : > { %v1371_v20 = vmul.f32 %v4687_v1, %v346_v3  ;;  %3413 = vst [vmem:[%s4721_s25 + $0x478] sm:$0xff] %v2389_v10  ;;  %v2393_v24 = vadd.f32 %v4692_v5, %v1368_v11  ;;  %v2394_v25 = vadd.f32 %v4692_v5, %v1369_v12  ;;  %v1372_v27 = vmul.f32 %v4687_v1, %v347_v9  ;;  %v369_v9 = vld [vmem:[%s4680_s11 + $0x568] sm:$0xff] }
  0x99   : > { %v2395_v26 = vadd.f32 %v4692_v5, %v1370_v13  ;;  %3414 = vst [vmem:[%s4721_s25 + $0x480] sm:$0xff] %v2390_v17  ;;  %3415 = vst [vmem:[%s4721_s25 + $0x488] sm:$0xff] %v2391_v18  ;;  %v1373_v30 = vmul.f32 %v4687_v1, %v348_v14  ;;  %v1374_v31 = vmul.f32 %v4687_v1, %v349_v15  ;;  %v370_v14 = vld [vmem:[%s4680_s11 + $0x570] sm:$0xff] }
  0x9a   : > { %3416 = vst [vmem:[%s4721_s25 + $0x490] sm:$0xff] %v2392_v19  ;;  %v2396_v29 = vadd.f32 %v4692_v5, %v1371_v20  ;;  %v1375_v32 = vmul.f32 %v4687_v1, %v350_v16  ;;  %3417 = vst [vmem:[%s4721_s25 + $0x498] sm:$0xff] %v2393_v24  ;;  %v2397_v34 = vadd.f32 %v4692_v5, %v1372_v27  ;;  %v371_v19 = vld [vmem:[%s4680_s11 + $0x578] sm:$0xff]  ;;  %v372_v24 = vld [vmem:[%s4680_s11 + $0x580] sm:$0xff] }
  0x9b   : > { %3418 = vst [vmem:[%s4721_s25 + $0x4a0] sm:$0xff] %v2394_v25  ;;  %3419 = vst [vmem:[%s4721_s25 + $0x4a8] sm:$0xff] %v2395_v26  ;;  %v1376_v35 = vmul.f32 %v4687_v1, %v351_v21  ;;  %v1377_v36 = vmul.f32 %v4687_v1, %v352_v22  ;;  %v1378_v37 = vmul.f32 %v4687_v1, %v353_v23  ;;  %v373_v25 = vld [vmem:[%s4680_s11 + $0x588] sm:$0xff]  ;;  %v374_v26 = vld [vmem:[%s4680_s11 + $0x590] sm:$0xff] }
  0x9c   : > { %3420 = vst [vmem:[%s4721_s25 + $0x4b0] sm:$0xff] %v2396_v29  ;;  %v2398_v41 = vadd.f32 %v4692_v5, %v1373_v30  ;;  %v2399_v42 = vadd.f32 %v4692_v5, %v1374_v31  ;;  %v2400_v43 = vadd.f32 %v4692_v5, %v1375_v32  ;;  %v1379_v44 = vmul.f32 %v4687_v1, %v354_v28  ;;  %v375_v31 = vld [vmem:[%s4680_s11 + $0x598] sm:$0xff]  ;;  %v376_v32 = vld [vmem:[%s4680_s11 + $0x5a0] sm:$0xff] }
  0x9d   : > { %3421 = vst [vmem:[%s4721_s25 + $0x4b8] sm:$0xff] %v2397_v34  ;;  %v2401_v48 = vadd.f32 %v4692_v5, %v1376_v35  ;;  %v2402_v49 = vadd.f32 %v4692_v5, %v1377_v36  ;;  %v2403_v50 = vadd.f32 %v4692_v5, %v1378_v37  ;;  %v1380_v51 = vmul.f32 %v4687_v1, %v355_v33  ;;  %v377_v33 = vld [vmem:[%s4680_s11 + $0x5a8] sm:$0xff] }
  0x9e   : > { %3422 = vst [vmem:[%s4721_s25 + $0x4c0] sm:$0xff] %v2398_v41  ;;  %3423 = vst [vmem:[%s4721_s25 + $0x4c8] sm:$0xff] %v2399_v42  ;;  %v2404_v53 = vadd.f32 %v4692_v5, %v1379_v44  ;;  %v1381_v54 = vmul.f32 %v4687_v1, %v356_v38  ;;  %v1382_v55 = vmul.f32 %v4687_v1, %v357_v39  ;;  %v378_v38 = vld [vmem:[%s4680_s11 + $0x5b0] sm:$0xff] }
  0x9f   : > { %3424 = vst [vmem:[%s4721_s25 + $0x4d0] sm:$0xff] %v2400_v43  ;;  %v1383_v56 = vmul.f32 %v4687_v1, %v358_v40  ;;  %3425 = vst [vmem:[%s4721_s25 + $0x4d8] sm:$0xff] %v2401_v48  ;;  %v2405_v58 = vadd.f32 %v4692_v5, %v1380_v51  ;;  %v1384_v59 = vmul.f32 %v4687_v1, %v359_v45  ;;  %v379_v43 = vld [vmem:[%s4680_s11 + $0x5b8] sm:$0xff]  ;;  %v380_v48 = vld [vmem:[%s4680_s11 + $0x5c0] sm:$0xff] }
  0xa0   : > { %3426 = vst [vmem:[%s4721_s25 + $0x4e0] sm:$0xff] %v2402_v49  ;;  %3427 = vst [vmem:[%s4721_s25 + $0x4e8] sm:$0xff] %v2403_v50  ;;  %v1385_v60 = vmul.f32 %v4687_v1, %v360_v46  ;;  %v1386_v61 = vmul.f32 %v4687_v1, %v361_v47  ;;  %v2406_v2 = vadd.f32 %v4692_v5, %v1381_v54  ;;  %v381_v49 = vld [vmem:[%s4680_s11 + $0x5c8] sm:$0xff]  ;;  %v382_v50 = vld [vmem:[%s4680_s11 + $0x5d0] sm:$0xff] }
  0xa1   : > { %3428 = vst [vmem:[%s4721_s25 + $0x4f0] sm:$0xff] %v2404_v53  ;;  %v2407_v3 = vadd.f32 %v4692_v5, %v1382_v55  ;;  %v2408_v4 = vadd.f32 %v4692_v5, %v1383_v56  ;;  %v1387_v6 = vmul.f32 %v4687_v1, %v362_v52  ;;  %3429 = vst [vmem:[%s4721_s25 + $0x4f8] sm:$0xff] %v2405_v58  ;;  %v383_v55 = vld [vmem:[%s4680_s11 + $0x5d8] sm:$0xff]  ;;  %v384_v56 = vld [vmem:[%s4680_s11 + $0x5e0] sm:$0xff] }
  0xa2   : > { %v2409_v10 = vadd.f32 %v4692_v5, %v1384_v59  ;;  %v2410_v11 = vadd.f32 %v4692_v5, %v1385_v60  ;;  %v2411_v12 = vadd.f32 %v4692_v5, %v1386_v61  ;;  %v1388_v13 = vmul.f32 %v4687_v1, %v363_v57  ;;  %3430 = vst [vmem:[%s4721_s25 + $0x500] sm:$0xff] %v2406_v2  ;;  %v385_v57 = vld [vmem:[%s4680_s11 + $0x5e8] sm:$0xff] }
  0xa3   : > { %3431 = vst [vmem:[%s4721_s25 + $0x508] sm:$0xff] %v2407_v3  ;;  %3432 = vst [vmem:[%s4721_s25 + $0x510] sm:$0xff] %v2408_v4  ;;  %v2412_v15 = vadd.f32 %v4692_v5, %v1387_v6  ;;  %v1389_v16 = vmul.f32 %v4687_v1, %v364_v62  ;;  %v1390_v17 = vmul.f32 %v4687_v1, %v365_v63  ;;  %v386_v62 = vld [vmem:[%s4680_s11 + $0x5f0] sm:$0xff]  ;;  %v387_v4 = vld [vmem:[%s4680_s11 + $0x5f8] sm:$0xff] }
  0xa4   : > { %v1391_v18 = vmul.f32 %v4687_v1, %v366_v0  ;;  %3433 = vst [vmem:[%s4721_s25 + $0x518] sm:$0xff] %v2409_v10  ;;  %3434 = vst [vmem:[%s4721_s25 + $0x520] sm:$0xff] %v2410_v11  ;;  %v2413_v20 = vadd.f32 %v4692_v5, %v1388_v13  ;;  %v1392_v21 = vmul.f32 %v4687_v1, %v367_v7  ;;  %v388_v10 = vld [vmem:[%s4680_s11 + $0x600] sm:$0xff]  ;;  %v389_v11 = vld [vmem:[%s4680_s11 + $0x608] sm:$0xff] }
  0xa5   : > { %3435 = vst [vmem:[%s4721_s25 + $0x528] sm:$0xff] %v2411_v12  ;;  %v1393_v22 = vmul.f32 %v4687_v1, %v368_v8  ;;  %v1394_v23 = vmul.f32 %v4687_v1, %v369_v9  ;;  %3436 = vst [vmem:[%s4721_s25 + $0x530] sm:$0xff] %v2412_v15  ;;  %v2414_v27 = vadd.f32 %v4692_v5, %v1389_v16  ;;  %v390_v12 = vld [vmem:[%s4680_s11 + $0x610] sm:$0xff] }
  0xa6   : > { %v2415_v28 = vadd.f32 %v4692_v5, %v1390_v17  ;;  %v2416_v29 = vadd.f32 %v4692_v5, %v1391_v18  ;;  %v1395_v30 = vmul.f32 %v4687_v1, %v370_v14  ;;  %3437 = vst [vmem:[%s4721_s25 + $0x538] sm:$0xff] %v2413_v20  ;;  %v2417_v34 = vadd.f32 %v4692_v5, %v1392_v21  ;;  %v391_v17 = vld [vmem:[%s4680_s11 + $0x618] sm:$0xff]  ;;  %v392_v18 = vld [vmem:[%s4680_s11 + $0x620] sm:$0xff] }
  0xa7   : > { %v2418_v35 = vadd.f32 %v4692_v5, %v1393_v22  ;;  %v2419_v36 = vadd.f32 %v4692_v5, %v1394_v23  ;;  %v1396_v37 = vmul.f32 %v4687_v1, %v371_v19  ;;  %3438 = vst [vmem:[%s4721_s25 + $0x540] sm:$0xff] %v2414_v27  ;;  %v1397_v40 = vmul.f32 %v4687_v1, %v372_v24  ;;  %v393_v19 = vld [vmem:[%s4680_s11 + $0x628] sm:$0xff]  ;;  %v394_v24 = vld [vmem:[%s4680_s11 + $0x630] sm:$0xff] }
  0xa8   : > { %3439 = vst [vmem:[%s4721_s25 + $0x548] sm:$0xff] %v2415_v28  ;;  %3440 = vst [vmem:[%s4721_s25 + $0x550] sm:$0xff] %v2416_v29  ;;  %v2420_v39 = vadd.f32 %v4692_v5, %v1395_v30  ;;  %v1398_v41 = vmul.f32 %v4687_v1, %v373_v25  ;;  %v1399_v42 = vmul.f32 %v4687_v1, %v374_v26  ;;  %v395_v29 = vld [vmem:[%s4680_s11 + $0x638] sm:$0xff] }
  0xa9   : > { %3441 = vst [vmem:[%s4721_s25 + $0x558] sm:$0xff] %v2417_v34  ;;  %3442 = vst [vmem:[%s4721_s25 + $0x560] sm:$0xff] %v2418_v35  ;;  %v2421_v44 = vadd.f32 %v4692_v5, %v1396_v37  ;;  %v1400_v45 = vmul.f32 %v4687_v1, %v375_v31  ;;  %v1401_v46 = vmul.f32 %v4687_v1, %v376_v32  ;;  %v396_v34 = vld [vmem:[%s4680_s11 + $0x640] sm:$0xff]  ;;  %v397_v35 = vld [vmem:[%s4680_s11 + $0x648] sm:$0xff] }
  0xaa   : > { %3443 = vst [vmem:[%s4721_s25 + $0x568] sm:$0xff] %v2419_v36  ;;  %v1402_v47 = vmul.f32 %v4687_v1, %v377_v33  ;;  %3444 = vst [vmem:[%s4721_s25 + $0x570] sm:$0xff] %v2420_v39  ;;  %v2422_v51 = vadd.f32 %v4692_v5, %v1397_v40  ;;  %v2423_v52 = vadd.f32 %v4692_v5, %v1398_v41  ;;  %v398_v36 = vld [vmem:[%s4680_s11 + $0x650] sm:$0xff]  ;;  %v399_v41 = vld [vmem:[%s4680_s11 + $0x658] sm:$0xff] }
  0xab   : > { %v2424_v53 = vadd.f32 %v4692_v5, %v1399_v42  ;;  %v1403_v54 = vmul.f32 %v4687_v1, %v378_v38  ;;  %3445 = vst [vmem:[%s4721_s25 + $0x578] sm:$0xff] %v2421_v44  ;;  %v2425_v58 = vadd.f32 %v4692_v5, %v1400_v45  ;;  %v2426_v59 = vadd.f32 %v4692_v5, %v1401_v46  ;;  %v400_v42 = vld [vmem:[%s4680_s11 + $0x660] sm:$0xff] }
  0xac   : > { %v2427_v60 = vadd.f32 %v4692_v5, %v1402_v47  ;;  %v1404_v61 = vmul.f32 %v4687_v1, %v379_v43  ;;  %3446 = vst [vmem:[%s4721_s25 + $0x580] sm:$0xff] %v2422_v51  ;;  %3447 = vst [vmem:[%s4721_s25 + $0x588] sm:$0xff] %v2423_v52  ;;  %v1405_v0 = vmul.f32 %v4687_v1, %v380_v48  ;;  %v401_v43 = vld [vmem:[%s4680_s11 + $0x668] sm:$0xff]  ;;  %v402_v48 = vld [vmem:[%s4680_s11 + $0x670] sm:$0xff] }
  0xad   : > { %3448 = vst [vmem:[%s4721_s25 + $0x590] sm:$0xff] %v2424_v53  ;;  %v2428_v63 = vadd.f32 %v4692_v5, %v1403_v54  ;;  %v1406_v2 = vmul.f32 %v4687_v1, %v381_v49  ;;  %v1407_v3 = vmul.f32 %v4687_v1, %v382_v50  ;;  %3449 = vst [vmem:[%s4721_s25 + $0x598] sm:$0xff] %v2425_v58  ;;  %v403_v53 = vld [vmem:[%s4680_s11 + $0x678] sm:$0xff]  ;;  %v404_v58 = vld [vmem:[%s4680_s11 + $0x680] sm:$0xff] }
  0xae   : > { %3450 = vst [vmem:[%s4721_s25 + $0x5a0] sm:$0xff] %v2426_v59  ;;  %3451 = vst [vmem:[%s4721_s25 + $0x5a8] sm:$0xff] %v2427_v60  ;;  %v2429_v6 = vadd.f32 %v4692_v5, %v1404_v61  ;;  %v1408_v7 = vmul.f32 %v4687_v1, %v383_v55  ;;  %v1409_v8 = vmul.f32 %v4687_v1, %v384_v56  ;;  %v405_v59 = vld [vmem:[%s4680_s11 + $0x688] sm:$0xff]  ;;  %v406_v60 = vld [vmem:[%s4680_s11 + $0x690] sm:$0xff] }
  0xaf   : > { %v1410_v9 = vmul.f32 %v4687_v1, %v385_v57  ;;  %3452 = vst [vmem:[%s4721_s25 + $0x5b0] sm:$0xff] %v2428_v63  ;;  %v2430_v13 = vadd.f32 %v4692_v5, %v1405_v0  ;;  %v2431_v14 = vadd.f32 %v4692_v5, %v1406_v2  ;;  %v2432_v15 = vadd.f32 %v4692_v5, %v1407_v3  ;;  %v407_v2 = vld [vmem:[%s4680_s11 + $0x698] sm:$0xff]  ;;  %v408_v3 = vld [vmem:[%s4680_s11 + $0x6a0] sm:$0xff] }
  0xb0   : > { %v1411_v16 = vmul.f32 %v4687_v1, %v386_v62  ;;  %3453 = vst [vmem:[%s4721_s25 + $0x5b8] sm:$0xff] %v2429_v6  ;;  %v2433_v20 = vadd.f32 %v4692_v5, %v1408_v7  ;;  %v2434_v21 = vadd.f32 %v4692_v5, %v1409_v8  ;;  %v1412_v23 = vmul.f32 %v4687_v1, %v387_v4  ;;  %v409_v4 = vld [vmem:[%s4680_s11 + $0x6a8] sm:$0xff] }
  0xb1   : > { %v2435_v22 = vadd.f32 %v4692_v5, %v1410_v9  ;;  %3454 = vst [vmem:[%s4721_s25 + $0x5c0] sm:$0xff] %v2430_v13  ;;  %3455 = vst [vmem:[%s4721_s25 + $0x5c8] sm:$0xff] %v2431_v14  ;;  %v1413_v26 = vmul.f32 %v4687_v1, %v388_v10  ;;  %v1414_v27 = vmul.f32 %v4687_v1, %v389_v11  ;;  %v410_v10 = vld [vmem:[%s4680_s11 + $0x6b0] sm:$0xff] }
  0xb2   : > { %3456 = vst [vmem:[%s4721_s25 + $0x5d0] sm:$0xff] %v2432_v15  ;;  %v2436_v25 = vadd.f32 %v4692_v5, %v1411_v16  ;;  %v1415_v28 = vmul.f32 %v4687_v1, %v390_v12  ;;  %3457 = vst [vmem:[%s4721_s25 + $0x5d8] sm:$0xff] %v2433_v20  ;;  %v2437_v30 = vadd.f32 %v4692_v5, %v1412_v23  ;;  %v411_v15 = vld [vmem:[%s4680_s11 + $0x6b8] sm:$0xff]  ;;  %v412_v20 = vld [vmem:[%s4680_s11 + $0x6c0] sm:$0xff] }
  0xb3   : > { %3458 = vst [vmem:[%s4721_s25 + $0x5e0] sm:$0xff] %v2434_v21  ;;  %3459 = vst [vmem:[%s4721_s25 + $0x5e8] sm:$0xff] %v2435_v22  ;;  %v1416_v31 = vmul.f32 %v4687_v1, %v391_v17  ;;  %v1417_v32 = vmul.f32 %v4687_v1, %v392_v18  ;;  %v1418_v33 = vmul.f32 %v4687_v1, %v393_v19  ;;  %v413_v21 = vld [vmem:[%s4680_s11 + $0x6c8] sm:$0xff]  ;;  %v414_v22 = vld [vmem:[%s4680_s11 + $0x6d0] sm:$0xff] }
  0xb4   : > { %3460 = vst [vmem:[%s4721_s25 + $0x5f0] sm:$0xff] %v2436_v25  ;;  %v2438_v37 = vadd.f32 %v4692_v5, %v1413_v26  ;;  %v2439_v38 = vadd.f32 %v4692_v5, %v1414_v27  ;;  %v2440_v39 = vadd.f32 %v4692_v5, %v1415_v28  ;;  %v1419_v40 = vmul.f32 %v4687_v1, %v394_v24  ;;  %v415_v27 = vld [vmem:[%s4680_s11 + $0x6d8] sm:$0xff]  ;;  %v416_v28 = vld [vmem:[%s4680_s11 + $0x6e0] sm:$0xff] }
  0xb5   : > { %3461 = vst [vmem:[%s4721_s25 + $0x5f8] sm:$0xff] %v2437_v30  ;;  %v2441_v44 = vadd.f32 %v4692_v5, %v1416_v31  ;;  %v2442_v45 = vadd.f32 %v4692_v5, %v1417_v32  ;;  %v2443_v46 = vadd.f32 %v4692_v5, %v1418_v33  ;;  %v1420_v47 = vmul.f32 %v4687_v1, %v395_v29  ;;  %v417_v29 = vld [vmem:[%s4680_s11 + $0x6e8] sm:$0xff] }
  0xb6   : > { %3462 = vst [vmem:[%s4721_s25 + $0x600] sm:$0xff] %v2438_v37  ;;  %3463 = vst [vmem:[%s4721_s25 + $0x608] sm:$0xff] %v2439_v38  ;;  %v2444_v49 = vadd.f32 %v4692_v5, %v1419_v40  ;;  %v1421_v50 = vmul.f32 %v4687_v1, %v396_v34  ;;  %v1422_v51 = vmul.f32 %v4687_v1, %v397_v35  ;;  %v418_v34 = vld [vmem:[%s4680_s11 + $0x6f0] sm:$0xff] }
  0xb7   : > { %3464 = vst [vmem:[%s4721_s25 + $0x610] sm:$0xff] %v2440_v39  ;;  %v1423_v52 = vmul.f32 %v4687_v1, %v398_v36  ;;  %3465 = vst [vmem:[%s4721_s25 + $0x618] sm:$0xff] %v2441_v44  ;;  %v2445_v54 = vadd.f32 %v4692_v5, %v1420_v47  ;;  %v1424_v55 = vmul.f32 %v4687_v1, %v399_v41  ;;  %v419_v39 = vld [vmem:[%s4680_s11 + $0x6f8] sm:$0xff]  ;;  %v420_v44 = vld [vmem:[%s4680_s11 + $0x700] sm:$0xff] }
  0xb8   : > { %3466 = vst [vmem:[%s4721_s25 + $0x620] sm:$0xff] %v2442_v45  ;;  %3467 = vst [vmem:[%s4721_s25 + $0x628] sm:$0xff] %v2443_v46  ;;  %v1425_v56 = vmul.f32 %v4687_v1, %v400_v42  ;;  %v1426_v57 = vmul.f32 %v4687_v1, %v401_v43  ;;  %v2446_v61 = vadd.f32 %v4692_v5, %v1421_v50  ;;  %v421_v45 = vld [vmem:[%s4680_s11 + $0x708] sm:$0xff]  ;;  %v422_v46 = vld [vmem:[%s4680_s11 + $0x710] sm:$0xff] }
  0xb9   : > { %3468 = vst [vmem:[%s4721_s25 + $0x630] sm:$0xff] %v2444_v49  ;;  %v2447_v62 = vadd.f32 %v4692_v5, %v1422_v51  ;;  %v2448_v63 = vadd.f32 %v4692_v5, %v1423_v52  ;;  %v1427_v0 = vmul.f32 %v4687_v1, %v402_v48  ;;  %3469 = vst [vmem:[%s4721_s25 + $0x638] sm:$0xff] %v2445_v54  ;;  %v423_v51 = vld [vmem:[%s4680_s11 + $0x718] sm:$0xff]  ;;  %v424_v52 = vld [vmem:[%s4680_s11 + $0x720] sm:$0xff] }
  0xba   : > { %v2449_v6 = vadd.f32 %v4692_v5, %v1424_v55  ;;  %v2450_v7 = vadd.f32 %v4692_v5, %v1425_v56  ;;  %v2451_v8 = vadd.f32 %v4692_v5, %v1426_v57  ;;  %v1428_v9 = vmul.f32 %v4687_v1, %v403_v53  ;;  %3470 = vst [vmem:[%s4721_s25 + $0x640] sm:$0xff] %v2446_v61  ;;  %v425_v53 = vld [vmem:[%s4680_s11 + $0x728] sm:$0xff] }
  0xbb   : > { %3471 = vst [vmem:[%s4721_s25 + $0x648] sm:$0xff] %v2447_v62  ;;  %3472 = vst [vmem:[%s4721_s25 + $0x650] sm:$0xff] %v2448_v63  ;;  %v2452_v11 = vadd.f32 %v4692_v5, %v1427_v0  ;;  %v1429_v12 = vmul.f32 %v4687_v1, %v404_v58  ;;  %v1430_v13 = vmul.f32 %v4687_v1, %v405_v59  ;;  %v426_v58 = vld [vmem:[%s4680_s11 + $0x730] sm:$0xff]  ;;  %v427_v63 = vld [vmem:[%s4680_s11 + $0x738] sm:$0xff] }
  0xbc   : > { %v1431_v14 = vmul.f32 %v4687_v1, %v406_v60  ;;  %3473 = vst [vmem:[%s4721_s25 + $0x658] sm:$0xff] %v2449_v6  ;;  %3474 = vst [vmem:[%s4721_s25 + $0x660] sm:$0xff] %v2450_v7  ;;  %v2453_v16 = vadd.f32 %v4692_v5, %v1428_v9  ;;  %v1432_v17 = vmul.f32 %v4687_v1, %v407_v2  ;;  %v428_v6 = vld [vmem:[%s4680_s11 + $0x740] sm:$0xff]  ;;  %v429_v7 = vld [vmem:[%s4680_s11 + $0x748] sm:$0xff] }
  0xbd   : > { %3475 = vst [vmem:[%s4721_s25 + $0x668] sm:$0xff] %v2451_v8  ;;  %v1433_v18 = vmul.f32 %v4687_v1, %v408_v3  ;;  %v1434_v19 = vmul.f32 %v4687_v1, %v409_v4  ;;  %3476 = vst [vmem:[%s4721_s25 + $0x670] sm:$0xff] %v2452_v11  ;;  %v2454_v23 = vadd.f32 %v4692_v5, %v1429_v12  ;;  %v430_v8 = vld [vmem:[%s4680_s11 + $0x750] sm:$0xff] }
  0xbe   : > { %v2455_v24 = vadd.f32 %v4692_v5, %v1430_v13  ;;  %v2456_v25 = vadd.f32 %v4692_v5, %v1431_v14  ;;  %v1435_v26 = vmul.f32 %v4687_v1, %v410_v10  ;;  %3477 = vst [vmem:[%s4721_s25 + $0x678] sm:$0xff] %v2453_v16  ;;  %v2457_v30 = vadd.f32 %v4692_v5, %v1432_v17  ;;  %v431_v13 = vld [vmem:[%s4680_s11 + $0x758] sm:$0xff]  ;;  %v432_v14 = vld [vmem:[%s4680_s11 + $0x760] sm:$0xff] }
  0xbf   : > { %v2458_v31 = vadd.f32 %v4692_v5, %v1433_v18  ;;  %v2459_v32 = vadd.f32 %v4692_v5, %v1434_v19  ;;  %v1436_v33 = vmul.f32 %v4687_v1, %v411_v15  ;;  %3478 = vst [vmem:[%s4721_s25 + $0x680] sm:$0xff] %v2454_v23  ;;  %v1437_v36 = vmul.f32 %v4687_v1, %v412_v20  ;;  %v433_v15 = vld [vmem:[%s4680_s11 + $0x768] sm:$0xff]  ;;  %v434_v20 = vld [vmem:[%s4680_s11 + $0x770] sm:$0xff] }
  0xc0   : > { %3479 = vst [vmem:[%s4721_s25 + $0x688] sm:$0xff] %v2455_v24  ;;  %3480 = vst [vmem:[%s4721_s25 + $0x690] sm:$0xff] %v2456_v25  ;;  %v2460_v35 = vadd.f32 %v4692_v5, %v1435_v26  ;;  %v1438_v37 = vmul.f32 %v4687_v1, %v413_v21  ;;  %v1439_v38 = vmul.f32 %v4687_v1, %v414_v22  ;;  %v435_v25 = vld [vmem:[%s4680_s11 + $0x778] sm:$0xff] }
  0xc1   : > { %3481 = vst [vmem:[%s4721_s25 + $0x698] sm:$0xff] %v2457_v30  ;;  %3482 = vst [vmem:[%s4721_s25 + $0x6a0] sm:$0xff] %v2458_v31  ;;  %v2461_v40 = vadd.f32 %v4692_v5, %v1436_v33  ;;  %v1440_v41 = vmul.f32 %v4687_v1, %v415_v27  ;;  %v1441_v42 = vmul.f32 %v4687_v1, %v416_v28  ;;  %v436_v30 = vld [vmem:[%s4680_s11 + $0x780] sm:$0xff]  ;;  %v437_v31 = vld [vmem:[%s4680_s11 + $0x788] sm:$0xff] }
  0xc2   : > { %3483 = vst [vmem:[%s4721_s25 + $0x6a8] sm:$0xff] %v2459_v32  ;;  %v1442_v43 = vmul.f32 %v4687_v1, %v417_v29  ;;  %3484 = vst [vmem:[%s4721_s25 + $0x6b0] sm:$0xff] %v2460_v35  ;;  %v2462_v47 = vadd.f32 %v4692_v5, %v1437_v36  ;;  %v2463_v48 = vadd.f32 %v4692_v5, %v1438_v37  ;;  %v438_v32 = vld [vmem:[%s4680_s11 + $0x790] sm:$0xff]  ;;  %v439_v37 = vld [vmem:[%s4680_s11 + $0x798] sm:$0xff] }
  0xc3   : > { %v2464_v49 = vadd.f32 %v4692_v5, %v1439_v38  ;;  %v1443_v50 = vmul.f32 %v4687_v1, %v418_v34  ;;  %3485 = vst [vmem:[%s4721_s25 + $0x6b8] sm:$0xff] %v2461_v40  ;;  %v2465_v54 = vadd.f32 %v4692_v5, %v1440_v41  ;;  %v2466_v55 = vadd.f32 %v4692_v5, %v1441_v42  ;;  %v440_v38 = vld [vmem:[%s4680_s11 + $0x7a0] sm:$0xff] }
  0xc4   : > { %v2467_v56 = vadd.f32 %v4692_v5, %v1442_v43  ;;  %v1444_v57 = vmul.f32 %v4687_v1, %v419_v39  ;;  %3486 = vst [vmem:[%s4721_s25 + $0x6c0] sm:$0xff] %v2462_v47  ;;  %3487 = vst [vmem:[%s4721_s25 + $0x6c8] sm:$0xff] %v2463_v48  ;;  %v1445_v60 = vmul.f32 %v4687_v1, %v420_v44  ;;  %v441_v39 = vld [vmem:[%s4680_s11 + $0x7a8] sm:$0xff]  ;;  %v442_v44 = vld [vmem:[%s4680_s11 + $0x7b0] sm:$0xff] }
  0xc5   : > { %3488 = vst [vmem:[%s4721_s25 + $0x6d0] sm:$0xff] %v2464_v49  ;;  %v2468_v59 = vadd.f32 %v4692_v5, %v1443_v50  ;;  %v1446_v61 = vmul.f32 %v4687_v1, %v421_v45  ;;  %v1447_v62 = vmul.f32 %v4687_v1, %v422_v46  ;;  %3489 = vst [vmem:[%s4721_s25 + $0x6d8] sm:$0xff] %v2465_v54  ;;  %v443_v49 = vld [vmem:[%s4680_s11 + $0x7b8] sm:$0xff]  ;;  %v444_v54 = vld [vmem:[%s4680_s11 + $0x7c0] sm:$0xff] }
  0xc6   : > { %3490 = vst [vmem:[%s4721_s25 + $0x6e0] sm:$0xff] %v2466_v55  ;;  %3491 = vst [vmem:[%s4721_s25 + $0x6e8] sm:$0xff] %v2467_v56  ;;  %v2469_v0 = vadd.f32 %v4692_v5, %v1444_v57  ;;  %v1448_v2 = vmul.f32 %v4687_v1, %v423_v51  ;;  %v1449_v3 = vmul.f32 %v4687_v1, %v424_v52  ;;  %v445_v55 = vld [vmem:[%s4680_s11 + $0x7c8] sm:$0xff]  ;;  %v446_v56 = vld [vmem:[%s4680_s11 + $0x7d0] sm:$0xff] }
  0xc7   : > { %v1450_v4 = vmul.f32 %v4687_v1, %v425_v53  ;;  %3492 = vst [vmem:[%s4721_s25 + $0x6f0] sm:$0xff] %v2468_v59  ;;  %v2470_v9 = vadd.f32 %v4692_v5, %v1445_v60  ;;  %v2471_v10 = vadd.f32 %v4692_v5, %v1446_v61  ;;  %v2472_v11 = vadd.f32 %v4692_v5, %v1447_v62  ;;  %v447_v61 = vld [vmem:[%s4680_s11 + $0x7d8] sm:$0xff]  ;;  %v448_v62 = vld [vmem:[%s4680_s11 + $0x7e0] sm:$0xff] }
  0xc8   : > { %v1451_v12 = vmul.f32 %v4687_v1, %v426_v58  ;;  %3493 = vst [vmem:[%s4721_s25 + $0x6f8] sm:$0xff] %v2469_v0  ;;  %v2473_v16 = vadd.f32 %v4692_v5, %v1448_v2  ;;  %v2474_v17 = vadd.f32 %v4692_v5, %v1449_v3  ;;  %v1452_v19 = vmul.f32 %v4687_v1, %v427_v63  ;;  %v449_v63 = vld [vmem:[%s4680_s11 + $0x7e8] sm:$0xff] }
  0xc9   : > { %v2475_v18 = vadd.f32 %v4692_v5, %v1450_v4  ;;  %3494 = vst [vmem:[%s4721_s25 + $0x700] sm:$0xff] %v2470_v9  ;;  %3495 = vst [vmem:[%s4721_s25 + $0x708] sm:$0xff] %v2471_v10  ;;  %v1453_v22 = vmul.f32 %v4687_v1, %v428_v6  ;;  %v1454_v23 = vmul.f32 %v4687_v1, %v429_v7  ;;  %v450_v6 = vld [vmem:[%s4680_s11 + $0x7f0] sm:$0xff] }
  0xca   : > { %3496 = vst [vmem:[%s4721_s25 + $0x710] sm:$0xff] %v2472_v11  ;;  %v2476_v21 = vadd.f32 %v4692_v5, %v1451_v12  ;;  %v1455_v24 = vmul.f32 %v4687_v1, %v430_v8  ;;  %3497 = vst [vmem:[%s4721_s25 + $0x718] sm:$0xff] %v2473_v16  ;;  %v2477_v26 = vadd.f32 %v4692_v5, %v1452_v19  ;;  %v451_v11 = vld [vmem:[%s4680_s11 + $0x7f8] sm:$0xff]  ;;  %v452_v16 = vld [vmem:[%s4680_s11 + $0x800] sm:$0xff] }
  0xcb   : > { %3498 = vst [vmem:[%s4721_s25 + $0x720] sm:$0xff] %v2474_v17  ;;  %3499 = vst [vmem:[%s4721_s25 + $0x728] sm:$0xff] %v2475_v18  ;;  %v1456_v27 = vmul.f32 %v4687_v1, %v431_v13  ;;  %v1457_v28 = vmul.f32 %v4687_v1, %v432_v14  ;;  %v1458_v29 = vmul.f32 %v4687_v1, %v433_v15  ;;  %v453_v17 = vld [vmem:[%s4680_s11 + $0x808] sm:$0xff]  ;;  %v454_v18 = vld [vmem:[%s4680_s11 + $0x810] sm:$0xff] }
  0xcc   : > { %3500 = vst [vmem:[%s4721_s25 + $0x730] sm:$0xff] %v2476_v21  ;;  %v2478_v33 = vadd.f32 %v4692_v5, %v1453_v22  ;;  %v2479_v34 = vadd.f32 %v4692_v5, %v1454_v23  ;;  %v2480_v35 = vadd.f32 %v4692_v5, %v1455_v24  ;;  %v1459_v36 = vmul.f32 %v4687_v1, %v434_v20  ;;  %v455_v23 = vld [vmem:[%s4680_s11 + $0x818] sm:$0xff]  ;;  %v456_v24 = vld [vmem:[%s4680_s11 + $0x820] sm:$0xff] }
  0xcd   : > { %3501 = vst [vmem:[%s4721_s25 + $0x738] sm:$0xff] %v2477_v26  ;;  %v2481_v40 = vadd.f32 %v4692_v5, %v1456_v27  ;;  %v2482_v41 = vadd.f32 %v4692_v5, %v1457_v28  ;;  %v2483_v42 = vadd.f32 %v4692_v5, %v1458_v29  ;;  %v1460_v43 = vmul.f32 %v4687_v1, %v435_v25  ;;  %v457_v25 = vld [vmem:[%s4680_s11 + $0x828] sm:$0xff] }
  0xce   : > { %3502 = vst [vmem:[%s4721_s25 + $0x740] sm:$0xff] %v2478_v33  ;;  %3503 = vst [vmem:[%s4721_s25 + $0x748] sm:$0xff] %v2479_v34  ;;  %v2484_v45 = vadd.f32 %v4692_v5, %v1459_v36  ;;  %v1461_v46 = vmul.f32 %v4687_v1, %v436_v30  ;;  %v1462_v47 = vmul.f32 %v4687_v1, %v437_v31  ;;  %v458_v30 = vld [vmem:[%s4680_s11 + $0x830] sm:$0xff] }
  0xcf   : > { %3504 = vst [vmem:[%s4721_s25 + $0x750] sm:$0xff] %v2480_v35  ;;  %v1463_v48 = vmul.f32 %v4687_v1, %v438_v32  ;;  %3505 = vst [vmem:[%s4721_s25 + $0x758] sm:$0xff] %v2481_v40  ;;  %v2485_v50 = vadd.f32 %v4692_v5, %v1460_v43  ;;  %v1464_v51 = vmul.f32 %v4687_v1, %v439_v37  ;;  %v459_v35 = vld [vmem:[%s4680_s11 + $0x838] sm:$0xff]  ;;  %v460_v40 = vld [vmem:[%s4680_s11 + $0x840] sm:$0xff] }
  0xd0   : > { %3506 = vst [vmem:[%s4721_s25 + $0x760] sm:$0xff] %v2482_v41  ;;  %3507 = vst [vmem:[%s4721_s25 + $0x768] sm:$0xff] %v2483_v42  ;;  %v1465_v52 = vmul.f32 %v4687_v1, %v440_v38  ;;  %v1466_v53 = vmul.f32 %v4687_v1, %v441_v39  ;;  %v2486_v57 = vadd.f32 %v4692_v5, %v1461_v46  ;;  %v461_v41 = vld [vmem:[%s4680_s11 + $0x848] sm:$0xff]  ;;  %v462_v42 = vld [vmem:[%s4680_s11 + $0x850] sm:$0xff] }
  0xd1   : > { %3508 = vst [vmem:[%s4721_s25 + $0x770] sm:$0xff] %v2484_v45  ;;  %v2487_v58 = vadd.f32 %v4692_v5, %v1462_v47  ;;  %v2488_v59 = vadd.f32 %v4692_v5, %v1463_v48  ;;  %v1467_v60 = vmul.f32 %v4687_v1, %v442_v44  ;;  %3509 = vst [vmem:[%s4721_s25 + $0x778] sm:$0xff] %v2485_v50  ;;  %v463_v47 = vld [vmem:[%s4680_s11 + $0x858] sm:$0xff]  ;;  %v464_v48 = vld [vmem:[%s4680_s11 + $0x860] sm:$0xff] }
  0xd2   : > { %v2489_v0 = vadd.f32 %v4692_v5, %v1464_v51  ;;  %v2490_v2 = vadd.f32 %v4692_v5, %v1465_v52  ;;  %v2491_v3 = vadd.f32 %v4692_v5, %v1466_v53  ;;  %v1468_v4 = vmul.f32 %v4687_v1, %v443_v49  ;;  %3510 = vst [vmem:[%s4721_s25 + $0x780] sm:$0xff] %v2486_v57  ;;  %v465_v49 = vld [vmem:[%s4680_s11 + $0x868] sm:$0xff] }
  0xd3   : > { %3511 = vst [vmem:[%s4721_s25 + $0x788] sm:$0xff] %v2487_v58  ;;  %3512 = vst [vmem:[%s4721_s25 + $0x790] sm:$0xff] %v2488_v59  ;;  %v2492_v7 = vadd.f32 %v4692_v5, %v1467_v60  ;;  %v1469_v8 = vmul.f32 %v4687_v1, %v444_v54  ;;  %v1470_v9 = vmul.f32 %v4687_v1, %v445_v55  ;;  %v466_v54 = vld [vmem:[%s4680_s11 + $0x870] sm:$0xff]  ;;  %v467_v59 = vld [vmem:[%s4680_s11 + $0x878] sm:$0xff] }
  0xd4   : > { %v1471_v10 = vmul.f32 %v4687_v1, %v446_v56  ;;  %3513 = vst [vmem:[%s4721_s25 + $0x798] sm:$0xff] %v2489_v0  ;;  %3514 = vst [vmem:[%s4721_s25 + $0x7a0] sm:$0xff] %v2490_v2  ;;  %v2493_v12 = vadd.f32 %v4692_v5, %v1468_v4  ;;  %v1472_v13 = vmul.f32 %v4687_v1, %v447_v61  ;;  %v468_v0 = vld [vmem:[%s4680_s11 + $0x880] sm:$0xff]  ;;  %v469_v2 = vld [vmem:[%s4680_s11 + $0x888] sm:$0xff] }
  0xd5   : > { %3515 = vst [vmem:[%s4721_s25 + $0x7a8] sm:$0xff] %v2491_v3  ;;  %v1473_v14 = vmul.f32 %v4687_v1, %v448_v62  ;;  %v1474_v15 = vmul.f32 %v4687_v1, %v449_v63  ;;  %3516 = vst [vmem:[%s4721_s25 + $0x7b0] sm:$0xff] %v2492_v7  ;;  %v2494_v19 = vadd.f32 %v4692_v5, %v1469_v8  ;;  %v470_v3 = vld [vmem:[%s4680_s11 + $0x890] sm:$0xff] }
  0xd6   : > { %v2495_v20 = vadd.f32 %v4692_v5, %v1470_v9  ;;  %v2496_v21 = vadd.f32 %v4692_v5, %v1471_v10  ;;  %v1475_v22 = vmul.f32 %v4687_v1, %v450_v6  ;;  %3517 = vst [vmem:[%s4721_s25 + $0x7b8] sm:$0xff] %v2493_v12  ;;  %v2497_v26 = vadd.f32 %v4692_v5, %v1472_v13  ;;  %v471_v9 = vld [vmem:[%s4680_s11 + $0x898] sm:$0xff]  ;;  %v472_v10 = vld [vmem:[%s4680_s11 + $0x8a0] sm:$0xff] }
  0xd7   : > { %v2498_v27 = vadd.f32 %v4692_v5, %v1473_v14  ;;  %v2499_v28 = vadd.f32 %v4692_v5, %v1474_v15  ;;  %v1476_v29 = vmul.f32 %v4687_v1, %v451_v11  ;;  %3518 = vst [vmem:[%s4721_s25 + $0x7c0] sm:$0xff] %v2494_v19  ;;  %v1477_v32 = vmul.f32 %v4687_v1, %v452_v16  ;;  %v473_v11 = vld [vmem:[%s4680_s11 + $0x8a8] sm:$0xff]  ;;  %v474_v16 = vld [vmem:[%s4680_s11 + $0x8b0] sm:$0xff] }
  0xd8   : > { %3519 = vst [vmem:[%s4721_s25 + $0x7c8] sm:$0xff] %v2495_v20  ;;  %3520 = vst [vmem:[%s4721_s25 + $0x7d0] sm:$0xff] %v2496_v21  ;;  %v2500_v31 = vadd.f32 %v4692_v5, %v1475_v22  ;;  %v1478_v33 = vmul.f32 %v4687_v1, %v453_v17  ;;  %v1479_v34 = vmul.f32 %v4687_v1, %v454_v18  ;;  %v475_v21 = vld [vmem:[%s4680_s11 + $0x8b8] sm:$0xff] }
  0xd9   : > { %3521 = vst [vmem:[%s4721_s25 + $0x7d8] sm:$0xff] %v2497_v26  ;;  %3522 = vst [vmem:[%s4721_s25 + $0x7e0] sm:$0xff] %v2498_v27  ;;  %v2501_v36 = vadd.f32 %v4692_v5, %v1476_v29  ;;  %v1480_v37 = vmul.f32 %v4687_v1, %v455_v23  ;;  %v1481_v38 = vmul.f32 %v4687_v1, %v456_v24  ;;  %v476_v26 = vld [vmem:[%s4680_s11 + $0x8c0] sm:$0xff]  ;;  %v477_v27 = vld [vmem:[%s4680_s11 + $0x8c8] sm:$0xff] }
  0xda   : > { %3523 = vst [vmem:[%s4721_s25 + $0x7e8] sm:$0xff] %v2499_v28  ;;  %v1482_v39 = vmul.f32 %v4687_v1, %v457_v25  ;;  %3524 = vst [vmem:[%s4721_s25 + $0x7f0] sm:$0xff] %v2500_v31  ;;  %v2502_v43 = vadd.f32 %v4692_v5, %v1477_v32  ;;  %v2503_v44 = vadd.f32 %v4692_v5, %v1478_v33  ;;  %v478_v28 = vld [vmem:[%s4680_s11 + $0x8d0] sm:$0xff]  ;;  %v479_v33 = vld [vmem:[%s4680_s11 + $0x8d8] sm:$0xff] }
  0xdb   : > { %v2504_v45 = vadd.f32 %v4692_v5, %v1479_v34  ;;  %v1483_v46 = vmul.f32 %v4687_v1, %v458_v30  ;;  %3525 = vst [vmem:[%s4721_s25 + $0x7f8] sm:$0xff] %v2501_v36  ;;  %v2505_v50 = vadd.f32 %v4692_v5, %v1480_v37  ;;  %v2506_v51 = vadd.f32 %v4692_v5, %v1481_v38  ;;  %v480_v34 = vld [vmem:[%s4680_s11 + $0x8e0] sm:$0xff] }
  0xdc   : > { %v2507_v52 = vadd.f32 %v4692_v5, %v1482_v39  ;;  %v1484_v53 = vmul.f32 %v4687_v1, %v459_v35  ;;  %3526 = vst [vmem:[%s4721_s25 + $0x800] sm:$0xff] %v2502_v43  ;;  %3527 = vst [vmem:[%s4721_s25 + $0x808] sm:$0xff] %v2503_v44  ;;  %v1485_v56 = vmul.f32 %v4687_v1, %v460_v40  ;;  %v481_v35 = vld [vmem:[%s4680_s11 + $0x8e8] sm:$0xff]  ;;  %v482_v40 = vld [vmem:[%s4680_s11 + $0x8f0] sm:$0xff] }
  0xdd   : > { %3528 = vst [vmem:[%s4721_s25 + $0x810] sm:$0xff] %v2504_v45  ;;  %v2508_v55 = vadd.f32 %v4692_v5, %v1483_v46  ;;  %v1486_v57 = vmul.f32 %v4687_v1, %v461_v41  ;;  %v1487_v58 = vmul.f32 %v4687_v1, %v462_v42  ;;  %3529 = vst [vmem:[%s4721_s25 + $0x818] sm:$0xff] %v2505_v50  ;;  %v483_v45 = vld [vmem:[%s4680_s11 + $0x8f8] sm:$0xff]  ;;  %v484_v50 = vld [vmem:[%s4680_s11 + $0x900] sm:$0xff] }
  0xde   : > { %3530 = vst [vmem:[%s4721_s25 + $0x820] sm:$0xff] %v2506_v51  ;;  %3531 = vst [vmem:[%s4721_s25 + $0x828] sm:$0xff] %v2507_v52  ;;  %v2509_v60 = vadd.f32 %v4692_v5, %v1484_v53  ;;  %v1488_v61 = vmul.f32 %v4687_v1, %v463_v47  ;;  %v1489_v62 = vmul.f32 %v4687_v1, %v464_v48  ;;  %v485_v51 = vld [vmem:[%s4680_s11 + $0x908] sm:$0xff]  ;;  %v486_v52 = vld [vmem:[%s4680_s11 + $0x910] sm:$0xff] }
  0xdf   : > { %v1490_v63 = vmul.f32 %v4687_v1, %v465_v49  ;;  %3532 = vst [vmem:[%s4721_s25 + $0x830] sm:$0xff] %v2508_v55  ;;  %v2510_v4 = vadd.f32 %v4692_v5, %v1485_v56  ;;  %v2511_v6 = vadd.f32 %v4692_v5, %v1486_v57  ;;  %v2512_v7 = vadd.f32 %v4692_v5, %v1487_v58  ;;  %v487_v57 = vld [vmem:[%s4680_s11 + $0x918] sm:$0xff]  ;;  %v488_v58 = vld [vmem:[%s4680_s11 + $0x920] sm:$0xff] }
  0xe0   : > { %v1491_v8 = vmul.f32 %v4687_v1, %v466_v54  ;;  %3533 = vst [vmem:[%s4721_s25 + $0x838] sm:$0xff] %v2509_v60  ;;  %v2513_v12 = vadd.f32 %v4692_v5, %v1488_v61  ;;  %v2514_v13 = vadd.f32 %v4692_v5, %v1489_v62  ;;  %v1492_v15 = vmul.f32 %v4687_v1, %v467_v59  ;;  %v489_v59 = vld [vmem:[%s4680_s11 + $0x928] sm:$0xff] }
  0xe1   : > { %v2515_v14 = vadd.f32 %v4692_v5, %v1490_v63  ;;  %3534 = vst [vmem:[%s4721_s25 + $0x840] sm:$0xff] %v2510_v4  ;;  %3535 = vst [vmem:[%s4721_s25 + $0x848] sm:$0xff] %v2511_v6  ;;  %v1493_v18 = vmul.f32 %v4687_v1, %v468_v0  ;;  %v1494_v19 = vmul.f32 %v4687_v1, %v469_v2  ;;  %v490_v0 = vld [vmem:[%s4680_s11 + $0x930] sm:$0xff] }
  0xe2   : > { %3536 = vst [vmem:[%s4721_s25 + $0x850] sm:$0xff] %v2512_v7  ;;  %v2516_v17 = vadd.f32 %v4692_v5, %v1491_v8  ;;  %v1495_v20 = vmul.f32 %v4687_v1, %v470_v3  ;;  %3537 = vst [vmem:[%s4721_s25 + $0x858] sm:$0xff] %v2513_v12  ;;  %v2517_v22 = vadd.f32 %v4692_v5, %v1492_v15  ;;  %v491_v7 = vld [vmem:[%s4680_s11 + $0x938] sm:$0xff]  ;;  %v492_v12 = vld [vmem:[%s4680_s11 + $0x940] sm:$0xff] }
  0xe3   : > { %3538 = vst [vmem:[%s4721_s25 + $0x860] sm:$0xff] %v2514_v13  ;;  %3539 = vst [vmem:[%s4721_s25 + $0x868] sm:$0xff] %v2515_v14  ;;  %v1496_v23 = vmul.f32 %v4687_v1, %v471_v9  ;;  %v1497_v24 = vmul.f32 %v4687_v1, %v472_v10  ;;  %v1498_v25 = vmul.f32 %v4687_v1, %v473_v11  ;;  %v493_v13 = vld [vmem:[%s4680_s11 + $0x948] sm:$0xff]  ;;  %v494_v14 = vld [vmem:[%s4680_s11 + $0x950] sm:$0xff] }
  0xe4   : > { %3540 = vst [vmem:[%s4721_s25 + $0x870] sm:$0xff] %v2516_v17  ;;  %v2518_v29 = vadd.f32 %v4692_v5, %v1493_v18  ;;  %v2519_v30 = vadd.f32 %v4692_v5, %v1494_v19  ;;  %v2520_v31 = vadd.f32 %v4692_v5, %v1495_v20  ;;  %v1499_v32 = vmul.f32 %v4687_v1, %v474_v16  ;;  %v495_v19 = vld [vmem:[%s4680_s11 + $0x958] sm:$0xff]  ;;  %v496_v20 = vld [vmem:[%s4680_s11 + $0x960] sm:$0xff] }
  0xe5   : > { %3541 = vst [vmem:[%s4721_s25 + $0x878] sm:$0xff] %v2517_v22  ;;  %v2521_v36 = vadd.f32 %v4692_v5, %v1496_v23  ;;  %v2522_v37 = vadd.f32 %v4692_v5, %v1497_v24  ;;  %v2523_v38 = vadd.f32 %v4692_v5, %v1498_v25  ;;  %v1500_v39 = vmul.f32 %v4687_v1, %v475_v21  ;;  %v497_v21 = vld [vmem:[%s4680_s11 + $0x968] sm:$0xff] }
  0xe6   : > { %3542 = vst [vmem:[%s4721_s25 + $0x880] sm:$0xff] %v2518_v29  ;;  %3543 = vst [vmem:[%s4721_s25 + $0x888] sm:$0xff] %v2519_v30  ;;  %v2524_v41 = vadd.f32 %v4692_v5, %v1499_v32  ;;  %v1501_v42 = vmul.f32 %v4687_v1, %v476_v26  ;;  %v1502_v43 = vmul.f32 %v4687_v1, %v477_v27  ;;  %v498_v26 = vld [vmem:[%s4680_s11 + $0x970] sm:$0xff] }
  0xe7   : > { %3544 = vst [vmem:[%s4721_s25 + $0x890] sm:$0xff] %v2520_v31  ;;  %v1503_v44 = vmul.f32 %v4687_v1, %v478_v28  ;;  %3545 = vst [vmem:[%s4721_s25 + $0x898] sm:$0xff] %v2521_v36  ;;  %v2525_v46 = vadd.f32 %v4692_v5, %v1500_v39  ;;  %v1504_v47 = vmul.f32 %v4687_v1, %v479_v33  ;;  %v499_v31 = vld [vmem:[%s4680_s11 + $0x978] sm:$0xff]  ;;  %v500_v36 = vld [vmem:[%s4680_s11 + $0x980] sm:$0xff] }
  0xe8   : > { %3546 = vst [vmem:[%s4721_s25 + $0x8a0] sm:$0xff] %v2522_v37  ;;  %3547 = vst [vmem:[%s4721_s25 + $0x8a8] sm:$0xff] %v2523_v38  ;;  %v1505_v48 = vmul.f32 %v4687_v1, %v480_v34  ;;  %v1506_v49 = vmul.f32 %v4687_v1, %v481_v35  ;;  %v2526_v53 = vadd.f32 %v4692_v5, %v1501_v42  ;;  %v501_v37 = vld [vmem:[%s4680_s11 + $0x988] sm:$0xff]  ;;  %v502_v38 = vld [vmem:[%s4680_s11 + $0x990] sm:$0xff] }
  0xe9   : > { %3548 = vst [vmem:[%s4721_s25 + $0x8b0] sm:$0xff] %v2524_v41  ;;  %v2527_v54 = vadd.f32 %v4692_v5, %v1502_v43  ;;  %v2528_v55 = vadd.f32 %v4692_v5, %v1503_v44  ;;  %v1507_v56 = vmul.f32 %v4687_v1, %v482_v40  ;;  %3549 = vst [vmem:[%s4721_s25 + $0x8b8] sm:$0xff] %v2525_v46  ;;  %v503_v43 = vld [vmem:[%s4680_s11 + $0x998] sm:$0xff]  ;;  %v504_v44 = vld [vmem:[%s4680_s11 + $0x9a0] sm:$0xff] }
  0xea   : > { %v2529_v60 = vadd.f32 %v4692_v5, %v1504_v47  ;;  %v2530_v61 = vadd.f32 %v4692_v5, %v1505_v48  ;;  %v2531_v62 = vadd.f32 %v4692_v5, %v1506_v49  ;;  %v1508_v63 = vmul.f32 %v4687_v1, %v483_v45  ;;  %3550 = vst [vmem:[%s4721_s25 + $0x8c0] sm:$0xff] %v2526_v53  ;;  %v505_v45 = vld [vmem:[%s4680_s11 + $0x9a8] sm:$0xff] }
  0xeb   : > { %3551 = vst [vmem:[%s4721_s25 + $0x8c8] sm:$0xff] %v2527_v54  ;;  %3552 = vst [vmem:[%s4721_s25 + $0x8d0] sm:$0xff] %v2528_v55  ;;  %v2532_v2 = vadd.f32 %v4692_v5, %v1507_v56  ;;  %v1509_v3 = vmul.f32 %v4687_v1, %v484_v50  ;;  %v1510_v4 = vmul.f32 %v4687_v1, %v485_v51  ;;  %v506_v50 = vld [vmem:[%s4680_s11 + $0x9b0] sm:$0xff]  ;;  %v507_v55 = vld [vmem:[%s4680_s11 + $0x9b8] sm:$0xff] }
  0xec   : > { %v1511_v6 = vmul.f32 %v4687_v1, %v486_v52  ;;  %3553 = vst [vmem:[%s4721_s25 + $0x8d8] sm:$0xff] %v2529_v60  ;;  %3554 = vst [vmem:[%s4721_s25 + $0x8e0] sm:$0xff] %v2530_v61  ;;  %v2533_v8 = vadd.f32 %v4692_v5, %v1508_v63  ;;  %v1512_v9 = vmul.f32 %v4687_v1, %v487_v57  ;;  %v508_v60 = vld [vmem:[%s4680_s11 + $0x9c0] sm:$0xff]  ;;  %v509_v61 = vld [vmem:[%s4680_s11 + $0x9c8] sm:$0xff] }
  0xed   : > { %3555 = vst [vmem:[%s4721_s25 + $0x8e8] sm:$0xff] %v2531_v62  ;;  %v1513_v10 = vmul.f32 %v4687_v1, %v488_v58  ;;  %v1514_v11 = vmul.f32 %v4687_v1, %v489_v59  ;;  %3556 = vst [vmem:[%s4721_s25 + $0x8f0] sm:$0xff] %v2532_v2  ;;  %v2534_v15 = vadd.f32 %v4692_v5, %v1509_v3  ;;  %v510_v62 = vld [vmem:[%s4680_s11 + $0x9d0] sm:$0xff] }
  0xee   : > { %v2535_v16 = vadd.f32 %v4692_v5, %v1510_v4  ;;  %v2536_v17 = vadd.f32 %v4692_v5, %v1511_v6  ;;  %v1515_v18 = vmul.f32 %v4687_v1, %v490_v0  ;;  %3557 = vst [vmem:[%s4721_s25 + $0x8f8] sm:$0xff] %v2533_v8  ;;  %v2537_v22 = vadd.f32 %v4692_v5, %v1512_v9  ;;  %v511_v4 = vld [vmem:[%s4680_s11 + $0x9d8] sm:$0xff]  ;;  %v512_v6 = vld [vmem:[%s4680_s11 + $0x9e0] sm:$0xff] }
  0xef   : > { %v2538_v23 = vadd.f32 %v4692_v5, %v1513_v10  ;;  %v2539_v24 = vadd.f32 %v4692_v5, %v1514_v11  ;;  %v1516_v25 = vmul.f32 %v4687_v1, %v491_v7  ;;  %3558 = vst [vmem:[%s4721_s25 + $0x900] sm:$0xff] %v2534_v15  ;;  %v1517_v28 = vmul.f32 %v4687_v1, %v492_v12  ;;  %v513_v7 = vld [vmem:[%s4680_s11 + $0x9e8] sm:$0xff]  ;;  %v514_v12 = vld [vmem:[%s4680_s11 + $0x9f0] sm:$0xff] }
  0xf0   : > { %3559 = vst [vmem:[%s4721_s25 + $0x908] sm:$0xff] %v2535_v16  ;;  %3560 = vst [vmem:[%s4721_s25 + $0x910] sm:$0xff] %v2536_v17  ;;  %v2540_v27 = vadd.f32 %v4692_v5, %v1515_v18  ;;  %v1518_v29 = vmul.f32 %v4687_v1, %v493_v13  ;;  %v1519_v30 = vmul.f32 %v4687_v1, %v494_v14  ;;  %v515_v17 = vld [vmem:[%s4680_s11 + $0x9f8] sm:$0xff] }
  0xf1   : > { %3561 = vst [vmem:[%s4721_s25 + $0x918] sm:$0xff] %v2537_v22  ;;  %3562 = vst [vmem:[%s4721_s25 + $0x920] sm:$0xff] %v2538_v23  ;;  %v2541_v32 = vadd.f32 %v4692_v5, %v1516_v25  ;;  %v1520_v33 = vmul.f32 %v4687_v1, %v495_v19  ;;  %v1521_v34 = vmul.f32 %v4687_v1, %v496_v20  ;;  %v516_v22 = vld [vmem:[%s4680_s11 + $0xa00] sm:$0xff]  ;;  %v517_v23 = vld [vmem:[%s4680_s11 + $0xa08] sm:$0xff] }
  0xf2   : > { %3563 = vst [vmem:[%s4721_s25 + $0x928] sm:$0xff] %v2539_v24  ;;  %v1522_v35 = vmul.f32 %v4687_v1, %v497_v21  ;;  %3564 = vst [vmem:[%s4721_s25 + $0x930] sm:$0xff] %v2540_v27  ;;  %v2542_v39 = vadd.f32 %v4692_v5, %v1517_v28  ;;  %v2543_v40 = vadd.f32 %v4692_v5, %v1518_v29  ;;  %v518_v24 = vld [vmem:[%s4680_s11 + $0xa10] sm:$0xff]  ;;  %v519_v29 = vld [vmem:[%s4680_s11 + $0xa18] sm:$0xff] }
  0xf3   : > { %v2544_v41 = vadd.f32 %v4692_v5, %v1519_v30  ;;  %v1523_v42 = vmul.f32 %v4687_v1, %v498_v26  ;;  %3565 = vst [vmem:[%s4721_s25 + $0x938] sm:$0xff] %v2541_v32  ;;  %v2545_v46 = vadd.f32 %v4692_v5, %v1520_v33  ;;  %v2546_v47 = vadd.f32 %v4692_v5, %v1521_v34  ;;  %v520_v30 = vld [vmem:[%s4680_s11 + $0xa20] sm:$0xff] }
  0xf4   : > { %v2547_v48 = vadd.f32 %v4692_v5, %v1522_v35  ;;  %v1524_v49 = vmul.f32 %v4687_v1, %v499_v31  ;;  %3566 = vst [vmem:[%s4721_s25 + $0x940] sm:$0xff] %v2542_v39  ;;  %3567 = vst [vmem:[%s4721_s25 + $0x948] sm:$0xff] %v2543_v40  ;;  %v1525_v52 = vmul.f32 %v4687_v1, %v500_v36  ;;  %v521_v31 = vld [vmem:[%s4680_s11 + $0xa28] sm:$0xff]  ;;  %v522_v36 = vld [vmem:[%s4680_s11 + $0xa30] sm:$0xff] }
  0xf5   : > { %3568 = vst [vmem:[%s4721_s25 + $0x950] sm:$0xff] %v2544_v41  ;;  %v2548_v51 = vadd.f32 %v4692_v5, %v1523_v42  ;;  %v1526_v53 = vmul.f32 %v4687_v1, %v501_v37  ;;  %v1527_v54 = vmul.f32 %v4687_v1, %v502_v38  ;;  %3569 = vst [vmem:[%s4721_s25 + $0x958] sm:$0xff] %v2545_v46  ;;  %v523_v41 = vld [vmem:[%s4680_s11 + $0xa38] sm:$0xff]  ;;  %v524_v46 = vld [vmem:[%s4680_s11 + $0xa40] sm:$0xff] }
  0xf6   : > { %3570 = vst [vmem:[%s4721_s25 + $0x960] sm:$0xff] %v2546_v47  ;;  %3571 = vst [vmem:[%s4721_s25 + $0x968] sm:$0xff] %v2547_v48  ;;  %v2549_v56 = vadd.f32 %v4692_v5, %v1524_v49  ;;  %v1528_v57 = vmul.f32 %v4687_v1, %v503_v43  ;;  %v1529_v58 = vmul.f32 %v4687_v1, %v504_v44  ;;  %v525_v47 = vld [vmem:[%s4680_s11 + $0xa48] sm:$0xff]  ;;  %v526_v48 = vld [vmem:[%s4680_s11 + $0xa50] sm:$0xff] }
  0xf7   : > { %v1530_v59 = vmul.f32 %v4687_v1, %v505_v45  ;;  %3572 = vst [vmem:[%s4721_s25 + $0x970] sm:$0xff] %v2548_v51  ;;  %v2550_v63 = vadd.f32 %v4692_v5, %v1525_v52  ;;  %v2551_v0 = vadd.f32 %v4692_v5, %v1526_v53  ;;  %v2552_v2 = vadd.f32 %v4692_v5, %v1527_v54  ;;  %v527_v53 = vld [vmem:[%s4680_s11 + $0xa58] sm:$0xff]  ;;  %v528_v54 = vld [vmem:[%s4680_s11 + $0xa60] sm:$0xff] }
  0xf8   : > { %v1531_v3 = vmul.f32 %v4687_v1, %v506_v50  ;;  %3573 = vst [vmem:[%s4721_s25 + $0x978] sm:$0xff] %v2549_v56  ;;  %v2553_v8 = vadd.f32 %v4692_v5, %v1528_v57  ;;  %v2554_v9 = vadd.f32 %v4692_v5, %v1529_v58  ;;  %v1532_v11 = vmul.f32 %v4687_v1, %v507_v55  ;;  %v529_v55 = vld [vmem:[%s4680_s11 + $0xa68] sm:$0xff] }
  0xf9   : > { %v2555_v10 = vadd.f32 %v4692_v5, %v1530_v59  ;;  %3574 = vst [vmem:[%s4721_s25 + $0x980] sm:$0xff] %v2550_v63  ;;  %3575 = vst [vmem:[%s4721_s25 + $0x988] sm:$0xff] %v2551_v0  ;;  %v1533_v14 = vmul.f32 %v4687_v1, %v508_v60  ;;  %v1534_v15 = vmul.f32 %v4687_v1, %v509_v61  ;;  %v530_v60 = vld [vmem:[%s4680_s11 + $0xa70] sm:$0xff] }
  0xfa   : > { %3576 = vst [vmem:[%s4721_s25 + $0x990] sm:$0xff] %v2552_v2  ;;  %v2556_v13 = vadd.f32 %v4692_v5, %v1531_v3  ;;  %v1535_v16 = vmul.f32 %v4687_v1, %v510_v62  ;;  %3577 = vst [vmem:[%s4721_s25 + $0x998] sm:$0xff] %v2553_v8  ;;  %v2557_v18 = vadd.f32 %v4692_v5, %v1532_v11  ;;  %v531_v2 = vld [vmem:[%s4680_s11 + $0xa78] sm:$0xff]  ;;  %v532_v8 = vld [vmem:[%s4680_s11 + $0xa80] sm:$0xff] }
  0xfb   : > { %3578 = vst [vmem:[%s4721_s25 + $0x9a0] sm:$0xff] %v2554_v9  ;;  %3579 = vst [vmem:[%s4721_s25 + $0x9a8] sm:$0xff] %v2555_v10  ;;  %v1536_v19 = vmul.f32 %v4687_v1, %v511_v4  ;;  %v1537_v20 = vmul.f32 %v4687_v1, %v512_v6  ;;  %v1538_v21 = vmul.f32 %v4687_v1, %v513_v7  ;;  %v533_v9 = vld [vmem:[%s4680_s11 + $0xa88] sm:$0xff]  ;;  %v534_v10 = vld [vmem:[%s4680_s11 + $0xa90] sm:$0xff] }
  0xfc   : > { %3580 = vst [vmem:[%s4721_s25 + $0x9b0] sm:$0xff] %v2556_v13  ;;  %v2558_v25 = vadd.f32 %v4692_v5, %v1533_v14  ;;  %v2559_v26 = vadd.f32 %v4692_v5, %v1534_v15  ;;  %v2560_v27 = vadd.f32 %v4692_v5, %v1535_v16  ;;  %v1539_v28 = vmul.f32 %v4687_v1, %v514_v12  ;;  %v535_v15 = vld [vmem:[%s4680_s11 + $0xa98] sm:$0xff]  ;;  %v536_v16 = vld [vmem:[%s4680_s11 + $0xaa0] sm:$0xff] }
  0xfd   : > { %3581 = vst [vmem:[%s4721_s25 + $0x9b8] sm:$0xff] %v2557_v18  ;;  %v2561_v32 = vadd.f32 %v4692_v5, %v1536_v19  ;;  %v2562_v33 = vadd.f32 %v4692_v5, %v1537_v20  ;;  %v2563_v34 = vadd.f32 %v4692_v5, %v1538_v21  ;;  %v1540_v35 = vmul.f32 %v4687_v1, %v515_v17  ;;  %v537_v17 = vld [vmem:[%s4680_s11 + $0xaa8] sm:$0xff] }
  0xfe   : > { %3582 = vst [vmem:[%s4721_s25 + $0x9c0] sm:$0xff] %v2558_v25  ;;  %3583 = vst [vmem:[%s4721_s25 + $0x9c8] sm:$0xff] %v2559_v26  ;;  %v2564_v37 = vadd.f32 %v4692_v5, %v1539_v28  ;;  %v1541_v38 = vmul.f32 %v4687_v1, %v516_v22  ;;  %v1542_v39 = vmul.f32 %v4687_v1, %v517_v23  ;;  %v538_v22 = vld [vmem:[%s4680_s11 + $0xab0] sm:$0xff] }
  0xff   : > { %3584 = vst [vmem:[%s4721_s25 + $0x9d0] sm:$0xff] %v2560_v27  ;;  %v1543_v40 = vmul.f32 %v4687_v1, %v518_v24  ;;  %3585 = vst [vmem:[%s4721_s25 + $0x9d8] sm:$0xff] %v2561_v32  ;;  %v2565_v42 = vadd.f32 %v4692_v5, %v1540_v35  ;;  %v1544_v43 = vmul.f32 %v4687_v1, %v519_v29  ;;  %v539_v27 = vld [vmem:[%s4680_s11 + $0xab8] sm:$0xff]  ;;  %v540_v32 = vld [vmem:[%s4680_s11 + $0xac0] sm:$0xff] }
 0x100   : > { %3586 = vst [vmem:[%s4721_s25 + $0x9e0] sm:$0xff] %v2562_v33  ;;  %3587 = vst [vmem:[%s4721_s25 + $0x9e8] sm:$0xff] %v2563_v34  ;;  %v1545_v44 = vmul.f32 %v4687_v1, %v520_v30  ;;  %v1546_v45 = vmul.f32 %v4687_v1, %v521_v31  ;;  %v2566_v49 = vadd.f32 %v4692_v5, %v1541_v38  ;;  %v541_v33 = vld [vmem:[%s4680_s11 + $0xac8] sm:$0xff]  ;;  %v542_v34 = vld [vmem:[%s4680_s11 + $0xad0] sm:$0xff] }
 0x101   : > { %3588 = vst [vmem:[%s4721_s25 + $0x9f0] sm:$0xff] %v2564_v37  ;;  %v2567_v50 = vadd.f32 %v4692_v5, %v1542_v39  ;;  %v2568_v51 = vadd.f32 %v4692_v5, %v1543_v40  ;;  %v1547_v52 = vmul.f32 %v4687_v1, %v522_v36  ;;  %3589 = vst [vmem:[%s4721_s25 + $0x9f8] sm:$0xff] %v2565_v42  ;;  %v543_v39 = vld [vmem:[%s4680_s11 + $0xad8] sm:$0xff]  ;;  %v544_v40 = vld [vmem:[%s4680_s11 + $0xae0] sm:$0xff] }
 0x102   : > { %v2569_v56 = vadd.f32 %v4692_v5, %v1544_v43  ;;  %v2570_v57 = vadd.f32 %v4692_v5, %v1545_v44  ;;  %v2571_v58 = vadd.f32 %v4692_v5, %v1546_v45  ;;  %v1548_v59 = vmul.f32 %v4687_v1, %v523_v41  ;;  %3590 = vst [vmem:[%s4721_s25 + $0xa00] sm:$0xff] %v2566_v49  ;;  %v545_v41 = vld [vmem:[%s4680_s11 + $0xae8] sm:$0xff] }
 0x103   : > { %3591 = vst [vmem:[%s4721_s25 + $0xa08] sm:$0xff] %v2567_v50  ;;  %3592 = vst [vmem:[%s4721_s25 + $0xa10] sm:$0xff] %v2568_v51  ;;  %v2572_v61 = vadd.f32 %v4692_v5, %v1547_v52  ;;  %v1549_v62 = vmul.f32 %v4687_v1, %v524_v46  ;;  %v1550_v63 = vmul.f32 %v4687_v1, %v525_v47  ;;  %v546_v46 = vld [vmem:[%s4680_s11 + $0xaf0] sm:$0xff]  ;;  %v547_v51 = vld [vmem:[%s4680_s11 + $0xaf8] sm:$0xff] }
 0x104   : > { %v1551_v0 = vmul.f32 %v4687_v1, %v526_v48  ;;  %3593 = vst [vmem:[%s4721_s25 + $0xa18] sm:$0xff] %v2569_v56  ;;  %3594 = vst [vmem:[%s4721_s25 + $0xa20] sm:$0xff] %v2570_v57  ;;  %v2573_v3 = vadd.f32 %v4692_v5, %v1548_v59  ;;  %v1552_v4 = vmul.f32 %v4687_v1, %v527_v53  ;;  %v548_v56 = vld [vmem:[%s4680_s11 + $0xb00] sm:$0xff]  ;;  %v549_v57 = vld [vmem:[%s4680_s11 + $0xb08] sm:$0xff] }
 0x105   : > { %3595 = vst [vmem:[%s4721_s25 + $0xa28] sm:$0xff] %v2571_v58  ;;  %v1553_v6 = vmul.f32 %v4687_v1, %v528_v54  ;;  %v1554_v7 = vmul.f32 %v4687_v1, %v529_v55  ;;  %3596 = vst [vmem:[%s4721_s25 + $0xa30] sm:$0xff] %v2572_v61  ;;  %v2574_v11 = vadd.f32 %v4692_v5, %v1549_v62  ;;  %v550_v58 = vld [vmem:[%s4680_s11 + $0xb10] sm:$0xff] }
 0x106   : > { %v2575_v12 = vadd.f32 %v4692_v5, %v1550_v63  ;;  %v2576_v13 = vadd.f32 %v4692_v5, %v1551_v0  ;;  %v1555_v14 = vmul.f32 %v4687_v1, %v530_v60  ;;  %3597 = vst [vmem:[%s4721_s25 + $0xa38] sm:$0xff] %v2573_v3  ;;  %v2577_v18 = vadd.f32 %v4692_v5, %v1552_v4  ;;  %v551_v63 = vld [vmem:[%s4680_s11 + $0xb18] sm:$0xff]  ;;  %v552_v0 = vld [vmem:[%s4680_s11 + $0xb20] sm:$0xff] }
 0x107   : > { %v2578_v19 = vadd.f32 %v4692_v5, %v1553_v6  ;;  %v2579_v20 = vadd.f32 %v4692_v5, %v1554_v7  ;;  %v1556_v21 = vmul.f32 %v4687_v1, %v531_v2  ;;  %3598 = vst [vmem:[%s4721_s25 + $0xa40] sm:$0xff] %v2574_v11  ;;  %v1557_v24 = vmul.f32 %v4687_v1, %v532_v8  ;;  %v553_v2 = vld [vmem:[%s4680_s11 + $0xb28] sm:$0xff]  ;;  %v554_v8 = vld [vmem:[%s4680_s11 + $0xb30] sm:$0xff] }
 0x108   : > { %3599 = vst [vmem:[%s4721_s25 + $0xa48] sm:$0xff] %v2575_v12  ;;  %3600 = vst [vmem:[%s4721_s25 + $0xa50] sm:$0xff] %v2576_v13  ;;  %v2580_v23 = vadd.f32 %v4692_v5, %v1555_v14  ;;  %v1558_v25 = vmul.f32 %v4687_v1, %v533_v9  ;;  %v1559_v26 = vmul.f32 %v4687_v1, %v534_v10  ;;  %v555_v13 = vld [vmem:[%s4680_s11 + $0xb38] sm:$0xff] }
 0x109   : > { %3601 = vst [vmem:[%s4721_s25 + $0xa58] sm:$0xff] %v2577_v18  ;;  %3602 = vst [vmem:[%s4721_s25 + $0xa60] sm:$0xff] %v2578_v19  ;;  %v2581_v28 = vadd.f32 %v4692_v5, %v1556_v21  ;;  %v1560_v29 = vmul.f32 %v4687_v1, %v535_v15  ;;  %v1561_v30 = vmul.f32 %v4687_v1, %v536_v16  ;;  %v556_v18 = vld [vmem:[%s4680_s11 + $0xb40] sm:$0xff]  ;;  %v557_v19 = vld [vmem:[%s4680_s11 + $0xb48] sm:$0xff] }
 0x10a   : > { %3603 = vst [vmem:[%s4721_s25 + $0xa68] sm:$0xff] %v2579_v20  ;;  %v1562_v31 = vmul.f32 %v4687_v1, %v537_v17  ;;  %3604 = vst [vmem:[%s4721_s25 + $0xa70] sm:$0xff] %v2580_v23  ;;  %v2582_v35 = vadd.f32 %v4692_v5, %v1557_v24  ;;  %v2583_v36 = vadd.f32 %v4692_v5, %v1558_v25  ;;  %v558_v20 = vld [vmem:[%s4680_s11 + $0xb50] sm:$0xff]  ;;  %v559_v25 = vld [vmem:[%s4680_s11 + $0xb58] sm:$0xff] }
 0x10b   : > { %v2584_v37 = vadd.f32 %v4692_v5, %v1559_v26  ;;  %v1563_v38 = vmul.f32 %v4687_v1, %v538_v22  ;;  %3605 = vst [vmem:[%s4721_s25 + $0xa78] sm:$0xff] %v2581_v28  ;;  %v2585_v42 = vadd.f32 %v4692_v5, %v1560_v29  ;;  %v2586_v43 = vadd.f32 %v4692_v5, %v1561_v30  ;;  %v560_v26 = vld [vmem:[%s4680_s11 + $0xb60] sm:$0xff] }
 0x10c   : > { %v2587_v44 = vadd.f32 %v4692_v5, %v1562_v31  ;;  %v1564_v45 = vmul.f32 %v4687_v1, %v539_v27  ;;  %3606 = vst [vmem:[%s4721_s25 + $0xa80] sm:$0xff] %v2582_v35  ;;  %3607 = vst [vmem:[%s4721_s25 + $0xa88] sm:$0xff] %v2583_v36  ;;  %v1565_v48 = vmul.f32 %v4687_v1, %v540_v32  ;;  %v561_v27 = vld [vmem:[%s4680_s11 + $0xb68] sm:$0xff]  ;;  %v562_v32 = vld [vmem:[%s4680_s11 + $0xb70] sm:$0xff] }
 0x10d   : > { %3608 = vst [vmem:[%s4721_s25 + $0xa90] sm:$0xff] %v2584_v37  ;;  %v2588_v47 = vadd.f32 %v4692_v5, %v1563_v38  ;;  %v1566_v49 = vmul.f32 %v4687_v1, %v541_v33  ;;  %v1567_v50 = vmul.f32 %v4687_v1, %v542_v34  ;;  %3609 = vst [vmem:[%s4721_s25 + $0xa98] sm:$0xff] %v2585_v42  ;;  %v563_v37 = vld [vmem:[%s4680_s11 + $0xb78] sm:$0xff]  ;;  %v564_v42 = vld [vmem:[%s4680_s11 + $0xb80] sm:$0xff] }
 0x10e   : > { %3610 = vst [vmem:[%s4721_s25 + $0xaa0] sm:$0xff] %v2586_v43  ;;  %3611 = vst [vmem:[%s4721_s25 + $0xaa8] sm:$0xff] %v2587_v44  ;;  %v2589_v52 = vadd.f32 %v4692_v5, %v1564_v45  ;;  %v1568_v53 = vmul.f32 %v4687_v1, %v543_v39  ;;  %v1569_v54 = vmul.f32 %v4687_v1, %v544_v40  ;;  %v565_v43 = vld [vmem:[%s4680_s11 + $0xb88] sm:$0xff]  ;;  %v566_v44 = vld [vmem:[%s4680_s11 + $0xb90] sm:$0xff] }
 0x10f   : > { %v1570_v55 = vmul.f32 %v4687_v1, %v545_v41  ;;  %3612 = vst [vmem:[%s4721_s25 + $0xab0] sm:$0xff] %v2588_v47  ;;  %v2590_v59 = vadd.f32 %v4692_v5, %v1565_v48  ;;  %v2591_v60 = vadd.f32 %v4692_v5, %v1566_v49  ;;  %v2592_v61 = vadd.f32 %v4692_v5, %v1567_v50  ;;  %v567_v49 = vld [vmem:[%s4680_s11 + $0xb98] sm:$0xff]  ;;  %v568_v50 = vld [vmem:[%s4680_s11 + $0xba0] sm:$0xff] }
 0x110   : > { %v1571_v62 = vmul.f32 %v4687_v1, %v546_v46  ;;  %3613 = vst [vmem:[%s4721_s25 + $0xab8] sm:$0xff] %v2589_v52  ;;  %v2593_v3 = vadd.f32 %v4692_v5, %v1568_v53  ;;  %v2594_v4 = vadd.f32 %v4692_v5, %v1569_v54  ;;  %v1572_v7 = vmul.f32 %v4687_v1, %v547_v51  ;;  %v569_v51 = vld [vmem:[%s4680_s11 + $0xba8] sm:$0xff] }
 0x111   : > { %v2595_v6 = vadd.f32 %v4692_v5, %v1570_v55  ;;  %3614 = vst [vmem:[%s4721_s25 + $0xac0] sm:$0xff] %v2590_v59  ;;  %3615 = vst [vmem:[%s4721_s25 + $0xac8] sm:$0xff] %v2591_v60  ;;  %v1573_v10 = vmul.f32 %v4687_v1, %v548_v56  ;;  %v1574_v11 = vmul.f32 %v4687_v1, %v549_v57  ;;  %v570_v56 = vld [vmem:[%s4680_s11 + $0xbb0] sm:$0xff] }
 0x112   : > { %3616 = vst [vmem:[%s4721_s25 + $0xad0] sm:$0xff] %v2592_v61  ;;  %v2596_v9 = vadd.f32 %v4692_v5, %v1571_v62  ;;  %v1575_v12 = vmul.f32 %v4687_v1, %v550_v58  ;;  %3617 = vst [vmem:[%s4721_s25 + $0xad8] sm:$0xff] %v2593_v3  ;;  %v2597_v14 = vadd.f32 %v4692_v5, %v1572_v7  ;;  %v571_v61 = vld [vmem:[%s4680_s11 + $0xbb8] sm:$0xff]  ;;  %v572_v3 = vld [vmem:[%s4680_s11 + $0xbc0] sm:$0xff] }
 0x113   : > { %3618 = vst [vmem:[%s4721_s25 + $0xae0] sm:$0xff] %v2594_v4  ;;  %3619 = vst [vmem:[%s4721_s25 + $0xae8] sm:$0xff] %v2595_v6  ;;  %v1576_v15 = vmul.f32 %v4687_v1, %v551_v63  ;;  %v1577_v16 = vmul.f32 %v4687_v1, %v552_v0  ;;  %v1578_v17 = vmul.f32 %v4687_v1, %v553_v2  ;;  %v573_v4 = vld [vmem:[%s4680_s11 + $0xbc8] sm:$0xff]  ;;  %v574_v6 = vld [vmem:[%s4680_s11 + $0xbd0] sm:$0xff] }
 0x114   : > { %3620 = vst [vmem:[%s4721_s25 + $0xaf0] sm:$0xff] %v2596_v9  ;;  %v2598_v21 = vadd.f32 %v4692_v5, %v1573_v10  ;;  %v2599_v22 = vadd.f32 %v4692_v5, %v1574_v11  ;;  %v2600_v23 = vadd.f32 %v4692_v5, %v1575_v12  ;;  %v1579_v24 = vmul.f32 %v4687_v1, %v554_v8  ;;  %v575_v11 = vld [vmem:[%s4680_s11 + $0xbd8] sm:$0xff]  ;;  %v576_v12 = vld [vmem:[%s4680_s11 + $0xbe0] sm:$0xff] }
 0x115   : > { %3621 = vst [vmem:[%s4721_s25 + $0xaf8] sm:$0xff] %v2597_v14  ;;  %v2601_v28 = vadd.f32 %v4692_v5, %v1576_v15  ;;  %v2602_v29 = vadd.f32 %v4692_v5, %v1577_v16  ;;  %v2603_v30 = vadd.f32 %v4692_v5, %v1578_v17  ;;  %v1580_v31 = vmul.f32 %v4687_v1, %v555_v13  ;;  %v577_v13 = vld [vmem:[%s4680_s11 + $0xbe8] sm:$0xff] }
 0x116   : > { %3622 = vst [vmem:[%s4721_s25 + $0xb00] sm:$0xff] %v2598_v21  ;;  %3623 = vst [vmem:[%s4721_s25 + $0xb08] sm:$0xff] %v2599_v22  ;;  %v2604_v33 = vadd.f32 %v4692_v5, %v1579_v24  ;;  %v1581_v34 = vmul.f32 %v4687_v1, %v556_v18  ;;  %v1582_v35 = vmul.f32 %v4687_v1, %v557_v19  ;;  %v578_v18 = vld [vmem:[%s4680_s11 + $0xbf0] sm:$0xff] }
 0x117   : > { %3624 = vst [vmem:[%s4721_s25 + $0xb10] sm:$0xff] %v2600_v23  ;;  %v1583_v36 = vmul.f32 %v4687_v1, %v558_v20  ;;  %3625 = vst [vmem:[%s4721_s25 + $0xb18] sm:$0xff] %v2601_v28  ;;  %v2605_v38 = vadd.f32 %v4692_v5, %v1580_v31  ;;  %v1584_v39 = vmul.f32 %v4687_v1, %v559_v25  ;;  %v579_v23 = vld [vmem:[%s4680_s11 + $0xbf8] sm:$0xff]  ;;  %v580_v28 = vld [vmem:[%s4680_s11 + $0xc00] sm:$0xff] }
 0x118   : > { %3626 = vst [vmem:[%s4721_s25 + $0xb20] sm:$0xff] %v2602_v29  ;;  %3627 = vst [vmem:[%s4721_s25 + $0xb28] sm:$0xff] %v2603_v30  ;;  %v1585_v40 = vmul.f32 %v4687_v1, %v560_v26  ;;  %v1586_v41 = vmul.f32 %v4687_v1, %v561_v27  ;;  %v2606_v45 = vadd.f32 %v4692_v5, %v1581_v34  ;;  %v581_v29 = vld [vmem:[%s4680_s11 + $0xc08] sm:$0xff]  ;;  %v582_v30 = vld [vmem:[%s4680_s11 + $0xc10] sm:$0xff] }
 0x119   : > { %3628 = vst [vmem:[%s4721_s25 + $0xb30] sm:$0xff] %v2604_v33  ;;  %v2607_v46 = vadd.f32 %v4692_v5, %v1582_v35  ;;  %v2608_v47 = vadd.f32 %v4692_v5, %v1583_v36  ;;  %v1587_v48 = vmul.f32 %v4687_v1, %v562_v32  ;;  %3629 = vst [vmem:[%s4721_s25 + $0xb38] sm:$0xff] %v2605_v38  ;;  %v583_v35 = vld [vmem:[%s4680_s11 + $0xc18] sm:$0xff]  ;;  %v584_v36 = vld [vmem:[%s4680_s11 + $0xc20] sm:$0xff] }
 0x11a   : > { %v2609_v52 = vadd.f32 %v4692_v5, %v1584_v39  ;;  %v2610_v53 = vadd.f32 %v4692_v5, %v1585_v40  ;;  %v2611_v54 = vadd.f32 %v4692_v5, %v1586_v41  ;;  %v1588_v55 = vmul.f32 %v4687_v1, %v563_v37  ;;  %3630 = vst [vmem:[%s4721_s25 + $0xb40] sm:$0xff] %v2606_v45  ;;  %v585_v37 = vld [vmem:[%s4680_s11 + $0xc28] sm:$0xff] }
 0x11b   : > { %3631 = vst [vmem:[%s4721_s25 + $0xb48] sm:$0xff] %v2607_v46  ;;  %3632 = vst [vmem:[%s4721_s25 + $0xb50] sm:$0xff] %v2608_v47  ;;  %v2612_v57 = vadd.f32 %v4692_v5, %v1587_v48  ;;  %v1589_v58 = vmul.f32 %v4687_v1, %v564_v42  ;;  %v1590_v59 = vmul.f32 %v4687_v1, %v565_v43  ;;  %v586_v42 = vld [vmem:[%s4680_s11 + $0xc30] sm:$0xff]  ;;  %v587_v47 = vld [vmem:[%s4680_s11 + $0xc38] sm:$0xff] }
 0x11c   : > { %v1591_v60 = vmul.f32 %v4687_v1, %v566_v44  ;;  %3633 = vst [vmem:[%s4721_s25 + $0xb58] sm:$0xff] %v2609_v52  ;;  %3634 = vst [vmem:[%s4721_s25 + $0xb60] sm:$0xff] %v2610_v53  ;;  %v2613_v62 = vadd.f32 %v4692_v5, %v1588_v55  ;;  %v1592_v63 = vmul.f32 %v4687_v1, %v567_v49  ;;  %v588_v52 = vld [vmem:[%s4680_s11 + $0xc40] sm:$0xff]  ;;  %v589_v53 = vld [vmem:[%s4680_s11 + $0xc48] sm:$0xff] }
 0x11d   : > { %3635 = vst [vmem:[%s4721_s25 + $0xb68] sm:$0xff] %v2611_v54  ;;  %v1593_v0 = vmul.f32 %v4687_v1, %v568_v50  ;;  %v1594_v2 = vmul.f32 %v4687_v1, %v569_v51  ;;  %3636 = vst [vmem:[%s4721_s25 + $0xb70] sm:$0xff] %v2612_v57  ;;  %v2614_v7 = vadd.f32 %v4692_v5, %v1589_v58  ;;  %v590_v54 = vld [vmem:[%s4680_s11 + $0xc50] sm:$0xff] }
 0x11e   : > { %v2615_v8 = vadd.f32 %v4692_v5, %v1590_v59  ;;  %v2616_v9 = vadd.f32 %v4692_v5, %v1591_v60  ;;  %v1595_v10 = vmul.f32 %v4687_v1, %v570_v56  ;;  %3637 = vst [vmem:[%s4721_s25 + $0xb78] sm:$0xff] %v2613_v62  ;;  %v2617_v14 = vadd.f32 %v4692_v5, %v1592_v63  ;;  %v591_v59 = vld [vmem:[%s4680_s11 + $0xc58] sm:$0xff]  ;;  %v592_v60 = vld [vmem:[%s4680_s11 + $0xc60] sm:$0xff] }
 0x11f   : > { %v2618_v15 = vadd.f32 %v4692_v5, %v1593_v0  ;;  %v2619_v16 = vadd.f32 %v4692_v5, %v1594_v2  ;;  %v1596_v17 = vmul.f32 %v4687_v1, %v571_v61  ;;  %3638 = vst [vmem:[%s4721_s25 + $0xb80] sm:$0xff] %v2614_v7  ;;  %v1597_v20 = vmul.f32 %v4687_v1, %v572_v3  ;;  %v593_v61 = vld [vmem:[%s4680_s11 + $0xc68] sm:$0xff]  ;;  %v594_v3 = vld [vmem:[%s4680_s11 + $0xc70] sm:$0xff] }
 0x120   : > { %3639 = vst [vmem:[%s4721_s25 + $0xb88] sm:$0xff] %v2615_v8  ;;  %3640 = vst [vmem:[%s4721_s25 + $0xb90] sm:$0xff] %v2616_v9  ;;  %v2620_v19 = vadd.f32 %v4692_v5, %v1595_v10  ;;  %v1598_v21 = vmul.f32 %v4687_v1, %v573_v4  ;;  %v1599_v22 = vmul.f32 %v4687_v1, %v574_v6  ;;  %v595_v9 = vld [vmem:[%s4680_s11 + $0xc78] sm:$0xff] }
 0x121   : > { %3641 = vst [vmem:[%s4721_s25 + $0xb98] sm:$0xff] %v2617_v14  ;;  %3642 = vst [vmem:[%s4721_s25 + $0xba0] sm:$0xff] %v2618_v15  ;;  %v2621_v24 = vadd.f32 %v4692_v5, %v1596_v17  ;;  %v1600_v25 = vmul.f32 %v4687_v1, %v575_v11  ;;  %v1601_v26 = vmul.f32 %v4687_v1, %v576_v12  ;;  %v596_v14 = vld [vmem:[%s4680_s11 + $0xc80] sm:$0xff]  ;;  %v597_v15 = vld [vmem:[%s4680_s11 + $0xc88] sm:$0xff] }
 0x122   : > { %3643 = vst [vmem:[%s4721_s25 + $0xba8] sm:$0xff] %v2619_v16  ;;  %v1602_v27 = vmul.f32 %v4687_v1, %v577_v13  ;;  %3644 = vst [vmem:[%s4721_s25 + $0xbb0] sm:$0xff] %v2620_v19  ;;  %v2622_v31 = vadd.f32 %v4692_v5, %v1597_v20  ;;  %v2623_v32 = vadd.f32 %v4692_v5, %v1598_v21  ;;  %v598_v16 = vld [vmem:[%s4680_s11 + $0xc90] sm:$0xff]  ;;  %v599_v21 = vld [vmem:[%s4680_s11 + $0xc98] sm:$0xff] }
 0x123   : > { %v2624_v33 = vadd.f32 %v4692_v5, %v1599_v22  ;;  %v1603_v34 = vmul.f32 %v4687_v1, %v578_v18  ;;  %3645 = vst [vmem:[%s4721_s25 + $0xbb8] sm:$0xff] %v2621_v24  ;;  %v2625_v38 = vadd.f32 %v4692_v5, %v1600_v25  ;;  %v2626_v39 = vadd.f32 %v4692_v5, %v1601_v26  ;;  %v600_v22 = vld [vmem:[%s4680_s11 + $0xca0] sm:$0xff] }
 0x124   : > { %v2627_v40 = vadd.f32 %v4692_v5, %v1602_v27  ;;  %v1604_v41 = vmul.f32 %v4687_v1, %v579_v23  ;;  %3646 = vst [vmem:[%s4721_s25 + $0xbc0] sm:$0xff] %v2622_v31  ;;  %3647 = vst [vmem:[%s4721_s25 + $0xbc8] sm:$0xff] %v2623_v32  ;;  %v1605_v44 = vmul.f32 %v4687_v1, %v580_v28  ;;  %v601_v23 = vld [vmem:[%s4680_s11 + $0xca8] sm:$0xff]  ;;  %v602_v28 = vld [vmem:[%s4680_s11 + $0xcb0] sm:$0xff] }
 0x125   : > { %3648 = vst [vmem:[%s4721_s25 + $0xbd0] sm:$0xff] %v2624_v33  ;;  %v2628_v43 = vadd.f32 %v4692_v5, %v1603_v34  ;;  %v1606_v45 = vmul.f32 %v4687_v1, %v581_v29  ;;  %v1607_v46 = vmul.f32 %v4687_v1, %v582_v30  ;;  %3649 = vst [vmem:[%s4721_s25 + $0xbd8] sm:$0xff] %v2625_v38  ;;  %v603_v33 = vld [vmem:[%s4680_s11 + $0xcb8] sm:$0xff]  ;;  %v604_v38 = vld [vmem:[%s4680_s11 + $0xcc0] sm:$0xff] }
 0x126   : > { %3650 = vst [vmem:[%s4721_s25 + $0xbe0] sm:$0xff] %v2626_v39  ;;  %3651 = vst [vmem:[%s4721_s25 + $0xbe8] sm:$0xff] %v2627_v40  ;;  %v2629_v48 = vadd.f32 %v4692_v5, %v1604_v41  ;;  %v1608_v49 = vmul.f32 %v4687_v1, %v583_v35  ;;  %v1609_v50 = vmul.f32 %v4687_v1, %v584_v36  ;;  %v605_v39 = vld [vmem:[%s4680_s11 + $0xcc8] sm:$0xff]  ;;  %v606_v40 = vld [vmem:[%s4680_s11 + $0xcd0] sm:$0xff] }
 0x127   : > { %v1610_v51 = vmul.f32 %v4687_v1, %v585_v37  ;;  %3652 = vst [vmem:[%s4721_s25 + $0xbf0] sm:$0xff] %v2628_v43  ;;  %v2630_v55 = vadd.f32 %v4692_v5, %v1605_v44  ;;  %v2631_v56 = vadd.f32 %v4692_v5, %v1606_v45  ;;  %v2632_v57 = vadd.f32 %v4692_v5, %v1607_v46  ;;  %v607_v45 = vld [vmem:[%s4680_s11 + $0xcd8] sm:$0xff]  ;;  %v608_v46 = vld [vmem:[%s4680_s11 + $0xce0] sm:$0xff] }
 0x128   : > { %v1611_v58 = vmul.f32 %v4687_v1, %v586_v42  ;;  %3653 = vst [vmem:[%s4721_s25 + $0xbf8] sm:$0xff] %v2629_v48  ;;  %v2633_v62 = vadd.f32 %v4692_v5, %v1608_v49  ;;  %v2634_v63 = vadd.f32 %v4692_v5, %v1609_v50  ;;  %v1612_v2 = vmul.f32 %v4687_v1, %v587_v47  ;;  %v609_v47 = vld [vmem:[%s4680_s11 + $0xce8] sm:$0xff] }
 0x129   : > { %v2635_v0 = vadd.f32 %v4692_v5, %v1610_v51  ;;  %3654 = vst [vmem:[%s4721_s25 + $0xc00] sm:$0xff] %v2630_v55  ;;  %3655 = vst [vmem:[%s4721_s25 + $0xc08] sm:$0xff] %v2631_v56  ;;  %v1613_v6 = vmul.f32 %v4687_v1, %v588_v52  ;;  %v1614_v7 = vmul.f32 %v4687_v1, %v589_v53  ;;  %v610_v52 = vld [vmem:[%s4680_s11 + $0xcf0] sm:$0xff] }
 0x12a   : > { %3656 = vst [vmem:[%s4721_s25 + $0xc10] sm:$0xff] %v2632_v57  ;;  %v2636_v4 = vadd.f32 %v4692_v5, %v1611_v58  ;;  %v1615_v8 = vmul.f32 %v4687_v1, %v590_v54  ;;  %3657 = vst [vmem:[%s4721_s25 + $0xc18] sm:$0xff] %v2633_v62  ;;  %v2637_v10 = vadd.f32 %v4692_v5, %v1612_v2  ;;  %v611_v57 = vld [vmem:[%s4680_s11 + $0xcf8] sm:$0xff]  ;;  %v612_v62 = vld [vmem:[%s4680_s11 + $0xd00] sm:$0xff] }
 0x12b   : > { %3658 = vst [vmem:[%s4721_s25 + $0xc20] sm:$0xff] %v2634_v63  ;;  %3659 = vst [vmem:[%s4721_s25 + $0xc28] sm:$0xff] %v2635_v0  ;;  %v1616_v11 = vmul.f32 %v4687_v1, %v591_v59  ;;  %v1617_v12 = vmul.f32 %v4687_v1, %v592_v60  ;;  %v1618_v13 = vmul.f32 %v4687_v1, %v593_v61  ;;  %v613_v63 = vld [vmem:[%s4680_s11 + $0xd08] sm:$0xff]  ;;  %v614_v0 = vld [vmem:[%s4680_s11 + $0xd10] sm:$0xff] }
 0x12c   : > { %3660 = vst [vmem:[%s4721_s25 + $0xc30] sm:$0xff] %v2636_v4  ;;  %v2638_v17 = vadd.f32 %v4692_v5, %v1613_v6  ;;  %v2639_v18 = vadd.f32 %v4692_v5, %v1614_v7  ;;  %v2640_v19 = vadd.f32 %v4692_v5, %v1615_v8  ;;  %v1619_v20 = vmul.f32 %v4687_v1, %v594_v3  ;;  %v615_v7 = vld [vmem:[%s4680_s11 + $0xd18] sm:$0xff]  ;;  %v616_v8 = vld [vmem:[%s4680_s11 + $0xd20] sm:$0xff] }
 0x12d   : > { %3661 = vst [vmem:[%s4721_s25 + $0xc38] sm:$0xff] %v2637_v10  ;;  %v2641_v24 = vadd.f32 %v4692_v5, %v1616_v11  ;;  %v2642_v25 = vadd.f32 %v4692_v5, %v1617_v12  ;;  %v2643_v26 = vadd.f32 %v4692_v5, %v1618_v13  ;;  %v1620_v27 = vmul.f32 %v4687_v1, %v595_v9  ;;  %v617_v9 = vld [vmem:[%s4680_s11 + $0xd28] sm:$0xff] }
 0x12e   : > { %3662 = vst [vmem:[%s4721_s25 + $0xc40] sm:$0xff] %v2638_v17  ;;  %3663 = vst [vmem:[%s4721_s25 + $0xc48] sm:$0xff] %v2639_v18  ;;  %v2644_v29 = vadd.f32 %v4692_v5, %v1619_v20  ;;  %v1621_v30 = vmul.f32 %v4687_v1, %v596_v14  ;;  %v1622_v31 = vmul.f32 %v4687_v1, %v597_v15  ;;  %v618_v14 = vld [vmem:[%s4680_s11 + $0xd30] sm:$0xff] }
 0x12f   : > { %3664 = vst [vmem:[%s4721_s25 + $0xc50] sm:$0xff] %v2640_v19  ;;  %v1623_v32 = vmul.f32 %v4687_v1, %v598_v16  ;;  %3665 = vst [vmem:[%s4721_s25 + $0xc58] sm:$0xff] %v2641_v24  ;;  %v2645_v34 = vadd.f32 %v4692_v5, %v1620_v27  ;;  %v1624_v35 = vmul.f32 %v4687_v1, %v599_v21  ;;  %v619_v19 = vld [vmem:[%s4680_s11 + $0xd38] sm:$0xff]  ;;  %v620_v24 = vld [vmem:[%s4680_s11 + $0xd40] sm:$0xff] }
 0x130   : > { %3666 = vst [vmem:[%s4721_s25 + $0xc60] sm:$0xff] %v2642_v25  ;;  %3667 = vst [vmem:[%s4721_s25 + $0xc68] sm:$0xff] %v2643_v26  ;;  %v1625_v36 = vmul.f32 %v4687_v1, %v600_v22  ;;  %v1626_v37 = vmul.f32 %v4687_v1, %v601_v23  ;;  %v2646_v41 = vadd.f32 %v4692_v5, %v1621_v30  ;;  %v621_v25 = vld [vmem:[%s4680_s11 + $0xd48] sm:$0xff]  ;;  %v622_v26 = vld [vmem:[%s4680_s11 + $0xd50] sm:$0xff] }
 0x131   : > { %3668 = vst [vmem:[%s4721_s25 + $0xc70] sm:$0xff] %v2644_v29  ;;  %v2647_v42 = vadd.f32 %v4692_v5, %v1622_v31  ;;  %v2648_v43 = vadd.f32 %v4692_v5, %v1623_v32  ;;  %v1627_v44 = vmul.f32 %v4687_v1, %v602_v28  ;;  %3669 = vst [vmem:[%s4721_s25 + $0xc78] sm:$0xff] %v2645_v34  ;;  %v623_v31 = vld [vmem:[%s4680_s11 + $0xd58] sm:$0xff]  ;;  %v624_v32 = vld [vmem:[%s4680_s11 + $0xd60] sm:$0xff] }
 0x132   : > { %v2649_v48 = vadd.f32 %v4692_v5, %v1624_v35  ;;  %v2650_v49 = vadd.f32 %v4692_v5, %v1625_v36  ;;  %v2651_v50 = vadd.f32 %v4692_v5, %v1626_v37  ;;  %v1628_v51 = vmul.f32 %v4687_v1, %v603_v33  ;;  %3670 = vst [vmem:[%s4721_s25 + $0xc80] sm:$0xff] %v2646_v41  ;;  %v625_v33 = vld [vmem:[%s4680_s11 + $0xd68] sm:$0xff] }
 0x133   : > { %3671 = vst [vmem:[%s4721_s25 + $0xc88] sm:$0xff] %v2647_v42  ;;  %3672 = vst [vmem:[%s4721_s25 + $0xc90] sm:$0xff] %v2648_v43  ;;  %v2652_v53 = vadd.f32 %v4692_v5, %v1627_v44  ;;  %v1629_v54 = vmul.f32 %v4687_v1, %v604_v38  ;;  %v1630_v55 = vmul.f32 %v4687_v1, %v605_v39  ;;  %v626_v38 = vld [vmem:[%s4680_s11 + $0xd70] sm:$0xff]  ;;  %v627_v43 = vld [vmem:[%s4680_s11 + $0xd78] sm:$0xff] }
 0x134   : > { %v1631_v56 = vmul.f32 %v4687_v1, %v606_v40  ;;  %3673 = vst [vmem:[%s4721_s25 + $0xc98] sm:$0xff] %v2649_v48  ;;  %3674 = vst [vmem:[%s4721_s25 + $0xca0] sm:$0xff] %v2650_v49  ;;  %v2653_v58 = vadd.f32 %v4692_v5, %v1628_v51  ;;  %v1632_v59 = vmul.f32 %v4687_v1, %v607_v45  ;;  %v628_v48 = vld [vmem:[%s4680_s11 + $0xd80] sm:$0xff]  ;;  %v629_v49 = vld [vmem:[%s4680_s11 + $0xd88] sm:$0xff] }
 0x135   : > { %3675 = vst [vmem:[%s4721_s25 + $0xca8] sm:$0xff] %v2651_v50  ;;  %v1633_v60 = vmul.f32 %v4687_v1, %v608_v46  ;;  %v1634_v61 = vmul.f32 %v4687_v1, %v609_v47  ;;  %3676 = vst [vmem:[%s4721_s25 + $0xcb0] sm:$0xff] %v2652_v53  ;;  %v2654_v2 = vadd.f32 %v4692_v5, %v1629_v54  ;;  %v630_v50 = vld [vmem:[%s4680_s11 + $0xd90] sm:$0xff] }
 0x136   : > { %v2655_v3 = vadd.f32 %v4692_v5, %v1630_v55  ;;  %v2656_v4 = vadd.f32 %v4692_v5, %v1631_v56  ;;  %v1635_v6 = vmul.f32 %v4687_v1, %v610_v52  ;;  %3677 = vst [vmem:[%s4721_s25 + $0xcb8] sm:$0xff] %v2653_v58  ;;  %v2657_v10 = vadd.f32 %v4692_v5, %v1632_v59  ;;  %v631_v55 = vld [vmem:[%s4680_s11 + $0xd98] sm:$0xff]  ;;  %v632_v56 = vld [vmem:[%s4680_s11 + $0xda0] sm:$0xff] }
 0x137   : > { %v2658_v11 = vadd.f32 %v4692_v5, %v1633_v60  ;;  %v2659_v12 = vadd.f32 %v4692_v5, %v1634_v61  ;;  %v1636_v13 = vmul.f32 %v4687_v1, %v611_v57  ;;  %3678 = vst [vmem:[%s4721_s25 + $0xcc0] sm:$0xff] %v2654_v2  ;;  %v1637_v16 = vmul.f32 %v4687_v1, %v612_v62  ;;  %v633_v57 = vld [vmem:[%s4680_s11 + $0xda8] sm:$0xff]  ;;  %v634_v62 = vld [vmem:[%s4680_s11 + $0xdb0] sm:$0xff] }
 0x138   : > { %3679 = vst [vmem:[%s4721_s25 + $0xcc8] sm:$0xff] %v2655_v3  ;;  %3680 = vst [vmem:[%s4721_s25 + $0xcd0] sm:$0xff] %v2656_v4  ;;  %v2660_v15 = vadd.f32 %v4692_v5, %v1635_v6  ;;  %v1638_v17 = vmul.f32 %v4687_v1, %v613_v63  ;;  %v1639_v18 = vmul.f32 %v4687_v1, %v614_v0  ;;  %v635_v4 = vld [vmem:[%s4680_s11 + $0xdb8] sm:$0xff] }
 0x139   : > { %3681 = vst [vmem:[%s4721_s25 + $0xcd8] sm:$0xff] %v2657_v10  ;;  %3682 = vst [vmem:[%s4721_s25 + $0xce0] sm:$0xff] %v2658_v11  ;;  %v2661_v20 = vadd.f32 %v4692_v5, %v1636_v13  ;;  %v1640_v21 = vmul.f32 %v4687_v1, %v615_v7  ;;  %v1641_v22 = vmul.f32 %v4687_v1, %v616_v8  ;;  %v636_v10 = vld [vmem:[%s4680_s11 + $0xdc0] sm:$0xff]  ;;  %v637_v11 = vld [vmem:[%s4680_s11 + $0xdc8] sm:$0xff] }
 0x13a   : > { %3683 = vst [vmem:[%s4721_s25 + $0xce8] sm:$0xff] %v2659_v12  ;;  %v1642_v23 = vmul.f32 %v4687_v1, %v617_v9  ;;  %3684 = vst [vmem:[%s4721_s25 + $0xcf0] sm:$0xff] %v2660_v15  ;;  %v2662_v27 = vadd.f32 %v4692_v5, %v1637_v16  ;;  %v2663_v28 = vadd.f32 %v4692_v5, %v1638_v17  ;;  %v638_v12 = vld [vmem:[%s4680_s11 + $0xdd0] sm:$0xff]  ;;  %v639_v17 = vld [vmem:[%s4680_s11 + $0xdd8] sm:$0xff] }
 0x13b   : > { %v2664_v29 = vadd.f32 %v4692_v5, %v1639_v18  ;;  %v1643_v30 = vmul.f32 %v4687_v1, %v618_v14  ;;  %3685 = vst [vmem:[%s4721_s25 + $0xcf8] sm:$0xff] %v2661_v20  ;;  %v2665_v34 = vadd.f32 %v4692_v5, %v1640_v21  ;;  %v2666_v35 = vadd.f32 %v4692_v5, %v1641_v22  ;;  %v640_v18 = vld [vmem:[%s4680_s11 + $0xde0] sm:$0xff] }
 0x13c   : > { %v2667_v36 = vadd.f32 %v4692_v5, %v1642_v23  ;;  %v1644_v37 = vmul.f32 %v4687_v1, %v619_v19  ;;  %3686 = vst [vmem:[%s4721_s25 + $0xd00] sm:$0xff] %v2662_v27  ;;  %3687 = vst [vmem:[%s4721_s25 + $0xd08] sm:$0xff] %v2663_v28  ;;  %v1645_v40 = vmul.f32 %v4687_v1, %v620_v24  ;;  %v641_v19 = vld [vmem:[%s4680_s11 + $0xde8] sm:$0xff]  ;;  %v642_v24 = vld [vmem:[%s4680_s11 + $0xdf0] sm:$0xff] }
 0x13d   : > { %3688 = vst [vmem:[%s4721_s25 + $0xd10] sm:$0xff] %v2664_v29  ;;  %v2668_v39 = vadd.f32 %v4692_v5, %v1643_v30  ;;  %v1646_v41 = vmul.f32 %v4687_v1, %v621_v25  ;;  %v1647_v42 = vmul.f32 %v4687_v1, %v622_v26  ;;  %3689 = vst [vmem:[%s4721_s25 + $0xd18] sm:$0xff] %v2665_v34  ;;  %v643_v29 = vld [vmem:[%s4680_s11 + $0xdf8] sm:$0xff]  ;;  %v644_v34 = vld [vmem:[%s4680_s11 + $0xe00] sm:$0xff] }
 0x13e   : > { %3690 = vst [vmem:[%s4721_s25 + $0xd20] sm:$0xff] %v2666_v35  ;;  %3691 = vst [vmem:[%s4721_s25 + $0xd28] sm:$0xff] %v2667_v36  ;;  %v2669_v44 = vadd.f32 %v4692_v5, %v1644_v37  ;;  %v1648_v45 = vmul.f32 %v4687_v1, %v623_v31  ;;  %v1649_v46 = vmul.f32 %v4687_v1, %v624_v32  ;;  %v645_v35 = vld [vmem:[%s4680_s11 + $0xe08] sm:$0xff]  ;;  %v646_v36 = vld [vmem:[%s4680_s11 + $0xe10] sm:$0xff] }
 0x13f   : > { %v1650_v47 = vmul.f32 %v4687_v1, %v625_v33  ;;  %3692 = vst [vmem:[%s4721_s25 + $0xd30] sm:$0xff] %v2668_v39  ;;  %v2670_v51 = vadd.f32 %v4692_v5, %v1645_v40  ;;  %v2671_v52 = vadd.f32 %v4692_v5, %v1646_v41  ;;  %v2672_v53 = vadd.f32 %v4692_v5, %v1647_v42  ;;  %v647_v41 = vld [vmem:[%s4680_s11 + $0xe18] sm:$0xff]  ;;  %v648_v42 = vld [vmem:[%s4680_s11 + $0xe20] sm:$0xff] }
 0x140   : > { %v1651_v54 = vmul.f32 %v4687_v1, %v626_v38  ;;  %3693 = vst [vmem:[%s4721_s25 + $0xd38] sm:$0xff] %v2669_v44  ;;  %v2673_v58 = vadd.f32 %v4692_v5, %v1648_v45  ;;  %v2674_v59 = vadd.f32 %v4692_v5, %v1649_v46  ;;  %v1652_v61 = vmul.f32 %v4687_v1, %v627_v43  ;;  %v649_v43 = vld [vmem:[%s4680_s11 + $0xe28] sm:$0xff] }
 0x141   : > { %v2675_v60 = vadd.f32 %v4692_v5, %v1650_v47  ;;  %3694 = vst [vmem:[%s4721_s25 + $0xd40] sm:$0xff] %v2670_v51  ;;  %3695 = vst [vmem:[%s4721_s25 + $0xd48] sm:$0xff] %v2671_v52  ;;  %v1653_v0 = vmul.f32 %v4687_v1, %v628_v48  ;;  %v1654_v2 = vmul.f32 %v4687_v1, %v629_v49  ;;  %v650_v48 = vld [vmem:[%s4680_s11 + $0xe30] sm:$0xff] }
 0x142   : > { %3696 = vst [vmem:[%s4721_s25 + $0xd50] sm:$0xff] %v2672_v53  ;;  %v2676_v63 = vadd.f32 %v4692_v5, %v1651_v54  ;;  %v1655_v3 = vmul.f32 %v4687_v1, %v630_v50  ;;  %3697 = vst [vmem:[%s4721_s25 + $0xd58] sm:$0xff] %v2673_v58  ;;  %v2677_v6 = vadd.f32 %v4692_v5, %v1652_v61  ;;  %v651_v53 = vld [vmem:[%s4680_s11 + $0xe38] sm:$0xff]  ;;  %v652_v58 = vld [vmem:[%s4680_s11 + $0xe40] sm:$0xff] }
 0x143   : > { %3698 = vst [vmem:[%s4721_s25 + $0xd60] sm:$0xff] %v2674_v59  ;;  %3699 = vst [vmem:[%s4721_s25 + $0xd68] sm:$0xff] %v2675_v60  ;;  %v1656_v7 = vmul.f32 %v4687_v1, %v631_v55  ;;  %v1657_v8 = vmul.f32 %v4687_v1, %v632_v56  ;;  %v1658_v9 = vmul.f32 %v4687_v1, %v633_v57  ;;  %v653_v59 = vld [vmem:[%s4680_s11 + $0xe48] sm:$0xff]  ;;  %v654_v60 = vld [vmem:[%s4680_s11 + $0xe50] sm:$0xff] }
 0x144   : > { %3700 = vst [vmem:[%s4721_s25 + $0xd70] sm:$0xff] %v2676_v63  ;;  %v2678_v13 = vadd.f32 %v4692_v5, %v1653_v0  ;;  %v2679_v14 = vadd.f32 %v4692_v5, %v1654_v2  ;;  %v2680_v15 = vadd.f32 %v4692_v5, %v1655_v3  ;;  %v1659_v16 = vmul.f32 %v4687_v1, %v634_v62  ;;  %v655_v2 = vld [vmem:[%s4680_s11 + $0xe58] sm:$0xff]  ;;  %v656_v3 = vld [vmem:[%s4680_s11 + $0xe60] sm:$0xff] }
 0x145   : > { %3701 = vst [vmem:[%s4721_s25 + $0xd78] sm:$0xff] %v2677_v6  ;;  %v2681_v20 = vadd.f32 %v4692_v5, %v1656_v7  ;;  %v2682_v21 = vadd.f32 %v4692_v5, %v1657_v8  ;;  %v2683_v22 = vadd.f32 %v4692_v5, %v1658_v9  ;;  %v1660_v23 = vmul.f32 %v4687_v1, %v635_v4  ;;  %v657_v4 = vld [vmem:[%s4680_s11 + $0xe68] sm:$0xff] }
 0x146   : > { %3702 = vst [vmem:[%s4721_s25 + $0xd80] sm:$0xff] %v2678_v13  ;;  %3703 = vst [vmem:[%s4721_s25 + $0xd88] sm:$0xff] %v2679_v14  ;;  %v2684_v25 = vadd.f32 %v4692_v5, %v1659_v16  ;;  %v1661_v26 = vmul.f32 %v4687_v1, %v636_v10  ;;  %v1662_v27 = vmul.f32 %v4687_v1, %v637_v11  ;;  %v658_v10 = vld [vmem:[%s4680_s11 + $0xe70] sm:$0xff] }
 0x147   : > { %3704 = vst [vmem:[%s4721_s25 + $0xd90] sm:$0xff] %v2680_v15  ;;  %v1663_v28 = vmul.f32 %v4687_v1, %v638_v12  ;;  %3705 = vst [vmem:[%s4721_s25 + $0xd98] sm:$0xff] %v2681_v20  ;;  %v2685_v30 = vadd.f32 %v4692_v5, %v1660_v23  ;;  %v1664_v31 = vmul.f32 %v4687_v1, %v639_v17  ;;  %v659_v15 = vld [vmem:[%s4680_s11 + $0xe78] sm:$0xff]  ;;  %v660_v20 = vld [vmem:[%s4680_s11 + $0xe80] sm:$0xff] }
 0x148   : > { %3706 = vst [vmem:[%s4721_s25 + $0xda0] sm:$0xff] %v2682_v21  ;;  %3707 = vst [vmem:[%s4721_s25 + $0xda8] sm:$0xff] %v2683_v22  ;;  %v1665_v32 = vmul.f32 %v4687_v1, %v640_v18  ;;  %v1666_v33 = vmul.f32 %v4687_v1, %v641_v19  ;;  %v2686_v37 = vadd.f32 %v4692_v5, %v1661_v26  ;;  %v661_v21 = vld [vmem:[%s4680_s11 + $0xe88] sm:$0xff]  ;;  %v662_v22 = vld [vmem:[%s4680_s11 + $0xe90] sm:$0xff] }
 0x149   : > { %3708 = vst [vmem:[%s4721_s25 + $0xdb0] sm:$0xff] %v2684_v25  ;;  %v2687_v38 = vadd.f32 %v4692_v5, %v1662_v27  ;;  %v2688_v39 = vadd.f32 %v4692_v5, %v1663_v28  ;;  %v1667_v40 = vmul.f32 %v4687_v1, %v642_v24  ;;  %3709 = vst [vmem:[%s4721_s25 + $0xdb8] sm:$0xff] %v2685_v30  ;;  %v663_v27 = vld [vmem:[%s4680_s11 + $0xe98] sm:$0xff]  ;;  %v664_v28 = vld [vmem:[%s4680_s11 + $0xea0] sm:$0xff] }
 0x14a   : > { %v2689_v44 = vadd.f32 %v4692_v5, %v1664_v31  ;;  %v2690_v45 = vadd.f32 %v4692_v5, %v1665_v32  ;;  %v2691_v46 = vadd.f32 %v4692_v5, %v1666_v33  ;;  %v1668_v47 = vmul.f32 %v4687_v1, %v643_v29  ;;  %3710 = vst [vmem:[%s4721_s25 + $0xdc0] sm:$0xff] %v2686_v37  ;;  %v665_v29 = vld [vmem:[%s4680_s11 + $0xea8] sm:$0xff] }
 0x14b   : > { %3711 = vst [vmem:[%s4721_s25 + $0xdc8] sm:$0xff] %v2687_v38  ;;  %3712 = vst [vmem:[%s4721_s25 + $0xdd0] sm:$0xff] %v2688_v39  ;;  %v2692_v49 = vadd.f32 %v4692_v5, %v1667_v40  ;;  %v1669_v50 = vmul.f32 %v4687_v1, %v644_v34  ;;  %v1670_v51 = vmul.f32 %v4687_v1, %v645_v35  ;;  %v666_v34 = vld [vmem:[%s4680_s11 + $0xeb0] sm:$0xff]  ;;  %v667_v39 = vld [vmem:[%s4680_s11 + $0xeb8] sm:$0xff] }
 0x14c   : > { %v1671_v52 = vmul.f32 %v4687_v1, %v646_v36  ;;  %3713 = vst [vmem:[%s4721_s25 + $0xdd8] sm:$0xff] %v2689_v44  ;;  %3714 = vst [vmem:[%s4721_s25 + $0xde0] sm:$0xff] %v2690_v45  ;;  %v2693_v54 = vadd.f32 %v4692_v5, %v1668_v47  ;;  %v1672_v55 = vmul.f32 %v4687_v1, %v647_v41  ;;  %v668_v44 = vld [vmem:[%s4680_s11 + $0xec0] sm:$0xff]  ;;  %v669_v45 = vld [vmem:[%s4680_s11 + $0xec8] sm:$0xff] }
 0x14d   : > { %3715 = vst [vmem:[%s4721_s25 + $0xde8] sm:$0xff] %v2691_v46  ;;  %v1673_v56 = vmul.f32 %v4687_v1, %v648_v42  ;;  %v1674_v57 = vmul.f32 %v4687_v1, %v649_v43  ;;  %3716 = vst [vmem:[%s4721_s25 + $0xdf0] sm:$0xff] %v2692_v49  ;;  %v2694_v61 = vadd.f32 %v4692_v5, %v1669_v50  ;;  %v670_v46 = vld [vmem:[%s4680_s11 + $0xed0] sm:$0xff] }
 0x14e   : > { %v2695_v62 = vadd.f32 %v4692_v5, %v1670_v51  ;;  %v2696_v63 = vadd.f32 %v4692_v5, %v1671_v52  ;;  %v1675_v0 = vmul.f32 %v4687_v1, %v650_v48  ;;  %3717 = vst [vmem:[%s4721_s25 + $0xdf8] sm:$0xff] %v2693_v54  ;;  %v2697_v6 = vadd.f32 %v4692_v5, %v1672_v55  ;;  %v671_v51 = vld [vmem:[%s4680_s11 + $0xed8] sm:$0xff]  ;;  %v672_v52 = vld [vmem:[%s4680_s11 + $0xee0] sm:$0xff] }
 0x14f   : > { %v2698_v7 = vadd.f32 %v4692_v5, %v1673_v56  ;;  %v2699_v8 = vadd.f32 %v4692_v5, %v1674_v57  ;;  %v1676_v9 = vmul.f32 %v4687_v1, %v651_v53  ;;  %3718 = vst [vmem:[%s4721_s25 + $0xe00] sm:$0xff] %v2694_v61  ;;  %v1677_v12 = vmul.f32 %v4687_v1, %v652_v58  ;;  %v673_v53 = vld [vmem:[%s4680_s11 + $0xee8] sm:$0xff]  ;;  %v674_v58 = vld [vmem:[%s4680_s11 + $0xef0] sm:$0xff] }
 0x150   : > { %3719 = vst [vmem:[%s4721_s25 + $0xe08] sm:$0xff] %v2695_v62  ;;  %3720 = vst [vmem:[%s4721_s25 + $0xe10] sm:$0xff] %v2696_v63  ;;  %v2700_v11 = vadd.f32 %v4692_v5, %v1675_v0  ;;  %v1678_v13 = vmul.f32 %v4687_v1, %v653_v59  ;;  %v1679_v14 = vmul.f32 %v4687_v1, %v654_v60  ;;  %v675_v63 = vld [vmem:[%s4680_s11 + $0xef8] sm:$0xff] }
 0x151   : > { %3721 = vst [vmem:[%s4721_s25 + $0xe18] sm:$0xff] %v2697_v6  ;;  %3722 = vst [vmem:[%s4721_s25 + $0xe20] sm:$0xff] %v2698_v7  ;;  %v2701_v16 = vadd.f32 %v4692_v5, %v1676_v9  ;;  %v1680_v17 = vmul.f32 %v4687_v1, %v655_v2  ;;  %v1681_v18 = vmul.f32 %v4687_v1, %v656_v3  ;;  %v676_v6 = vld [vmem:[%s4680_s11 + $0xf00] sm:$0xff]  ;;  %v677_v7 = vld [vmem:[%s4680_s11 + $0xf08] sm:$0xff] }
 0x152   : > { %3723 = vst [vmem:[%s4721_s25 + $0xe28] sm:$0xff] %v2699_v8  ;;  %v1682_v19 = vmul.f32 %v4687_v1, %v657_v4  ;;  %3724 = vst [vmem:[%s4721_s25 + $0xe30] sm:$0xff] %v2700_v11  ;;  %v2702_v23 = vadd.f32 %v4692_v5, %v1677_v12  ;;  %v2703_v24 = vadd.f32 %v4692_v5, %v1678_v13  ;;  %v678_v8 = vld [vmem:[%s4680_s11 + $0xf10] sm:$0xff]  ;;  %v679_v13 = vld [vmem:[%s4680_s11 + $0xf18] sm:$0xff] }
 0x153   : > { %v2704_v25 = vadd.f32 %v4692_v5, %v1679_v14  ;;  %v1683_v26 = vmul.f32 %v4687_v1, %v658_v10  ;;  %3725 = vst [vmem:[%s4721_s25 + $0xe38] sm:$0xff] %v2701_v16  ;;  %v2705_v30 = vadd.f32 %v4692_v5, %v1680_v17  ;;  %v2706_v31 = vadd.f32 %v4692_v5, %v1681_v18  ;;  %v680_v14 = vld [vmem:[%s4680_s11 + $0xf20] sm:$0xff] }
 0x154   : > { %v2707_v32 = vadd.f32 %v4692_v5, %v1682_v19  ;;  %v1684_v33 = vmul.f32 %v4687_v1, %v659_v15  ;;  %3726 = vst [vmem:[%s4721_s25 + $0xe40] sm:$0xff] %v2702_v23  ;;  %3727 = vst [vmem:[%s4721_s25 + $0xe48] sm:$0xff] %v2703_v24  ;;  %v1685_v36 = vmul.f32 %v4687_v1, %v660_v20  ;;  %v681_v15 = vld [vmem:[%s4680_s11 + $0xf28] sm:$0xff]  ;;  %v682_v20 = vld [vmem:[%s4680_s11 + $0xf30] sm:$0xff] }
 0x155   : > { %3728 = vst [vmem:[%s4721_s25 + $0xe50] sm:$0xff] %v2704_v25  ;;  %v2708_v35 = vadd.f32 %v4692_v5, %v1683_v26  ;;  %v1686_v37 = vmul.f32 %v4687_v1, %v661_v21  ;;  %v1687_v38 = vmul.f32 %v4687_v1, %v662_v22  ;;  %3729 = vst [vmem:[%s4721_s25 + $0xe58] sm:$0xff] %v2705_v30  ;;  %v683_v25 = vld [vmem:[%s4680_s11 + $0xf38] sm:$0xff]  ;;  %v684_v30 = vld [vmem:[%s4680_s11 + $0xf40] sm:$0xff] }
 0x156   : > { %3730 = vst [vmem:[%s4721_s25 + $0xe60] sm:$0xff] %v2706_v31  ;;  %3731 = vst [vmem:[%s4721_s25 + $0xe68] sm:$0xff] %v2707_v32  ;;  %v2709_v40 = vadd.f32 %v4692_v5, %v1684_v33  ;;  %v1688_v41 = vmul.f32 %v4687_v1, %v663_v27  ;;  %v1689_v42 = vmul.f32 %v4687_v1, %v664_v28  ;;  %v685_v31 = vld [vmem:[%s4680_s11 + $0xf48] sm:$0xff]  ;;  %v686_v32 = vld [vmem:[%s4680_s11 + $0xf50] sm:$0xff] }
 0x157   : > { %v1690_v43 = vmul.f32 %v4687_v1, %v665_v29  ;;  %3732 = vst [vmem:[%s4721_s25 + $0xe70] sm:$0xff] %v2708_v35  ;;  %v2710_v47 = vadd.f32 %v4692_v5, %v1685_v36  ;;  %v2711_v48 = vadd.f32 %v4692_v5, %v1686_v37  ;;  %v2712_v49 = vadd.f32 %v4692_v5, %v1687_v38  ;;  %v687_v37 = vld [vmem:[%s4680_s11 + $0xf58] sm:$0xff]  ;;  %v688_v38 = vld [vmem:[%s4680_s11 + $0xf60] sm:$0xff] }
 0x158   : > { %v1691_v50 = vmul.f32 %v4687_v1, %v666_v34  ;;  %3733 = vst [vmem:[%s4721_s25 + $0xe78] sm:$0xff] %v2709_v40  ;;  %v2713_v54 = vadd.f32 %v4692_v5, %v1688_v41  ;;  %v2714_v55 = vadd.f32 %v4692_v5, %v1689_v42  ;;  %v1692_v57 = vmul.f32 %v4687_v1, %v667_v39  ;;  %v689_v39 = vld [vmem:[%s4680_s11 + $0xf68] sm:$0xff] }
 0x159   : > { %v2715_v56 = vadd.f32 %v4692_v5, %v1690_v43  ;;  %3734 = vst [vmem:[%s4721_s25 + $0xe80] sm:$0xff] %v2710_v47  ;;  %3735 = vst [vmem:[%s4721_s25 + $0xe88] sm:$0xff] %v2711_v48  ;;  %v1693_v60 = vmul.f32 %v4687_v1, %v668_v44  ;;  %v1694_v61 = vmul.f32 %v4687_v1, %v669_v45  ;;  %v690_v44 = vld [vmem:[%s4680_s11 + $0xf70] sm:$0xff] }
 0x15a   : > { %3736 = vst [vmem:[%s4721_s25 + $0xe90] sm:$0xff] %v2712_v49  ;;  %v2716_v59 = vadd.f32 %v4692_v5, %v1691_v50  ;;  %v1695_v62 = vmul.f32 %v4687_v1, %v670_v46  ;;  %3737 = vst [vmem:[%s4721_s25 + $0xe98] sm:$0xff] %v2713_v54  ;;  %v2717_v0 = vadd.f32 %v4692_v5, %v1692_v57  ;;  %v691_v49 = vld [vmem:[%s4680_s11 + $0xf78] sm:$0xff]  ;;  %v692_v54 = vld [vmem:[%s4680_s11 + $0xf80] sm:$0xff] }
 0x15b   : > { %3738 = vst [vmem:[%s4721_s25 + $0xea0] sm:$0xff] %v2714_v55  ;;  %3739 = vst [vmem:[%s4721_s25 + $0xea8] sm:$0xff] %v2715_v56  ;;  %v1696_v2 = vmul.f32 %v4687_v1, %v671_v51  ;;  %v1697_v3 = vmul.f32 %v4687_v1, %v672_v52  ;;  %v1698_v4 = vmul.f32 %v4687_v1, %v673_v53  ;;  %v693_v55 = vld [vmem:[%s4680_s11 + $0xf88] sm:$0xff]  ;;  %v694_v56 = vld [vmem:[%s4680_s11 + $0xf90] sm:$0xff] }
 0x15c   : > { %3740 = vst [vmem:[%s4721_s25 + $0xeb0] sm:$0xff] %v2716_v59  ;;  %v2718_v9 = vadd.f32 %v4692_v5, %v1693_v60  ;;  %v2719_v10 = vadd.f32 %v4692_v5, %v1694_v61  ;;  %v2720_v11 = vadd.f32 %v4692_v5, %v1695_v62  ;;  %v1699_v12 = vmul.f32 %v4687_v1, %v674_v58  ;;  %v695_v61 = vld [vmem:[%s4680_s11 + $0xf98] sm:$0xff]  ;;  %v696_v62 = vld [vmem:[%s4680_s11 + $0xfa0] sm:$0xff] }
 0x15d   : > { %3741 = vst [vmem:[%s4721_s25 + $0xeb8] sm:$0xff] %v2717_v0  ;;  %v2721_v16 = vadd.f32 %v4692_v5, %v1696_v2  ;;  %v2722_v17 = vadd.f32 %v4692_v5, %v1697_v3  ;;  %v2723_v18 = vadd.f32 %v4692_v5, %v1698_v4  ;;  %v1700_v19 = vmul.f32 %v4687_v1, %v675_v63  ;;  %v697_v63 = vld [vmem:[%s4680_s11 + $0xfa8] sm:$0xff] }
 0x15e   : > { %3742 = vst [vmem:[%s4721_s25 + $0xec0] sm:$0xff] %v2718_v9  ;;  %3743 = vst [vmem:[%s4721_s25 + $0xec8] sm:$0xff] %v2719_v10  ;;  %v2724_v21 = vadd.f32 %v4692_v5, %v1699_v12  ;;  %v1701_v22 = vmul.f32 %v4687_v1, %v676_v6  ;;  %v1702_v23 = vmul.f32 %v4687_v1, %v677_v7  ;;  %v698_v6 = vld [vmem:[%s4680_s11 + $0xfb0] sm:$0xff] }
 0x15f   : > { %3744 = vst [vmem:[%s4721_s25 + $0xed0] sm:$0xff] %v2720_v11  ;;  %v1703_v24 = vmul.f32 %v4687_v1, %v678_v8  ;;  %3745 = vst [vmem:[%s4721_s25 + $0xed8] sm:$0xff] %v2721_v16  ;;  %v2725_v26 = vadd.f32 %v4692_v5, %v1700_v19  ;;  %v1704_v27 = vmul.f32 %v4687_v1, %v679_v13  ;;  %v699_v11 = vld [vmem:[%s4680_s11 + $0xfb8] sm:$0xff]  ;;  %v700_v16 = vld [vmem:[%s4680_s11 + $0xfc0] sm:$0xff] }
 0x160   : > { %3746 = vst [vmem:[%s4721_s25 + $0xee0] sm:$0xff] %v2722_v17  ;;  %3747 = vst [vmem:[%s4721_s25 + $0xee8] sm:$0xff] %v2723_v18  ;;  %v1705_v28 = vmul.f32 %v4687_v1, %v680_v14  ;;  %v1706_v29 = vmul.f32 %v4687_v1, %v681_v15  ;;  %v2726_v33 = vadd.f32 %v4692_v5, %v1701_v22  ;;  %v701_v17 = vld [vmem:[%s4680_s11 + $0xfc8] sm:$0xff]  ;;  %v702_v18 = vld [vmem:[%s4680_s11 + $0xfd0] sm:$0xff] }
 0x161   : > { %3748 = vst [vmem:[%s4721_s25 + $0xef0] sm:$0xff] %v2724_v21  ;;  %v2727_v34 = vadd.f32 %v4692_v5, %v1702_v23  ;;  %v2728_v35 = vadd.f32 %v4692_v5, %v1703_v24  ;;  %v1707_v36 = vmul.f32 %v4687_v1, %v682_v20  ;;  %3749 = vst [vmem:[%s4721_s25 + $0xef8] sm:$0xff] %v2725_v26  ;;  %v703_v23 = vld [vmem:[%s4680_s11 + $0xfd8] sm:$0xff]  ;;  %v704_v24 = vld [vmem:[%s4680_s11 + $0xfe0] sm:$0xff] }
 0x162   : > { %v2729_v40 = vadd.f32 %v4692_v5, %v1704_v27  ;;  %v2730_v41 = vadd.f32 %v4692_v5, %v1705_v28  ;;  %v2731_v42 = vadd.f32 %v4692_v5, %v1706_v29  ;;  %v1708_v43 = vmul.f32 %v4687_v1, %v683_v25  ;;  %3750 = vst [vmem:[%s4721_s25 + $0xf00] sm:$0xff] %v2726_v33  ;;  %v705_v25 = vld [vmem:[%s4680_s11 + $0xfe8] sm:$0xff] }
 0x163   : > { %3751 = vst [vmem:[%s4721_s25 + $0xf08] sm:$0xff] %v2727_v34  ;;  %3752 = vst [vmem:[%s4721_s25 + $0xf10] sm:$0xff] %v2728_v35  ;;  %v2732_v45 = vadd.f32 %v4692_v5, %v1707_v36  ;;  %v1709_v46 = vmul.f32 %v4687_v1, %v684_v30  ;;  %v1710_v47 = vmul.f32 %v4687_v1, %v685_v31  ;;  %v706_v30 = vld [vmem:[%s4680_s11 + $0xff0] sm:$0xff]  ;;  %v707_v35 = vld [vmem:[%s4680_s11 + $0xff8] sm:$0xff] }
 0x164   : > { %v1711_v48 = vmul.f32 %v4687_v1, %v686_v32  ;;  %3753 = vst [vmem:[%s4721_s25 + $0xf18] sm:$0xff] %v2729_v40  ;;  %3754 = vst [vmem:[%s4721_s25 + $0xf20] sm:$0xff] %v2730_v41  ;;  %v2733_v50 = vadd.f32 %v4692_v5, %v1708_v43  ;;  %v1712_v51 = vmul.f32 %v4687_v1, %v687_v37  ;;  %v708_v40 = vld [vmem:[%s4680_s11 + $0x1000] sm:$0xff]  ;;  %v709_v41 = vld [vmem:[%s4680_s11 + $0x1008] sm:$0xff] }
 0x165   : > { %3755 = vst [vmem:[%s4721_s25 + $0xf28] sm:$0xff] %v2731_v42  ;;  %v1713_v52 = vmul.f32 %v4687_v1, %v688_v38  ;;  %v1714_v53 = vmul.f32 %v4687_v1, %v689_v39  ;;  %3756 = vst [vmem:[%s4721_s25 + $0xf30] sm:$0xff] %v2732_v45  ;;  %v2734_v57 = vadd.f32 %v4692_v5, %v1709_v46  ;;  %v710_v42 = vld [vmem:[%s4680_s11 + $0x1010] sm:$0xff] }
 0x166   : > { %v2735_v58 = vadd.f32 %v4692_v5, %v1710_v47  ;;  %v2736_v59 = vadd.f32 %v4692_v5, %v1711_v48  ;;  %v1715_v60 = vmul.f32 %v4687_v1, %v690_v44  ;;  %3757 = vst [vmem:[%s4721_s25 + $0xf38] sm:$0xff] %v2733_v50  ;;  %v2737_v0 = vadd.f32 %v4692_v5, %v1712_v51  ;;  %v711_v47 = vld [vmem:[%s4680_s11 + $0x1018] sm:$0xff]  ;;  %v712_v48 = vld [vmem:[%s4680_s11 + $0x1020] sm:$0xff] }
 0x167   : > { %v2738_v2 = vadd.f32 %v4692_v5, %v1713_v52  ;;  %v2739_v3 = vadd.f32 %v4692_v5, %v1714_v53  ;;  %v1716_v4 = vmul.f32 %v4687_v1, %v691_v49  ;;  %3758 = vst [vmem:[%s4721_s25 + $0xf40] sm:$0xff] %v2734_v57  ;;  %v1717_v8 = vmul.f32 %v4687_v1, %v692_v54  ;;  %v713_v49 = vld [vmem:[%s4680_s11 + $0x1028] sm:$0xff]  ;;  %v714_v54 = vld [vmem:[%s4680_s11 + $0x1030] sm:$0xff] }
 0x168   : > { %3759 = vst [vmem:[%s4721_s25 + $0xf48] sm:$0xff] %v2735_v58  ;;  %3760 = vst [vmem:[%s4721_s25 + $0xf50] sm:$0xff] %v2736_v59  ;;  %v2740_v7 = vadd.f32 %v4692_v5, %v1715_v60  ;;  %v1718_v9 = vmul.f32 %v4687_v1, %v693_v55  ;;  %v1719_v10 = vmul.f32 %v4687_v1, %v694_v56  ;;  %v715_v59 = vld [vmem:[%s4680_s11 + $0x1038] sm:$0xff] }
 0x169   : > { %3761 = vst [vmem:[%s4721_s25 + $0xf58] sm:$0xff] %v2737_v0  ;;  %3762 = vst [vmem:[%s4721_s25 + $0xf60] sm:$0xff] %v2738_v2  ;;  %v2741_v12 = vadd.f32 %v4692_v5, %v1716_v4  ;;  %v1720_v13 = vmul.f32 %v4687_v1, %v695_v61  ;;  %v1721_v14 = vmul.f32 %v4687_v1, %v696_v62  ;;  %v716_v0 = vld [vmem:[%s4680_s11 + $0x1040] sm:$0xff]  ;;  %v717_v2 = vld [vmem:[%s4680_s11 + $0x1048] sm:$0xff] }
 0x16a   : > { %3763 = vst [vmem:[%s4721_s25 + $0xf68] sm:$0xff] %v2739_v3  ;;  %v1722_v15 = vmul.f32 %v4687_v1, %v697_v63  ;;  %3764 = vst [vmem:[%s4721_s25 + $0xf70] sm:$0xff] %v2740_v7  ;;  %v2742_v19 = vadd.f32 %v4692_v5, %v1717_v8  ;;  %v2743_v20 = vadd.f32 %v4692_v5, %v1718_v9  ;;  %v718_v3 = vld [vmem:[%s4680_s11 + $0x1050] sm:$0xff]  ;;  %v719_v9 = vld [vmem:[%s4680_s11 + $0x1058] sm:$0xff] }
 0x16b   : > { %v2744_v21 = vadd.f32 %v4692_v5, %v1719_v10  ;;  %v1723_v22 = vmul.f32 %v4687_v1, %v698_v6  ;;  %3765 = vst [vmem:[%s4721_s25 + $0xf78] sm:$0xff] %v2741_v12  ;;  %v2745_v26 = vadd.f32 %v4692_v5, %v1720_v13  ;;  %v2746_v27 = vadd.f32 %v4692_v5, %v1721_v14  ;;  %v720_v10 = vld [vmem:[%s4680_s11 + $0x1060] sm:$0xff] }
 0x16c   : > { %v2747_v28 = vadd.f32 %v4692_v5, %v1722_v15  ;;  %v1724_v29 = vmul.f32 %v4687_v1, %v699_v11  ;;  %3766 = vst [vmem:[%s4721_s25 + $0xf80] sm:$0xff] %v2742_v19  ;;  %3767 = vst [vmem:[%s4721_s25 + $0xf88] sm:$0xff] %v2743_v20  ;;  %v1725_v32 = vmul.f32 %v4687_v1, %v700_v16  ;;  %v721_v11 = vld [vmem:[%s4680_s11 + $0x1068] sm:$0xff]  ;;  %v722_v16 = vld [vmem:[%s4680_s11 + $0x1070] sm:$0xff] }
 0x16d   : > { %3768 = vst [vmem:[%s4721_s25 + $0xf90] sm:$0xff] %v2744_v21  ;;  %v2748_v31 = vadd.f32 %v4692_v5, %v1723_v22  ;;  %v1726_v33 = vmul.f32 %v4687_v1, %v701_v17  ;;  %v1727_v34 = vmul.f32 %v4687_v1, %v702_v18  ;;  %3769 = vst [vmem:[%s4721_s25 + $0xf98] sm:$0xff] %v2745_v26  ;;  %v723_v21 = vld [vmem:[%s4680_s11 + $0x1078] sm:$0xff]  ;;  %v724_v26 = vld [vmem:[%s4680_s11 + $0x1080] sm:$0xff] }
 0x16e   : > { %3770 = vst [vmem:[%s4721_s25 + $0xfa0] sm:$0xff] %v2746_v27  ;;  %3771 = vst [vmem:[%s4721_s25 + $0xfa8] sm:$0xff] %v2747_v28  ;;  %v2749_v36 = vadd.f32 %v4692_v5, %v1724_v29  ;;  %v1728_v37 = vmul.f32 %v4687_v1, %v703_v23  ;;  %v1729_v38 = vmul.f32 %v4687_v1, %v704_v24  ;;  %v725_v27 = vld [vmem:[%s4680_s11 + $0x1088] sm:$0xff]  ;;  %v726_v28 = vld [vmem:[%s4680_s11 + $0x1090] sm:$0xff] }
 0x16f   : > { %v1730_v39 = vmul.f32 %v4687_v1, %v705_v25  ;;  %3772 = vst [vmem:[%s4721_s25 + $0xfb0] sm:$0xff] %v2748_v31  ;;  %v2750_v43 = vadd.f32 %v4692_v5, %v1725_v32  ;;  %v2751_v44 = vadd.f32 %v4692_v5, %v1726_v33  ;;  %v2752_v45 = vadd.f32 %v4692_v5, %v1727_v34  ;;  %v727_v33 = vld [vmem:[%s4680_s11 + $0x1098] sm:$0xff]  ;;  %v728_v34 = vld [vmem:[%s4680_s11 + $0x10a0] sm:$0xff] }
 0x170   : > { %v1731_v46 = vmul.f32 %v4687_v1, %v706_v30  ;;  %3773 = vst [vmem:[%s4721_s25 + $0xfb8] sm:$0xff] %v2749_v36  ;;  %v2753_v50 = vadd.f32 %v4692_v5, %v1728_v37  ;;  %v2754_v51 = vadd.f32 %v4692_v5, %v1729_v38  ;;  %v1732_v53 = vmul.f32 %v4687_v1, %v707_v35  ;;  %v729_v35 = vld [vmem:[%s4680_s11 + $0x10a8] sm:$0xff] }
 0x171   : > { %v2755_v52 = vadd.f32 %v4692_v5, %v1730_v39  ;;  %3774 = vst [vmem:[%s4721_s25 + $0xfc0] sm:$0xff] %v2750_v43  ;;  %3775 = vst [vmem:[%s4721_s25 + $0xfc8] sm:$0xff] %v2751_v44  ;;  %v1733_v56 = vmul.f32 %v4687_v1, %v708_v40  ;;  %v1734_v57 = vmul.f32 %v4687_v1, %v709_v41  ;;  %v730_v40 = vld [vmem:[%s4680_s11 + $0x10b0] sm:$0xff] }
 0x172   : > { %3776 = vst [vmem:[%s4721_s25 + $0xfd0] sm:$0xff] %v2752_v45  ;;  %v2756_v55 = vadd.f32 %v4692_v5, %v1731_v46  ;;  %v1735_v58 = vmul.f32 %v4687_v1, %v710_v42  ;;  %3777 = vst [vmem:[%s4721_s25 + $0xfd8] sm:$0xff] %v2753_v50  ;;  %v2757_v60 = vadd.f32 %v4692_v5, %v1732_v53  ;;  %v731_v45 = vld [vmem:[%s4680_s11 + $0x10b8] sm:$0xff]  ;;  %v732_v50 = vld [vmem:[%s4680_s11 + $0x10c0] sm:$0xff] }
 0x173   : > { %3778 = vst [vmem:[%s4721_s25 + $0xfe0] sm:$0xff] %v2754_v51  ;;  %3779 = vst [vmem:[%s4721_s25 + $0xfe8] sm:$0xff] %v2755_v52  ;;  %v1736_v61 = vmul.f32 %v4687_v1, %v711_v47  ;;  %v1737_v62 = vmul.f32 %v4687_v1, %v712_v48  ;;  %v1738_v63 = vmul.f32 %v4687_v1, %v713_v49  ;;  %v733_v51 = vld [vmem:[%s4680_s11 + $0x10c8] sm:$0xff]  ;;  %v734_v52 = vld [vmem:[%s4680_s11 + $0x10d0] sm:$0xff] }
 0x174   : > { %3780 = vst [vmem:[%s4721_s25 + $0xff0] sm:$0xff] %v2756_v55  ;;  %v2758_v4 = vadd.f32 %v4692_v5, %v1733_v56  ;;  %v2759_v6 = vadd.f32 %v4692_v5, %v1734_v57  ;;  %v2760_v7 = vadd.f32 %v4692_v5, %v1735_v58  ;;  %v1739_v8 = vmul.f32 %v4687_v1, %v714_v54  ;;  %v735_v57 = vld [vmem:[%s4680_s11 + $0x10d8] sm:$0xff]  ;;  %v736_v58 = vld [vmem:[%s4680_s11 + $0x10e0] sm:$0xff] }
 0x175   : > { %3781 = vst [vmem:[%s4721_s25 + $0xff8] sm:$0xff] %v2757_v60  ;;  %v2761_v12 = vadd.f32 %v4692_v5, %v1736_v61  ;;  %v2762_v13 = vadd.f32 %v4692_v5, %v1737_v62  ;;  %v2763_v14 = vadd.f32 %v4692_v5, %v1738_v63  ;;  %v1740_v15 = vmul.f32 %v4687_v1, %v715_v59  ;;  %v737_v59 = vld [vmem:[%s4680_s11 + $0x10e8] sm:$0xff] }
 0x176   : > { %3782 = vst [vmem:[%s4721_s25 + $0x1000] sm:$0xff] %v2758_v4  ;;  %3783 = vst [vmem:[%s4721_s25 + $0x1008] sm:$0xff] %v2759_v6  ;;  %v2764_v17 = vadd.f32 %v4692_v5, %v1739_v8  ;;  %v1741_v18 = vmul.f32 %v4687_v1, %v716_v0  ;;  %v1742_v19 = vmul.f32 %v4687_v1, %v717_v2  ;;  %v738_v0 = vld [vmem:[%s4680_s11 + $0x10f0] sm:$0xff] }
 0x177   : > { %3784 = vst [vmem:[%s4721_s25 + $0x1010] sm:$0xff] %v2760_v7  ;;  %v1743_v20 = vmul.f32 %v4687_v1, %v718_v3  ;;  %3785 = vst [vmem:[%s4721_s25 + $0x1018] sm:$0xff] %v2761_v12  ;;  %v2765_v22 = vadd.f32 %v4692_v5, %v1740_v15  ;;  %v1744_v23 = vmul.f32 %v4687_v1, %v719_v9  ;;  %v739_v7 = vld [vmem:[%s4680_s11 + $0x10f8] sm:$0xff]  ;;  %v740_v12 = vld [vmem:[%s4680_s11 + $0x1100] sm:$0xff] }
 0x178   : > { %3786 = vst [vmem:[%s4721_s25 + $0x1020] sm:$0xff] %v2762_v13  ;;  %3787 = vst [vmem:[%s4721_s25 + $0x1028] sm:$0xff] %v2763_v14  ;;  %v1745_v24 = vmul.f32 %v4687_v1, %v720_v10  ;;  %v1746_v25 = vmul.f32 %v4687_v1, %v721_v11  ;;  %v2766_v29 = vadd.f32 %v4692_v5, %v1741_v18  ;;  %v741_v13 = vld [vmem:[%s4680_s11 + $0x1108] sm:$0xff]  ;;  %v742_v14 = vld [vmem:[%s4680_s11 + $0x1110] sm:$0xff] }
 0x179   : > { %3788 = vst [vmem:[%s4721_s25 + $0x1030] sm:$0xff] %v2764_v17  ;;  %v2767_v30 = vadd.f32 %v4692_v5, %v1742_v19  ;;  %v2768_v31 = vadd.f32 %v4692_v5, %v1743_v20  ;;  %v1747_v32 = vmul.f32 %v4687_v1, %v722_v16  ;;  %3789 = vst [vmem:[%s4721_s25 + $0x1038] sm:$0xff] %v2765_v22  ;;  %v743_v19 = vld [vmem:[%s4680_s11 + $0x1118] sm:$0xff]  ;;  %v744_v20 = vld [vmem:[%s4680_s11 + $0x1120] sm:$0xff] }
 0x17a   : > { %v2769_v36 = vadd.f32 %v4692_v5, %v1744_v23  ;;  %v2770_v37 = vadd.f32 %v4692_v5, %v1745_v24  ;;  %v2771_v38 = vadd.f32 %v4692_v5, %v1746_v25  ;;  %v1748_v39 = vmul.f32 %v4687_v1, %v723_v21  ;;  %3790 = vst [vmem:[%s4721_s25 + $0x1040] sm:$0xff] %v2766_v29  ;;  %v745_v21 = vld [vmem:[%s4680_s11 + $0x1128] sm:$0xff] }
 0x17b   : > { %3791 = vst [vmem:[%s4721_s25 + $0x1048] sm:$0xff] %v2767_v30  ;;  %3792 = vst [vmem:[%s4721_s25 + $0x1050] sm:$0xff] %v2768_v31  ;;  %v2772_v41 = vadd.f32 %v4692_v5, %v1747_v32  ;;  %v1749_v42 = vmul.f32 %v4687_v1, %v724_v26  ;;  %v1750_v43 = vmul.f32 %v4687_v1, %v725_v27  ;;  %v746_v26 = vld [vmem:[%s4680_s11 + $0x1130] sm:$0xff]  ;;  %v747_v31 = vld [vmem:[%s4680_s11 + $0x1138] sm:$0xff] }
 0x17c   : > { %v1751_v44 = vmul.f32 %v4687_v1, %v726_v28  ;;  %3793 = vst [vmem:[%s4721_s25 + $0x1058] sm:$0xff] %v2769_v36  ;;  %3794 = vst [vmem:[%s4721_s25 + $0x1060] sm:$0xff] %v2770_v37  ;;  %v2773_v46 = vadd.f32 %v4692_v5, %v1748_v39  ;;  %v1752_v47 = vmul.f32 %v4687_v1, %v727_v33  ;;  %v748_v36 = vld [vmem:[%s4680_s11 + $0x1140] sm:$0xff]  ;;  %v749_v37 = vld [vmem:[%s4680_s11 + $0x1148] sm:$0xff] }
 0x17d   : > { %3795 = vst [vmem:[%s4721_s25 + $0x1068] sm:$0xff] %v2771_v38  ;;  %v1753_v48 = vmul.f32 %v4687_v1, %v728_v34  ;;  %v1754_v49 = vmul.f32 %v4687_v1, %v729_v35  ;;  %3796 = vst [vmem:[%s4721_s25 + $0x1070] sm:$0xff] %v2772_v41  ;;  %v2774_v53 = vadd.f32 %v4692_v5, %v1749_v42  ;;  %v750_v38 = vld [vmem:[%s4680_s11 + $0x1150] sm:$0xff] }
 0x17e   : > { %v2775_v54 = vadd.f32 %v4692_v5, %v1750_v43  ;;  %v2776_v55 = vadd.f32 %v4692_v5, %v1751_v44  ;;  %v1755_v56 = vmul.f32 %v4687_v1, %v730_v40  ;;  %3797 = vst [vmem:[%s4721_s25 + $0x1078] sm:$0xff] %v2773_v46  ;;  %v2777_v60 = vadd.f32 %v4692_v5, %v1752_v47  ;;  %v751_v43 = vld [vmem:[%s4680_s11 + $0x1158] sm:$0xff]  ;;  %v752_v44 = vld [vmem:[%s4680_s11 + $0x1160] sm:$0xff] }
 0x17f   : > { %v2778_v61 = vadd.f32 %v4692_v5, %v1753_v48  ;;  %v2779_v62 = vadd.f32 %v4692_v5, %v1754_v49  ;;  %v1756_v63 = vmul.f32 %v4687_v1, %v731_v45  ;;  %3798 = vst [vmem:[%s4721_s25 + $0x1080] sm:$0xff] %v2774_v53  ;;  %v1757_v3 = vmul.f32 %v4687_v1, %v732_v50  ;;  %v753_v45 = vld [vmem:[%s4680_s11 + $0x1168] sm:$0xff]  ;;  %v754_v50 = vld [vmem:[%s4680_s11 + $0x1170] sm:$0xff] }
 0x180   : > { %3799 = vst [vmem:[%s4721_s25 + $0x1088] sm:$0xff] %v2775_v54  ;;  %3800 = vst [vmem:[%s4721_s25 + $0x1090] sm:$0xff] %v2776_v55  ;;  %v2780_v2 = vadd.f32 %v4692_v5, %v1755_v56  ;;  %v1758_v4 = vmul.f32 %v4687_v1, %v733_v51  ;;  %v1759_v6 = vmul.f32 %v4687_v1, %v734_v52  ;;  %v755_v55 = vld [vmem:[%s4680_s11 + $0x1178] sm:$0xff] }
 0x181   : > { %3801 = vst [vmem:[%s4721_s25 + $0x1098] sm:$0xff] %v2777_v60  ;;  %3802 = vst [vmem:[%s4721_s25 + $0x10a0] sm:$0xff] %v2778_v61  ;;  %v2781_v8 = vadd.f32 %v4692_v5, %v1756_v63  ;;  %v1760_v9 = vmul.f32 %v4687_v1, %v735_v57  ;;  %v1761_v10 = vmul.f32 %v4687_v1, %v736_v58  ;;  %v756_v60 = vld [vmem:[%s4680_s11 + $0x1180] sm:$0xff]  ;;  %v757_v61 = vld [vmem:[%s4680_s11 + $0x1188] sm:$0xff] }
 0x182   : > { %3803 = vst [vmem:[%s4721_s25 + $0x10a8] sm:$0xff] %v2779_v62  ;;  %v1762_v11 = vmul.f32 %v4687_v1, %v737_v59  ;;  %3804 = vst [vmem:[%s4721_s25 + $0x10b0] sm:$0xff] %v2780_v2  ;;  %v2782_v15 = vadd.f32 %v4692_v5, %v1757_v3  ;;  %v2783_v16 = vadd.f32 %v4692_v5, %v1758_v4  ;;  %v758_v62 = vld [vmem:[%s4680_s11 + $0x1190] sm:$0xff]  ;;  %v759_v4 = vld [vmem:[%s4680_s11 + $0x1198] sm:$0xff] }
 0x183   : > { %v2784_v17 = vadd.f32 %v4692_v5, %v1759_v6  ;;  %v1763_v18 = vmul.f32 %v4687_v1, %v738_v0  ;;  %3805 = vst [vmem:[%s4721_s25 + $0x10b8] sm:$0xff] %v2781_v8  ;;  %v2785_v22 = vadd.f32 %v4692_v5, %v1760_v9  ;;  %v2786_v23 = vadd.f32 %v4692_v5, %v1761_v10  ;;  %v760_v6 = vld [vmem:[%s4680_s11 + $0x11a0] sm:$0xff] }
 0x184   : > { %v2787_v24 = vadd.f32 %v4692_v5, %v1762_v11  ;;  %v1764_v25 = vmul.f32 %v4687_v1, %v739_v7  ;;  %3806 = vst [vmem:[%s4721_s25 + $0x10c0] sm:$0xff] %v2782_v15  ;;  %3807 = vst [vmem:[%s4721_s25 + $0x10c8] sm:$0xff] %v2783_v16  ;;  %v1765_v28 = vmul.f32 %v4687_v1, %v740_v12  ;;  %v761_v7 = vld [vmem:[%s4680_s11 + $0x11a8] sm:$0xff]  ;;  %v762_v12 = vld [vmem:[%s4680_s11 + $0x11b0] sm:$0xff] }
 0x185   : > { %3808 = vst [vmem:[%s4721_s25 + $0x10d0] sm:$0xff] %v2784_v17  ;;  %v2788_v27 = vadd.f32 %v4692_v5, %v1763_v18  ;;  %v1766_v29 = vmul.f32 %v4687_v1, %v741_v13  ;;  %v1767_v30 = vmul.f32 %v4687_v1, %v742_v14  ;;  %3809 = vst [vmem:[%s4721_s25 + $0x10d8] sm:$0xff] %v2785_v22  ;;  %v763_v17 = vld [vmem:[%s4680_s11 + $0x11b8] sm:$0xff]  ;;  %v764_v22 = vld [vmem:[%s4680_s11 + $0x11c0] sm:$0xff] }
 0x186   : > { %3810 = vst [vmem:[%s4721_s25 + $0x10e0] sm:$0xff] %v2786_v23  ;;  %3811 = vst [vmem:[%s4721_s25 + $0x10e8] sm:$0xff] %v2787_v24  ;;  %v2789_v32 = vadd.f32 %v4692_v5, %v1764_v25  ;;  %v1768_v33 = vmul.f32 %v4687_v1, %v743_v19  ;;  %v1769_v34 = vmul.f32 %v4687_v1, %v744_v20  ;;  %v765_v23 = vld [vmem:[%s4680_s11 + $0x11c8] sm:$0xff]  ;;  %v766_v24 = vld [vmem:[%s4680_s11 + $0x11d0] sm:$0xff] }
 0x187   : > { %v1770_v35 = vmul.f32 %v4687_v1, %v745_v21  ;;  %3812 = vst [vmem:[%s4721_s25 + $0x10f0] sm:$0xff] %v2788_v27  ;;  %v2790_v39 = vadd.f32 %v4692_v5, %v1765_v28  ;;  %v2791_v40 = vadd.f32 %v4692_v5, %v1766_v29  ;;  %v2792_v41 = vadd.f32 %v4692_v5, %v1767_v30  ;;  %v767_v29 = vld [vmem:[%s4680_s11 + $0x11d8] sm:$0xff]  ;;  %v768_v30 = vld [vmem:[%s4680_s11 + $0x11e0] sm:$0xff] }
 0x188   : > { %v1771_v42 = vmul.f32 %v4687_v1, %v746_v26  ;;  %3813 = vst [vmem:[%s4721_s25 + $0x10f8] sm:$0xff] %v2789_v32  ;;  %v2793_v46 = vadd.f32 %v4692_v5, %v1768_v33  ;;  %v2794_v47 = vadd.f32 %v4692_v5, %v1769_v34  ;;  %v1772_v49 = vmul.f32 %v4687_v1, %v747_v31  ;;  %v769_v31 = vld [vmem:[%s4680_s11 + $0x11e8] sm:$0xff] }
 0x189   : > { %v2795_v48 = vadd.f32 %v4692_v5, %v1770_v35  ;;  %3814 = vst [vmem:[%s4721_s25 + $0x1100] sm:$0xff] %v2790_v39  ;;  %3815 = vst [vmem:[%s4721_s25 + $0x1108] sm:$0xff] %v2791_v40  ;;  %v1773_v52 = vmul.f32 %v4687_v1, %v748_v36  ;;  %v1774_v53 = vmul.f32 %v4687_v1, %v749_v37  ;;  %v770_v36 = vld [vmem:[%s4680_s11 + $0x11f0] sm:$0xff] }
 0x18a   : > { %3816 = vst [vmem:[%s4721_s25 + $0x1110] sm:$0xff] %v2792_v41  ;;  %v2796_v51 = vadd.f32 %v4692_v5, %v1771_v42  ;;  %v1775_v54 = vmul.f32 %v4687_v1, %v750_v38  ;;  %3817 = vst [vmem:[%s4721_s25 + $0x1118] sm:$0xff] %v2793_v46  ;;  %v2797_v56 = vadd.f32 %v4692_v5, %v1772_v49  ;;  %v771_v41 = vld [vmem:[%s4680_s11 + $0x11f8] sm:$0xff]  ;;  %v772_v46 = vld [vmem:[%s4680_s11 + $0x1200] sm:$0xff] }
 0x18b   : > { %3818 = vst [vmem:[%s4721_s25 + $0x1120] sm:$0xff] %v2794_v47  ;;  %3819 = vst [vmem:[%s4721_s25 + $0x1128] sm:$0xff] %v2795_v48  ;;  %v1776_v57 = vmul.f32 %v4687_v1, %v751_v43  ;;  %v1777_v58 = vmul.f32 %v4687_v1, %v752_v44  ;;  %v1778_v59 = vmul.f32 %v4687_v1, %v753_v45  ;;  %v773_v47 = vld [vmem:[%s4680_s11 + $0x1208] sm:$0xff]  ;;  %v774_v48 = vld [vmem:[%s4680_s11 + $0x1210] sm:$0xff] }
 0x18c   : > { %3820 = vst [vmem:[%s4721_s25 + $0x1130] sm:$0xff] %v2796_v51  ;;  %v2798_v63 = vadd.f32 %v4692_v5, %v1773_v52  ;;  %v2799_v0 = vadd.f32 %v4692_v5, %v1774_v53  ;;  %v2800_v2 = vadd.f32 %v4692_v5, %v1775_v54  ;;  %v1779_v3 = vmul.f32 %v4687_v1, %v754_v50  ;;  %v775_v53 = vld [vmem:[%s4680_s11 + $0x1218] sm:$0xff]  ;;  %v776_v54 = vld [vmem:[%s4680_s11 + $0x1220] sm:$0xff] }
 0x18d   : > { %3821 = vst [vmem:[%s4721_s25 + $0x1138] sm:$0xff] %v2797_v56  ;;  %v2801_v8 = vadd.f32 %v4692_v5, %v1776_v57  ;;  %v2802_v9 = vadd.f32 %v4692_v5, %v1777_v58  ;;  %v2803_v10 = vadd.f32 %v4692_v5, %v1778_v59  ;;  %v1780_v11 = vmul.f32 %v4687_v1, %v755_v55  ;;  %v777_v55 = vld [vmem:[%s4680_s11 + $0x1228] sm:$0xff] }
 0x18e   : > { %3822 = vst [vmem:[%s4721_s25 + $0x1140] sm:$0xff] %v2798_v63  ;;  %3823 = vst [vmem:[%s4721_s25 + $0x1148] sm:$0xff] %v2799_v0  ;;  %v2804_v13 = vadd.f32 %v4692_v5, %v1779_v3  ;;  %v1781_v14 = vmul.f32 %v4687_v1, %v756_v60  ;;  %v1782_v15 = vmul.f32 %v4687_v1, %v757_v61  ;;  %v778_v60 = vld [vmem:[%s4680_s11 + $0x1230] sm:$0xff] }
 0x18f   : > { %3824 = vst [vmem:[%s4721_s25 + $0x1150] sm:$0xff] %v2800_v2  ;;  %v1783_v16 = vmul.f32 %v4687_v1, %v758_v62  ;;  %3825 = vst [vmem:[%s4721_s25 + $0x1158] sm:$0xff] %v2801_v8  ;;  %v2805_v18 = vadd.f32 %v4692_v5, %v1780_v11  ;;  %v1784_v19 = vmul.f32 %v4687_v1, %v759_v4  ;;  %v779_v2 = vld [vmem:[%s4680_s11 + $0x1238] sm:$0xff]  ;;  %v780_v8 = vld [vmem:[%s4680_s11 + $0x1240] sm:$0xff] }
 0x190   : > { %3826 = vst [vmem:[%s4721_s25 + $0x1160] sm:$0xff] %v2802_v9  ;;  %3827 = vst [vmem:[%s4721_s25 + $0x1168] sm:$0xff] %v2803_v10  ;;  %v1785_v20 = vmul.f32 %v4687_v1, %v760_v6  ;;  %v1786_v21 = vmul.f32 %v4687_v1, %v761_v7  ;;  %v2806_v25 = vadd.f32 %v4692_v5, %v1781_v14  ;;  %v781_v9 = vld [vmem:[%s4680_s11 + $0x1248] sm:$0xff]  ;;  %v782_v10 = vld [vmem:[%s4680_s11 + $0x1250] sm:$0xff] }
 0x191   : > { %3828 = vst [vmem:[%s4721_s25 + $0x1170] sm:$0xff] %v2804_v13  ;;  %v2807_v26 = vadd.f32 %v4692_v5, %v1782_v15  ;;  %v2808_v27 = vadd.f32 %v4692_v5, %v1783_v16  ;;  %v1787_v28 = vmul.f32 %v4687_v1, %v762_v12  ;;  %3829 = vst [vmem:[%s4721_s25 + $0x1178] sm:$0xff] %v2805_v18  ;;  %v783_v15 = vld [vmem:[%s4680_s11 + $0x1258] sm:$0xff]  ;;  %v784_v16 = vld [vmem:[%s4680_s11 + $0x1260] sm:$0xff] }
 0x192   : > { %v2809_v32 = vadd.f32 %v4692_v5, %v1784_v19  ;;  %v2810_v33 = vadd.f32 %v4692_v5, %v1785_v20  ;;  %v2811_v34 = vadd.f32 %v4692_v5, %v1786_v21  ;;  %v1788_v35 = vmul.f32 %v4687_v1, %v763_v17  ;;  %3830 = vst [vmem:[%s4721_s25 + $0x1180] sm:$0xff] %v2806_v25  ;;  %v785_v17 = vld [vmem:[%s4680_s11 + $0x1268] sm:$0xff] }
 0x193   : > { %3831 = vst [vmem:[%s4721_s25 + $0x1188] sm:$0xff] %v2807_v26  ;;  %3832 = vst [vmem:[%s4721_s25 + $0x1190] sm:$0xff] %v2808_v27  ;;  %v2812_v37 = vadd.f32 %v4692_v5, %v1787_v28  ;;  %v1789_v38 = vmul.f32 %v4687_v1, %v764_v22  ;;  %v1790_v39 = vmul.f32 %v4687_v1, %v765_v23  ;;  %v786_v22 = vld [vmem:[%s4680_s11 + $0x1270] sm:$0xff]  ;;  %v787_v27 = vld [vmem:[%s4680_s11 + $0x1278] sm:$0xff] }
 0x194   : > { %v1791_v40 = vmul.f32 %v4687_v1, %v766_v24  ;;  %3833 = vst [vmem:[%s4721_s25 + $0x1198] sm:$0xff] %v2809_v32  ;;  %3834 = vst [vmem:[%s4721_s25 + $0x11a0] sm:$0xff] %v2810_v33  ;;  %v2813_v42 = vadd.f32 %v4692_v5, %v1788_v35  ;;  %v1792_v43 = vmul.f32 %v4687_v1, %v767_v29  ;;  %v788_v32 = vld [vmem:[%s4680_s11 + $0x1280] sm:$0xff]  ;;  %v789_v33 = vld [vmem:[%s4680_s11 + $0x1288] sm:$0xff] }
 0x195   : > { %3835 = vst [vmem:[%s4721_s25 + $0x11a8] sm:$0xff] %v2811_v34  ;;  %v1793_v44 = vmul.f32 %v4687_v1, %v768_v30  ;;  %v1794_v45 = vmul.f32 %v4687_v1, %v769_v31  ;;  %3836 = vst [vmem:[%s4721_s25 + $0x11b0] sm:$0xff] %v2812_v37  ;;  %v2814_v49 = vadd.f32 %v4692_v5, %v1789_v38  ;;  %v790_v34 = vld [vmem:[%s4680_s11 + $0x1290] sm:$0xff] }
 0x196   : > { %v2815_v50 = vadd.f32 %v4692_v5, %v1790_v39  ;;  %v2816_v51 = vadd.f32 %v4692_v5, %v1791_v40  ;;  %v1795_v52 = vmul.f32 %v4687_v1, %v770_v36  ;;  %3837 = vst [vmem:[%s4721_s25 + $0x11b8] sm:$0xff] %v2813_v42  ;;  %v2817_v56 = vadd.f32 %v4692_v5, %v1792_v43  ;;  %v791_v39 = vld [vmem:[%s4680_s11 + $0x1298] sm:$0xff]  ;;  %v792_v40 = vld [vmem:[%s4680_s11 + $0x12a0] sm:$0xff] }
 0x197   : > { %v2818_v57 = vadd.f32 %v4692_v5, %v1793_v44  ;;  %v2819_v58 = vadd.f32 %v4692_v5, %v1794_v45  ;;  %v1796_v59 = vmul.f32 %v4687_v1, %v771_v41  ;;  %3838 = vst [vmem:[%s4721_s25 + $0x11c0] sm:$0xff] %v2814_v49  ;;  %v1797_v62 = vmul.f32 %v4687_v1, %v772_v46  ;;  %v793_v41 = vld [vmem:[%s4680_s11 + $0x12a8] sm:$0xff]  ;;  %v794_v46 = vld [vmem:[%s4680_s11 + $0x12b0] sm:$0xff] }
 0x198   : > { %3839 = vst [vmem:[%s4721_s25 + $0x11c8] sm:$0xff] %v2815_v50  ;;  %3840 = vst [vmem:[%s4721_s25 + $0x11d0] sm:$0xff] %v2816_v51  ;;  %v2820_v61 = vadd.f32 %v4692_v5, %v1795_v52  ;;  %v1798_v63 = vmul.f32 %v4687_v1, %v773_v47  ;;  %v1799_v0 = vmul.f32 %v4687_v1, %v774_v48  ;;  %v795_v51 = vld [vmem:[%s4680_s11 + $0x12b8] sm:$0xff] }
 0x199   : > { %3841 = vst [vmem:[%s4721_s25 + $0x11d8] sm:$0xff] %v2817_v56  ;;  %3842 = vst [vmem:[%s4721_s25 + $0x11e0] sm:$0xff] %v2818_v57  ;;  %v2821_v3 = vadd.f32 %v4692_v5, %v1796_v59  ;;  %v1800_v4 = vmul.f32 %v4687_v1, %v775_v53  ;;  %v1801_v6 = vmul.f32 %v4687_v1, %v776_v54  ;;  %v796_v56 = vld [vmem:[%s4680_s11 + $0x12c0] sm:$0xff]  ;;  %v797_v57 = vld [vmem:[%s4680_s11 + $0x12c8] sm:$0xff] }
 0x19a   : > { %3843 = vst [vmem:[%s4721_s25 + $0x11e8] sm:$0xff] %v2819_v58  ;;  %v1802_v7 = vmul.f32 %v4687_v1, %v777_v55  ;;  %3844 = vst [vmem:[%s4721_s25 + $0x11f0] sm:$0xff] %v2820_v61  ;;  %v2822_v11 = vadd.f32 %v4692_v5, %v1797_v62  ;;  %v2823_v12 = vadd.f32 %v4692_v5, %v1798_v63  ;;  %v798_v58 = vld [vmem:[%s4680_s11 + $0x12d0] sm:$0xff]  ;;  %v799_v63 = vld [vmem:[%s4680_s11 + $0x12d8] sm:$0xff] }
 0x19b   : > { %v2824_v13 = vadd.f32 %v4692_v5, %v1799_v0  ;;  %v1803_v14 = vmul.f32 %v4687_v1, %v778_v60  ;;  %3845 = vst [vmem:[%s4721_s25 + $0x11f8] sm:$0xff] %v2821_v3  ;;  %v2825_v18 = vadd.f32 %v4692_v5, %v1800_v4  ;;  %v2826_v19 = vadd.f32 %v4692_v5, %v1801_v6  ;;  %v800_v0 = vld [vmem:[%s4680_s11 + $0x12e0] sm:$0xff] }
 0x19c   : > { %v2827_v20 = vadd.f32 %v4692_v5, %v1802_v7  ;;  %v1804_v21 = vmul.f32 %v4687_v1, %v779_v2  ;;  %3846 = vst [vmem:[%s4721_s25 + $0x1200] sm:$0xff] %v2822_v11  ;;  %3847 = vst [vmem:[%s4721_s25 + $0x1208] sm:$0xff] %v2823_v12  ;;  %v1805_v24 = vmul.f32 %v4687_v1, %v780_v8  ;;  %v801_v2 = vld [vmem:[%s4680_s11 + $0x12e8] sm:$0xff]  ;;  %v802_v8 = vld [vmem:[%s4680_s11 + $0x12f0] sm:$0xff] }
 0x19d   : > { %3848 = vst [vmem:[%s4721_s25 + $0x1210] sm:$0xff] %v2824_v13  ;;  %v2828_v23 = vadd.f32 %v4692_v5, %v1803_v14  ;;  %v1806_v25 = vmul.f32 %v4687_v1, %v781_v9  ;;  %v1807_v26 = vmul.f32 %v4687_v1, %v782_v10  ;;  %3849 = vst [vmem:[%s4721_s25 + $0x1218] sm:$0xff] %v2825_v18  ;;  %v803_v13 = vld [vmem:[%s4680_s11 + $0x12f8] sm:$0xff]  ;;  %v804_v18 = vld [vmem:[%s4680_s11 + $0x1300] sm:$0xff] }
 0x19e   : > { %3850 = vst [vmem:[%s4721_s25 + $0x1220] sm:$0xff] %v2826_v19  ;;  %3851 = vst [vmem:[%s4721_s25 + $0x1228] sm:$0xff] %v2827_v20  ;;  %v2829_v28 = vadd.f32 %v4692_v5, %v1804_v21  ;;  %v1808_v29 = vmul.f32 %v4687_v1, %v783_v15  ;;  %v1809_v30 = vmul.f32 %v4687_v1, %v784_v16  ;;  %v805_v19 = vld [vmem:[%s4680_s11 + $0x1308] sm:$0xff]  ;;  %v806_v20 = vld [vmem:[%s4680_s11 + $0x1310] sm:$0xff] }
 0x19f   : > { %v1810_v31 = vmul.f32 %v4687_v1, %v785_v17  ;;  %3852 = vst [vmem:[%s4721_s25 + $0x1230] sm:$0xff] %v2828_v23  ;;  %v2830_v35 = vadd.f32 %v4692_v5, %v1805_v24  ;;  %v2831_v36 = vadd.f32 %v4692_v5, %v1806_v25  ;;  %v2832_v37 = vadd.f32 %v4692_v5, %v1807_v26  ;;  %v807_v25 = vld [vmem:[%s4680_s11 + $0x1318] sm:$0xff]  ;;  %v808_v26 = vld [vmem:[%s4680_s11 + $0x1320] sm:$0xff] }
 0x1a0   : > { %v1811_v38 = vmul.f32 %v4687_v1, %v786_v22  ;;  %3853 = vst [vmem:[%s4721_s25 + $0x1238] sm:$0xff] %v2829_v28  ;;  %v2833_v42 = vadd.f32 %v4692_v5, %v1808_v29  ;;  %v2834_v43 = vadd.f32 %v4692_v5, %v1809_v30  ;;  %v1812_v45 = vmul.f32 %v4687_v1, %v787_v27  ;;  %v809_v27 = vld [vmem:[%s4680_s11 + $0x1328] sm:$0xff] }
 0x1a1   : > { %v2835_v44 = vadd.f32 %v4692_v5, %v1810_v31  ;;  %3854 = vst [vmem:[%s4721_s25 + $0x1240] sm:$0xff] %v2830_v35  ;;  %3855 = vst [vmem:[%s4721_s25 + $0x1248] sm:$0xff] %v2831_v36  ;;  %v1813_v48 = vmul.f32 %v4687_v1, %v788_v32  ;;  %v1814_v49 = vmul.f32 %v4687_v1, %v789_v33  ;;  %v810_v32 = vld [vmem:[%s4680_s11 + $0x1330] sm:$0xff] }
 0x1a2   : > { %3856 = vst [vmem:[%s4721_s25 + $0x1250] sm:$0xff] %v2832_v37  ;;  %v2836_v47 = vadd.f32 %v4692_v5, %v1811_v38  ;;  %v1815_v50 = vmul.f32 %v4687_v1, %v790_v34  ;;  %3857 = vst [vmem:[%s4721_s25 + $0x1258] sm:$0xff] %v2833_v42  ;;  %v2837_v52 = vadd.f32 %v4692_v5, %v1812_v45  ;;  %v811_v37 = vld [vmem:[%s4680_s11 + $0x1338] sm:$0xff]  ;;  %v812_v42 = vld [vmem:[%s4680_s11 + $0x1340] sm:$0xff] }
 0x1a3   : > { %3858 = vst [vmem:[%s4721_s25 + $0x1260] sm:$0xff] %v2834_v43  ;;  %3859 = vst [vmem:[%s4721_s25 + $0x1268] sm:$0xff] %v2835_v44  ;;  %v1816_v53 = vmul.f32 %v4687_v1, %v791_v39  ;;  %v1817_v54 = vmul.f32 %v4687_v1, %v792_v40  ;;  %v1818_v55 = vmul.f32 %v4687_v1, %v793_v41  ;;  %v813_v43 = vld [vmem:[%s4680_s11 + $0x1348] sm:$0xff]  ;;  %v814_v44 = vld [vmem:[%s4680_s11 + $0x1350] sm:$0xff] }
 0x1a4   : > { %3860 = vst [vmem:[%s4721_s25 + $0x1270] sm:$0xff] %v2836_v47  ;;  %v2838_v59 = vadd.f32 %v4692_v5, %v1813_v48  ;;  %v2839_v60 = vadd.f32 %v4692_v5, %v1814_v49  ;;  %v2840_v61 = vadd.f32 %v4692_v5, %v1815_v50  ;;  %v1819_v62 = vmul.f32 %v4687_v1, %v794_v46  ;;  %v815_v49 = vld [vmem:[%s4680_s11 + $0x1358] sm:$0xff]  ;;  %v816_v50 = vld [vmem:[%s4680_s11 + $0x1360] sm:$0xff] }
 0x1a5   : > { %3861 = vst [vmem:[%s4721_s25 + $0x1278] sm:$0xff] %v2837_v52  ;;  %v2841_v3 = vadd.f32 %v4692_v5, %v1816_v53  ;;  %v2842_v4 = vadd.f32 %v4692_v5, %v1817_v54  ;;  %v2843_v6 = vadd.f32 %v4692_v5, %v1818_v55  ;;  %v1820_v7 = vmul.f32 %v4687_v1, %v795_v51  ;;  %v817_v51 = vld [vmem:[%s4680_s11 + $0x1368] sm:$0xff] }
 0x1a6   : > { %3862 = vst [vmem:[%s4721_s25 + $0x1280] sm:$0xff] %v2838_v59  ;;  %3863 = vst [vmem:[%s4721_s25 + $0x1288] sm:$0xff] %v2839_v60  ;;  %v2844_v9 = vadd.f32 %v4692_v5, %v1819_v62  ;;  %v1821_v10 = vmul.f32 %v4687_v1, %v796_v56  ;;  %v1822_v11 = vmul.f32 %v4687_v1, %v797_v57  ;;  %v818_v56 = vld [vmem:[%s4680_s11 + $0x1370] sm:$0xff] }
 0x1a7   : > { %3864 = vst [vmem:[%s4721_s25 + $0x1290] sm:$0xff] %v2840_v61  ;;  %v1823_v12 = vmul.f32 %v4687_v1, %v798_v58  ;;  %3865 = vst [vmem:[%s4721_s25 + $0x1298] sm:$0xff] %v2841_v3  ;;  %v2845_v14 = vadd.f32 %v4692_v5, %v1820_v7  ;;  %v1824_v15 = vmul.f32 %v4687_v1, %v799_v63  ;;  %v819_v61 = vld [vmem:[%s4680_s11 + $0x1378] sm:$0xff]  ;;  %v820_v3 = vld [vmem:[%s4680_s11 + $0x1380] sm:$0xff] }
 0x1a8   : > { %3866 = vst [vmem:[%s4721_s25 + $0x12a0] sm:$0xff] %v2842_v4  ;;  %3867 = vst [vmem:[%s4721_s25 + $0x12a8] sm:$0xff] %v2843_v6  ;;  %v1825_v16 = vmul.f32 %v4687_v1, %v800_v0  ;;  %v1826_v17 = vmul.f32 %v4687_v1, %v801_v2  ;;  %v2846_v21 = vadd.f32 %v4692_v5, %v1821_v10  ;;  %v821_v4 = vld [vmem:[%s4680_s11 + $0x1388] sm:$0xff]  ;;  %v822_v6 = vld [vmem:[%s4680_s11 + $0x1390] sm:$0xff] }
 0x1a9   : > { %3868 = vst [vmem:[%s4721_s25 + $0x12b0] sm:$0xff] %v2844_v9  ;;  %v2847_v22 = vadd.f32 %v4692_v5, %v1822_v11  ;;  %v2848_v23 = vadd.f32 %v4692_v5, %v1823_v12  ;;  %v1827_v24 = vmul.f32 %v4687_v1, %v802_v8  ;;  %3869 = vst [vmem:[%s4721_s25 + $0x12b8] sm:$0xff] %v2845_v14  ;;  %v823_v11 = vld [vmem:[%s4680_s11 + $0x1398] sm:$0xff]  ;;  %v824_v12 = vld [vmem:[%s4680_s11 + $0x13a0] sm:$0xff] }
 0x1aa   : > { %v2849_v28 = vadd.f32 %v4692_v5, %v1824_v15  ;;  %v2850_v29 = vadd.f32 %v4692_v5, %v1825_v16  ;;  %v2851_v30 = vadd.f32 %v4692_v5, %v1826_v17  ;;  %v1828_v31 = vmul.f32 %v4687_v1, %v803_v13  ;;  %3870 = vst [vmem:[%s4721_s25 + $0x12c0] sm:$0xff] %v2846_v21  ;;  %v825_v13 = vld [vmem:[%s4680_s11 + $0x13a8] sm:$0xff] }
 0x1ab   : > { %3871 = vst [vmem:[%s4721_s25 + $0x12c8] sm:$0xff] %v2847_v22  ;;  %3872 = vst [vmem:[%s4721_s25 + $0x12d0] sm:$0xff] %v2848_v23  ;;  %v2852_v33 = vadd.f32 %v4692_v5, %v1827_v24  ;;  %v1829_v34 = vmul.f32 %v4687_v1, %v804_v18  ;;  %v1830_v35 = vmul.f32 %v4687_v1, %v805_v19  ;;  %v826_v18 = vld [vmem:[%s4680_s11 + $0x13b0] sm:$0xff]  ;;  %v827_v23 = vld [vmem:[%s4680_s11 + $0x13b8] sm:$0xff] }
 0x1ac   : > { %v1831_v36 = vmul.f32 %v4687_v1, %v806_v20  ;;  %3873 = vst [vmem:[%s4721_s25 + $0x12d8] sm:$0xff] %v2849_v28  ;;  %3874 = vst [vmem:[%s4721_s25 + $0x12e0] sm:$0xff] %v2850_v29  ;;  %v2853_v38 = vadd.f32 %v4692_v5, %v1828_v31  ;;  %v1832_v39 = vmul.f32 %v4687_v1, %v807_v25  ;;  %v828_v28 = vld [vmem:[%s4680_s11 + $0x13c0] sm:$0xff]  ;;  %v829_v29 = vld [vmem:[%s4680_s11 + $0x13c8] sm:$0xff] }
 0x1ad   : > { %3875 = vst [vmem:[%s4721_s25 + $0x12e8] sm:$0xff] %v2851_v30  ;;  %v1833_v40 = vmul.f32 %v4687_v1, %v808_v26  ;;  %v1834_v41 = vmul.f32 %v4687_v1, %v809_v27  ;;  %3876 = vst [vmem:[%s4721_s25 + $0x12f0] sm:$0xff] %v2852_v33  ;;  %v2854_v45 = vadd.f32 %v4692_v5, %v1829_v34  ;;  %v830_v30 = vld [vmem:[%s4680_s11 + $0x13d0] sm:$0xff] }
 0x1ae   : > { %v2855_v46 = vadd.f32 %v4692_v5, %v1830_v35  ;;  %v2856_v47 = vadd.f32 %v4692_v5, %v1831_v36  ;;  %v1835_v48 = vmul.f32 %v4687_v1, %v810_v32  ;;  %3877 = vst [vmem:[%s4721_s25 + $0x12f8] sm:$0xff] %v2853_v38  ;;  %v2857_v52 = vadd.f32 %v4692_v5, %v1832_v39  ;;  %v831_v35 = vld [vmem:[%s4680_s11 + $0x13d8] sm:$0xff]  ;;  %v832_v36 = vld [vmem:[%s4680_s11 + $0x13e0] sm:$0xff] }
 0x1af   : > { %v2858_v53 = vadd.f32 %v4692_v5, %v1833_v40  ;;  %v2859_v54 = vadd.f32 %v4692_v5, %v1834_v41  ;;  %v1836_v55 = vmul.f32 %v4687_v1, %v811_v37  ;;  %3878 = vst [vmem:[%s4721_s25 + $0x1300] sm:$0xff] %v2854_v45  ;;  %v1837_v58 = vmul.f32 %v4687_v1, %v812_v42  ;;  %v833_v37 = vld [vmem:[%s4680_s11 + $0x13e8] sm:$0xff]  ;;  %v834_v42 = vld [vmem:[%s4680_s11 + $0x13f0] sm:$0xff] }
 0x1b0   : > { %3879 = vst [vmem:[%s4721_s25 + $0x1308] sm:$0xff] %v2855_v46  ;;  %3880 = vst [vmem:[%s4721_s25 + $0x1310] sm:$0xff] %v2856_v47  ;;  %v2860_v57 = vadd.f32 %v4692_v5, %v1835_v48  ;;  %v1838_v59 = vmul.f32 %v4687_v1, %v813_v43  ;;  %v1839_v60 = vmul.f32 %v4687_v1, %v814_v44  ;;  %v835_v47 = vld [vmem:[%s4680_s11 + $0x13f8] sm:$0xff] }
 0x1b1   : > { %3881 = vst [vmem:[%s4721_s25 + $0x1318] sm:$0xff] %v2857_v52  ;;  %3882 = vst [vmem:[%s4721_s25 + $0x1320] sm:$0xff] %v2858_v53  ;;  %v2861_v62 = vadd.f32 %v4692_v5, %v1836_v55  ;;  %v1840_v63 = vmul.f32 %v4687_v1, %v815_v49  ;;  %v1841_v0 = vmul.f32 %v4687_v1, %v816_v50  ;;  %v836_v52 = vld [vmem:[%s4680_s11 + $0x1400] sm:$0xff]  ;;  %v837_v53 = vld [vmem:[%s4680_s11 + $0x1408] sm:$0xff] }
 0x1b2   : > { %3883 = vst [vmem:[%s4721_s25 + $0x1328] sm:$0xff] %v2859_v54  ;;  %v1842_v2 = vmul.f32 %v4687_v1, %v817_v51  ;;  %3884 = vst [vmem:[%s4721_s25 + $0x1330] sm:$0xff] %v2860_v57  ;;  %v2862_v7 = vadd.f32 %v4692_v5, %v1837_v58  ;;  %v2863_v8 = vadd.f32 %v4692_v5, %v1838_v59  ;;  %v838_v54 = vld [vmem:[%s4680_s11 + $0x1410] sm:$0xff]  ;;  %v839_v59 = vld [vmem:[%s4680_s11 + $0x1418] sm:$0xff] }
 0x1b3   : > { %v2864_v9 = vadd.f32 %v4692_v5, %v1839_v60  ;;  %v1843_v10 = vmul.f32 %v4687_v1, %v818_v56  ;;  %3885 = vst [vmem:[%s4721_s25 + $0x1338] sm:$0xff] %v2861_v62  ;;  %v2865_v14 = vadd.f32 %v4692_v5, %v1840_v63  ;;  %v2866_v15 = vadd.f32 %v4692_v5, %v1841_v0  ;;  %v840_v60 = vld [vmem:[%s4680_s11 + $0x1420] sm:$0xff] }
 0x1b4   : > { %v2867_v16 = vadd.f32 %v4692_v5, %v1842_v2  ;;  %v1844_v17 = vmul.f32 %v4687_v1, %v819_v61  ;;  %3886 = vst [vmem:[%s4721_s25 + $0x1340] sm:$0xff] %v2862_v7  ;;  %3887 = vst [vmem:[%s4721_s25 + $0x1348] sm:$0xff] %v2863_v8  ;;  %v1845_v20 = vmul.f32 %v4687_v1, %v820_v3  ;;  %v841_v61 = vld [vmem:[%s4680_s11 + $0x1428] sm:$0xff]  ;;  %v842_v3 = vld [vmem:[%s4680_s11 + $0x1430] sm:$0xff] }
 0x1b5   : > { %3888 = vst [vmem:[%s4721_s25 + $0x1350] sm:$0xff] %v2864_v9  ;;  %v2868_v19 = vadd.f32 %v4692_v5, %v1843_v10  ;;  %v1846_v21 = vmul.f32 %v4687_v1, %v821_v4  ;;  %v1847_v22 = vmul.f32 %v4687_v1, %v822_v6  ;;  %3889 = vst [vmem:[%s4721_s25 + $0x1358] sm:$0xff] %v2865_v14  ;;  %v843_v9 = vld [vmem:[%s4680_s11 + $0x1438] sm:$0xff]  ;;  %v844_v14 = vld [vmem:[%s4680_s11 + $0x1440] sm:$0xff] }
 0x1b6   : > { %3890 = vst [vmem:[%s4721_s25 + $0x1360] sm:$0xff] %v2866_v15  ;;  %3891 = vst [vmem:[%s4721_s25 + $0x1368] sm:$0xff] %v2867_v16  ;;  %v2869_v24 = vadd.f32 %v4692_v5, %v1844_v17  ;;  %v1848_v25 = vmul.f32 %v4687_v1, %v823_v11  ;;  %v1849_v26 = vmul.f32 %v4687_v1, %v824_v12  ;;  %v845_v15 = vld [vmem:[%s4680_s11 + $0x1448] sm:$0xff]  ;;  %v846_v16 = vld [vmem:[%s4680_s11 + $0x1450] sm:$0xff] }
 0x1b7   : > { %v1850_v27 = vmul.f32 %v4687_v1, %v825_v13  ;;  %3892 = vst [vmem:[%s4721_s25 + $0x1370] sm:$0xff] %v2868_v19  ;;  %v2870_v31 = vadd.f32 %v4692_v5, %v1845_v20  ;;  %v2871_v32 = vadd.f32 %v4692_v5, %v1846_v21  ;;  %v2872_v33 = vadd.f32 %v4692_v5, %v1847_v22  ;;  %v847_v21 = vld [vmem:[%s4680_s11 + $0x1458] sm:$0xff]  ;;  %v848_v22 = vld [vmem:[%s4680_s11 + $0x1460] sm:$0xff] }
 0x1b8   : > { %v1851_v34 = vmul.f32 %v4687_v1, %v826_v18  ;;  %3893 = vst [vmem:[%s4721_s25 + $0x1378] sm:$0xff] %v2869_v24  ;;  %v2873_v38 = vadd.f32 %v4692_v5, %v1848_v25  ;;  %v2874_v39 = vadd.f32 %v4692_v5, %v1849_v26  ;;  %v1852_v41 = vmul.f32 %v4687_v1, %v827_v23  ;;  %v849_v23 = vld [vmem:[%s4680_s11 + $0x1468] sm:$0xff] }
 0x1b9   : > { %v2875_v40 = vadd.f32 %v4692_v5, %v1850_v27  ;;  %3894 = vst [vmem:[%s4721_s25 + $0x1380] sm:$0xff] %v2870_v31  ;;  %3895 = vst [vmem:[%s4721_s25 + $0x1388] sm:$0xff] %v2871_v32  ;;  %v1853_v44 = vmul.f32 %v4687_v1, %v828_v28  ;;  %v1854_v45 = vmul.f32 %v4687_v1, %v829_v29  ;;  %v850_v28 = vld [vmem:[%s4680_s11 + $0x1470] sm:$0xff] }
 0x1ba   : > { %3896 = vst [vmem:[%s4721_s25 + $0x1390] sm:$0xff] %v2872_v33  ;;  %v2876_v43 = vadd.f32 %v4692_v5, %v1851_v34  ;;  %v1855_v46 = vmul.f32 %v4687_v1, %v830_v30  ;;  %3897 = vst [vmem:[%s4721_s25 + $0x1398] sm:$0xff] %v2873_v38  ;;  %v2877_v48 = vadd.f32 %v4692_v5, %v1852_v41  ;;  %v851_v33 = vld [vmem:[%s4680_s11 + $0x1478] sm:$0xff]  ;;  %v852_v38 = vld [vmem:[%s4680_s11 + $0x1480] sm:$0xff] }
 0x1bb   : > { %3898 = vst [vmem:[%s4721_s25 + $0x13a0] sm:$0xff] %v2874_v39  ;;  %3899 = vst [vmem:[%s4721_s25 + $0x13a8] sm:$0xff] %v2875_v40  ;;  %v1856_v49 = vmul.f32 %v4687_v1, %v831_v35  ;;  %v1857_v50 = vmul.f32 %v4687_v1, %v832_v36  ;;  %v1858_v51 = vmul.f32 %v4687_v1, %v833_v37  ;;  %v853_v39 = vld [vmem:[%s4680_s11 + $0x1488] sm:$0xff]  ;;  %v854_v40 = vld [vmem:[%s4680_s11 + $0x1490] sm:$0xff] }
 0x1bc   : > { %3900 = vst [vmem:[%s4721_s25 + $0x13b0] sm:$0xff] %v2876_v43  ;;  %v2878_v55 = vadd.f32 %v4692_v5, %v1853_v44  ;;  %v2879_v56 = vadd.f32 %v4692_v5, %v1854_v45  ;;  %v2880_v57 = vadd.f32 %v4692_v5, %v1855_v46  ;;  %v1859_v58 = vmul.f32 %v4687_v1, %v834_v42  ;;  %v855_v45 = vld [vmem:[%s4680_s11 + $0x1498] sm:$0xff]  ;;  %v856_v46 = vld [vmem:[%s4680_s11 + $0x14a0] sm:$0xff] }
 0x1bd   : > { %3901 = vst [vmem:[%s4721_s25 + $0x13b8] sm:$0xff] %v2877_v48  ;;  %v2881_v62 = vadd.f32 %v4692_v5, %v1856_v49  ;;  %v2882_v63 = vadd.f32 %v4692_v5, %v1857_v50  ;;  %v2883_v0 = vadd.f32 %v4692_v5, %v1858_v51  ;;  %v1860_v2 = vmul.f32 %v4687_v1, %v835_v47  ;;  %v857_v47 = vld [vmem:[%s4680_s11 + $0x14a8] sm:$0xff] }
 0x1be   : > { %3902 = vst [vmem:[%s4721_s25 + $0x13c0] sm:$0xff] %v2878_v55  ;;  %3903 = vst [vmem:[%s4721_s25 + $0x13c8] sm:$0xff] %v2879_v56  ;;  %v2884_v4 = vadd.f32 %v4692_v5, %v1859_v58  ;;  %v1861_v6 = vmul.f32 %v4687_v1, %v836_v52  ;;  %v1862_v7 = vmul.f32 %v4687_v1, %v837_v53  ;;  %v858_v52 = vld [vmem:[%s4680_s11 + $0x14b0] sm:$0xff] }
 0x1bf   : > { %3904 = vst [vmem:[%s4721_s25 + $0x13d0] sm:$0xff] %v2880_v57  ;;  %v1863_v8 = vmul.f32 %v4687_v1, %v838_v54  ;;  %3905 = vst [vmem:[%s4721_s25 + $0x13d8] sm:$0xff] %v2881_v62  ;;  %v2885_v10 = vadd.f32 %v4692_v5, %v1860_v2  ;;  %v1864_v11 = vmul.f32 %v4687_v1, %v839_v59  ;;  %v859_v57 = vld [vmem:[%s4680_s11 + $0x14b8] sm:$0xff]  ;;  %v860_v62 = vld [vmem:[%s4680_s11 + $0x14c0] sm:$0xff] }
 0x1c0   : > { %3906 = vst [vmem:[%s4721_s25 + $0x13e0] sm:$0xff] %v2882_v63  ;;  %3907 = vst [vmem:[%s4721_s25 + $0x13e8] sm:$0xff] %v2883_v0  ;;  %v1865_v12 = vmul.f32 %v4687_v1, %v840_v60  ;;  %v1866_v13 = vmul.f32 %v4687_v1, %v841_v61  ;;  %v2886_v17 = vadd.f32 %v4692_v5, %v1861_v6  ;;  %v861_v63 = vld [vmem:[%s4680_s11 + $0x14c8] sm:$0xff]  ;;  %v862_v0 = vld [vmem:[%s4680_s11 + $0x14d0] sm:$0xff] }
 0x1c1   : > { %3908 = vst [vmem:[%s4721_s25 + $0x13f0] sm:$0xff] %v2884_v4  ;;  %v2887_v18 = vadd.f32 %v4692_v5, %v1862_v7  ;;  %v2888_v19 = vadd.f32 %v4692_v5, %v1863_v8  ;;  %v1867_v20 = vmul.f32 %v4687_v1, %v842_v3  ;;  %3909 = vst [vmem:[%s4721_s25 + $0x13f8] sm:$0xff] %v2885_v10  ;;  %v863_v7 = vld [vmem:[%s4680_s11 + $0x14d8] sm:$0xff]  ;;  %v864_v8 = vld [vmem:[%s4680_s11 + $0x14e0] sm:$0xff] }
 0x1c2   : > { %v2889_v24 = vadd.f32 %v4692_v5, %v1864_v11  ;;  %v2890_v25 = vadd.f32 %v4692_v5, %v1865_v12  ;;  %v2891_v26 = vadd.f32 %v4692_v5, %v1866_v13  ;;  %v1868_v27 = vmul.f32 %v4687_v1, %v843_v9  ;;  %3910 = vst [vmem:[%s4721_s25 + $0x1400] sm:$0xff] %v2886_v17  ;;  %v865_v9 = vld [vmem:[%s4680_s11 + $0x14e8] sm:$0xff] }
 0x1c3   : > { %3911 = vst [vmem:[%s4721_s25 + $0x1408] sm:$0xff] %v2887_v18  ;;  %3912 = vst [vmem:[%s4721_s25 + $0x1410] sm:$0xff] %v2888_v19  ;;  %v2892_v29 = vadd.f32 %v4692_v5, %v1867_v20  ;;  %v1869_v30 = vmul.f32 %v4687_v1, %v844_v14  ;;  %v1870_v31 = vmul.f32 %v4687_v1, %v845_v15  ;;  %v866_v14 = vld [vmem:[%s4680_s11 + $0x14f0] sm:$0xff]  ;;  %v867_v19 = vld [vmem:[%s4680_s11 + $0x14f8] sm:$0xff] }
 0x1c4   : > { %v1871_v32 = vmul.f32 %v4687_v1, %v846_v16  ;;  %3913 = vst [vmem:[%s4721_s25 + $0x1418] sm:$0xff] %v2889_v24  ;;  %3914 = vst [vmem:[%s4721_s25 + $0x1420] sm:$0xff] %v2890_v25  ;;  %v2893_v34 = vadd.f32 %v4692_v5, %v1868_v27  ;;  %v1872_v35 = vmul.f32 %v4687_v1, %v847_v21  ;;  %v868_v24 = vld [vmem:[%s4680_s11 + $0x1500] sm:$0xff]  ;;  %v869_v25 = vld [vmem:[%s4680_s11 + $0x1508] sm:$0xff] }
 0x1c5   : > { %3915 = vst [vmem:[%s4721_s25 + $0x1428] sm:$0xff] %v2891_v26  ;;  %v1873_v36 = vmul.f32 %v4687_v1, %v848_v22  ;;  %v1874_v37 = vmul.f32 %v4687_v1, %v849_v23  ;;  %3916 = vst [vmem:[%s4721_s25 + $0x1430] sm:$0xff] %v2892_v29  ;;  %v2894_v41 = vadd.f32 %v4692_v5, %v1869_v30  ;;  %v870_v26 = vld [vmem:[%s4680_s11 + $0x1510] sm:$0xff] }
 0x1c6   : > { %v2895_v42 = vadd.f32 %v4692_v5, %v1870_v31  ;;  %v2896_v43 = vadd.f32 %v4692_v5, %v1871_v32  ;;  %v1875_v44 = vmul.f32 %v4687_v1, %v850_v28  ;;  %3917 = vst [vmem:[%s4721_s25 + $0x1438] sm:$0xff] %v2893_v34  ;;  %v2897_v48 = vadd.f32 %v4692_v5, %v1872_v35  ;;  %v871_v31 = vld [vmem:[%s4680_s11 + $0x1518] sm:$0xff]  ;;  %v872_v32 = vld [vmem:[%s4680_s11 + $0x1520] sm:$0xff] }
 0x1c7   : > { %v2898_v49 = vadd.f32 %v4692_v5, %v1873_v36  ;;  %v2899_v50 = vadd.f32 %v4692_v5, %v1874_v37  ;;  %v1876_v51 = vmul.f32 %v4687_v1, %v851_v33  ;;  %3918 = vst [vmem:[%s4721_s25 + $0x1440] sm:$0xff] %v2894_v41  ;;  %v1877_v54 = vmul.f32 %v4687_v1, %v852_v38  ;;  %v873_v33 = vld [vmem:[%s4680_s11 + $0x1528] sm:$0xff]  ;;  %v874_v38 = vld [vmem:[%s4680_s11 + $0x1530] sm:$0xff] }
 0x1c8   : > { %3919 = vst [vmem:[%s4721_s25 + $0x1448] sm:$0xff] %v2895_v42  ;;  %3920 = vst [vmem:[%s4721_s25 + $0x1450] sm:$0xff] %v2896_v43  ;;  %v2900_v53 = vadd.f32 %v4692_v5, %v1875_v44  ;;  %v1878_v55 = vmul.f32 %v4687_v1, %v853_v39  ;;  %v1879_v56 = vmul.f32 %v4687_v1, %v854_v40  ;;  %v875_v43 = vld [vmem:[%s4680_s11 + $0x1538] sm:$0xff] }
 0x1c9   : > { %3921 = vst [vmem:[%s4721_s25 + $0x1458] sm:$0xff] %v2897_v48  ;;  %3922 = vst [vmem:[%s4721_s25 + $0x1460] sm:$0xff] %v2898_v49  ;;  %v2901_v58 = vadd.f32 %v4692_v5, %v1876_v51  ;;  %v1880_v59 = vmul.f32 %v4687_v1, %v855_v45  ;;  %v1881_v60 = vmul.f32 %v4687_v1, %v856_v46  ;;  %v876_v48 = vld [vmem:[%s4680_s11 + $0x1540] sm:$0xff]  ;;  %v877_v49 = vld [vmem:[%s4680_s11 + $0x1548] sm:$0xff] }
 0x1ca   : > { %3923 = vst [vmem:[%s4721_s25 + $0x1468] sm:$0xff] %v2899_v50  ;;  %v1882_v61 = vmul.f32 %v4687_v1, %v857_v47  ;;  %3924 = vst [vmem:[%s4721_s25 + $0x1470] sm:$0xff] %v2900_v53  ;;  %v2902_v2 = vadd.f32 %v4692_v5, %v1877_v54  ;;  %v2903_v3 = vadd.f32 %v4692_v5, %v1878_v55  ;;  %v878_v50 = vld [vmem:[%s4680_s11 + $0x1550] sm:$0xff]  ;;  %v879_v55 = vld [vmem:[%s4680_s11 + $0x1558] sm:$0xff] }
 0x1cb   : > { %v2904_v4 = vadd.f32 %v4692_v5, %v1879_v56  ;;  %v1883_v6 = vmul.f32 %v4687_v1, %v858_v52  ;;  %3925 = vst [vmem:[%s4721_s25 + $0x1478] sm:$0xff] %v2901_v58  ;;  %v2905_v10 = vadd.f32 %v4692_v5, %v1880_v59  ;;  %v2906_v11 = vadd.f32 %v4692_v5, %v1881_v60  ;;  %v880_v56 = vld [vmem:[%s4680_s11 + $0x1560] sm:$0xff] }
 0x1cc   : > { %v2907_v12 = vadd.f32 %v4692_v5, %v1882_v61  ;;  %v1884_v13 = vmul.f32 %v4687_v1, %v859_v57  ;;  %3926 = vst [vmem:[%s4721_s25 + $0x1480] sm:$0xff] %v2902_v2  ;;  %3927 = vst [vmem:[%s4721_s25 + $0x1488] sm:$0xff] %v2903_v3  ;;  %v1885_v16 = vmul.f32 %v4687_v1, %v860_v62  ;;  %v881_v57 = vld [vmem:[%s4680_s11 + $0x1568] sm:$0xff]  ;;  %v882_v62 = vld [vmem:[%s4680_s11 + $0x1570] sm:$0xff] }
 0x1cd   : > { %3928 = vst [vmem:[%s4721_s25 + $0x1490] sm:$0xff] %v2904_v4  ;;  %v2908_v15 = vadd.f32 %v4692_v5, %v1883_v6  ;;  %v1886_v17 = vmul.f32 %v4687_v1, %v861_v63  ;;  %v1887_v18 = vmul.f32 %v4687_v1, %v862_v0  ;;  %3929 = vst [vmem:[%s4721_s25 + $0x1498] sm:$0xff] %v2905_v10  ;;  %v883_v4 = vld [vmem:[%s4680_s11 + $0x1578] sm:$0xff]  ;;  %v884_v10 = vld [vmem:[%s4680_s11 + $0x1580] sm:$0xff] }
 0x1ce   : > { %3930 = vst [vmem:[%s4721_s25 + $0x14a0] sm:$0xff] %v2906_v11  ;;  %3931 = vst [vmem:[%s4721_s25 + $0x14a8] sm:$0xff] %v2907_v12  ;;  %v2909_v20 = vadd.f32 %v4692_v5, %v1884_v13  ;;  %v1888_v21 = vmul.f32 %v4687_v1, %v863_v7  ;;  %v1889_v22 = vmul.f32 %v4687_v1, %v864_v8  ;;  %v885_v11 = vld [vmem:[%s4680_s11 + $0x1588] sm:$0xff]  ;;  %v886_v12 = vld [vmem:[%s4680_s11 + $0x1590] sm:$0xff] }
 0x1cf   : > { %v1890_v23 = vmul.f32 %v4687_v1, %v865_v9  ;;  %3932 = vst [vmem:[%s4721_s25 + $0x14b0] sm:$0xff] %v2908_v15  ;;  %v2910_v27 = vadd.f32 %v4692_v5, %v1885_v16  ;;  %v2911_v28 = vadd.f32 %v4692_v5, %v1886_v17  ;;  %v2912_v29 = vadd.f32 %v4692_v5, %v1887_v18  ;;  %v887_v17 = vld [vmem:[%s4680_s11 + $0x1598] sm:$0xff]  ;;  %v888_v18 = vld [vmem:[%s4680_s11 + $0x15a0] sm:$0xff] }
 0x1d0   : > { %v1891_v30 = vmul.f32 %v4687_v1, %v866_v14  ;;  %3933 = vst [vmem:[%s4721_s25 + $0x14b8] sm:$0xff] %v2909_v20  ;;  %v2913_v34 = vadd.f32 %v4692_v5, %v1888_v21  ;;  %v2914_v35 = vadd.f32 %v4692_v5, %v1889_v22  ;;  %v1892_v37 = vmul.f32 %v4687_v1, %v867_v19  ;;  %v889_v19 = vld [vmem:[%s4680_s11 + $0x15a8] sm:$0xff] }
 0x1d1   : > { %v2915_v36 = vadd.f32 %v4692_v5, %v1890_v23  ;;  %3934 = vst [vmem:[%s4721_s25 + $0x14c0] sm:$0xff] %v2910_v27  ;;  %3935 = vst [vmem:[%s4721_s25 + $0x14c8] sm:$0xff] %v2911_v28  ;;  %v1893_v40 = vmul.f32 %v4687_v1, %v868_v24  ;;  %v1894_v41 = vmul.f32 %v4687_v1, %v869_v25  ;;  %v890_v24 = vld [vmem:[%s4680_s11 + $0x15b0] sm:$0xff] }
 0x1d2   : > { %3936 = vst [vmem:[%s4721_s25 + $0x14d0] sm:$0xff] %v2912_v29  ;;  %v2916_v39 = vadd.f32 %v4692_v5, %v1891_v30  ;;  %v1895_v42 = vmul.f32 %v4687_v1, %v870_v26  ;;  %3937 = vst [vmem:[%s4721_s25 + $0x14d8] sm:$0xff] %v2913_v34  ;;  %v2917_v44 = vadd.f32 %v4692_v5, %v1892_v37  ;;  %v891_v29 = vld [vmem:[%s4680_s11 + $0x15b8] sm:$0xff]  ;;  %v892_v34 = vld [vmem:[%s4680_s11 + $0x15c0] sm:$0xff] }
 0x1d3   : > { %3938 = vst [vmem:[%s4721_s25 + $0x14e0] sm:$0xff] %v2914_v35  ;;  %3939 = vst [vmem:[%s4721_s25 + $0x14e8] sm:$0xff] %v2915_v36  ;;  %v1896_v45 = vmul.f32 %v4687_v1, %v871_v31  ;;  %v1897_v46 = vmul.f32 %v4687_v1, %v872_v32  ;;  %v1898_v47 = vmul.f32 %v4687_v1, %v873_v33  ;;  %v893_v35 = vld [vmem:[%s4680_s11 + $0x15c8] sm:$0xff]  ;;  %v894_v36 = vld [vmem:[%s4680_s11 + $0x15d0] sm:$0xff] }
 0x1d4   : > { %3940 = vst [vmem:[%s4721_s25 + $0x14f0] sm:$0xff] %v2916_v39  ;;  %v2918_v51 = vadd.f32 %v4692_v5, %v1893_v40  ;;  %v2919_v52 = vadd.f32 %v4692_v5, %v1894_v41  ;;  %v2920_v53 = vadd.f32 %v4692_v5, %v1895_v42  ;;  %v1899_v54 = vmul.f32 %v4687_v1, %v874_v38  ;;  %v895_v41 = vld [vmem:[%s4680_s11 + $0x15d8] sm:$0xff]  ;;  %v896_v42 = vld [vmem:[%s4680_s11 + $0x15e0] sm:$0xff] }
 0x1d5   : > { %3941 = vst [vmem:[%s4721_s25 + $0x14f8] sm:$0xff] %v2917_v44  ;;  %v2921_v58 = vadd.f32 %v4692_v5, %v1896_v45  ;;  %v2922_v59 = vadd.f32 %v4692_v5, %v1897_v46  ;;  %v2923_v60 = vadd.f32 %v4692_v5, %v1898_v47  ;;  %v1900_v61 = vmul.f32 %v4687_v1, %v875_v43  ;;  %v897_v43 = vld [vmem:[%s4680_s11 + $0x15e8] sm:$0xff] }
 0x1d6   : > { %3942 = vst [vmem:[%s4721_s25 + $0x1500] sm:$0xff] %v2918_v51  ;;  %3943 = vst [vmem:[%s4721_s25 + $0x1508] sm:$0xff] %v2919_v52  ;;  %v2924_v63 = vadd.f32 %v4692_v5, %v1899_v54  ;;  %v1901_v0 = vmul.f32 %v4687_v1, %v876_v48  ;;  %v1902_v2 = vmul.f32 %v4687_v1, %v877_v49  ;;  %v898_v48 = vld [vmem:[%s4680_s11 + $0x15f0] sm:$0xff] }
 0x1d7   : > { %3944 = vst [vmem:[%s4721_s25 + $0x1510] sm:$0xff] %v2920_v53  ;;  %v1903_v3 = vmul.f32 %v4687_v1, %v878_v50  ;;  %3945 = vst [vmem:[%s4721_s25 + $0x1518] sm:$0xff] %v2921_v58  ;;  %v2925_v6 = vadd.f32 %v4692_v5, %v1900_v61  ;;  %v1904_v7 = vmul.f32 %v4687_v1, %v879_v55  ;;  %v899_v53 = vld [vmem:[%s4680_s11 + $0x15f8] sm:$0xff]  ;;  %v900_v58 = vld [vmem:[%s4680_s11 + $0x1600] sm:$0xff] }
 0x1d8   : > { %3946 = vst [vmem:[%s4721_s25 + $0x1520] sm:$0xff] %v2922_v59  ;;  %3947 = vst [vmem:[%s4721_s25 + $0x1528] sm:$0xff] %v2923_v60  ;;  %v1905_v8 = vmul.f32 %v4687_v1, %v880_v56  ;;  %v1906_v9 = vmul.f32 %v4687_v1, %v881_v57  ;;  %v2926_v13 = vadd.f32 %v4692_v5, %v1901_v0  ;;  %v901_v59 = vld [vmem:[%s4680_s11 + $0x1608] sm:$0xff]  ;;  %v902_v60 = vld [vmem:[%s4680_s11 + $0x1610] sm:$0xff] }
 0x1d9   : > { %3948 = vst [vmem:[%s4721_s25 + $0x1530] sm:$0xff] %v2924_v63  ;;  %v2927_v14 = vadd.f32 %v4692_v5, %v1902_v2  ;;  %v2928_v15 = vadd.f32 %v4692_v5, %v1903_v3  ;;  %v1907_v16 = vmul.f32 %v4687_v1, %v882_v62  ;;  %3949 = vst [vmem:[%s4721_s25 + $0x1538] sm:$0xff] %v2925_v6  ;;  %v903_v2 = vld [vmem:[%s4680_s11 + $0x1618] sm:$0xff]  ;;  %v904_v3 = vld [vmem:[%s4680_s11 + $0x1620] sm:$0xff] }
 0x1da   : > { %v2929_v20 = vadd.f32 %v4692_v5, %v1904_v7  ;;  %v2930_v21 = vadd.f32 %v4692_v5, %v1905_v8  ;;  %v2931_v22 = vadd.f32 %v4692_v5, %v1906_v9  ;;  %v1908_v23 = vmul.f32 %v4687_v1, %v883_v4  ;;  %3950 = vst [vmem:[%s4721_s25 + $0x1540] sm:$0xff] %v2926_v13  ;;  %v905_v4 = vld [vmem:[%s4680_s11 + $0x1628] sm:$0xff] }
 0x1db   : > { %3951 = vst [vmem:[%s4721_s25 + $0x1548] sm:$0xff] %v2927_v14  ;;  %3952 = vst [vmem:[%s4721_s25 + $0x1550] sm:$0xff] %v2928_v15  ;;  %v2932_v25 = vadd.f32 %v4692_v5, %v1907_v16  ;;  %v1909_v26 = vmul.f32 %v4687_v1, %v884_v10  ;;  %v1910_v27 = vmul.f32 %v4687_v1, %v885_v11  ;;  %v906_v10 = vld [vmem:[%s4680_s11 + $0x1630] sm:$0xff]  ;;  %v907_v15 = vld [vmem:[%s4680_s11 + $0x1638] sm:$0xff] }
 0x1dc   : > { %v1911_v28 = vmul.f32 %v4687_v1, %v886_v12  ;;  %3953 = vst [vmem:[%s4721_s25 + $0x1558] sm:$0xff] %v2929_v20  ;;  %3954 = vst [vmem:[%s4721_s25 + $0x1560] sm:$0xff] %v2930_v21  ;;  %v2933_v30 = vadd.f32 %v4692_v5, %v1908_v23  ;;  %v1912_v31 = vmul.f32 %v4687_v1, %v887_v17  ;;  %v908_v20 = vld [vmem:[%s4680_s11 + $0x1640] sm:$0xff]  ;;  %v909_v21 = vld [vmem:[%s4680_s11 + $0x1648] sm:$0xff] }
 0x1dd   : > { %3955 = vst [vmem:[%s4721_s25 + $0x1568] sm:$0xff] %v2931_v22  ;;  %v1913_v32 = vmul.f32 %v4687_v1, %v888_v18  ;;  %v1914_v33 = vmul.f32 %v4687_v1, %v889_v19  ;;  %3956 = vst [vmem:[%s4721_s25 + $0x1570] sm:$0xff] %v2932_v25  ;;  %v2934_v37 = vadd.f32 %v4692_v5, %v1909_v26  ;;  %v910_v22 = vld [vmem:[%s4680_s11 + $0x1650] sm:$0xff] }
 0x1de   : > { %v2935_v38 = vadd.f32 %v4692_v5, %v1910_v27  ;;  %v2936_v39 = vadd.f32 %v4692_v5, %v1911_v28  ;;  %v1915_v40 = vmul.f32 %v4687_v1, %v890_v24  ;;  %3957 = vst [vmem:[%s4721_s25 + $0x1578] sm:$0xff] %v2933_v30  ;;  %v2937_v44 = vadd.f32 %v4692_v5, %v1912_v31  ;;  %v911_v27 = vld [vmem:[%s4680_s11 + $0x1658] sm:$0xff]  ;;  %v912_v28 = vld [vmem:[%s4680_s11 + $0x1660] sm:$0xff] }
 0x1df   : > { %v2938_v45 = vadd.f32 %v4692_v5, %v1913_v32  ;;  %v2939_v46 = vadd.f32 %v4692_v5, %v1914_v33  ;;  %v1916_v47 = vmul.f32 %v4687_v1, %v891_v29  ;;  %3958 = vst [vmem:[%s4721_s25 + $0x1580] sm:$0xff] %v2934_v37  ;;  %v1917_v50 = vmul.f32 %v4687_v1, %v892_v34  ;;  %v913_v29 = vld [vmem:[%s4680_s11 + $0x1668] sm:$0xff]  ;;  %v914_v34 = vld [vmem:[%s4680_s11 + $0x1670] sm:$0xff] }
 0x1e0   : > { %3959 = vst [vmem:[%s4721_s25 + $0x1588] sm:$0xff] %v2935_v38  ;;  %3960 = vst [vmem:[%s4721_s25 + $0x1590] sm:$0xff] %v2936_v39  ;;  %v2940_v49 = vadd.f32 %v4692_v5, %v1915_v40  ;;  %v1918_v51 = vmul.f32 %v4687_v1, %v893_v35  ;;  %v1919_v52 = vmul.f32 %v4687_v1, %v894_v36  ;;  %v915_v39 = vld [vmem:[%s4680_s11 + $0x1678] sm:$0xff] }
 0x1e1   : > { %3961 = vst [vmem:[%s4721_s25 + $0x1598] sm:$0xff] %v2937_v44  ;;  %3962 = vst [vmem:[%s4721_s25 + $0x15a0] sm:$0xff] %v2938_v45  ;;  %v2941_v54 = vadd.f32 %v4692_v5, %v1916_v47  ;;  %v1920_v55 = vmul.f32 %v4687_v1, %v895_v41  ;;  %v1921_v56 = vmul.f32 %v4687_v1, %v896_v42  ;;  %v916_v44 = vld [vmem:[%s4680_s11 + $0x1680] sm:$0xff]  ;;  %v917_v45 = vld [vmem:[%s4680_s11 + $0x1688] sm:$0xff] }
 0x1e2   : > { %3963 = vst [vmem:[%s4721_s25 + $0x15a8] sm:$0xff] %v2939_v46  ;;  %v1922_v57 = vmul.f32 %v4687_v1, %v897_v43  ;;  %3964 = vst [vmem:[%s4721_s25 + $0x15b0] sm:$0xff] %v2940_v49  ;;  %v2942_v61 = vadd.f32 %v4692_v5, %v1917_v50  ;;  %v2943_v62 = vadd.f32 %v4692_v5, %v1918_v51  ;;  %v918_v46 = vld [vmem:[%s4680_s11 + $0x1690] sm:$0xff]  ;;  %v919_v51 = vld [vmem:[%s4680_s11 + $0x1698] sm:$0xff] }
 0x1e3   : > { %v2944_v63 = vadd.f32 %v4692_v5, %v1919_v52  ;;  %v1923_v0 = vmul.f32 %v4687_v1, %v898_v48  ;;  %3965 = vst [vmem:[%s4721_s25 + $0x15b8] sm:$0xff] %v2941_v54  ;;  %v2945_v6 = vadd.f32 %v4692_v5, %v1920_v55  ;;  %v2946_v7 = vadd.f32 %v4692_v5, %v1921_v56  ;;  %v920_v52 = vld [vmem:[%s4680_s11 + $0x16a0] sm:$0xff] }
 0x1e4   : > { %v2947_v8 = vadd.f32 %v4692_v5, %v1922_v57  ;;  %v1924_v9 = vmul.f32 %v4687_v1, %v899_v53  ;;  %3966 = vst [vmem:[%s4721_s25 + $0x15c0] sm:$0xff] %v2942_v61  ;;  %3967 = vst [vmem:[%s4721_s25 + $0x15c8] sm:$0xff] %v2943_v62  ;;  %v1925_v12 = vmul.f32 %v4687_v1, %v900_v58  ;;  %v921_v53 = vld [vmem:[%s4680_s11 + $0x16a8] sm:$0xff]  ;;  %v922_v58 = vld [vmem:[%s4680_s11 + $0x16b0] sm:$0xff] }
 0x1e5   : > { %3968 = vst [vmem:[%s4721_s25 + $0x15d0] sm:$0xff] %v2944_v63  ;;  %v2948_v11 = vadd.f32 %v4692_v5, %v1923_v0  ;;  %v1926_v13 = vmul.f32 %v4687_v1, %v901_v59  ;;  %v1927_v14 = vmul.f32 %v4687_v1, %v902_v60  ;;  %3969 = vst [vmem:[%s4721_s25 + $0x15d8] sm:$0xff] %v2945_v6  ;;  %v923_v63 = vld [vmem:[%s4680_s11 + $0x16b8] sm:$0xff]  ;;  %v924_v6 = vld [vmem:[%s4680_s11 + $0x16c0] sm:$0xff] }
 0x1e6   : > { %3970 = vst [vmem:[%s4721_s25 + $0x15e0] sm:$0xff] %v2946_v7  ;;  %3971 = vst [vmem:[%s4721_s25 + $0x15e8] sm:$0xff] %v2947_v8  ;;  %v2949_v16 = vadd.f32 %v4692_v5, %v1924_v9  ;;  %v1928_v17 = vmul.f32 %v4687_v1, %v903_v2  ;;  %v1929_v18 = vmul.f32 %v4687_v1, %v904_v3  ;;  %v925_v7 = vld [vmem:[%s4680_s11 + $0x16c8] sm:$0xff]  ;;  %v926_v8 = vld [vmem:[%s4680_s11 + $0x16d0] sm:$0xff] }
 0x1e7   : > { %v1930_v19 = vmul.f32 %v4687_v1, %v905_v4  ;;  %3972 = vst [vmem:[%s4721_s25 + $0x15f0] sm:$0xff] %v2948_v11  ;;  %v2950_v23 = vadd.f32 %v4692_v5, %v1925_v12  ;;  %v2951_v24 = vadd.f32 %v4692_v5, %v1926_v13  ;;  %v2952_v25 = vadd.f32 %v4692_v5, %v1927_v14  ;;  %v927_v13 = vld [vmem:[%s4680_s11 + $0x16d8] sm:$0xff]  ;;  %v928_v14 = vld [vmem:[%s4680_s11 + $0x16e0] sm:$0xff] }
 0x1e8   : > { %v1931_v26 = vmul.f32 %v4687_v1, %v906_v10  ;;  %3973 = vst [vmem:[%s4721_s25 + $0x15f8] sm:$0xff] %v2949_v16  ;;  %v2953_v30 = vadd.f32 %v4692_v5, %v1928_v17  ;;  %v2954_v31 = vadd.f32 %v4692_v5, %v1929_v18  ;;  %v1932_v33 = vmul.f32 %v4687_v1, %v907_v15  ;;  %v929_v15 = vld [vmem:[%s4680_s11 + $0x16e8] sm:$0xff] }
 0x1e9   : > { %v2955_v32 = vadd.f32 %v4692_v5, %v1930_v19  ;;  %3974 = vst [vmem:[%s4721_s25 + $0x1600] sm:$0xff] %v2950_v23  ;;  %3975 = vst [vmem:[%s4721_s25 + $0x1608] sm:$0xff] %v2951_v24  ;;  %v1933_v36 = vmul.f32 %v4687_v1, %v908_v20  ;;  %v1934_v37 = vmul.f32 %v4687_v1, %v909_v21  ;;  %v930_v20 = vld [vmem:[%s4680_s11 + $0x16f0] sm:$0xff] }
 0x1ea   : > { %3976 = vst [vmem:[%s4721_s25 + $0x1610] sm:$0xff] %v2952_v25  ;;  %v2956_v35 = vadd.f32 %v4692_v5, %v1931_v26  ;;  %v1935_v38 = vmul.f32 %v4687_v1, %v910_v22  ;;  %3977 = vst [vmem:[%s4721_s25 + $0x1618] sm:$0xff] %v2953_v30  ;;  %v2957_v40 = vadd.f32 %v4692_v5, %v1932_v33  ;;  %v931_v25 = vld [vmem:[%s4680_s11 + $0x16f8] sm:$0xff]  ;;  %v932_v30 = vld [vmem:[%s4680_s11 + $0x1700] sm:$0xff] }
 0x1eb   : > { %3978 = vst [vmem:[%s4721_s25 + $0x1620] sm:$0xff] %v2954_v31  ;;  %3979 = vst [vmem:[%s4721_s25 + $0x1628] sm:$0xff] %v2955_v32  ;;  %v1936_v41 = vmul.f32 %v4687_v1, %v911_v27  ;;  %v1937_v42 = vmul.f32 %v4687_v1, %v912_v28  ;;  %v1938_v43 = vmul.f32 %v4687_v1, %v913_v29  ;;  %v933_v31 = vld [vmem:[%s4680_s11 + $0x1708] sm:$0xff]  ;;  %v934_v32 = vld [vmem:[%s4680_s11 + $0x1710] sm:$0xff] }
 0x1ec   : > { %3980 = vst [vmem:[%s4721_s25 + $0x1630] sm:$0xff] %v2956_v35  ;;  %v2958_v47 = vadd.f32 %v4692_v5, %v1933_v36  ;;  %v2959_v48 = vadd.f32 %v4692_v5, %v1934_v37  ;;  %v2960_v49 = vadd.f32 %v4692_v5, %v1935_v38  ;;  %v1939_v50 = vmul.f32 %v4687_v1, %v914_v34  ;;  %v935_v37 = vld [vmem:[%s4680_s11 + $0x1718] sm:$0xff]  ;;  %v936_v38 = vld [vmem:[%s4680_s11 + $0x1720] sm:$0xff] }
 0x1ed   : > { %3981 = vst [vmem:[%s4721_s25 + $0x1638] sm:$0xff] %v2957_v40  ;;  %v2961_v54 = vadd.f32 %v4692_v5, %v1936_v41  ;;  %v2962_v55 = vadd.f32 %v4692_v5, %v1937_v42  ;;  %v2963_v56 = vadd.f32 %v4692_v5, %v1938_v43  ;;  %v1940_v57 = vmul.f32 %v4687_v1, %v915_v39  ;;  %v937_v39 = vld [vmem:[%s4680_s11 + $0x1728] sm:$0xff] }
 0x1ee   : > { %3982 = vst [vmem:[%s4721_s25 + $0x1640] sm:$0xff] %v2958_v47  ;;  %3983 = vst [vmem:[%s4721_s25 + $0x1648] sm:$0xff] %v2959_v48  ;;  %v2964_v59 = vadd.f32 %v4692_v5, %v1939_v50  ;;  %v1941_v60 = vmul.f32 %v4687_v1, %v916_v44  ;;  %v1942_v61 = vmul.f32 %v4687_v1, %v917_v45  ;;  %v938_v44 = vld [vmem:[%s4680_s11 + $0x1730] sm:$0xff] }
 0x1ef   : > { %3984 = vst [vmem:[%s4721_s25 + $0x1650] sm:$0xff] %v2960_v49  ;;  %v1943_v62 = vmul.f32 %v4687_v1, %v918_v46  ;;  %3985 = vst [vmem:[%s4721_s25 + $0x1658] sm:$0xff] %v2961_v54  ;;  %v2965_v0 = vadd.f32 %v4692_v5, %v1940_v57  ;;  %v1944_v2 = vmul.f32 %v4687_v1, %v919_v51  ;;  %v939_v49 = vld [vmem:[%s4680_s11 + $0x1738] sm:$0xff]  ;;  %v940_v54 = vld [vmem:[%s4680_s11 + $0x1740] sm:$0xff] }
 0x1f0   : > { %3986 = vst [vmem:[%s4721_s25 + $0x1660] sm:$0xff] %v2962_v55  ;;  %3987 = vst [vmem:[%s4721_s25 + $0x1668] sm:$0xff] %v2963_v56  ;;  %v1945_v3 = vmul.f32 %v4687_v1, %v920_v52  ;;  %v1946_v4 = vmul.f32 %v4687_v1, %v921_v53  ;;  %v2966_v9 = vadd.f32 %v4692_v5, %v1941_v60  ;;  %v941_v55 = vld [vmem:[%s4680_s11 + $0x1748] sm:$0xff]  ;;  %v942_v56 = vld [vmem:[%s4680_s11 + $0x1750] sm:$0xff] }
 0x1f1   : > { %3988 = vst [vmem:[%s4721_s25 + $0x1670] sm:$0xff] %v2964_v59  ;;  %v2967_v10 = vadd.f32 %v4692_v5, %v1942_v61  ;;  %v2968_v11 = vadd.f32 %v4692_v5, %v1943_v62  ;;  %v1947_v12 = vmul.f32 %v4687_v1, %v922_v58  ;;  %3989 = vst [vmem:[%s4721_s25 + $0x1678] sm:$0xff] %v2965_v0  ;;  %v943_v61 = vld [vmem:[%s4680_s11 + $0x1758] sm:$0xff]  ;;  %v944_v62 = vld [vmem:[%s4680_s11 + $0x1760] sm:$0xff] }
 0x1f2   : > { %v2969_v16 = vadd.f32 %v4692_v5, %v1944_v2  ;;  %v2970_v17 = vadd.f32 %v4692_v5, %v1945_v3  ;;  %v2971_v18 = vadd.f32 %v4692_v5, %v1946_v4  ;;  %v1948_v19 = vmul.f32 %v4687_v1, %v923_v63  ;;  %3990 = vst [vmem:[%s4721_s25 + $0x1680] sm:$0xff] %v2966_v9  ;;  %v945_v63 = vld [vmem:[%s4680_s11 + $0x1768] sm:$0xff] }
 0x1f3   : > { %3991 = vst [vmem:[%s4721_s25 + $0x1688] sm:$0xff] %v2967_v10  ;;  %3992 = vst [vmem:[%s4721_s25 + $0x1690] sm:$0xff] %v2968_v11  ;;  %v2972_v21 = vadd.f32 %v4692_v5, %v1947_v12  ;;  %v1949_v22 = vmul.f32 %v4687_v1, %v924_v6  ;;  %v1950_v23 = vmul.f32 %v4687_v1, %v925_v7  ;;  %v946_v6 = vld [vmem:[%s4680_s11 + $0x1770] sm:$0xff]  ;;  %v947_v11 = vld [vmem:[%s4680_s11 + $0x1778] sm:$0xff] }
 0x1f4   : > { %v1951_v24 = vmul.f32 %v4687_v1, %v926_v8  ;;  %3993 = vst [vmem:[%s4721_s25 + $0x1698] sm:$0xff] %v2969_v16  ;;  %3994 = vst [vmem:[%s4721_s25 + $0x16a0] sm:$0xff] %v2970_v17  ;;  %v2973_v26 = vadd.f32 %v4692_v5, %v1948_v19  ;;  %v1952_v27 = vmul.f32 %v4687_v1, %v927_v13  ;;  %v948_v16 = vld [vmem:[%s4680_s11 + $0x1780] sm:$0xff]  ;;  %v949_v17 = vld [vmem:[%s4680_s11 + $0x1788] sm:$0xff] }
 0x1f5   : > { %3995 = vst [vmem:[%s4721_s25 + $0x16a8] sm:$0xff] %v2971_v18  ;;  %v1953_v28 = vmul.f32 %v4687_v1, %v928_v14  ;;  %v1954_v29 = vmul.f32 %v4687_v1, %v929_v15  ;;  %3996 = vst [vmem:[%s4721_s25 + $0x16b0] sm:$0xff] %v2972_v21  ;;  %v2974_v33 = vadd.f32 %v4692_v5, %v1949_v22  ;;  %v950_v18 = vld [vmem:[%s4680_s11 + $0x1790] sm:$0xff] }
 0x1f6   : > { %v2975_v34 = vadd.f32 %v4692_v5, %v1950_v23  ;;  %v2976_v35 = vadd.f32 %v4692_v5, %v1951_v24  ;;  %v1955_v36 = vmul.f32 %v4687_v1, %v930_v20  ;;  %3997 = vst [vmem:[%s4721_s25 + $0x16b8] sm:$0xff] %v2973_v26  ;;  %v2977_v40 = vadd.f32 %v4692_v5, %v1952_v27  ;;  %v951_v23 = vld [vmem:[%s4680_s11 + $0x1798] sm:$0xff]  ;;  %v952_v24 = vld [vmem:[%s4680_s11 + $0x17a0] sm:$0xff] }
 0x1f7   : > { %v2978_v41 = vadd.f32 %v4692_v5, %v1953_v28  ;;  %v2979_v42 = vadd.f32 %v4692_v5, %v1954_v29  ;;  %v1956_v43 = vmul.f32 %v4687_v1, %v931_v25  ;;  %3998 = vst [vmem:[%s4721_s25 + $0x16c0] sm:$0xff] %v2974_v33  ;;  %v1957_v46 = vmul.f32 %v4687_v1, %v932_v30  ;;  %v953_v25 = vld [vmem:[%s4680_s11 + $0x17a8] sm:$0xff]  ;;  %v954_v30 = vld [vmem:[%s4680_s11 + $0x17b0] sm:$0xff] }
 0x1f8   : > { %3999 = vst [vmem:[%s4721_s25 + $0x16c8] sm:$0xff] %v2975_v34  ;;  %4000 = vst [vmem:[%s4721_s25 + $0x16d0] sm:$0xff] %v2976_v35  ;;  %v2980_v45 = vadd.f32 %v4692_v5, %v1955_v36  ;;  %v1958_v47 = vmul.f32 %v4687_v1, %v933_v31  ;;  %v1959_v48 = vmul.f32 %v4687_v1, %v934_v32  ;;  %v955_v35 = vld [vmem:[%s4680_s11 + $0x17b8] sm:$0xff] }
 0x1f9   : > { %4001 = vst [vmem:[%s4721_s25 + $0x16d8] sm:$0xff] %v2977_v40  ;;  %4002 = vst [vmem:[%s4721_s25 + $0x16e0] sm:$0xff] %v2978_v41  ;;  %v2981_v50 = vadd.f32 %v4692_v5, %v1956_v43  ;;  %v1960_v51 = vmul.f32 %v4687_v1, %v935_v37  ;;  %v1961_v52 = vmul.f32 %v4687_v1, %v936_v38  ;;  %v956_v40 = vld [vmem:[%s4680_s11 + $0x17c0] sm:$0xff]  ;;  %v957_v41 = vld [vmem:[%s4680_s11 + $0x17c8] sm:$0xff] }
 0x1fa   : > { %4003 = vst [vmem:[%s4721_s25 + $0x16e8] sm:$0xff] %v2979_v42  ;;  %v1962_v53 = vmul.f32 %v4687_v1, %v937_v39  ;;  %4004 = vst [vmem:[%s4721_s25 + $0x16f0] sm:$0xff] %v2980_v45  ;;  %v2982_v57 = vadd.f32 %v4692_v5, %v1957_v46  ;;  %v2983_v58 = vadd.f32 %v4692_v5, %v1958_v47  ;;  %v958_v42 = vld [vmem:[%s4680_s11 + $0x17d0] sm:$0xff]  ;;  %v959_v47 = vld [vmem:[%s4680_s11 + $0x17d8] sm:$0xff] }
 0x1fb   : > { %v2984_v59 = vadd.f32 %v4692_v5, %v1959_v48  ;;  %v1963_v60 = vmul.f32 %v4687_v1, %v938_v44  ;;  %4005 = vst [vmem:[%s4721_s25 + $0x16f8] sm:$0xff] %v2981_v50  ;;  %v2985_v0 = vadd.f32 %v4692_v5, %v1960_v51  ;;  %v2986_v2 = vadd.f32 %v4692_v5, %v1961_v52  ;;  %v960_v48 = vld [vmem:[%s4680_s11 + $0x17e0] sm:$0xff] }
 0x1fc   : > { %v2987_v3 = vadd.f32 %v4692_v5, %v1962_v53  ;;  %v1964_v4 = vmul.f32 %v4687_v1, %v939_v49  ;;  %4006 = vst [vmem:[%s4721_s25 + $0x1700] sm:$0xff] %v2982_v57  ;;  %4007 = vst [vmem:[%s4721_s25 + $0x1708] sm:$0xff] %v2983_v58  ;;  %v1965_v8 = vmul.f32 %v4687_v1, %v940_v54  ;;  %v961_v49 = vld [vmem:[%s4680_s11 + $0x17e8] sm:$0xff]  ;;  %v962_v54 = vld [vmem:[%s4680_s11 + $0x17f0] sm:$0xff] }
 0x1fd   : > { %4008 = vst [vmem:[%s4721_s25 + $0x1710] sm:$0xff] %v2984_v59  ;;  %v2988_v7 = vadd.f32 %v4692_v5, %v1963_v60  ;;  %v1966_v9 = vmul.f32 %v4687_v1, %v941_v55  ;;  %v1967_v10 = vmul.f32 %v4687_v1, %v942_v56  ;;  %4009 = vst [vmem:[%s4721_s25 + $0x1718] sm:$0xff] %v2985_v0  ;;  %v963_v59 = vld [vmem:[%s4680_s11 + $0x17f8] sm:$0xff]  ;;  %v964_v0 = vld [vmem:[%s4680_s11 + $0x1800] sm:$0xff] }
 0x1fe   : > { %4010 = vst [vmem:[%s4721_s25 + $0x1720] sm:$0xff] %v2986_v2  ;;  %4011 = vst [vmem:[%s4721_s25 + $0x1728] sm:$0xff] %v2987_v3  ;;  %v2989_v12 = vadd.f32 %v4692_v5, %v1964_v4  ;;  %v1968_v13 = vmul.f32 %v4687_v1, %v943_v61  ;;  %v1969_v14 = vmul.f32 %v4687_v1, %v944_v62  ;;  %v965_v2 = vld [vmem:[%s4680_s11 + $0x1808] sm:$0xff]  ;;  %v966_v3 = vld [vmem:[%s4680_s11 + $0x1810] sm:$0xff] }
 0x1ff   : > { %v1970_v15 = vmul.f32 %v4687_v1, %v945_v63  ;;  %4012 = vst [vmem:[%s4721_s25 + $0x1730] sm:$0xff] %v2988_v7  ;;  %v2990_v19 = vadd.f32 %v4692_v5, %v1965_v8  ;;  %v2991_v20 = vadd.f32 %v4692_v5, %v1966_v9  ;;  %v2992_v21 = vadd.f32 %v4692_v5, %v1967_v10  ;;  %v967_v9 = vld [vmem:[%s4680_s11 + $0x1818] sm:$0xff]  ;;  %v968_v10 = vld [vmem:[%s4680_s11 + $0x1820] sm:$0xff] }
 0x200   : > { %v1971_v22 = vmul.f32 %v4687_v1, %v946_v6  ;;  %4013 = vst [vmem:[%s4721_s25 + $0x1738] sm:$0xff] %v2989_v12  ;;  %v2993_v26 = vadd.f32 %v4692_v5, %v1968_v13  ;;  %v2994_v27 = vadd.f32 %v4692_v5, %v1969_v14  ;;  %v1972_v29 = vmul.f32 %v4687_v1, %v947_v11  ;;  %v969_v11 = vld [vmem:[%s4680_s11 + $0x1828] sm:$0xff] }
 0x201   : > { %v2995_v28 = vadd.f32 %v4692_v5, %v1970_v15  ;;  %4014 = vst [vmem:[%s4721_s25 + $0x1740] sm:$0xff] %v2990_v19  ;;  %4015 = vst [vmem:[%s4721_s25 + $0x1748] sm:$0xff] %v2991_v20  ;;  %v1973_v32 = vmul.f32 %v4687_v1, %v948_v16  ;;  %v1974_v33 = vmul.f32 %v4687_v1, %v949_v17  ;;  %v970_v16 = vld [vmem:[%s4680_s11 + $0x1830] sm:$0xff] }
 0x202   : > { %4016 = vst [vmem:[%s4721_s25 + $0x1750] sm:$0xff] %v2992_v21  ;;  %v2996_v31 = vadd.f32 %v4692_v5, %v1971_v22  ;;  %v1975_v34 = vmul.f32 %v4687_v1, %v950_v18  ;;  %4017 = vst [vmem:[%s4721_s25 + $0x1758] sm:$0xff] %v2993_v26  ;;  %v2997_v36 = vadd.f32 %v4692_v5, %v1972_v29  ;;  %v971_v21 = vld [vmem:[%s4680_s11 + $0x1838] sm:$0xff]  ;;  %v972_v26 = vld [vmem:[%s4680_s11 + $0x1840] sm:$0xff] }
 0x203   : > { %4018 = vst [vmem:[%s4721_s25 + $0x1760] sm:$0xff] %v2994_v27  ;;  %4019 = vst [vmem:[%s4721_s25 + $0x1768] sm:$0xff] %v2995_v28  ;;  %v1976_v37 = vmul.f32 %v4687_v1, %v951_v23  ;;  %v1977_v38 = vmul.f32 %v4687_v1, %v952_v24  ;;  %v1978_v39 = vmul.f32 %v4687_v1, %v953_v25  ;;  %v973_v27 = vld [vmem:[%s4680_s11 + $0x1848] sm:$0xff]  ;;  %v974_v28 = vld [vmem:[%s4680_s11 + $0x1850] sm:$0xff] }
 0x204   : > { %4020 = vst [vmem:[%s4721_s25 + $0x1770] sm:$0xff] %v2996_v31  ;;  %v2998_v43 = vadd.f32 %v4692_v5, %v1973_v32  ;;  %v2999_v44 = vadd.f32 %v4692_v5, %v1974_v33  ;;  %v3000_v45 = vadd.f32 %v4692_v5, %v1975_v34  ;;  %v1979_v46 = vmul.f32 %v4687_v1, %v954_v30  ;;  %v975_v33 = vld [vmem:[%s4680_s11 + $0x1858] sm:$0xff]  ;;  %v976_v34 = vld [vmem:[%s4680_s11 + $0x1860] sm:$0xff] }
 0x205   : > { %4021 = vst [vmem:[%s4721_s25 + $0x1778] sm:$0xff] %v2997_v36  ;;  %v3001_v50 = vadd.f32 %v4692_v5, %v1976_v37  ;;  %v3002_v51 = vadd.f32 %v4692_v5, %v1977_v38  ;;  %v3003_v52 = vadd.f32 %v4692_v5, %v1978_v39  ;;  %v1980_v53 = vmul.f32 %v4687_v1, %v955_v35  ;;  %v977_v35 = vld [vmem:[%s4680_s11 + $0x1868] sm:$0xff] }
 0x206   : > { %4022 = vst [vmem:[%s4721_s25 + $0x1780] sm:$0xff] %v2998_v43  ;;  %4023 = vst [vmem:[%s4721_s25 + $0x1788] sm:$0xff] %v2999_v44  ;;  %v3004_v55 = vadd.f32 %v4692_v5, %v1979_v46  ;;  %v1981_v56 = vmul.f32 %v4687_v1, %v956_v40  ;;  %v1982_v57 = vmul.f32 %v4687_v1, %v957_v41  ;;  %v978_v40 = vld [vmem:[%s4680_s11 + $0x1870] sm:$0xff] }
 0x207   : > { %4024 = vst [vmem:[%s4721_s25 + $0x1790] sm:$0xff] %v3000_v45  ;;  %v1983_v58 = vmul.f32 %v4687_v1, %v958_v42  ;;  %4025 = vst [vmem:[%s4721_s25 + $0x1798] sm:$0xff] %v3001_v50  ;;  %v3005_v60 = vadd.f32 %v4692_v5, %v1980_v53  ;;  %v1984_v61 = vmul.f32 %v4687_v1, %v959_v47  ;;  %v979_v45 = vld [vmem:[%s4680_s11 + $0x1878] sm:$0xff]  ;;  %v980_v50 = vld [vmem:[%s4680_s11 + $0x1880] sm:$0xff] }
 0x208   : > { %4026 = vst [vmem:[%s4721_s25 + $0x17a0] sm:$0xff] %v3002_v51  ;;  %4027 = vst [vmem:[%s4721_s25 + $0x17a8] sm:$0xff] %v3003_v52  ;;  %v1985_v62 = vmul.f32 %v4687_v1, %v960_v48  ;;  %v1986_v63 = vmul.f32 %v4687_v1, %v961_v49  ;;  %v3006_v4 = vadd.f32 %v4692_v5, %v1981_v56  ;;  %v981_v51 = vld [vmem:[%s4680_s11 + $0x1888] sm:$0xff]  ;;  %v982_v52 = vld [vmem:[%s4680_s11 + $0x1890] sm:$0xff] }
 0x209   : > { %4028 = vst [vmem:[%s4721_s25 + $0x17b0] sm:$0xff] %v3004_v55  ;;  %v3007_v6 = vadd.f32 %v4692_v5, %v1982_v57  ;;  %v3008_v7 = vadd.f32 %v4692_v5, %v1983_v58  ;;  %v1987_v8 = vmul.f32 %v4687_v1, %v962_v54  ;;  %4029 = vst [vmem:[%s4721_s25 + $0x17b8] sm:$0xff] %v3005_v60  ;;  %v983_v57 = vld [vmem:[%s4680_s11 + $0x1898] sm:$0xff]  ;;  %v984_v58 = vld [vmem:[%s4680_s11 + $0x18a0] sm:$0xff] }
 0x20a   : > { %v3009_v12 = vadd.f32 %v4692_v5, %v1984_v61  ;;  %v3010_v13 = vadd.f32 %v4692_v5, %v1985_v62  ;;  %v3011_v14 = vadd.f32 %v4692_v5, %v1986_v63  ;;  %v1988_v15 = vmul.f32 %v4687_v1, %v963_v59  ;;  %4030 = vst [vmem:[%s4721_s25 + $0x17c0] sm:$0xff] %v3006_v4  ;;  %v985_v59 = vld [vmem:[%s4680_s11 + $0x18a8] sm:$0xff] }
 0x20b   : > { %4031 = vst [vmem:[%s4721_s25 + $0x17c8] sm:$0xff] %v3007_v6  ;;  %4032 = vst [vmem:[%s4721_s25 + $0x17d0] sm:$0xff] %v3008_v7  ;;  %v3012_v17 = vadd.f32 %v4692_v5, %v1987_v8  ;;  %v1989_v18 = vmul.f32 %v4687_v1, %v964_v0  ;;  %v1990_v19 = vmul.f32 %v4687_v1, %v965_v2  ;;  %v986_v0 = vld [vmem:[%s4680_s11 + $0x18b0] sm:$0xff]  ;;  %v987_v7 = vld [vmem:[%s4680_s11 + $0x18b8] sm:$0xff] }
 0x20c   : > { %v1991_v20 = vmul.f32 %v4687_v1, %v966_v3  ;;  %4033 = vst [vmem:[%s4721_s25 + $0x17d8] sm:$0xff] %v3009_v12  ;;  %4034 = vst [vmem:[%s4721_s25 + $0x17e0] sm:$0xff] %v3010_v13  ;;  %v3013_v22 = vadd.f32 %v4692_v5, %v1988_v15  ;;  %v1992_v23 = vmul.f32 %v4687_v1, %v967_v9  ;;  %v988_v12 = vld [vmem:[%s4680_s11 + $0x18c0] sm:$0xff]  ;;  %v989_v13 = vld [vmem:[%s4680_s11 + $0x18c8] sm:$0xff] }
 0x20d   : > { %4035 = vst [vmem:[%s4721_s25 + $0x17e8] sm:$0xff] %v3011_v14  ;;  %v1993_v24 = vmul.f32 %v4687_v1, %v968_v10  ;;  %v1994_v25 = vmul.f32 %v4687_v1, %v969_v11  ;;  %4036 = vst [vmem:[%s4721_s25 + $0x17f0] sm:$0xff] %v3012_v17  ;;  %v3014_v29 = vadd.f32 %v4692_v5, %v1989_v18  ;;  %v990_v14 = vld [vmem:[%s4680_s11 + $0x18d0] sm:$0xff] }
 0x20e   : > { %v3015_v30 = vadd.f32 %v4692_v5, %v1990_v19  ;;  %v3016_v31 = vadd.f32 %v4692_v5, %v1991_v20  ;;  %v1995_v32 = vmul.f32 %v4687_v1, %v970_v16  ;;  %4037 = vst [vmem:[%s4721_s25 + $0x17f8] sm:$0xff] %v3013_v22  ;;  %v3017_v36 = vadd.f32 %v4692_v5, %v1992_v23  ;;  %v991_v19 = vld [vmem:[%s4680_s11 + $0x18d8] sm:$0xff]  ;;  %v992_v20 = vld [vmem:[%s4680_s11 + $0x18e0] sm:$0xff] }
 0x20f   : > { %v3018_v37 = vadd.f32 %v4692_v5, %v1993_v24  ;;  %v3019_v38 = vadd.f32 %v4692_v5, %v1994_v25  ;;  %v1996_v39 = vmul.f32 %v4687_v1, %v971_v21  ;;  %4038 = vst [vmem:[%s4721_s25 + $0x1800] sm:$0xff] %v3014_v29  ;;  %v1997_v42 = vmul.f32 %v4687_v1, %v972_v26  ;;  %v993_v21 = vld [vmem:[%s4680_s11 + $0x18e8] sm:$0xff]  ;;  %v994_v26 = vld [vmem:[%s4680_s11 + $0x18f0] sm:$0xff] }
 0x210   : > { %4039 = vst [vmem:[%s4721_s25 + $0x1808] sm:$0xff] %v3015_v30  ;;  %4040 = vst [vmem:[%s4721_s25 + $0x1810] sm:$0xff] %v3016_v31  ;;  %v3020_v41 = vadd.f32 %v4692_v5, %v1995_v32  ;;  %v1998_v43 = vmul.f32 %v4687_v1, %v973_v27  ;;  %v1999_v44 = vmul.f32 %v4687_v1, %v974_v28  ;;  %v995_v31 = vld [vmem:[%s4680_s11 + $0x18f8] sm:$0xff] }
 0x211   : > { %4041 = vst [vmem:[%s4721_s25 + $0x1818] sm:$0xff] %v3017_v36  ;;  %4042 = vst [vmem:[%s4721_s25 + $0x1820] sm:$0xff] %v3018_v37  ;;  %v3021_v46 = vadd.f32 %v4692_v5, %v1996_v39  ;;  %v2000_v47 = vmul.f32 %v4687_v1, %v975_v33  ;;  %v2001_v48 = vmul.f32 %v4687_v1, %v976_v34  ;;  %v996_v36 = vld [vmem:[%s4680_s11 + $0x1900] sm:$0xff]  ;;  %v997_v37 = vld [vmem:[%s4680_s11 + $0x1908] sm:$0xff] }
 0x212   : > { %4043 = vst [vmem:[%s4721_s25 + $0x1828] sm:$0xff] %v3019_v38  ;;  %v2002_v49 = vmul.f32 %v4687_v1, %v977_v35  ;;  %4044 = vst [vmem:[%s4721_s25 + $0x1830] sm:$0xff] %v3020_v41  ;;  %v3022_v53 = vadd.f32 %v4692_v5, %v1997_v42  ;;  %v3023_v54 = vadd.f32 %v4692_v5, %v1998_v43  ;;  %v998_v38 = vld [vmem:[%s4680_s11 + $0x1910] sm:$0xff]  ;;  %v999_v43 = vld [vmem:[%s4680_s11 + $0x1918] sm:$0xff] }
 0x213   : > { %v3024_v55 = vadd.f32 %v4692_v5, %v1999_v44  ;;  %v2003_v56 = vmul.f32 %v4687_v1, %v978_v40  ;;  %4045 = vst [vmem:[%s4721_s25 + $0x1838] sm:$0xff] %v3021_v46  ;;  %v3025_v60 = vadd.f32 %v4692_v5, %v2000_v47  ;;  %v3026_v61 = vadd.f32 %v4692_v5, %v2001_v48  ;;  %v1000_v44 = vld [vmem:[%s4680_s11 + $0x1920] sm:$0xff] }
 0x214   : > { %v3027_v62 = vadd.f32 %v4692_v5, %v2002_v49  ;;  %v2004_v63 = vmul.f32 %v4687_v1, %v979_v45  ;;  %4046 = vst [vmem:[%s4721_s25 + $0x1840] sm:$0xff] %v3022_v53  ;;  %4047 = vst [vmem:[%s4721_s25 + $0x1848] sm:$0xff] %v3023_v54  ;;  %v2005_v3 = vmul.f32 %v4687_v1, %v980_v50  ;;  %v1001_v45 = vld [vmem:[%s4680_s11 + $0x1928] sm:$0xff]  ;;  %v1002_v50 = vld [vmem:[%s4680_s11 + $0x1930] sm:$0xff] }
 0x215   : > { %4048 = vst [vmem:[%s4721_s25 + $0x1850] sm:$0xff] %v3024_v55  ;;  %v3028_v2 = vadd.f32 %v4692_v5, %v2003_v56  ;;  %v2006_v4 = vmul.f32 %v4687_v1, %v981_v51  ;;  %v2007_v6 = vmul.f32 %v4687_v1, %v982_v52  ;;  %4049 = vst [vmem:[%s4721_s25 + $0x1858] sm:$0xff] %v3025_v60  ;;  %v1003_v55 = vld [vmem:[%s4680_s11 + $0x1938] sm:$0xff]  ;;  %v1004_v60 = vld [vmem:[%s4680_s11 + $0x1940] sm:$0xff] }
 0x216   : > { %4050 = vst [vmem:[%s4721_s25 + $0x1860] sm:$0xff] %v3026_v61  ;;  %4051 = vst [vmem:[%s4721_s25 + $0x1868] sm:$0xff] %v3027_v62  ;;  %v3029_v8 = vadd.f32 %v4692_v5, %v2004_v63  ;;  %v2008_v9 = vmul.f32 %v4687_v1, %v983_v57  ;;  %v2009_v10 = vmul.f32 %v4687_v1, %v984_v58  ;;  %v1005_v61 = vld [vmem:[%s4680_s11 + $0x1948] sm:$0xff]  ;;  %v1006_v62 = vld [vmem:[%s4680_s11 + $0x1950] sm:$0xff] }
 0x217   : > { %v2010_v11 = vmul.f32 %v4687_v1, %v985_v59  ;;  %4052 = vst [vmem:[%s4721_s25 + $0x1870] sm:$0xff] %v3028_v2  ;;  %v3030_v15 = vadd.f32 %v4692_v5, %v2005_v3  ;;  %v3031_v16 = vadd.f32 %v4692_v5, %v2006_v4  ;;  %v3032_v17 = vadd.f32 %v4692_v5, %v2007_v6  ;;  %v1007_v4 = vld [vmem:[%s4680_s11 + $0x1958] sm:$0xff]  ;;  %v1008_v6 = vld [vmem:[%s4680_s11 + $0x1960] sm:$0xff] }
 0x218   : > { %v2011_v18 = vmul.f32 %v4687_v1, %v986_v0  ;;  %4053 = vst [vmem:[%s4721_s25 + $0x1878] sm:$0xff] %v3029_v8  ;;  %v3033_v22 = vadd.f32 %v4692_v5, %v2008_v9  ;;  %v3034_v23 = vadd.f32 %v4692_v5, %v2009_v10  ;;  %v2012_v25 = vmul.f32 %v4687_v1, %v987_v7  ;;  %v1009_v7 = vld [vmem:[%s4680_s11 + $0x1968] sm:$0xff] }
 0x219   : > { %v3035_v24 = vadd.f32 %v4692_v5, %v2010_v11  ;;  %4054 = vst [vmem:[%s4721_s25 + $0x1880] sm:$0xff] %v3030_v15  ;;  %4055 = vst [vmem:[%s4721_s25 + $0x1888] sm:$0xff] %v3031_v16  ;;  %v2013_v28 = vmul.f32 %v4687_v1, %v988_v12  ;;  %v2014_v29 = vmul.f32 %v4687_v1, %v989_v13  ;;  %v1010_v12 = vld [vmem:[%s4680_s11 + $0x1970] sm:$0xff] }
 0x21a   : > { %4056 = vst [vmem:[%s4721_s25 + $0x1890] sm:$0xff] %v3032_v17  ;;  %v3036_v27 = vadd.f32 %v4692_v5, %v2011_v18  ;;  %v2015_v30 = vmul.f32 %v4687_v1, %v990_v14  ;;  %4057 = vst [vmem:[%s4721_s25 + $0x1898] sm:$0xff] %v3033_v22  ;;  %v3037_v32 = vadd.f32 %v4692_v5, %v2012_v25  ;;  %v1011_v17 = vld [vmem:[%s4680_s11 + $0x1978] sm:$0xff]  ;;  %v1012_v22 = vld [vmem:[%s4680_s11 + $0x1980] sm:$0xff] }
 0x21b   : > { %4058 = vst [vmem:[%s4721_s25 + $0x18a0] sm:$0xff] %v3034_v23  ;;  %4059 = vst [vmem:[%s4721_s25 + $0x18a8] sm:$0xff] %v3035_v24  ;;  %v2016_v33 = vmul.f32 %v4687_v1, %v991_v19  ;;  %v2017_v34 = vmul.f32 %v4687_v1, %v992_v20  ;;  %v2018_v35 = vmul.f32 %v4687_v1, %v993_v21  ;;  %v1013_v23 = vld [vmem:[%s4680_s11 + $0x1988] sm:$0xff]  ;;  %v1014_v24 = vld [vmem:[%s4680_s11 + $0x1990] sm:$0xff] }
 0x21c   : > { %4060 = vst [vmem:[%s4721_s25 + $0x18b0] sm:$0xff] %v3036_v27  ;;  %v3038_v39 = vadd.f32 %v4692_v5, %v2013_v28  ;;  %v3039_v40 = vadd.f32 %v4692_v5, %v2014_v29  ;;  %v3040_v41 = vadd.f32 %v4692_v5, %v2015_v30  ;;  %v2019_v42 = vmul.f32 %v4687_v1, %v994_v26  ;;  %v1015_v29 = vld [vmem:[%s4680_s11 + $0x1998] sm:$0xff]  ;;  %v1016_v30 = vld [vmem:[%s4680_s11 + $0x19a0] sm:$0xff] }
 0x21d   : > { %4061 = vst [vmem:[%s4721_s25 + $0x18b8] sm:$0xff] %v3037_v32  ;;  %v3041_v46 = vadd.f32 %v4692_v5, %v2016_v33  ;;  %v3042_v47 = vadd.f32 %v4692_v5, %v2017_v34  ;;  %v3043_v48 = vadd.f32 %v4692_v5, %v2018_v35  ;;  %v2020_v49 = vmul.f32 %v4687_v1, %v995_v31  ;;  %v1017_v31 = vld [vmem:[%s4680_s11 + $0x19a8] sm:$0xff] }
 0x21e   : > { %4062 = vst [vmem:[%s4721_s25 + $0x18c0] sm:$0xff] %v3038_v39  ;;  %4063 = vst [vmem:[%s4721_s25 + $0x18c8] sm:$0xff] %v3039_v40  ;;  %v3044_v51 = vadd.f32 %v4692_v5, %v2019_v42  ;;  %v2021_v52 = vmul.f32 %v4687_v1, %v996_v36  ;;  %v2022_v53 = vmul.f32 %v4687_v1, %v997_v37  ;;  %v1018_v36 = vld [vmem:[%s4680_s11 + $0x19b0] sm:$0xff] }
 0x21f   : > { %4064 = vst [vmem:[%s4721_s25 + $0x18d0] sm:$0xff] %v3040_v41  ;;  %v2023_v54 = vmul.f32 %v4687_v1, %v998_v38  ;;  %4065 = vst [vmem:[%s4721_s25 + $0x18d8] sm:$0xff] %v3041_v46  ;;  %v3045_v56 = vadd.f32 %v4692_v5, %v2020_v49  ;;  %v2024_v57 = vmul.f32 %v4687_v1, %v999_v43  ;;  %v1019_v41 = vld [vmem:[%s4680_s11 + $0x19b8] sm:$0xff]  ;;  %v1020_v46 = vld [vmem:[%s4680_s11 + $0x19c0] sm:$0xff] }
 0x220   : > { %4066 = vst [vmem:[%s4721_s25 + $0x18e0] sm:$0xff] %v3042_v47  ;;  %4067 = vst [vmem:[%s4721_s25 + $0x18e8] sm:$0xff] %v3043_v48  ;;  %v2025_v58 = vmul.f32 %v4687_v1, %v1000_v44  ;;  %v2026_v59 = vmul.f32 %v4687_v1, %v1001_v45  ;;  %v3046_v63 = vadd.f32 %v4692_v5, %v2021_v52  ;;  %v1021_v47 = vld [vmem:[%s4680_s11 + $0x19c8] sm:$0xff]  ;;  %v1022_v48 = vld [vmem:[%s4680_s11 + $0x19d0] sm:$0xff] }
 0x221   : > { %4068 = vst [vmem:[%s4721_s25 + $0x18f0] sm:$0xff] %v3044_v51  ;;  %v3047_v0 = vadd.f32 %v4692_v5, %v2022_v53  ;;  %v3048_v2 = vadd.f32 %v4692_v5, %v2023_v54  ;;  %v2027_v3 = vmul.f32 %v4687_v1, %v1002_v50  ;;  %4069 = vst [vmem:[%s4721_s25 + $0x18f8] sm:$0xff] %v3045_v56  ;;  %v1023_v53 = vld [vmem:[%s4680_s11 + $0x19d8] sm:$0xff]  ;;  %v1024_v54 = vld [vmem:[%s4680_s11 + $0x19e0] sm:$0xff] }
 0x222   : > { %v3049_v8 = vadd.f32 %v4692_v5, %v2024_v57  ;;  %v3050_v9 = vadd.f32 %v4692_v5, %v2025_v58  ;;  %v3051_v10 = vadd.f32 %v4692_v5, %v2026_v59  ;;  %v2028_v11 = vmul.f32 %v4687_v1, %v1003_v55  ;;  %4070 = vst [vmem:[%s4721_s25 + $0x1900] sm:$0xff] %v3046_v63  ;;  %v1025_v55 = vld [vmem:[%s4680_s11 + $0x19e8] sm:$0xff] }
 0x223   : > { %4071 = vst [vmem:[%s4721_s25 + $0x1908] sm:$0xff] %v3047_v0  ;;  %4072 = vst [vmem:[%s4721_s25 + $0x1910] sm:$0xff] %v3048_v2  ;;  %v3052_v13 = vadd.f32 %v4692_v5, %v2027_v3  ;;  %v2029_v14 = vmul.f32 %v4687_v1, %v1004_v60  ;;  %v2030_v15 = vmul.f32 %v4687_v1, %v1005_v61  ;;  %v1026_v60 = vld [vmem:[%s4680_s11 + $0x19f0] sm:$0xff]  ;;  %v1027_v2 = vld [vmem:[%s4680_s11 + $0x19f8] sm:$0xff] }
 0x224   : > { %v2031_v16 = vmul.f32 %v4687_v1, %v1006_v62  ;;  %4073 = vst [vmem:[%s4721_s25 + $0x1918] sm:$0xff] %v3049_v8  ;;  %4074 = vst [vmem:[%s4721_s25 + $0x1920] sm:$0xff] %v3050_v9  ;;  %v3053_v18 = vadd.f32 %v4692_v5, %v2028_v11  ;;  %v2032_v19 = vmul.f32 %v4687_v1, %v1007_v4  ;;  %v1028_v8 = vld [vmem:[%s4680_s11 + $0x1a00] sm:$0xff]  ;;  %v1029_v9 = vld [vmem:[%s4680_s11 + $0x1a08] sm:$0xff] }
 0x225   : > { %4075 = vst [vmem:[%s4721_s25 + $0x1928] sm:$0xff] %v3051_v10  ;;  %v2033_v20 = vmul.f32 %v4687_v1, %v1008_v6  ;;  %v2034_v21 = vmul.f32 %v4687_v1, %v1009_v7  ;;  %4076 = vst [vmem:[%s4721_s25 + $0x1930] sm:$0xff] %v3052_v13  ;;  %v3054_v25 = vadd.f32 %v4692_v5, %v2029_v14  ;;  %v1030_v10 = vld [vmem:[%s4680_s11 + $0x1a10] sm:$0xff] }
 0x226   : > { %v3055_v26 = vadd.f32 %v4692_v5, %v2030_v15  ;;  %v3056_v27 = vadd.f32 %v4692_v5, %v2031_v16  ;;  %v2035_v28 = vmul.f32 %v4687_v1, %v1010_v12  ;;  %4077 = vst [vmem:[%s4721_s25 + $0x1938] sm:$0xff] %v3053_v18  ;;  %v3057_v32 = vadd.f32 %v4692_v5, %v2032_v19  ;;  %v1031_v15 = vld [vmem:[%s4680_s11 + $0x1a18] sm:$0xff]  ;;  %v1032_v16 = vld [vmem:[%s4680_s11 + $0x1a20] sm:$0xff] }
 0x227   : > { %v3058_v33 = vadd.f32 %v4692_v5, %v2033_v20  ;;  %v3059_v34 = vadd.f32 %v4692_v5, %v2034_v21  ;;  %v2036_v35 = vmul.f32 %v4687_v1, %v1011_v17  ;;  %4078 = vst [vmem:[%s4721_s25 + $0x1940] sm:$0xff] %v3054_v25  ;;  %v2037_v38 = vmul.f32 %v4687_v1, %v1012_v22  ;;  %v1033_v17 = vld [vmem:[%s4680_s11 + $0x1a28] sm:$0xff]  ;;  %v1034_v22 = vld [vmem:[%s4680_s11 + $0x1a30] sm:$0xff] }
 0x228   : > { %4079 = vst [vmem:[%s4721_s25 + $0x1948] sm:$0xff] %v3055_v26  ;;  %4080 = vst [vmem:[%s4721_s25 + $0x1950] sm:$0xff] %v3056_v27  ;;  %v3060_v37 = vadd.f32 %v4692_v5, %v2035_v28  ;;  %v2038_v39 = vmul.f32 %v4687_v1, %v1013_v23  ;;  %v2039_v40 = vmul.f32 %v4687_v1, %v1014_v24  ;;  %v1035_v27 = vld [vmem:[%s4680_s11 + $0x1a38] sm:$0xff] }
 0x229   : > { %4081 = vst [vmem:[%s4721_s25 + $0x1958] sm:$0xff] %v3057_v32  ;;  %4082 = vst [vmem:[%s4721_s25 + $0x1960] sm:$0xff] %v3058_v33  ;;  %v3061_v42 = vadd.f32 %v4692_v5, %v2036_v35  ;;  %v2040_v43 = vmul.f32 %v4687_v1, %v1015_v29  ;;  %v2041_v44 = vmul.f32 %v4687_v1, %v1016_v30  ;;  %v1036_v32 = vld [vmem:[%s4680_s11 + $0x1a40] sm:$0xff]  ;;  %v1037_v33 = vld [vmem:[%s4680_s11 + $0x1a48] sm:$0xff] }
 0x22a   : > { %4083 = vst [vmem:[%s4721_s25 + $0x1968] sm:$0xff] %v3059_v34  ;;  %v2042_v45 = vmul.f32 %v4687_v1, %v1017_v31  ;;  %4084 = vst [vmem:[%s4721_s25 + $0x1970] sm:$0xff] %v3060_v37  ;;  %v3062_v49 = vadd.f32 %v4692_v5, %v2037_v38  ;;  %v3063_v50 = vadd.f32 %v4692_v5, %v2038_v39  ;;  %v1038_v34 = vld [vmem:[%s4680_s11 + $0x1a50] sm:$0xff]  ;;  %v1039_v39 = vld [vmem:[%s4680_s11 + $0x1a58] sm:$0xff] }
 0x22b   : > { %v3064_v51 = vadd.f32 %v4692_v5, %v2039_v40  ;;  %v2043_v52 = vmul.f32 %v4687_v1, %v1018_v36  ;;  %4085 = vst [vmem:[%s4721_s25 + $0x1978] sm:$0xff] %v3061_v42  ;;  %v3065_v56 = vadd.f32 %v4692_v5, %v2040_v43  ;;  %v3066_v57 = vadd.f32 %v4692_v5, %v2041_v44  ;;  %v1040_v40 = vld [vmem:[%s4680_s11 + $0x1a60] sm:$0xff] }
 0x22c   : > { %v3067_v58 = vadd.f32 %v4692_v5, %v2042_v45  ;;  %v2044_v59 = vmul.f32 %v4687_v1, %v1019_v41  ;;  %4086 = vst [vmem:[%s4721_s25 + $0x1980] sm:$0xff] %v3062_v49  ;;  %4087 = vst [vmem:[%s4721_s25 + $0x1988] sm:$0xff] %v3063_v50  ;;  %v2045_v62 = vmul.f32 %v4687_v1, %v1020_v46  ;;  %v1041_v41 = vld [vmem:[%s4680_s11 + $0x1a68] sm:$0xff]  ;;  %v1042_v46 = vld [vmem:[%s4680_s11 + $0x1a70] sm:$0xff] }
 0x22d   : > { %4088 = vst [vmem:[%s4721_s25 + $0x1990] sm:$0xff] %v3064_v51  ;;  %v3068_v61 = vadd.f32 %v4692_v5, %v2043_v52  ;;  %v2046_v63 = vmul.f32 %v4687_v1, %v1021_v47  ;;  %v2047_v0 = vmul.f32 %v4687_v1, %v1022_v48  ;;  %4089 = vst [vmem:[%s4721_s25 + $0x1998] sm:$0xff] %v3065_v56  ;;  %v1043_v51 = vld [vmem:[%s4680_s11 + $0x1a78] sm:$0xff]  ;;  %v1044_v56 = vld [vmem:[%s4680_s11 + $0x1a80] sm:$0xff] }
 0x22e   : > { %4090 = vst [vmem:[%s4721_s25 + $0x19a0] sm:$0xff] %v3066_v57  ;;  %4091 = vst [vmem:[%s4721_s25 + $0x19a8] sm:$0xff] %v3067_v58  ;;  %v3069_v3 = vadd.f32 %v4692_v5, %v2044_v59  ;;  %v2048_v4 = vmul.f32 %v4687_v1, %v1023_v53  ;;  %v2049_v6 = vmul.f32 %v4687_v1, %v1024_v54  ;;  %v1045_v57 = vld [vmem:[%s4680_s11 + $0x1a88] sm:$0xff]  ;;  %v1046_v58 = vld [vmem:[%s4680_s11 + $0x1a90] sm:$0xff] }
 0x22f   : > { %v2050_v7 = vmul.f32 %v4687_v1, %v1025_v55  ;;  %4092 = vst [vmem:[%s4721_s25 + $0x19b0] sm:$0xff] %v3068_v61  ;;  %v3070_v11 = vadd.f32 %v4692_v5, %v2045_v62  ;;  %v3071_v12 = vadd.f32 %v4692_v5, %v2046_v63  ;;  %v3072_v13 = vadd.f32 %v4692_v5, %v2047_v0  ;;  %v1047_v63 = vld [vmem:[%s4680_s11 + $0x1a98] sm:$0xff]  ;;  %v1048_v0 = vld [vmem:[%s4680_s11 + $0x1aa0] sm:$0xff] }
 0x230   : > { %v2051_v14 = vmul.f32 %v4687_v1, %v1026_v60  ;;  %4093 = vst [vmem:[%s4721_s25 + $0x19b8] sm:$0xff] %v3069_v3  ;;  %v3073_v18 = vadd.f32 %v4692_v5, %v2048_v4  ;;  %v3074_v19 = vadd.f32 %v4692_v5, %v2049_v6  ;;  %v2052_v21 = vmul.f32 %v4687_v1, %v1027_v2  ;;  %v1049_v2 = vld [vmem:[%s4680_s11 + $0x1aa8] sm:$0xff] }
 0x231   : > { %v3075_v20 = vadd.f32 %v4692_v5, %v2050_v7  ;;  %4094 = vst [vmem:[%s4721_s25 + $0x19c0] sm:$0xff] %v3070_v11  ;;  %4095 = vst [vmem:[%s4721_s25 + $0x19c8] sm:$0xff] %v3071_v12  ;;  %v2053_v24 = vmul.f32 %v4687_v1, %v1028_v8  ;;  %v2054_v25 = vmul.f32 %v4687_v1, %v1029_v9  ;;  %v1050_v8 = vld [vmem:[%s4680_s11 + $0x1ab0] sm:$0xff] }
 0x232   : > { %4096 = vst [vmem:[%s4721_s25 + $0x19d0] sm:$0xff] %v3072_v13  ;;  %v3076_v23 = vadd.f32 %v4692_v5, %v2051_v14  ;;  %v2055_v26 = vmul.f32 %v4687_v1, %v1030_v10  ;;  %4097 = vst [vmem:[%s4721_s25 + $0x19d8] sm:$0xff] %v3073_v18  ;;  %v3077_v28 = vadd.f32 %v4692_v5, %v2052_v21  ;;  %v1051_v13 = vld [vmem:[%s4680_s11 + $0x1ab8] sm:$0xff]  ;;  %v1052_v18 = vld [vmem:[%s4680_s11 + $0x1ac0] sm:$0xff] }
 0x233   : > { %4098 = vst [vmem:[%s4721_s25 + $0x19e0] sm:$0xff] %v3074_v19  ;;  %4099 = vst [vmem:[%s4721_s25 + $0x19e8] sm:$0xff] %v3075_v20  ;;  %v2056_v29 = vmul.f32 %v4687_v1, %v1031_v15  ;;  %v2057_v30 = vmul.f32 %v4687_v1, %v1032_v16  ;;  %v2058_v31 = vmul.f32 %v4687_v1, %v1033_v17  ;;  %v1053_v19 = vld [vmem:[%s4680_s11 + $0x1ac8] sm:$0xff]  ;;  %v1054_v20 = vld [vmem:[%s4680_s11 + $0x1ad0] sm:$0xff] }
 0x234   : > { %4100 = vst [vmem:[%s4721_s25 + $0x19f0] sm:$0xff] %v3076_v23  ;;  %v3078_v35 = vadd.f32 %v4692_v5, %v2053_v24  ;;  %v3079_v36 = vadd.f32 %v4692_v5, %v2054_v25  ;;  %v3080_v37 = vadd.f32 %v4692_v5, %v2055_v26  ;;  %v2059_v38 = vmul.f32 %v4687_v1, %v1034_v22  ;;  %v1055_v25 = vld [vmem:[%s4680_s11 + $0x1ad8] sm:$0xff]  ;;  %v1056_v26 = vld [vmem:[%s4680_s11 + $0x1ae0] sm:$0xff] }
 0x235   : > { %4101 = vst [vmem:[%s4721_s25 + $0x19f8] sm:$0xff] %v3077_v28  ;;  %v3081_v42 = vadd.f32 %v4692_v5, %v2056_v29  ;;  %v3082_v43 = vadd.f32 %v4692_v5, %v2057_v30  ;;  %v3083_v44 = vadd.f32 %v4692_v5, %v2058_v31  ;;  %v2060_v45 = vmul.f32 %v4687_v1, %v1035_v27  ;;  %v1057_v27 = vld [vmem:[%s4680_s11 + $0x1ae8] sm:$0xff] }
 0x236   : > { %4102 = vst [vmem:[%s4721_s25 + $0x1a00] sm:$0xff] %v3078_v35  ;;  %4103 = vst [vmem:[%s4721_s25 + $0x1a08] sm:$0xff] %v3079_v36  ;;  %v3084_v47 = vadd.f32 %v4692_v5, %v2059_v38  ;;  %v2061_v48 = vmul.f32 %v4687_v1, %v1036_v32  ;;  %v2062_v49 = vmul.f32 %v4687_v1, %v1037_v33  ;;  %v1058_v32 = vld [vmem:[%s4680_s11 + $0x1af0] sm:$0xff] }
 0x237   : > { %4104 = vst [vmem:[%s4721_s25 + $0x1a10] sm:$0xff] %v3080_v37  ;;  %v2063_v50 = vmul.f32 %v4687_v1, %v1038_v34  ;;  %4105 = vst [vmem:[%s4721_s25 + $0x1a18] sm:$0xff] %v3081_v42  ;;  %v3085_v52 = vadd.f32 %v4692_v5, %v2060_v45  ;;  %v2064_v53 = vmul.f32 %v4687_v1, %v1039_v39  ;;  %v1059_v37 = vld [vmem:[%s4680_s11 + $0x1af8] sm:$0xff]  ;;  %v1060_v42 = vld [vmem:[%s4680_s11 + $0x1b00] sm:$0xff] }
 0x238   : > { %4106 = vst [vmem:[%s4721_s25 + $0x1a20] sm:$0xff] %v3082_v43  ;;  %4107 = vst [vmem:[%s4721_s25 + $0x1a28] sm:$0xff] %v3083_v44  ;;  %v2065_v54 = vmul.f32 %v4687_v1, %v1040_v40  ;;  %v2066_v55 = vmul.f32 %v4687_v1, %v1041_v41  ;;  %v3086_v59 = vadd.f32 %v4692_v5, %v2061_v48  ;;  %v1061_v43 = vld [vmem:[%s4680_s11 + $0x1b08] sm:$0xff]  ;;  %v1062_v44 = vld [vmem:[%s4680_s11 + $0x1b10] sm:$0xff] }
 0x239   : > { %4108 = vst [vmem:[%s4721_s25 + $0x1a30] sm:$0xff] %v3084_v47  ;;  %v3087_v60 = vadd.f32 %v4692_v5, %v2062_v49  ;;  %v3088_v61 = vadd.f32 %v4692_v5, %v2063_v50  ;;  %v2067_v62 = vmul.f32 %v4687_v1, %v1042_v46  ;;  %4109 = vst [vmem:[%s4721_s25 + $0x1a38] sm:$0xff] %v3085_v52  ;;  %v1063_v49 = vld [vmem:[%s4680_s11 + $0x1b18] sm:$0xff]  ;;  %v1064_v50 = vld [vmem:[%s4680_s11 + $0x1b20] sm:$0xff] }
 0x23a   : > { %v3089_v3 = vadd.f32 %v4692_v5, %v2064_v53  ;;  %v3090_v4 = vadd.f32 %v4692_v5, %v2065_v54  ;;  %v3091_v6 = vadd.f32 %v4692_v5, %v2066_v55  ;;  %v2068_v7 = vmul.f32 %v4687_v1, %v1043_v51  ;;  %4110 = vst [vmem:[%s4721_s25 + $0x1a40] sm:$0xff] %v3086_v59  ;;  %v1065_v51 = vld [vmem:[%s4680_s11 + $0x1b28] sm:$0xff] }
 0x23b   : > { %4111 = vst [vmem:[%s4721_s25 + $0x1a48] sm:$0xff] %v3087_v60  ;;  %4112 = vst [vmem:[%s4721_s25 + $0x1a50] sm:$0xff] %v3088_v61  ;;  %v3092_v9 = vadd.f32 %v4692_v5, %v2067_v62  ;;  %v2069_v10 = vmul.f32 %v4687_v1, %v1044_v56  ;;  %v2070_v11 = vmul.f32 %v4687_v1, %v1045_v57  ;;  %v1066_v56 = vld [vmem:[%s4680_s11 + $0x1b30] sm:$0xff]  ;;  %v1067_v61 = vld [vmem:[%s4680_s11 + $0x1b38] sm:$0xff] }
 0x23c   : > { %v2071_v12 = vmul.f32 %v4687_v1, %v1046_v58  ;;  %4113 = vst [vmem:[%s4721_s25 + $0x1a58] sm:$0xff] %v3089_v3  ;;  %4114 = vst [vmem:[%s4721_s25 + $0x1a60] sm:$0xff] %v3090_v4  ;;  %v3093_v14 = vadd.f32 %v4692_v5, %v2068_v7  ;;  %v2072_v15 = vmul.f32 %v4687_v1, %v1047_v63  ;;  %v1068_v3 = vld [vmem:[%s4680_s11 + $0x1b40] sm:$0xff]  ;;  %v1069_v4 = vld [vmem:[%s4680_s11 + $0x1b48] sm:$0xff] }
 0x23d   : > { %4115 = vst [vmem:[%s4721_s25 + $0x1a68] sm:$0xff] %v3091_v6  ;;  %v2073_v16 = vmul.f32 %v4687_v1, %v1048_v0  ;;  %v2074_v17 = vmul.f32 %v4687_v1, %v1049_v2  ;;  %4116 = vst [vmem:[%s4721_s25 + $0x1a70] sm:$0xff] %v3092_v9  ;;  %v3094_v21 = vadd.f32 %v4692_v5, %v2069_v10  ;;  %v1070_v6 = vld [vmem:[%s4680_s11 + $0x1b50] sm:$0xff] }
 0x23e   : > { %v3095_v22 = vadd.f32 %v4692_v5, %v2070_v11  ;;  %v3096_v23 = vadd.f32 %v4692_v5, %v2071_v12  ;;  %v2075_v24 = vmul.f32 %v4687_v1, %v1050_v8  ;;  %4117 = vst [vmem:[%s4721_s25 + $0x1a78] sm:$0xff] %v3093_v14  ;;  %v3097_v28 = vadd.f32 %v4692_v5, %v2072_v15  ;;  %v1071_v11 = vld [vmem:[%s4680_s11 + $0x1b58] sm:$0xff]  ;;  %v1072_v12 = vld [vmem:[%s4680_s11 + $0x1b60] sm:$0xff] }
 0x23f   : > { %v3098_v29 = vadd.f32 %v4692_v5, %v2073_v16  ;;  %v3099_v30 = vadd.f32 %v4692_v5, %v2074_v17  ;;  %v2076_v31 = vmul.f32 %v4687_v1, %v1051_v13  ;;  %4118 = vst [vmem:[%s4721_s25 + $0x1a80] sm:$0xff] %v3094_v21  ;;  %v2077_v34 = vmul.f32 %v4687_v1, %v1052_v18  ;;  %v1073_v13 = vld [vmem:[%s4680_s11 + $0x1b68] sm:$0xff]  ;;  %v1074_v18 = vld [vmem:[%s4680_s11 + $0x1b70] sm:$0xff] }
 0x240   : > { %4119 = vst [vmem:[%s4721_s25 + $0x1a88] sm:$0xff] %v3095_v22  ;;  %4120 = vst [vmem:[%s4721_s25 + $0x1a90] sm:$0xff] %v3096_v23  ;;  %v3100_v33 = vadd.f32 %v4692_v5, %v2075_v24  ;;  %v2078_v35 = vmul.f32 %v4687_v1, %v1053_v19  ;;  %v2079_v36 = vmul.f32 %v4687_v1, %v1054_v20  ;;  %v1075_v23 = vld [vmem:[%s4680_s11 + $0x1b78] sm:$0xff] }
 0x241   : > { %4121 = vst [vmem:[%s4721_s25 + $0x1a98] sm:$0xff] %v3097_v28  ;;  %4122 = vst [vmem:[%s4721_s25 + $0x1aa0] sm:$0xff] %v3098_v29  ;;  %v3101_v38 = vadd.f32 %v4692_v5, %v2076_v31  ;;  %v2080_v39 = vmul.f32 %v4687_v1, %v1055_v25  ;;  %v2081_v40 = vmul.f32 %v4687_v1, %v1056_v26  ;;  %v1076_v28 = vld [vmem:[%s4680_s11 + $0x1b80] sm:$0xff]  ;;  %v1077_v29 = vld [vmem:[%s4680_s11 + $0x1b88] sm:$0xff] }
 0x242   : > { %4123 = vst [vmem:[%s4721_s25 + $0x1aa8] sm:$0xff] %v3099_v30  ;;  %v2082_v41 = vmul.f32 %v4687_v1, %v1057_v27  ;;  %4124 = vst [vmem:[%s4721_s25 + $0x1ab0] sm:$0xff] %v3100_v33  ;;  %v3102_v45 = vadd.f32 %v4692_v5, %v2077_v34  ;;  %v3103_v46 = vadd.f32 %v4692_v5, %v2078_v35  ;;  %v1078_v30 = vld [vmem:[%s4680_s11 + $0x1b90] sm:$0xff]  ;;  %v1079_v35 = vld [vmem:[%s4680_s11 + $0x1b98] sm:$0xff] }
 0x243   : > { %v3104_v47 = vadd.f32 %v4692_v5, %v2079_v36  ;;  %v2083_v48 = vmul.f32 %v4687_v1, %v1058_v32  ;;  %4125 = vst [vmem:[%s4721_s25 + $0x1ab8] sm:$0xff] %v3101_v38  ;;  %v3105_v52 = vadd.f32 %v4692_v5, %v2080_v39  ;;  %v3106_v53 = vadd.f32 %v4692_v5, %v2081_v40  ;;  %v1080_v36 = vld [vmem:[%s4680_s11 + $0x1ba0] sm:$0xff] }
 0x244   : > { %v3107_v54 = vadd.f32 %v4692_v5, %v2082_v41  ;;  %v2084_v55 = vmul.f32 %v4687_v1, %v1059_v37  ;;  %4126 = vst [vmem:[%s4721_s25 + $0x1ac0] sm:$0xff] %v3102_v45  ;;  %4127 = vst [vmem:[%s4721_s25 + $0x1ac8] sm:$0xff] %v3103_v46  ;;  %v2085_v58 = vmul.f32 %v4687_v1, %v1060_v42  ;;  %v1081_v37 = vld [vmem:[%s4680_s11 + $0x1ba8] sm:$0xff]  ;;  %v1082_v42 = vld [vmem:[%s4680_s11 + $0x1bb0] sm:$0xff] }
 0x245   : > { %4128 = vst [vmem:[%s4721_s25 + $0x1ad0] sm:$0xff] %v3104_v47  ;;  %v3108_v57 = vadd.f32 %v4692_v5, %v2083_v48  ;;  %v2086_v59 = vmul.f32 %v4687_v1, %v1061_v43  ;;  %v2087_v60 = vmul.f32 %v4687_v1, %v1062_v44  ;;  %4129 = vst [vmem:[%s4721_s25 + $0x1ad8] sm:$0xff] %v3105_v52  ;;  %v1083_v47 = vld [vmem:[%s4680_s11 + $0x1bb8] sm:$0xff]  ;;  %v1084_v52 = vld [vmem:[%s4680_s11 + $0x1bc0] sm:$0xff] }
 0x246   : > { %4130 = vst [vmem:[%s4721_s25 + $0x1ae0] sm:$0xff] %v3106_v53  ;;  %4131 = vst [vmem:[%s4721_s25 + $0x1ae8] sm:$0xff] %v3107_v54  ;;  %v3109_v62 = vadd.f32 %v4692_v5, %v2084_v55  ;;  %v2088_v63 = vmul.f32 %v4687_v1, %v1063_v49  ;;  %v2089_v0 = vmul.f32 %v4687_v1, %v1064_v50  ;;  %v1085_v53 = vld [vmem:[%s4680_s11 + $0x1bc8] sm:$0xff]  ;;  %v1086_v54 = vld [vmem:[%s4680_s11 + $0x1bd0] sm:$0xff] }
 0x247   : > { %v2090_v2 = vmul.f32 %v4687_v1, %v1065_v51  ;;  %4132 = vst [vmem:[%s4721_s25 + $0x1af0] sm:$0xff] %v3108_v57  ;;  %v3110_v7 = vadd.f32 %v4692_v5, %v2085_v58  ;;  %v3111_v8 = vadd.f32 %v4692_v5, %v2086_v59  ;;  %v3112_v9 = vadd.f32 %v4692_v5, %v2087_v60  ;;  %v1087_v59 = vld [vmem:[%s4680_s11 + $0x1bd8] sm:$0xff]  ;;  %v1088_v60 = vld [vmem:[%s4680_s11 + $0x1be0] sm:$0xff] }
 0x248   : > { %v2091_v10 = vmul.f32 %v4687_v1, %v1066_v56  ;;  %4133 = vst [vmem:[%s4721_s25 + $0x1af8] sm:$0xff] %v3109_v62  ;;  %v3113_v14 = vadd.f32 %v4692_v5, %v2088_v63  ;;  %v3114_v15 = vadd.f32 %v4692_v5, %v2089_v0  ;;  %v2092_v17 = vmul.f32 %v4687_v1, %v1067_v61  ;;  %v1089_v61 = vld [vmem:[%s4680_s11 + $0x1be8] sm:$0xff] }
 0x249   : > { %v3115_v16 = vadd.f32 %v4692_v5, %v2090_v2  ;;  %4134 = vst [vmem:[%s4721_s25 + $0x1b00] sm:$0xff] %v3110_v7  ;;  %4135 = vst [vmem:[%s4721_s25 + $0x1b08] sm:$0xff] %v3111_v8  ;;  %v2093_v20 = vmul.f32 %v4687_v1, %v1068_v3  ;;  %v2094_v21 = vmul.f32 %v4687_v1, %v1069_v4  ;;  %v1090_v3 = vld [vmem:[%s4680_s11 + $0x1bf0] sm:$0xff] }
 0x24a   : > { %4136 = vst [vmem:[%s4721_s25 + $0x1b10] sm:$0xff] %v3112_v9  ;;  %v3116_v19 = vadd.f32 %v4692_v5, %v2091_v10  ;;  %v2095_v22 = vmul.f32 %v4687_v1, %v1070_v6  ;;  %4137 = vst [vmem:[%s4721_s25 + $0x1b18] sm:$0xff] %v3113_v14  ;;  %v3117_v24 = vadd.f32 %v4692_v5, %v2092_v17  ;;  %v1091_v9 = vld [vmem:[%s4680_s11 + $0x1bf8] sm:$0xff]  ;;  %v1092_v14 = vld [vmem:[%s4680_s11 + $0x1c00] sm:$0xff] }
 0x24b   : > { %4138 = vst [vmem:[%s4721_s25 + $0x1b20] sm:$0xff] %v3114_v15  ;;  %4139 = vst [vmem:[%s4721_s25 + $0x1b28] sm:$0xff] %v3115_v16  ;;  %v2096_v25 = vmul.f32 %v4687_v1, %v1071_v11  ;;  %v2097_v26 = vmul.f32 %v4687_v1, %v1072_v12  ;;  %v2098_v27 = vmul.f32 %v4687_v1, %v1073_v13  ;;  %v1093_v15 = vld [vmem:[%s4680_s11 + $0x1c08] sm:$0xff]  ;;  %v1094_v16 = vld [vmem:[%s4680_s11 + $0x1c10] sm:$0xff] }
 0x24c   : > { %4140 = vst [vmem:[%s4721_s25 + $0x1b30] sm:$0xff] %v3116_v19  ;;  %v3118_v31 = vadd.f32 %v4692_v5, %v2093_v20  ;;  %v3119_v32 = vadd.f32 %v4692_v5, %v2094_v21  ;;  %v3120_v33 = vadd.f32 %v4692_v5, %v2095_v22  ;;  %v2099_v34 = vmul.f32 %v4687_v1, %v1074_v18  ;;  %v1095_v21 = vld [vmem:[%s4680_s11 + $0x1c18] sm:$0xff]  ;;  %v1096_v22 = vld [vmem:[%s4680_s11 + $0x1c20] sm:$0xff] }
 0x24d   : > { %4141 = vst [vmem:[%s4721_s25 + $0x1b38] sm:$0xff] %v3117_v24  ;;  %v3121_v38 = vadd.f32 %v4692_v5, %v2096_v25  ;;  %v3122_v39 = vadd.f32 %v4692_v5, %v2097_v26  ;;  %v3123_v40 = vadd.f32 %v4692_v5, %v2098_v27  ;;  %v2100_v41 = vmul.f32 %v4687_v1, %v1075_v23  ;;  %v1097_v23 = vld [vmem:[%s4680_s11 + $0x1c28] sm:$0xff] }
 0x24e   : > { %4142 = vst [vmem:[%s4721_s25 + $0x1b40] sm:$0xff] %v3118_v31  ;;  %4143 = vst [vmem:[%s4721_s25 + $0x1b48] sm:$0xff] %v3119_v32  ;;  %v3124_v43 = vadd.f32 %v4692_v5, %v2099_v34  ;;  %v2101_v44 = vmul.f32 %v4687_v1, %v1076_v28  ;;  %v2102_v45 = vmul.f32 %v4687_v1, %v1077_v29  ;;  %v1098_v28 = vld [vmem:[%s4680_s11 + $0x1c30] sm:$0xff] }
 0x24f   : > { %4144 = vst [vmem:[%s4721_s25 + $0x1b50] sm:$0xff] %v3120_v33  ;;  %v2103_v46 = vmul.f32 %v4687_v1, %v1078_v30  ;;  %4145 = vst [vmem:[%s4721_s25 + $0x1b58] sm:$0xff] %v3121_v38  ;;  %v3125_v48 = vadd.f32 %v4692_v5, %v2100_v41  ;;  %v2104_v49 = vmul.f32 %v4687_v1, %v1079_v35  ;;  %v1099_v33 = vld [vmem:[%s4680_s11 + $0x1c38] sm:$0xff]  ;;  %v1100_v38 = vld [vmem:[%s4680_s11 + $0x1c40] sm:$0xff] }
 0x250   : > { %4146 = vst [vmem:[%s4721_s25 + $0x1b60] sm:$0xff] %v3122_v39  ;;  %4147 = vst [vmem:[%s4721_s25 + $0x1b68] sm:$0xff] %v3123_v40  ;;  %v2105_v50 = vmul.f32 %v4687_v1, %v1080_v36  ;;  %v2106_v51 = vmul.f32 %v4687_v1, %v1081_v37  ;;  %v3126_v55 = vadd.f32 %v4692_v5, %v2101_v44  ;;  %v1101_v39 = vld [vmem:[%s4680_s11 + $0x1c48] sm:$0xff]  ;;  %v1102_v40 = vld [vmem:[%s4680_s11 + $0x1c50] sm:$0xff] }
 0x251   : > { %4148 = vst [vmem:[%s4721_s25 + $0x1b70] sm:$0xff] %v3124_v43  ;;  %v3127_v56 = vadd.f32 %v4692_v5, %v2102_v45  ;;  %v3128_v57 = vadd.f32 %v4692_v5, %v2103_v46  ;;  %v2107_v58 = vmul.f32 %v4687_v1, %v1082_v42  ;;  %4149 = vst [vmem:[%s4721_s25 + $0x1b78] sm:$0xff] %v3125_v48  ;;  %v1103_v45 = vld [vmem:[%s4680_s11 + $0x1c58] sm:$0xff]  ;;  %v1104_v46 = vld [vmem:[%s4680_s11 + $0x1c60] sm:$0xff] }
 0x252   : > { %v3129_v62 = vadd.f32 %v4692_v5, %v2104_v49  ;;  %v3130_v63 = vadd.f32 %v4692_v5, %v2105_v50  ;;  %v3131_v0 = vadd.f32 %v4692_v5, %v2106_v51  ;;  %v2108_v2 = vmul.f32 %v4687_v1, %v1083_v47  ;;  %4150 = vst [vmem:[%s4721_s25 + $0x1b80] sm:$0xff] %v3126_v55  ;;  %v1105_v47 = vld [vmem:[%s4680_s11 + $0x1c68] sm:$0xff] }
 0x253   : > { %4151 = vst [vmem:[%s4721_s25 + $0x1b88] sm:$0xff] %v3127_v56  ;;  %4152 = vst [vmem:[%s4721_s25 + $0x1b90] sm:$0xff] %v3128_v57  ;;  %v3132_v4 = vadd.f32 %v4692_v5, %v2107_v58  ;;  %v2109_v6 = vmul.f32 %v4687_v1, %v1084_v52  ;;  %v2110_v7 = vmul.f32 %v4687_v1, %v1085_v53  ;;  %v1106_v52 = vld [vmem:[%s4680_s11 + $0x1c70] sm:$0xff]  ;;  %v1107_v57 = vld [vmem:[%s4680_s11 + $0x1c78] sm:$0xff] }
 0x254   : > { %v2111_v8 = vmul.f32 %v4687_v1, %v1086_v54  ;;  %4153 = vst [vmem:[%s4721_s25 + $0x1b98] sm:$0xff] %v3129_v62  ;;  %4154 = vst [vmem:[%s4721_s25 + $0x1ba0] sm:$0xff] %v3130_v63  ;;  %v3133_v10 = vadd.f32 %v4692_v5, %v2108_v2  ;;  %v2112_v11 = vmul.f32 %v4687_v1, %v1087_v59  ;;  %v1108_v62 = vld [vmem:[%s4680_s11 + $0x1c80] sm:$0xff]  ;;  %v1109_v63 = vld [vmem:[%s4680_s11 + $0x1c88] sm:$0xff] }
 0x255   : > { %4155 = vst [vmem:[%s4721_s25 + $0x1ba8] sm:$0xff] %v3131_v0  ;;  %v2113_v12 = vmul.f32 %v4687_v1, %v1088_v60  ;;  %v2114_v13 = vmul.f32 %v4687_v1, %v1089_v61  ;;  %4156 = vst [vmem:[%s4721_s25 + $0x1bb0] sm:$0xff] %v3132_v4  ;;  %v3134_v17 = vadd.f32 %v4692_v5, %v2109_v6  ;;  %v1110_v0 = vld [vmem:[%s4680_s11 + $0x1c90] sm:$0xff] }
 0x256   : > { %v3135_v18 = vadd.f32 %v4692_v5, %v2110_v7  ;;  %v3136_v19 = vadd.f32 %v4692_v5, %v2111_v8  ;;  %v2115_v20 = vmul.f32 %v4687_v1, %v1090_v3  ;;  %4157 = vst [vmem:[%s4721_s25 + $0x1bb8] sm:$0xff] %v3133_v10  ;;  %v3137_v24 = vadd.f32 %v4692_v5, %v2112_v11  ;;  %v1111_v7 = vld [vmem:[%s4680_s11 + $0x1c98] sm:$0xff]  ;;  %v1112_v8 = vld [vmem:[%s4680_s11 + $0x1ca0] sm:$0xff] }
 0x257   : > { %v3138_v25 = vadd.f32 %v4692_v5, %v2113_v12  ;;  %v3139_v26 = vadd.f32 %v4692_v5, %v2114_v13  ;;  %v2116_v27 = vmul.f32 %v4687_v1, %v1091_v9  ;;  %4158 = vst [vmem:[%s4721_s25 + $0x1bc0] sm:$0xff] %v3134_v17  ;;  %v2117_v30 = vmul.f32 %v4687_v1, %v1092_v14  ;;  %v1113_v9 = vld [vmem:[%s4680_s11 + $0x1ca8] sm:$0xff]  ;;  %v1114_v14 = vld [vmem:[%s4680_s11 + $0x1cb0] sm:$0xff] }
 0x258   : > { %4159 = vst [vmem:[%s4721_s25 + $0x1bc8] sm:$0xff] %v3135_v18  ;;  %4160 = vst [vmem:[%s4721_s25 + $0x1bd0] sm:$0xff] %v3136_v19  ;;  %v3140_v29 = vadd.f32 %v4692_v5, %v2115_v20  ;;  %v2118_v31 = vmul.f32 %v4687_v1, %v1093_v15  ;;  %v2119_v32 = vmul.f32 %v4687_v1, %v1094_v16  ;;  %v1115_v19 = vld [vmem:[%s4680_s11 + $0x1cb8] sm:$0xff] }
 0x259   : > { %4161 = vst [vmem:[%s4721_s25 + $0x1bd8] sm:$0xff] %v3137_v24  ;;  %4162 = vst [vmem:[%s4721_s25 + $0x1be0] sm:$0xff] %v3138_v25  ;;  %v3141_v34 = vadd.f32 %v4692_v5, %v2116_v27  ;;  %v2120_v35 = vmul.f32 %v4687_v1, %v1095_v21  ;;  %v2121_v36 = vmul.f32 %v4687_v1, %v1096_v22  ;;  %v1116_v24 = vld [vmem:[%s4680_s11 + $0x1cc0] sm:$0xff]  ;;  %v1117_v25 = vld [vmem:[%s4680_s11 + $0x1cc8] sm:$0xff] }
 0x25a   : > { %4163 = vst [vmem:[%s4721_s25 + $0x1be8] sm:$0xff] %v3139_v26  ;;  %v2122_v37 = vmul.f32 %v4687_v1, %v1097_v23  ;;  %4164 = vst [vmem:[%s4721_s25 + $0x1bf0] sm:$0xff] %v3140_v29  ;;  %v3142_v41 = vadd.f32 %v4692_v5, %v2117_v30  ;;  %v3143_v42 = vadd.f32 %v4692_v5, %v2118_v31  ;;  %v1118_v26 = vld [vmem:[%s4680_s11 + $0x1cd0] sm:$0xff]  ;;  %v1119_v31 = vld [vmem:[%s4680_s11 + $0x1cd8] sm:$0xff] }
 0x25b   : > { %v3144_v43 = vadd.f32 %v4692_v5, %v2119_v32  ;;  %v2123_v44 = vmul.f32 %v4687_v1, %v1098_v28  ;;  %4165 = vst [vmem:[%s4721_s25 + $0x1bf8] sm:$0xff] %v3141_v34  ;;  %v3145_v48 = vadd.f32 %v4692_v5, %v2120_v35  ;;  %v3146_v49 = vadd.f32 %v4692_v5, %v2121_v36  ;;  %v1120_v32 = vld [vmem:[%s4680_s11 + $0x1ce0] sm:$0xff] }
 0x25c   : > { %v3147_v50 = vadd.f32 %v4692_v5, %v2122_v37  ;;  %v2124_v51 = vmul.f32 %v4687_v1, %v1099_v33  ;;  %4166 = vst [vmem:[%s4721_s25 + $0x1c00] sm:$0xff] %v3142_v41  ;;  %4167 = vst [vmem:[%s4721_s25 + $0x1c08] sm:$0xff] %v3143_v42  ;;  %v2125_v54 = vmul.f32 %v4687_v1, %v1100_v38  ;;  %v1121_v33 = vld [vmem:[%s4680_s11 + $0x1ce8] sm:$0xff]  ;;  %v1122_v38 = vld [vmem:[%s4680_s11 + $0x1cf0] sm:$0xff] }
 0x25d   : > { %4168 = vst [vmem:[%s4721_s25 + $0x1c10] sm:$0xff] %v3144_v43  ;;  %v3148_v53 = vadd.f32 %v4692_v5, %v2123_v44  ;;  %v2126_v55 = vmul.f32 %v4687_v1, %v1101_v39  ;;  %v2127_v56 = vmul.f32 %v4687_v1, %v1102_v40  ;;  %4169 = vst [vmem:[%s4721_s25 + $0x1c18] sm:$0xff] %v3145_v48  ;;  %v1123_v43 = vld [vmem:[%s4680_s11 + $0x1cf8] sm:$0xff]  ;;  %v1124_v48 = vld [vmem:[%s4680_s11 + $0x1d00] sm:$0xff] }
 0x25e   : > { %4170 = vst [vmem:[%s4721_s25 + $0x1c20] sm:$0xff] %v3146_v49  ;;  %4171 = vst [vmem:[%s4721_s25 + $0x1c28] sm:$0xff] %v3147_v50  ;;  %v3149_v58 = vadd.f32 %v4692_v5, %v2124_v51  ;;  %v2128_v59 = vmul.f32 %v4687_v1, %v1103_v45  ;;  %v2129_v60 = vmul.f32 %v4687_v1, %v1104_v46  ;;  %v1125_v49 = vld [vmem:[%s4680_s11 + $0x1d08] sm:$0xff]  ;;  %v1126_v50 = vld [vmem:[%s4680_s11 + $0x1d10] sm:$0xff] }
 0x25f   : > { %v2130_v61 = vmul.f32 %v4687_v1, %v1105_v47  ;;  %4172 = vst [vmem:[%s4721_s25 + $0x1c30] sm:$0xff] %v3148_v53  ;;  %v3150_v2 = vadd.f32 %v4692_v5, %v2125_v54  ;;  %v3151_v3 = vadd.f32 %v4692_v5, %v2126_v55  ;;  %v3152_v4 = vadd.f32 %v4692_v5, %v2127_v56  ;;  %v1127_v55 = vld [vmem:[%s4680_s11 + $0x1d18] sm:$0xff]  ;;  %v1128_v56 = vld [vmem:[%s4680_s11 + $0x1d20] sm:$0xff] }
 0x260   : > { %v2131_v6 = vmul.f32 %v4687_v1, %v1106_v52  ;;  %4173 = vst [vmem:[%s4721_s25 + $0x1c38] sm:$0xff] %v3149_v58  ;;  %v3153_v10 = vadd.f32 %v4692_v5, %v2128_v59  ;;  %v3154_v11 = vadd.f32 %v4692_v5, %v2129_v60  ;;  %v2132_v13 = vmul.f32 %v4687_v1, %v1107_v57  ;;  %v1129_v57 = vld [vmem:[%s4680_s11 + $0x1d28] sm:$0xff] }
 0x261   : > { %v3155_v12 = vadd.f32 %v4692_v5, %v2130_v61  ;;  %4174 = vst [vmem:[%s4721_s25 + $0x1c40] sm:$0xff] %v3150_v2  ;;  %4175 = vst [vmem:[%s4721_s25 + $0x1c48] sm:$0xff] %v3151_v3  ;;  %v2133_v16 = vmul.f32 %v4687_v1, %v1108_v62  ;;  %v2134_v17 = vmul.f32 %v4687_v1, %v1109_v63  ;;  %v1130_v62 = vld [vmem:[%s4680_s11 + $0x1d30] sm:$0xff] }
 0x262   : > { %4176 = vst [vmem:[%s4721_s25 + $0x1c50] sm:$0xff] %v3152_v4  ;;  %v3156_v15 = vadd.f32 %v4692_v5, %v2131_v6  ;;  %v2135_v18 = vmul.f32 %v4687_v1, %v1110_v0  ;;  %4177 = vst [vmem:[%s4721_s25 + $0x1c58] sm:$0xff] %v3153_v10  ;;  %v3157_v20 = vadd.f32 %v4692_v5, %v2132_v13  ;;  %v1131_v4 = vld [vmem:[%s4680_s11 + $0x1d38] sm:$0xff]  ;;  %v1132_v10 = vld [vmem:[%s4680_s11 + $0x1d40] sm:$0xff] }
 0x263   : > { %4178 = vst [vmem:[%s4721_s25 + $0x1c60] sm:$0xff] %v3154_v11  ;;  %4179 = vst [vmem:[%s4721_s25 + $0x1c68] sm:$0xff] %v3155_v12  ;;  %v2136_v21 = vmul.f32 %v4687_v1, %v1111_v7  ;;  %v2137_v22 = vmul.f32 %v4687_v1, %v1112_v8  ;;  %v2138_v23 = vmul.f32 %v4687_v1, %v1113_v9  ;;  %v1133_v11 = vld [vmem:[%s4680_s11 + $0x1d48] sm:$0xff]  ;;  %v1134_v12 = vld [vmem:[%s4680_s11 + $0x1d50] sm:$0xff] }
 0x264   : > { %4180 = vst [vmem:[%s4721_s25 + $0x1c70] sm:$0xff] %v3156_v15  ;;  %v3158_v27 = vadd.f32 %v4692_v5, %v2133_v16  ;;  %v3159_v28 = vadd.f32 %v4692_v5, %v2134_v17  ;;  %v3160_v29 = vadd.f32 %v4692_v5, %v2135_v18  ;;  %v2139_v30 = vmul.f32 %v4687_v1, %v1114_v14  ;;  %v1135_v17 = vld [vmem:[%s4680_s11 + $0x1d58] sm:$0xff]  ;;  %v1136_v18 = vld [vmem:[%s4680_s11 + $0x1d60] sm:$0xff] }
 0x265   : > { %4181 = vst [vmem:[%s4721_s25 + $0x1c78] sm:$0xff] %v3157_v20  ;;  %v3161_v34 = vadd.f32 %v4692_v5, %v2136_v21  ;;  %v3162_v35 = vadd.f32 %v4692_v5, %v2137_v22  ;;  %v3163_v36 = vadd.f32 %v4692_v5, %v2138_v23  ;;  %v2140_v37 = vmul.f32 %v4687_v1, %v1115_v19  ;;  %v1137_v19 = vld [vmem:[%s4680_s11 + $0x1d68] sm:$0xff] }
 0x266   : > { %4182 = vst [vmem:[%s4721_s25 + $0x1c80] sm:$0xff] %v3158_v27  ;;  %4183 = vst [vmem:[%s4721_s25 + $0x1c88] sm:$0xff] %v3159_v28  ;;  %v3164_v39 = vadd.f32 %v4692_v5, %v2139_v30  ;;  %v2141_v40 = vmul.f32 %v4687_v1, %v1116_v24  ;;  %v2142_v41 = vmul.f32 %v4687_v1, %v1117_v25  ;;  %v1138_v24 = vld [vmem:[%s4680_s11 + $0x1d70] sm:$0xff] }
 0x267   : > { %4184 = vst [vmem:[%s4721_s25 + $0x1c90] sm:$0xff] %v3160_v29  ;;  %v2143_v42 = vmul.f32 %v4687_v1, %v1118_v26  ;;  %4185 = vst [vmem:[%s4721_s25 + $0x1c98] sm:$0xff] %v3161_v34  ;;  %v3165_v44 = vadd.f32 %v4692_v5, %v2140_v37  ;;  %v2144_v45 = vmul.f32 %v4687_v1, %v1119_v31  ;;  %v1139_v29 = vld [vmem:[%s4680_s11 + $0x1d78] sm:$0xff]  ;;  %v1140_v34 = vld [vmem:[%s4680_s11 + $0x1d80] sm:$0xff] }
 0x268   : > { %4186 = vst [vmem:[%s4721_s25 + $0x1ca0] sm:$0xff] %v3162_v35  ;;  %4187 = vst [vmem:[%s4721_s25 + $0x1ca8] sm:$0xff] %v3163_v36  ;;  %v2145_v46 = vmul.f32 %v4687_v1, %v1120_v32  ;;  %v2146_v47 = vmul.f32 %v4687_v1, %v1121_v33  ;;  %v3166_v51 = vadd.f32 %v4692_v5, %v2141_v40  ;;  %v1141_v35 = vld [vmem:[%s4680_s11 + $0x1d88] sm:$0xff]  ;;  %v1142_v36 = vld [vmem:[%s4680_s11 + $0x1d90] sm:$0xff] }
 0x269   : > { %4188 = vst [vmem:[%s4721_s25 + $0x1cb0] sm:$0xff] %v3164_v39  ;;  %v3167_v52 = vadd.f32 %v4692_v5, %v2142_v41  ;;  %v3168_v53 = vadd.f32 %v4692_v5, %v2143_v42  ;;  %v2147_v54 = vmul.f32 %v4687_v1, %v1122_v38  ;;  %4189 = vst [vmem:[%s4721_s25 + $0x1cb8] sm:$0xff] %v3165_v44  ;;  %v1143_v41 = vld [vmem:[%s4680_s11 + $0x1d98] sm:$0xff]  ;;  %v1144_v42 = vld [vmem:[%s4680_s11 + $0x1da0] sm:$0xff] }
 0x26a   : > { %v3169_v58 = vadd.f32 %v4692_v5, %v2144_v45  ;;  %v3170_v59 = vadd.f32 %v4692_v5, %v2145_v46  ;;  %v3171_v60 = vadd.f32 %v4692_v5, %v2146_v47  ;;  %v2148_v61 = vmul.f32 %v4687_v1, %v1123_v43  ;;  %4190 = vst [vmem:[%s4721_s25 + $0x1cc0] sm:$0xff] %v3166_v51  ;;  %v1145_v43 = vld [vmem:[%s4680_s11 + $0x1da8] sm:$0xff] }
 0x26b   : > { %4191 = vst [vmem:[%s4721_s25 + $0x1cc8] sm:$0xff] %v3167_v52  ;;  %4192 = vst [vmem:[%s4721_s25 + $0x1cd0] sm:$0xff] %v3168_v53  ;;  %v3172_v63 = vadd.f32 %v4692_v5, %v2147_v54  ;;  %v2149_v0 = vmul.f32 %v4687_v1, %v1124_v48  ;;  %v2150_v2 = vmul.f32 %v4687_v1, %v1125_v49  ;;  %v1146_v48 = vld [vmem:[%s4680_s11 + $0x1db0] sm:$0xff]  ;;  %v1147_v53 = vld [vmem:[%s4680_s11 + $0x1db8] sm:$0xff] }
 0x26c   : > { %v2151_v3 = vmul.f32 %v4687_v1, %v1126_v50  ;;  %4193 = vst [vmem:[%s4721_s25 + $0x1cd8] sm:$0xff] %v3169_v58  ;;  %4194 = vst [vmem:[%s4721_s25 + $0x1ce0] sm:$0xff] %v3170_v59  ;;  %v3173_v6 = vadd.f32 %v4692_v5, %v2148_v61  ;;  %v2152_v7 = vmul.f32 %v4687_v1, %v1127_v55  ;;  %v1148_v58 = vld [vmem:[%s4680_s11 + $0x1dc0] sm:$0xff]  ;;  %v1149_v59 = vld [vmem:[%s4680_s11 + $0x1dc8] sm:$0xff] }
 0x26d   : > { %4195 = vst [vmem:[%s4721_s25 + $0x1ce8] sm:$0xff] %v3171_v60  ;;  %v2153_v8 = vmul.f32 %v4687_v1, %v1128_v56  ;;  %v2154_v9 = vmul.f32 %v4687_v1, %v1129_v57  ;;  %4196 = vst [vmem:[%s4721_s25 + $0x1cf0] sm:$0xff] %v3172_v63  ;;  %v3174_v13 = vadd.f32 %v4692_v5, %v2149_v0  ;;  %v1150_v60 = vld [vmem:[%s4680_s11 + $0x1dd0] sm:$0xff] }
 0x26e   : > { %v3175_v14 = vadd.f32 %v4692_v5, %v2150_v2  ;;  %v3176_v15 = vadd.f32 %v4692_v5, %v2151_v3  ;;  %v2155_v16 = vmul.f32 %v4687_v1, %v1130_v62  ;;  %4197 = vst [vmem:[%s4721_s25 + $0x1cf8] sm:$0xff] %v3173_v6  ;;  %v3177_v20 = vadd.f32 %v4692_v5, %v2152_v7  ;;  %v1151_v2 = vld [vmem:[%s4680_s11 + $0x1dd8] sm:$0xff]  ;;  %v1152_v3 = vld [vmem:[%s4680_s11 + $0x1de0] sm:$0xff] }
 0x26f   : > { %v3178_v21 = vadd.f32 %v4692_v5, %v2153_v8  ;;  %v3179_v22 = vadd.f32 %v4692_v5, %v2154_v9  ;;  %v2156_v23 = vmul.f32 %v4687_v1, %v1131_v4  ;;  %4198 = vst [vmem:[%s4721_s25 + $0x1d00] sm:$0xff] %v3174_v13  ;;  %v2157_v26 = vmul.f32 %v4687_v1, %v1132_v10  ;;  %v1153_v4 = vld [vmem:[%s4680_s11 + $0x1de8] sm:$0xff]  ;;  %v1154_v10 = vld [vmem:[%s4680_s11 + $0x1df0] sm:$0xff] }
 0x270   : > { %4199 = vst [vmem:[%s4721_s25 + $0x1d08] sm:$0xff] %v3175_v14  ;;  %4200 = vst [vmem:[%s4721_s25 + $0x1d10] sm:$0xff] %v3176_v15  ;;  %v3180_v25 = vadd.f32 %v4692_v5, %v2155_v16  ;;  %v2158_v27 = vmul.f32 %v4687_v1, %v1133_v11  ;;  %v2159_v28 = vmul.f32 %v4687_v1, %v1134_v12  ;;  %v1155_v15 = vld [vmem:[%s4680_s11 + $0x1df8] sm:$0xff] }
 0x271   : > { %4201 = vst [vmem:[%s4721_s25 + $0x1d18] sm:$0xff] %v3177_v20  ;;  %4202 = vst [vmem:[%s4721_s25 + $0x1d20] sm:$0xff] %v3178_v21  ;;  %v3181_v30 = vadd.f32 %v4692_v5, %v2156_v23  ;;  %v2160_v31 = vmul.f32 %v4687_v1, %v1135_v17  ;;  %v2161_v32 = vmul.f32 %v4687_v1, %v1136_v18  ;;  %v1156_v20 = vld [vmem:[%s4680_s11 + $0x1e00] sm:$0xff]  ;;  %v1157_v21 = vld [vmem:[%s4680_s11 + $0x1e08] sm:$0xff] }
 0x272   : > { %4203 = vst [vmem:[%s4721_s25 + $0x1d28] sm:$0xff] %v3179_v22  ;;  %v2162_v33 = vmul.f32 %v4687_v1, %v1137_v19  ;;  %4204 = vst [vmem:[%s4721_s25 + $0x1d30] sm:$0xff] %v3180_v25  ;;  %v3182_v37 = vadd.f32 %v4692_v5, %v2157_v26  ;;  %v3183_v38 = vadd.f32 %v4692_v5, %v2158_v27  ;;  %v1158_v22 = vld [vmem:[%s4680_s11 + $0x1e10] sm:$0xff]  ;;  %v1159_v27 = vld [vmem:[%s4680_s11 + $0x1e18] sm:$0xff] }
 0x273   : > { %v3184_v39 = vadd.f32 %v4692_v5, %v2159_v28  ;;  %v2163_v40 = vmul.f32 %v4687_v1, %v1138_v24  ;;  %4205 = vst [vmem:[%s4721_s25 + $0x1d38] sm:$0xff] %v3181_v30  ;;  %v3185_v44 = vadd.f32 %v4692_v5, %v2160_v31  ;;  %v3186_v45 = vadd.f32 %v4692_v5, %v2161_v32  ;;  %v1160_v28 = vld [vmem:[%s4680_s11 + $0x1e20] sm:$0xff] }
 0x274   : > { %v3187_v46 = vadd.f32 %v4692_v5, %v2162_v33  ;;  %v2164_v47 = vmul.f32 %v4687_v1, %v1139_v29  ;;  %4206 = vst [vmem:[%s4721_s25 + $0x1d40] sm:$0xff] %v3182_v37  ;;  %4207 = vst [vmem:[%s4721_s25 + $0x1d48] sm:$0xff] %v3183_v38  ;;  %v2165_v50 = vmul.f32 %v4687_v1, %v1140_v34  ;;  %v1161_v29 = vld [vmem:[%s4680_s11 + $0x1e28] sm:$0xff]  ;;  %v1162_v34 = vld [vmem:[%s4680_s11 + $0x1e30] sm:$0xff] }
 0x275   : > { %4208 = vst [vmem:[%s4721_s25 + $0x1d50] sm:$0xff] %v3184_v39  ;;  %v3188_v49 = vadd.f32 %v4692_v5, %v2163_v40  ;;  %v2166_v51 = vmul.f32 %v4687_v1, %v1141_v35  ;;  %v2167_v52 = vmul.f32 %v4687_v1, %v1142_v36  ;;  %4209 = vst [vmem:[%s4721_s25 + $0x1d58] sm:$0xff] %v3185_v44  ;;  %v1163_v39 = vld [vmem:[%s4680_s11 + $0x1e38] sm:$0xff]  ;;  %v1164_v44 = vld [vmem:[%s4680_s11 + $0x1e40] sm:$0xff] }
 0x276   : > { %4210 = vst [vmem:[%s4721_s25 + $0x1d60] sm:$0xff] %v3186_v45  ;;  %4211 = vst [vmem:[%s4721_s25 + $0x1d68] sm:$0xff] %v3187_v46  ;;  %v3189_v54 = vadd.f32 %v4692_v5, %v2164_v47  ;;  %v2168_v55 = vmul.f32 %v4687_v1, %v1143_v41  ;;  %v2169_v56 = vmul.f32 %v4687_v1, %v1144_v42  ;;  %v1165_v45 = vld [vmem:[%s4680_s11 + $0x1e48] sm:$0xff]  ;;  %v1166_v46 = vld [vmem:[%s4680_s11 + $0x1e50] sm:$0xff] }
 0x277   : > { %v2170_v57 = vmul.f32 %v4687_v1, %v1145_v43  ;;  %4212 = vst [vmem:[%s4721_s25 + $0x1d70] sm:$0xff] %v3188_v49  ;;  %v3190_v61 = vadd.f32 %v4692_v5, %v2165_v50  ;;  %v3191_v62 = vadd.f32 %v4692_v5, %v2166_v51  ;;  %v3192_v63 = vadd.f32 %v4692_v5, %v2167_v52  ;;  %v1167_v51 = vld [vmem:[%s4680_s11 + $0x1e58] sm:$0xff]  ;;  %v1168_v52 = vld [vmem:[%s4680_s11 + $0x1e60] sm:$0xff] }
 0x278   : > { %v2171_v0 = vmul.f32 %v4687_v1, %v1146_v48  ;;  %4213 = vst [vmem:[%s4721_s25 + $0x1d78] sm:$0xff] %v3189_v54  ;;  %v3193_v6 = vadd.f32 %v4692_v5, %v2168_v55  ;;  %v3194_v7 = vadd.f32 %v4692_v5, %v2169_v56  ;;  %v2172_v9 = vmul.f32 %v4687_v1, %v1147_v53  ;;  %v1169_v53 = vld [vmem:[%s4680_s11 + $0x1e68] sm:$0xff] }
 0x279   : > { %v3195_v8 = vadd.f32 %v4692_v5, %v2170_v57  ;;  %4214 = vst [vmem:[%s4721_s25 + $0x1d80] sm:$0xff] %v3190_v61  ;;  %4215 = vst [vmem:[%s4721_s25 + $0x1d88] sm:$0xff] %v3191_v62  ;;  %v2173_v12 = vmul.f32 %v4687_v1, %v1148_v58  ;;  %v2174_v13 = vmul.f32 %v4687_v1, %v1149_v59  ;;  %v1170_v58 = vld [vmem:[%s4680_s11 + $0x1e70] sm:$0xff] }
 0x27a   : > { %4216 = vst [vmem:[%s4721_s25 + $0x1d90] sm:$0xff] %v3192_v63  ;;  %v3196_v11 = vadd.f32 %v4692_v5, %v2171_v0  ;;  %v2175_v14 = vmul.f32 %v4687_v1, %v1150_v60  ;;  %4217 = vst [vmem:[%s4721_s25 + $0x1d98] sm:$0xff] %v3193_v6  ;;  %v3197_v16 = vadd.f32 %v4692_v5, %v2172_v9  ;;  %v1171_v63 = vld [vmem:[%s4680_s11 + $0x1e78] sm:$0xff]  ;;  %v1172_v6 = vld [vmem:[%s4680_s11 + $0x1e80] sm:$0xff] }
 0x27b   : > { %4218 = vst [vmem:[%s4721_s25 + $0x1da0] sm:$0xff] %v3194_v7  ;;  %4219 = vst [vmem:[%s4721_s25 + $0x1da8] sm:$0xff] %v3195_v8  ;;  %v2176_v17 = vmul.f32 %v4687_v1, %v1151_v2  ;;  %v2177_v18 = vmul.f32 %v4687_v1, %v1152_v3  ;;  %v2178_v19 = vmul.f32 %v4687_v1, %v1153_v4  ;;  %v1173_v7 = vld [vmem:[%s4680_s11 + $0x1e88] sm:$0xff]  ;;  %v1174_v8 = vld [vmem:[%s4680_s11 + $0x1e90] sm:$0xff] }
 0x27c   : > { %4220 = vst [vmem:[%s4721_s25 + $0x1db0] sm:$0xff] %v3196_v11  ;;  %v3198_v23 = vadd.f32 %v4692_v5, %v2173_v12  ;;  %v3199_v24 = vadd.f32 %v4692_v5, %v2174_v13  ;;  %v3200_v25 = vadd.f32 %v4692_v5, %v2175_v14  ;;  %v2179_v26 = vmul.f32 %v4687_v1, %v1154_v10  ;;  %v1175_v13 = vld [vmem:[%s4680_s11 + $0x1e98] sm:$0xff]  ;;  %v1176_v14 = vld [vmem:[%s4680_s11 + $0x1ea0] sm:$0xff] }
 0x27d   : > { %4221 = vst [vmem:[%s4721_s25 + $0x1db8] sm:$0xff] %v3197_v16  ;;  %v3201_v30 = vadd.f32 %v4692_v5, %v2176_v17  ;;  %v3202_v31 = vadd.f32 %v4692_v5, %v2177_v18  ;;  %v3203_v32 = vadd.f32 %v4692_v5, %v2178_v19  ;;  %v2180_v33 = vmul.f32 %v4687_v1, %v1155_v15  ;;  %v1177_v15 = vld [vmem:[%s4680_s11 + $0x1ea8] sm:$0xff] }
 0x27e   : > { %4222 = vst [vmem:[%s4721_s25 + $0x1dc0] sm:$0xff] %v3198_v23  ;;  %4223 = vst [vmem:[%s4721_s25 + $0x1dc8] sm:$0xff] %v3199_v24  ;;  %v3204_v35 = vadd.f32 %v4692_v5, %v2179_v26  ;;  %v2181_v36 = vmul.f32 %v4687_v1, %v1156_v20  ;;  %v2182_v37 = vmul.f32 %v4687_v1, %v1157_v21  ;;  %v1178_v20 = vld [vmem:[%s4680_s11 + $0x1eb0] sm:$0xff] }
 0x27f   : > { %4224 = vst [vmem:[%s4721_s25 + $0x1dd0] sm:$0xff] %v3200_v25  ;;  %v2183_v38 = vmul.f32 %v4687_v1, %v1158_v22  ;;  %4225 = vst [vmem:[%s4721_s25 + $0x1dd8] sm:$0xff] %v3201_v30  ;;  %v3205_v40 = vadd.f32 %v4692_v5, %v2180_v33  ;;  %v2184_v41 = vmul.f32 %v4687_v1, %v1159_v27  ;;  %v1179_v25 = vld [vmem:[%s4680_s11 + $0x1eb8] sm:$0xff]  ;;  %v1180_v30 = vld [vmem:[%s4680_s11 + $0x1ec0] sm:$0xff] }
 0x280   : > { %4226 = vst [vmem:[%s4721_s25 + $0x1de0] sm:$0xff] %v3202_v31  ;;  %4227 = vst [vmem:[%s4721_s25 + $0x1de8] sm:$0xff] %v3203_v32  ;;  %v2185_v42 = vmul.f32 %v4687_v1, %v1160_v28  ;;  %v2186_v43 = vmul.f32 %v4687_v1, %v1161_v29  ;;  %v3206_v47 = vadd.f32 %v4692_v5, %v2181_v36  ;;  %v1181_v31 = vld [vmem:[%s4680_s11 + $0x1ec8] sm:$0xff]  ;;  %v1182_v32 = vld [vmem:[%s4680_s11 + $0x1ed0] sm:$0xff] }
 0x281   : > { %4228 = vst [vmem:[%s4721_s25 + $0x1df0] sm:$0xff] %v3204_v35  ;;  %v3207_v48 = vadd.f32 %v4692_v5, %v2182_v37  ;;  %v3208_v49 = vadd.f32 %v4692_v5, %v2183_v38  ;;  %v2187_v50 = vmul.f32 %v4687_v1, %v1162_v34  ;;  %4229 = vst [vmem:[%s4721_s25 + $0x1df8] sm:$0xff] %v3205_v40  ;;  %v1183_v37 = vld [vmem:[%s4680_s11 + $0x1ed8] sm:$0xff]  ;;  %v1184_v38 = vld [vmem:[%s4680_s11 + $0x1ee0] sm:$0xff] }
 0x282   : > { %v3209_v54 = vadd.f32 %v4692_v5, %v2184_v41  ;;  %v3210_v55 = vadd.f32 %v4692_v5, %v2185_v42  ;;  %v3211_v56 = vadd.f32 %v4692_v5, %v2186_v43  ;;  %v2188_v57 = vmul.f32 %v4687_v1, %v1163_v39  ;;  %4230 = vst [vmem:[%s4721_s25 + $0x1e00] sm:$0xff] %v3206_v47  ;;  %v1185_v39 = vld [vmem:[%s4680_s11 + $0x1ee8] sm:$0xff] }
 0x283   : > { %4231 = vst [vmem:[%s4721_s25 + $0x1e08] sm:$0xff] %v3207_v48  ;;  %4232 = vst [vmem:[%s4721_s25 + $0x1e10] sm:$0xff] %v3208_v49  ;;  %v3212_v59 = vadd.f32 %v4692_v5, %v2187_v50  ;;  %v2189_v60 = vmul.f32 %v4687_v1, %v1164_v44  ;;  %v2190_v61 = vmul.f32 %v4687_v1, %v1165_v45  ;;  %v1186_v44 = vld [vmem:[%s4680_s11 + $0x1ef0] sm:$0xff]  ;;  %v1187_v49 = vld [vmem:[%s4680_s11 + $0x1ef8] sm:$0xff] }
 0x284   : > { %v2191_v62 = vmul.f32 %v4687_v1, %v1166_v46  ;;  %4233 = vst [vmem:[%s4721_s25 + $0x1e18] sm:$0xff] %v3209_v54  ;;  %4234 = vst [vmem:[%s4721_s25 + $0x1e20] sm:$0xff] %v3210_v55  ;;  %v3213_v0 = vadd.f32 %v4692_v5, %v2188_v57  ;;  %v2192_v2 = vmul.f32 %v4687_v1, %v1167_v51  ;;  %v1188_v54 = vld [vmem:[%s4680_s11 + $0x1f00] sm:$0xff]  ;;  %v1189_v55 = vld [vmem:[%s4680_s11 + $0x1f08] sm:$0xff] }
 0x285   : > { %4235 = vst [vmem:[%s4721_s25 + $0x1e28] sm:$0xff] %v3211_v56  ;;  %v2193_v3 = vmul.f32 %v4687_v1, %v1168_v52  ;;  %v2194_v4 = vmul.f32 %v4687_v1, %v1169_v53  ;;  %4236 = vst [vmem:[%s4721_s25 + $0x1e30] sm:$0xff] %v3212_v59  ;;  %v3214_v9 = vadd.f32 %v4692_v5, %v2189_v60  ;;  %v1190_v56 = vld [vmem:[%s4680_s11 + $0x1f10] sm:$0xff] }
 0x286   : > { %v3215_v10 = vadd.f32 %v4692_v5, %v2190_v61  ;;  %v3216_v11 = vadd.f32 %v4692_v5, %v2191_v62  ;;  %v2195_v12 = vmul.f32 %v4687_v1, %v1170_v58  ;;  %4237 = vst [vmem:[%s4721_s25 + $0x1e38] sm:$0xff] %v3213_v0  ;;  %v3217_v16 = vadd.f32 %v4692_v5, %v2192_v2  ;;  %v1191_v61 = vld [vmem:[%s4680_s11 + $0x1f18] sm:$0xff]  ;;  %v1192_v62 = vld [vmem:[%s4680_s11 + $0x1f20] sm:$0xff] }
 0x287   : > { %v3218_v17 = vadd.f32 %v4692_v5, %v2193_v3  ;;  %v3219_v18 = vadd.f32 %v4692_v5, %v2194_v4  ;;  %v2196_v19 = vmul.f32 %v4687_v1, %v1171_v63  ;;  %4238 = vst [vmem:[%s4721_s25 + $0x1e40] sm:$0xff] %v3214_v9  ;;  %v2197_v22 = vmul.f32 %v4687_v1, %v1172_v6  ;;  %v1193_v63 = vld [vmem:[%s4680_s11 + $0x1f28] sm:$0xff]  ;;  %v1194_v6 = vld [vmem:[%s4680_s11 + $0x1f30] sm:$0xff] }
 0x288   : > { %4239 = vst [vmem:[%s4721_s25 + $0x1e48] sm:$0xff] %v3215_v10  ;;  %4240 = vst [vmem:[%s4721_s25 + $0x1e50] sm:$0xff] %v3216_v11  ;;  %v3220_v21 = vadd.f32 %v4692_v5, %v2195_v12  ;;  %v2198_v23 = vmul.f32 %v4687_v1, %v1173_v7  ;;  %v2199_v24 = vmul.f32 %v4687_v1, %v1174_v8  ;;  %v1195_v11 = vld [vmem:[%s4680_s11 + $0x1f38] sm:$0xff] }
 0x289   : > { %4241 = vst [vmem:[%s4721_s25 + $0x1e58] sm:$0xff] %v3217_v16  ;;  %4242 = vst [vmem:[%s4721_s25 + $0x1e60] sm:$0xff] %v3218_v17  ;;  %v3221_v26 = vadd.f32 %v4692_v5, %v2196_v19  ;;  %v2200_v27 = vmul.f32 %v4687_v1, %v1175_v13  ;;  %v2201_v28 = vmul.f32 %v4687_v1, %v1176_v14  ;;  %v1196_v16 = vld [vmem:[%s4680_s11 + $0x1f40] sm:$0xff]  ;;  %v1197_v17 = vld [vmem:[%s4680_s11 + $0x1f48] sm:$0xff] }
 0x28a   : > { %4243 = vst [vmem:[%s4721_s25 + $0x1e68] sm:$0xff] %v3219_v18  ;;  %v2202_v29 = vmul.f32 %v4687_v1, %v1177_v15  ;;  %4244 = vst [vmem:[%s4721_s25 + $0x1e70] sm:$0xff] %v3220_v21  ;;  %v3222_v33 = vadd.f32 %v4692_v5, %v2197_v22  ;;  %v3223_v34 = vadd.f32 %v4692_v5, %v2198_v23  ;;  %v1198_v18 = vld [vmem:[%s4680_s11 + $0x1f50] sm:$0xff]  ;;  %v1199_v23 = vld [vmem:[%s4680_s11 + $0x1f58] sm:$0xff] }
 0x28b   : > { %v3224_v35 = vadd.f32 %v4692_v5, %v2199_v24  ;;  %v2203_v36 = vmul.f32 %v4687_v1, %v1178_v20  ;;  %4245 = vst [vmem:[%s4721_s25 + $0x1e78] sm:$0xff] %v3221_v26  ;;  %v3225_v40 = vadd.f32 %v4692_v5, %v2200_v27  ;;  %v3226_v41 = vadd.f32 %v4692_v5, %v2201_v28  ;;  %v1200_v24 = vld [vmem:[%s4680_s11 + $0x1f60] sm:$0xff] }
 0x28c   : > { %v3227_v42 = vadd.f32 %v4692_v5, %v2202_v29  ;;  %v2204_v43 = vmul.f32 %v4687_v1, %v1179_v25  ;;  %4246 = vst [vmem:[%s4721_s25 + $0x1e80] sm:$0xff] %v3222_v33  ;;  %4247 = vst [vmem:[%s4721_s25 + $0x1e88] sm:$0xff] %v3223_v34  ;;  %v2205_v46 = vmul.f32 %v4687_v1, %v1180_v30  ;;  %v1201_v25 = vld [vmem:[%s4680_s11 + $0x1f68] sm:$0xff]  ;;  %v1202_v30 = vld [vmem:[%s4680_s11 + $0x1f70] sm:$0xff] }
 0x28d   : > { %4248 = vst [vmem:[%s4721_s25 + $0x1e90] sm:$0xff] %v3224_v35  ;;  %v3228_v45 = vadd.f32 %v4692_v5, %v2203_v36  ;;  %v2206_v47 = vmul.f32 %v4687_v1, %v1181_v31  ;;  %v2207_v48 = vmul.f32 %v4687_v1, %v1182_v32  ;;  %4249 = vst [vmem:[%s4721_s25 + $0x1e98] sm:$0xff] %v3225_v40  ;;  %v1203_v35 = vld [vmem:[%s4680_s11 + $0x1f78] sm:$0xff]  ;;  %v1204_v40 = vld [vmem:[%s4680_s11 + $0x1f80] sm:$0xff] }
 0x28e   : > { %4250 = vst [vmem:[%s4721_s25 + $0x1ea0] sm:$0xff] %v3226_v41  ;;  %4251 = vst [vmem:[%s4721_s25 + $0x1ea8] sm:$0xff] %v3227_v42  ;;  %v3229_v50 = vadd.f32 %v4692_v5, %v2204_v43  ;;  %v2208_v51 = vmul.f32 %v4687_v1, %v1183_v37  ;;  %v2209_v52 = vmul.f32 %v4687_v1, %v1184_v38  ;;  %v1205_v41 = vld [vmem:[%s4680_s11 + $0x1f88] sm:$0xff]  ;;  %v1206_v42 = vld [vmem:[%s4680_s11 + $0x1f90] sm:$0xff] }
 0x28f   : > { %v2210_v53 = vmul.f32 %v4687_v1, %v1185_v39  ;;  %4252 = vst [vmem:[%s4721_s25 + $0x1eb0] sm:$0xff] %v3228_v45  ;;  %v3230_v57 = vadd.f32 %v4692_v5, %v2205_v46  ;;  %v3231_v58 = vadd.f32 %v4692_v5, %v2206_v47  ;;  %v3232_v59 = vadd.f32 %v4692_v5, %v2207_v48  ;;  %v1207_v47 = vld [vmem:[%s4680_s11 + $0x1f98] sm:$0xff]  ;;  %v1208_v48 = vld [vmem:[%s4680_s11 + $0x1fa0] sm:$0xff] }
 0x290   : > { %v2211_v60 = vmul.f32 %v4687_v1, %v1186_v44  ;;  %4253 = vst [vmem:[%s4721_s25 + $0x1eb8] sm:$0xff] %v3229_v50  ;;  %v3233_v0 = vadd.f32 %v4692_v5, %v2208_v51  ;;  %v3234_v2 = vadd.f32 %v4692_v5, %v2209_v52  ;;  %v2212_v4 = vmul.f32 %v4687_v1, %v1187_v49  ;;  %v1209_v49 = vld [vmem:[%s4680_s11 + $0x1fa8] sm:$0xff] }
 0x291   : > { %v3235_v3 = vadd.f32 %v4692_v5, %v2210_v53  ;;  %4254 = vst [vmem:[%s4721_s25 + $0x1ec0] sm:$0xff] %v3230_v57  ;;  %4255 = vst [vmem:[%s4721_s25 + $0x1ec8] sm:$0xff] %v3231_v58  ;;  %v2213_v8 = vmul.f32 %v4687_v1, %v1188_v54  ;;  %v2214_v9 = vmul.f32 %v4687_v1, %v1189_v55  ;;  %v1210_v54 = vld [vmem:[%s4680_s11 + $0x1fb0] sm:$0xff] }
 0x292   : > { %4256 = vst [vmem:[%s4721_s25 + $0x1ed0] sm:$0xff] %v3232_v59  ;;  %v3236_v7 = vadd.f32 %v4692_v5, %v2211_v60  ;;  %v2215_v10 = vmul.f32 %v4687_v1, %v1190_v56  ;;  %4257 = vst [vmem:[%s4721_s25 + $0x1ed8] sm:$0xff] %v3233_v0  ;;  %v3237_v12 = vadd.f32 %v4692_v5, %v2212_v4  ;;  %v1211_v59 = vld [vmem:[%s4680_s11 + $0x1fb8] sm:$0xff]  ;;  %v1212_v0 = vld [vmem:[%s4680_s11 + $0x1fc0] sm:$0xff] }
 0x293   : > { %4258 = vst [vmem:[%s4721_s25 + $0x1ee0] sm:$0xff] %v3234_v2  ;;  %4259 = vst [vmem:[%s4721_s25 + $0x1ee8] sm:$0xff] %v3235_v3  ;;  %v2216_v13 = vmul.f32 %v4687_v1, %v1191_v61  ;;  %v2217_v14 = vmul.f32 %v4687_v1, %v1192_v62  ;;  %v2218_v15 = vmul.f32 %v4687_v1, %v1193_v63  ;;  %v1213_v2 = vld [vmem:[%s4680_s11 + $0x1fc8] sm:$0xff]  ;;  %v1214_v3 = vld [vmem:[%s4680_s11 + $0x1fd0] sm:$0xff] }
 0x294   : > { %4260 = vst [vmem:[%s4721_s25 + $0x1ef0] sm:$0xff] %v3236_v7  ;;  %v3238_v19 = vadd.f32 %v4692_v5, %v2213_v8  ;;  %v3239_v20 = vadd.f32 %v4692_v5, %v2214_v9  ;;  %v3240_v21 = vadd.f32 %v4692_v5, %v2215_v10  ;;  %v2219_v22 = vmul.f32 %v4687_v1, %v1194_v6  ;;  %v1215_v9 = vld [vmem:[%s4680_s11 + $0x1fd8] sm:$0xff]  ;;  %v1216_v10 = vld [vmem:[%s4680_s11 + $0x1fe0] sm:$0xff] }
 0x295   : > { %4261 = vst [vmem:[%s4721_s25 + $0x1ef8] sm:$0xff] %v3237_v12  ;;  %v3241_v26 = vadd.f32 %v4692_v5, %v2216_v13  ;;  %v3242_v27 = vadd.f32 %v4692_v5, %v2217_v14  ;;  %v3243_v28 = vadd.f32 %v4692_v5, %v2218_v15  ;;  %v2220_v29 = vmul.f32 %v4687_v1, %v1195_v11  ;;  %v1217_v11 = vld [vmem:[%s4680_s11 + $0x1fe8] sm:$0xff] }
 0x296   : > { %4262 = vst [vmem:[%s4721_s25 + $0x1f00] sm:$0xff] %v3238_v19  ;;  %4263 = vst [vmem:[%s4721_s25 + $0x1f08] sm:$0xff] %v3239_v20  ;;  %v3244_v31 = vadd.f32 %v4692_v5, %v2219_v22  ;;  %v2221_v32 = vmul.f32 %v4687_v1, %v1196_v16  ;;  %v2222_v33 = vmul.f32 %v4687_v1, %v1197_v17  ;;  %v1218_v16 = vld [vmem:[%s4680_s11 + $0x1ff0] sm:$0xff] }
 0x297   : > { %4264 = vst [vmem:[%s4721_s25 + $0x1f10] sm:$0xff] %v3240_v21  ;;  %v2223_v34 = vmul.f32 %v4687_v1, %v1198_v18  ;;  %4265 = vst [vmem:[%s4721_s25 + $0x1f18] sm:$0xff] %v3241_v26  ;;  %v3245_v36 = vadd.f32 %v4692_v5, %v2220_v29  ;;  %v2224_v37 = vmul.f32 %v4687_v1, %v1199_v23  ;;  %v1219_v21 = vld [vmem:[%s4680_s11 + $0x1ff8] sm:$0xff] }
 0x298   : > { %4266 = vst [vmem:[%s4721_s25 + $0x1f20] sm:$0xff] %v3242_v27  ;;  %4267 = vst [vmem:[%s4721_s25 + $0x1f28] sm:$0xff] %v3243_v28  ;;  %v2225_v38 = vmul.f32 %v4687_v1, %v1200_v24  ;;  %v2226_v39 = vmul.f32 %v4687_v1, %v1201_v25  ;;  %v3246_v43 = vadd.f32 %v4692_v5, %v2221_v32 }
 0x299   : > { %4268 = vst [vmem:[%s4721_s25 + $0x1f30] sm:$0xff] %v3244_v31  ;;  %v3247_v44 = vadd.f32 %v4692_v5, %v2222_v33  ;;  %v3248_v45 = vadd.f32 %v4692_v5, %v2223_v34  ;;  %v2227_v46 = vmul.f32 %v4687_v1, %v1202_v30  ;;  %4269 = vst [vmem:[%s4721_s25 + $0x1f38] sm:$0xff] %v3245_v36 }
 0x29a   : > { %v3249_v50 = vadd.f32 %v4692_v5, %v2224_v37  ;;  %v3250_v51 = vadd.f32 %v4692_v5, %v2225_v38  ;;  %v3251_v52 = vadd.f32 %v4692_v5, %v2226_v39  ;;  %v2228_v53 = vmul.f32 %v4687_v1, %v1203_v35  ;;  %4270 = vst [vmem:[%s4721_s25 + $0x1f40] sm:$0xff] %v3246_v43 }
 0x29b   : > { %4271 = vst [vmem:[%s4721_s25 + $0x1f48] sm:$0xff] %v3247_v44  ;;  %4272 = vst [vmem:[%s4721_s25 + $0x1f50] sm:$0xff] %v3248_v45  ;;  %v3252_v55 = vadd.f32 %v4692_v5, %v2227_v46  ;;  %v2229_v56 = vmul.f32 %v4687_v1, %v1204_v40  ;;  %v2230_v57 = vmul.f32 %v4687_v1, %v1205_v41 }
 0x29c   : > { %v2231_v58 = vmul.f32 %v4687_v1, %v1206_v42  ;;  %4273 = vst [vmem:[%s4721_s25 + $0x1f58] sm:$0xff] %v3249_v50  ;;  %4274 = vst [vmem:[%s4721_s25 + $0x1f60] sm:$0xff] %v3250_v51  ;;  %v3253_v60 = vadd.f32 %v4692_v5, %v2228_v53  ;;  %v2232_v61 = vmul.f32 %v4687_v1, %v1207_v47 }
 0x29d   : > { %4275 = vst [vmem:[%s4721_s25 + $0x1f68] sm:$0xff] %v3251_v52  ;;  %v2233_v62 = vmul.f32 %v4687_v1, %v1208_v48  ;;  %v2234_v63 = vmul.f32 %v4687_v1, %v1209_v49  ;;  %4276 = vst [vmem:[%s4721_s25 + $0x1f70] sm:$0xff] %v3252_v55  ;;  %v3254_v4 = vadd.f32 %v4692_v5, %v2229_v56 }
 0x29e   : > { %v3255_v6 = vadd.f32 %v4692_v5, %v2230_v57  ;;  %v3256_v7 = vadd.f32 %v4692_v5, %v2231_v58  ;;  %v2235_v8 = vmul.f32 %v4687_v1, %v1210_v54  ;;  %4277 = vst [vmem:[%s4721_s25 + $0x1f78] sm:$0xff] %v3253_v60  ;;  %v3257_v12 = vadd.f32 %v4692_v5, %v2232_v61 }
 0x29f   : > { %v3258_v13 = vadd.f32 %v4692_v5, %v2233_v62  ;;  %v3259_v14 = vadd.f32 %v4692_v5, %v2234_v63  ;;  %v2236_v15 = vmul.f32 %v4687_v1, %v1211_v59  ;;  %4278 = vst [vmem:[%s4721_s25 + $0x1f80] sm:$0xff] %v3254_v4  ;;  %v2237_v18 = vmul.f32 %v4687_v1, %v1212_v0 }
 0x2a0   : > { %4279 = vst [vmem:[%s4721_s25 + $0x1f88] sm:$0xff] %v3255_v6  ;;  %4280 = vst [vmem:[%s4721_s25 + $0x1f90] sm:$0xff] %v3256_v7  ;;  %v3260_v17 = vadd.f32 %v4692_v5, %v2235_v8  ;;  %v2238_v19 = vmul.f32 %v4687_v1, %v1213_v2  ;;  %v2239_v20 = vmul.f32 %v4687_v1, %v1214_v3 }
 0x2a1   : > { %4281 = vst [vmem:[%s4721_s25 + $0x1f98] sm:$0xff] %v3257_v12  ;;  %4282 = vst [vmem:[%s4721_s25 + $0x1fa0] sm:$0xff] %v3258_v13  ;;  %v3261_v22 = vadd.f32 %v4692_v5, %v2236_v15  ;;  %v2240_v23 = vmul.f32 %v4687_v1, %v1215_v9  ;;  %v2241_v24 = vmul.f32 %v4687_v1, %v1216_v10 }
 0x2a2   : > { %4283 = vst [vmem:[%s4721_s25 + $0x1fa8] sm:$0xff] %v3259_v14  ;;  %v2242_v25 = vmul.f32 %v4687_v1, %v1217_v11  ;;  %4284 = vst [vmem:[%s4721_s25 + $0x1fb0] sm:$0xff] %v3260_v17  ;;  %v3262_v26 = vadd.f32 %v4692_v5, %v2237_v18  ;;  %v3263_v27 = vadd.f32 %v4692_v5, %v2238_v19 }
 0x2a3   : > { %v3264_v28 = vadd.f32 %v4692_v5, %v2239_v20  ;;  %v2243_v29 = vmul.f32 %v4687_v1, %v1218_v16  ;;  %4285 = vst [vmem:[%s4721_s25 + $0x1fb8] sm:$0xff] %v3261_v22  ;;  %v3265_v30 = vadd.f32 %v4692_v5, %v2240_v23  ;;  %v3266_v31 = vadd.f32 %v4692_v5, %v2241_v24 }
 0x2a4   : > { %v3267_v32 = vadd.f32 %v4692_v5, %v2242_v25  ;;  %v2244_v33 = vmul.f32 %v4687_v1, %v1219_v21  ;;  %4286 = vst [vmem:[%s4721_s25 + $0x1fc0] sm:$0xff] %v3262_v26  ;;  %4287 = vst [vmem:[%s4721_s25 + $0x1fc8] sm:$0xff] %v3263_v27 }
 0x2a5   : > { %4288 = vst [vmem:[%s4721_s25 + $0x1fd0] sm:$0xff] %v3264_v28  ;;  %v3268_v34 = vadd.f32 %v4692_v5, %v2243_v29  ;;  %4289 = vst [vmem:[%s4721_s25 + $0x1fd8] sm:$0xff] %v3265_v30 }
 0x2a6   : > { %4290 = vst [vmem:[%s4721_s25 + $0x1fe0] sm:$0xff] %v3266_v31  ;;  %4291 = vst [vmem:[%s4721_s25 + $0x1fe8] sm:$0xff] %v3267_v32  ;;  %v3269_v1 = vadd.f32 %v4692_v5, %v2244_v33 }
 0x2a7   : > { %4292 = vst [vmem:[%s4721_s25 + $0x1ff0] sm:$0xff] %v3268_v34 }
 0x2a8   : > { %4293 = vst [vmem:[%s4721_s25 + $0x1ff8] sm:$0xff] %v3269_v1 }
 0x2a9   : > { %4493 = shalt.err (!%p4490_p9)
}
 0x2aa   : > { %s4494_s24 = scalar_lea.hbm %s8789_s13, 131072  ;;  %s4498_s30 = scalar_lea.hbm %s8842_s3, 524288 }
 0x2ab   : > { %p4495_p13 = scmp.ne.s32.totalorder %s8789_s13, %s4494_s24  ;;  %p4499_p2 = scmp.lt.s32.totalorder %s8789_s13, %s8842_s3 }
 0x2ac   : > { %p4500_p3 = scmp.lt.s32.totalorder %s4498_s30, %s4494_s24 }
 0x2ad   : > { %p4496_p1 = pnand %p4495_p13, %p8851_p11 }
 0x2ae   : > { %p4501_p6 = por %p4500_p3, %p4499_p2 }
 0x2af   : > { %p4497_p0 = pneg %p4496_p1 }
 0x2b1   : > { %p4502_p10 = pnand %p4501_p6, %p4497_p0 }
 0x2b3   : > { %4505 = shalt.err (!%p4502_p10)
}
 0x2b4   : > { %s4550_s11 = smov 2048   ;;  %s4551_s6 = smov 128  }
 0x2b5   : > { %4404 = dma.vmem_to_hbm [thread:$0]  (%p8851_p11), %s8791_s10, 131072, %s8789_s13, %s4295_s14, %s4550_s11, %s4550_s11, %s4551_s6  }
 0x2b6 PF: > { %p4415_p12 = scmp.ge.s32.totalorder %s4544_s19, 2  ;;  %s4324_s8 = sand.u32 1, %s4532_s16  }
 0x2b7   : > { %p8852_p4 = scmp.ne.s32.totalorder %s8848_s27, 0  ;;  %s4325_s25 = scalar_lea.sflag [#allocation6], %s4324_s8 }
 0x2b9   : > { %p4411_p5 = pnand %p4415_p12, %p8852_p4 }
 0x2bb   : > { %p4412_p7 = pneg %p4411_p5 }
 0x2bd   : > { %4527 = dma.done.wait (%p4412_p7), %s4325_s25, 131072  }
 0x2be   : > { %4529 = vsyncadd (%p4412_p7), %s4325_s25, 4294836224  ;;  %p18_p8 = scmp.ge.s32.totalorder %s4603_s20, 6   ;;  %s8853_s16 = smov %s4536_s17 }
 0x2bf   : > { %s8854_s17 = smov %s4540_s18  ;;  %s8855_s18 = smov %s4615_s23 }
 0x2c0   : > { %s8856_s19 = smov %s4603_s20  ;;  %20 = sbr.rel (!%p18_p8) target bundleno = 8 (0x8), region = 77 }
 0x2c5   :  { %4330 = vsyncpa [#allocation5], 1 }
 0x2c6   :  { %4332 = vsyncpa [#allocation5 + $0x1], 1 }
 0x2c7   :  { %4333 = vsyncpa [#allocation6], 1 }
 0x2c8   :  { %4335 = vsyncpa [#allocation6 + $0x1], 1 }

</bundles_post_ra>
